<compile_context>
chip_gen: v7x
topology: tpu7x:2x2x1
jax: 0.10.0
libtpu: 0.0.40
codegen_flags: <defaults>
</compile_context>

<pallas_src>
import jax
import jax.numpy as jnp
from jax.experimental import pallas as pl
from jax.experimental.pallas import tpu as pltpu

EPS = 1e-5


# ----------------------------------------------------------------------------- #
# Implicit-GEMM 3x3 conv kernel (+ fused BN/ReLU epilogue, + fused residual add)
# ----------------------------------------------------------------------------- #
def _tap_offsets(stride, k):
    """For tap index k in {0,1,2}: (phase index, row/col offset) into the phase layout."""
    if stride == 1:
        return 0, k
    # stride 2: even/odd phase split; phases are front-padded by one zero row/col.
    return (k + 1) % 2, (0 if k == 0 else 1)


def _make_conv3x3_kernel(stride, has_bn, res_mode):
    """3x3 conv (stride 1 or 2) over a 'phase layout' activation:
         stride 1: (1, 1, 1, H+2,   W+2,   Cin)  = zero-padded activated map
         stride 2: (1, 2, 2, H/2+1, W/2+1, Cin)  = space-to-depth phases, front-padded by 1
       so that every tap (and the strided 1x1 shortcut) is a plain contiguous static slice.
       Optional fused epilogues: BN+ReLU (has_bn) and residual add (identity / 1x1 projection).
    """

    def kernel(*refs):
        i = 0
        xp_ref = refs[i]; i += 1                     # (1, P, P, Ha, Wa, Cin) bf16
        w_ref = refs[i]; i += 1                      # (3, 3, Cin, Cout) bf16
        if has_bn:
            s_ref, b_ref = refs[i], refs[i + 1]; i += 2          # (1, Cout) f32
        if res_mode == "identity":
            rx_ref = refs[i]; i += 1                 # (1, Ho, Wo, Cout) bf16
        elif res_mode == "project":
            sp_ref, wsc_ref = refs[i], refs[i + 1]; i += 2       # phase src + (Cin_sc, Cout)
        o_ref = refs[i]                              # (1, Ho, Wo, Cout)
        acc_ref = refs[i + 1]                        # (Ho*Wo, Cout) f32 VMEM scratch

        _, ho, wo, cout = o_ref.shape
        cin = xp_ref.shape[-1]

        acc_ref[...] = jnp.zeros_like(acc_ref)
        # 9 taps, fully unrolled: implicit GEMM, no im2col materialisation in HBM.
        for ky in range(3):
            py, ro = _tap_offsets(stride, ky)
            for kx in range(3):
                px, co = _tap_offsets(stride, kx)
                patch = xp_ref[0, py, px, ro:ro + ho, co:co + wo, :]
                acc_ref[...] += jnp.dot(patch.reshape(ho * wo, cin), w_ref[ky, kx],
                                        preferred_element_type=jnp.float32)

        out = acc_ref[...]
        if has_bn:                                   # fused BN2 + ReLU epilogue
            out = jnp.maximum(out * s_ref[...] + b_ref[...], 0.0)
        if res_mode == "identity":                   # fused identity residual add
            out = out + rx_ref[0].reshape(ho * wo, cout).astype(jnp.float32)
        elif res_mode == "project":                  # fused 1x1-conv shortcut: centre tap of the
            cin_sc = sp_ref.shape[-1]                # conv1 input == o1[::stride, ::stride]
            center = sp_ref[0, 0, 0, 1:1 + ho, 1:1 + wo, :]
            out = out + jnp.dot(center.reshape(ho * wo, cin_sc), wsc_ref[...],
                                preferred_element_type=jnp.float32)
        o_ref[...] = out.reshape(1, ho, wo, cout).astype(o_ref.dtype)

    return kernel


def conv3x3(xp, w, *, stride, out_spatial, bn_scale=None, bn_bias=None,
            residual=None, shortcut_src=None, shortcut_w=None,
            out_dtype=jnp.bfloat16):
    """Pallas implicit-GEMM 3x3 conv.  xp is the phase-layout activation (bf16),
    w is (3, 3, Cin, Cout) bf16.  Grid = (batch,), one full feature map per step."""
    n = xp.shape[0]
    cin = xp.shape[-1]
    cout = w.shape[-1]
    ho, wo = out_spatial
    has_bn = bn_scale is not None
    if residual is not None:
        res_mode = "identity"
    elif shortcut_w is not None:
        res_mode = "project"
    else:
        res_mode = None

    kernel = _make_conv3x3_kernel(stride, has_bn, res_mode)

    def full_spec(a):                                # one batch element per grid step
        shape = a.shape
        return pl.BlockSpec((1,) + shape[1:], lambda b: (b,) + (0,) * (len(shape) - 1))

    def const_spec(a):                               # whole (small) array, resident
        shape = a.shape
        return pl.BlockSpec(shape, lambda b: (0,) * len(shape))

    operands = [xp, w]
    in_specs = [full_spec(xp), const_spec(w)]
    flops = 2 * n * ho * wo * 9 * cin * cout
    if has_bn:
        operands += [bn_scale, bn_bias]
        in_specs += [const_spec(bn_scale), const_spec(bn_bias)]
    if res_mode == "identity":
        operands += [residual]
        in_specs += [full_spec(residual)]
    elif res_mode == "project":
        operands += [shortcut_src, shortcut_w]
        in_specs += [full_spec(shortcut_src), const_spec(shortcut_w)]
        flops += 2 * n * ho * wo * shortcut_src.shape[-1] * cout

    bytes_accessed = int(sum(a.size * a.dtype.itemsize for a in operands)
                         + n * ho * wo * cout * jnp.dtype(out_dtype).itemsize)

    return pl.pallas_call(
        kernel,
        out_shape=jax.ShapeDtypeStruct((n, ho, wo, cout), out_dtype),
        grid=(n,),
        in_specs=in_specs,
        out_specs=pl.BlockSpec((1, ho, wo, cout), lambda b: (b, 0, 0, 0)),
        scratch_shapes=[pltpu.VMEM((ho * wo, cout), jnp.float32)],
        compiler_params=pltpu.CompilerParams(
            dimension_semantics=("parallel",),           # batch split across TensorCores
            vmem_limit_bytes=48 * 1024 * 1024),          # headroom, still under v7x's 64 MiB
        cost_estimate=pl.CostEstimate(flops=int(flops), transcendentals=0,
                                      bytes_accessed=bytes_accessed),
    )(*operands)


# ----------------------------------------------------------------------------- #
# JAX-side layout prep (single fused elementwise pass each; bf16; no 9x blowup)
# ----------------------------------------------------------------------------- #
def _bn_relu_phase_input(x, scale, bias, stride):
    """o1 = relu(x*scale + bias) (f32 math -> bf16), then zero-pad so the conv border
    wraps the *activated* map, laid out so every kernel tap is a contiguous slice."""
    n, h, w, c = x.shape
    o1 = jnp.maximum(x.astype(jnp.float32) * scale + bias, 0.0).astype(jnp.bfloat16)
    if stride == 1:
        o1p = jnp.pad(o1, ((0, 0), (1, 1), (1, 1), (0, 0)))
        return o1p.reshape(n, 1, 1, h + 2, w + 2, c)
    assert stride == 2 and h % 2 == 0 and w % 2 == 0
    ph = o1.reshape(n, h // 2, 2, w // 2, 2, c).transpose(0, 2, 4, 1, 3, 5)
    return jnp.pad(ph, ((0, 0), (0, 0), (0, 0), (1, 0), (1, 0), (0, 0)))


def _phase1_pad(y):
    """Zero-pad a (N, H, W, C) bf16 map into the trivial (stride-1) phase layout."""
    n, h, w, c = y.shape
    return jnp.pad(y, ((0, 0), (1, 1), (1, 1), (0, 0))).reshape(n, 1, 1, h + 2, w + 2, c)


# ----------------------------------------------------------------------------- #
# Parameters: init (raw, PyTorch-like) + one-time packing (folded BN, HWIO bf16 weights)
# ----------------------------------------------------------------------------- #
def _conv_init(key, cout, cin, kh, kw):
    fan = cin * kh * kw
    return jax.random.normal(key, (cout, cin, kh, kw), jnp.float32) * (2.0 / fan) ** 0.5


def _bn_init(key, c):
    kg, kb, km, kv = jax.random.split(key, 4)
    return {
        "gamma": 1.0 + 0.1 * jax.random.normal(kg, (c,), jnp.float32),
        "beta": 0.1 * jax.random.normal(kb, (c,), jnp.float32),
        "mean": 0.1 * jax.random.normal(km, (c,), jnp.float32),
        "var": 1.0 + 0.1 * jax.random.uniform(kv, (c,), jnp.float32),
    }


def init_basic_block(key, in_planes, out_planes, stride):
    k1, k2, k3, k4, k5 = jax.random.split(key, 5)
    params = {
        "bn1": _bn_init(k1, in_planes),
        "conv1": _conv_init(k2, out_planes, in_planes, 3, 3),
        "bn2": _bn_init(k3, out_planes),
        "conv2": _conv_init(k4, out_planes, out_planes, 3, 3),
    }
    if in_planes != out_planes:
        params["conv_sc"] = _conv_init(k5, out_planes, in_planes, 1, 1)
    return params


def init_network_block(key, nb_layers, in_planes, out_planes, stride):
    keys = jax.random.split(key, int(nb_layers))
    layers = []
    for i in range(int(nb_layers)):
        ip = in_planes if i == 0 else out_planes   # i == 0 and in_planes or out_planes
        st = stride if i == 0 else 1               # i == 0 and stride or 1
        layers.append((ip, out_planes, st, init_basic_block(keys[i], ip, out_planes, st)))
    return layers


def _fold_bn(bn):
    s = bn["gamma"] / jnp.sqrt(bn["var"] + EPS)
    return s, bn["beta"] - bn["mean"] * s


def pack_basic_block(params, in_planes, out_planes):
    s1, b1 = _fold_bn(params["bn1"])
    s2, b2 = _fold_bn(params["bn2"])
    packed = {
        "s1": s1, "b1": b1,
        "w1": jnp.transpose(params["conv1"], (2, 3, 1, 0)).astype(jnp.bfloat16),
        "w2": jnp.transpose(params["conv2"], (2, 3, 1, 0)).astype(jnp.bfloat16),
        "s2": s2.reshape(1, out_planes), "b2": b2.reshape(1, out_planes),
    }
    if in_planes != out_planes:
        packed["wsc"] = jnp.transpose(params["conv_sc"][:, :, 0, 0], (1, 0)).astype(jnp.bfloat16)
    return packed


def pack_network_block(layers):
    return [(ip, op, st, pack_basic_block(p, ip, op)) for ip, op, st, p in layers]


# ----------------------------------------------------------------------------- #
# Forward
# ----------------------------------------------------------------------------- #
def basic_block_forward(x_nhwc, packed, in_planes, out_planes, stride):
    n, h, w, c = x_nhwc.shape
    assert c == in_planes
    equal = in_planes == out_planes
    if equal and stride != 1:
        raise ValueError("identity shortcut requires stride == 1 (mirrors PyTorch BasicBlock)")
    ho = (h + 2 - 3) // stride + 1
    wo = (w + 2 - 3) // stride + 1

    # BN1 + ReLU + activation-wrapping zero pad (+ stride-2 phase split): one XLA pass, bf16.
    xp = _bn_relu_phase_input(x_nhwc, packed["s1"], packed["b1"], stride)

    # conv1 (3x3, stride) with BN2 + ReLU fused into the kernel epilogue; o2 stored in bf16.
    o2 = conv3x3(xp, packed["w1"], stride=stride, out_spatial=(ho, wo),
                 bn_scale=packed["s2"], bn_bias=packed["b2"])

    # conv2 (3x3, stride 1) with the residual add fused into the kernel epilogue.
    o2p = _phase1_pad(o2)
    if equal:
        out = conv3x3(o2p, packed["w2"], stride=1, out_spatial=(ho, wo),
                      residual=x_nhwc.astype(jnp.bfloat16))
    else:
        # 1x1 projection shortcut: computed inside conv2's kernel from the centre tap of xp
        # (== relu(bn1(x))[::stride, ::stride]); no separate pallas_call, no f32 HBM round trip.
        out = conv3x3(o2p, packed["w2"], stride=1, out_spatial=(ho, wo),
                      shortcut_src=xp, shortcut_w=packed["wsc"])
    return out                                        # (N, Ho, Wo, out_planes) bf16


def network_block_forward(x_nchw, packed_layers):
    x = jnp.transpose(x_nchw, (0, 2, 3, 1))           # NCHW -> NHWC
    for ip, op, st, packed in packed_layers:
        x = basic_block_forward(x, packed, ip, op, st)
    return jnp.transpose(x, (0, 3, 1, 2)).astype(jnp.float32)   # NHWC -> NCHW


# ----------------------------------------------------------------------------- #
# Pure-JAX reference (mirrors the kernel's bf16 activations / f32 accumulation)
# ----------------------------------------------------------------------------- #
def _ref_conv(x_bf16, w_oihw, stride, pad):
    w = jnp.transpose(w_oihw, (2, 3, 1, 0)).astype(jnp.bfloat16)
    return jax.lax.conv_general_dilated(
        x_bf16, w, (stride, stride), [(pad, pad), (pad, pad)],
        dimension_numbers=("NHWC", "HWIO", "NHWC"),
        preferred_element_type=jnp.float32)


def _ref_block(x, params, ip, op, stride):
    s1, b1 = _fold_bn(params["bn1"])
    s2, b2 = _fold_bn(params["bn2"])
    o1 = jnp.maximum(x.astype(jnp.float32) * s1 + b1, 0.0).astype(jnp.bfloat16)
    c1 = _ref_conv(o1, params["conv1"], stride, 1)
    o2 = jnp.maximum(c1 * s2 + b2, 0.0).astype(jnp.bfloat16)
    c2 = _ref_conv(o2, params["conv2"], 1, 1)
    sc = x.astype(jnp.float32) if ip == op else _ref_conv(o1, params["conv_sc"], stride, 0)
    return (c2 + sc).astype(jnp.bfloat16)


def _ref_network_block(x_nchw, layers):
    x = jnp.transpose(x_nchw, (0, 2, 3, 1))
    for ip, op, st, params in layers:
        x = _ref_block(x, params, ip, op, st)
    return jnp.transpose(x, (0, 3, 1, 2)).astype(jnp.float32)


# ----------------------------------------------------------------------------- #
if __name__ == "__main__":
    key = jax.random.PRNGKey(0)
    kx, kp = jax.random.split(key)

    # NetworkBlock(nb_layers=2, in_planes=4, out_planes=8, block=BasicBlock, stride=2)
    nb_layers, in_planes, out_planes, stride = 2, 4, 8, 2
    x = jax.random.normal(kx, (2, in_planes, 16, 16), jnp.float32)  # NCHW, like PyTorch

    layers = init_network_block(kp, nb_layers, in_planes, out_planes, stride)
    packed_layers = pack_network_block(layers)   # one-time BN fold + weight packing

    fwd = jax.jit(lambda xx: network_block_forward(xx, packed_layers))
    out = jax.block_until_ready(fwd(x))
    ref = jax.block_until_ready(_ref_network_block(x, layers))

    assert out.shape == (2, out_planes, 8, 8), out.shape
    assert jnp.allclose(out, ref, atol=2e-2, rtol=2e-2), float(jnp.abs(out - ref).max())

    print("KERNEL_OK")
</pallas_src>

<mosaic_0001>
module attributes {stable_mosaic.version = 11 : i64} {
  func.func @kernel(%arg0: i32, %arg1: memref<1x1x1x10x10x8xbf16, #tpu.memory_space<vmem>>, %arg2: memref<3x3x8x8xbf16, #tpu.memory_space<vmem>>, %arg3: memref<1x2x2x9x9x4xbf16, #tpu.memory_space<vmem>>, %arg4: memref<4x8xbf16, #tpu.memory_space<vmem>>, %arg5: memref<1x8x8x8xbf16, #tpu.memory_space<vmem>>, %arg6: memref<64x8xf32, #tpu.memory_space<vmem>>) attributes {dimension_semantics = [#tpu.dimension_semantics<parallel>], iteration_bounds = array<i64: 2>, scalar_prefetch = 0 : i64, scratch_operands = 1 : i64, tpu.core_type = #tpu.core_type<tc>, window_params = [{transform_indices = @transform_0, window_bounds = array<i64: 1, 1, 1, 10, 10, 8>}, {pipeline_mode = #tpu.pipeline_mode<synchronous>, transform_indices = @transform_1, window_bounds = array<i64: 3, 3, 8, 8>}, {transform_indices = @transform_2, window_bounds = array<i64: 1, 2, 2, 9, 9, 4>}, {pipeline_mode = #tpu.pipeline_mode<synchronous>, transform_indices = @transform_3, window_bounds = array<i64: 4, 8>}, {transform_indices = @transform_4, window_bounds = array<i64: 1, 8, 8, 8>}]} {
    %cst = arith.constant 0.000000e+00 : f32
    %0 = vector.broadcast %cst : f32 to vector<64x8xf32>
    %c0 = arith.constant 0 : index
    %c0_0 = arith.constant 0 : index
    %1 = vector.load %arg6[%c0, %c0_0] : memref<64x8xf32, #tpu.memory_space<vmem>>, vector<64x8xf32>
    tpu.vector_store %arg6[%c0, %c0_0], %0 {strides = array<i32>} : memref<64x8xf32, #tpu.memory_space<vmem>>, vector<64x8xf32>,
    %c0_1 = arith.constant 0 : index
    %c0_2 = arith.constant 0 : index
    %c0_3 = arith.constant 0 : index
    %c0_4 = arith.constant 0 : index
    %c0_5 = arith.constant 0 : index
    %c0_6 = arith.constant 0 : index
    %2 = vector.load %arg1[%c0_1, %c0_2, %c0_3, %c0_4, %c0_5, %c0_6] : memref<1x1x1x10x10x8xbf16, #tpu.memory_space<vmem>>, vector<1x1x1x8x8x8xbf16>
    %3 = vector.shape_cast %2 : vector<1x1x1x8x8x8xbf16> to vector<8x8x8xbf16>
    %c0_7 = arith.constant 0 : index
    %c0_8 = arith.constant 0 : index
    %4 = vector.load %arg6[%c0_7, %c0_8] : memref<64x8xf32, #tpu.memory_space<vmem>>, vector<64x8xf32>
    %5 = vector.shape_cast %3 : vector<8x8x8xbf16> to vector<64x8xbf16>
    %c0_9 = arith.constant 0 : index
    %c0_10 = arith.constant 0 : index
    %c0_11 = arith.constant 0 : index
    %c0_12 = arith.constant 0 : index
    %6 = vector.load %arg2[%c0_9, %c0_10, %c0_11, %c0_12] : memref<3x3x8x8xbf16, #tpu.memory_space<vmem>>, vector<1x1x8x8xbf16>
    %7 = vector.shape_cast %6 : vector<1x1x8x8xbf16> to vector<8x8xbf16>
    %cst_13 = arith.constant dense<0.000000e+00> : vector<64x8xf32>
    %8 = tpu.matmul %5, %7, %cst_13 {dimension_numbers = #tpu.dot_dimension_numbers<[1], [0], [0], [1], [0, 0, 1, 1], [], []>} : vector<64x8xbf16>, vector<8x8xbf16>, vector<64x8xf32> -> vector<64x8xf32>
    %9 = arith.addf %4, %8 : vector<64x8xf32>
    %c0_14 = arith.constant 0 : index
    %c0_15 = arith.constant 0 : index
    %10 = vector.load %arg6[%c0_14, %c0_15] : memref<64x8xf32, #tpu.memory_space<vmem>>, vector<64x8xf32>
    tpu.vector_store %arg6[%c0_14, %c0_15], %9 {strides = array<i32>} : memref<64x8xf32, #tpu.memory_space<vmem>>, vector<64x8xf32>,
    %c0_16 = arith.constant 0 : index
    %c0_17 = arith.constant 0 : index
    %c0_18 = arith.constant 0 : index
    %c0_19 = arith.constant 0 : index
    %c1 = arith.constant 1 : index
    %c0_20 = arith.constant 0 : index
    %11 = vector.load %arg1[%c0_16, %c0_17, %c0_18, %c0_19, %c1, %c0_20] : memref<1x1x1x10x10x8xbf16, #tpu.memory_space<vmem>>, vector<1x1x1x8x8x8xbf16>
    %12 = vector.shape_cast %11 : vector<1x1x1x8x8x8xbf16> to vector<8x8x8xbf16>
    %c0_21 = arith.constant 0 : index
    %c0_22 = arith.constant 0 : index
    %13 = vector.load %arg6[%c0_21, %c0_22] : memref<64x8xf32, #tpu.memory_space<vmem>>, vector<64x8xf32>
    %14 = vector.shape_cast %12 : vector<8x8x8xbf16> to vector<64x8xbf16>
    %c0_23 = arith.constant 0 : index
    %c1_24 = arith.constant 1 : index
    %c0_25 = arith.constant 0 : index
    %c0_26 = arith.constant 0 : index
    %15 = vector.load %arg2[%c0_23, %c1_24, %c0_25, %c0_26] : memref<3x3x8x8xbf16, #tpu.memory_space<vmem>>, vector<1x1x8x8xbf16>
    %16 = vector.shape_cast %15 : vector<1x1x8x8xbf16> to vector<8x8xbf16>
    %cst_27 = arith.constant dense<0.000000e+00> : vector<64x8xf32>
    %17 = tpu.matmul %14, %16, %cst_27 {dimension_numbers = #tpu.dot_dimension_numbers<[1], [0], [0], [1], [0, 0, 1, 1], [], []>} : vector<64x8xbf16>, vector<8x8xbf16>, vector<64x8xf32> -> vector<64x8xf32>
    %18 = arith.addf %13, %17 : vector<64x8xf32>
    %c0_28 = arith.constant 0 : index
    %c0_29 = arith.constant 0 : index
    %19 = vector.load %arg6[%c0_28, %c0_29] : memref<64x8xf32, #tpu.memory_space<vmem>>, vector<64x8xf32>
    tpu.vector_store %arg6[%c0_28, %c0_29], %18 {strides = array<i32>} : memref<64x8xf32, #tpu.memory_space<vmem>>, vector<64x8xf32>,
    %c0_30 = arith.constant 0 : index
    %c0_31 = arith.constant 0 : index
    %c0_32 = arith.constant 0 : index
    %c0_33 = arith.constant 0 : index
    %c2 = arith.constant 2 : index
    %c0_34 = arith.constant 0 : index
    %20 = vector.load %arg1[%c0_30, %c0_31, %c0_32, %c0_33, %c2, %c0_34] : memref<1x1x1x10x10x8xbf16, #tpu.memory_space<vmem>>, vector<1x1x1x8x8x8xbf16>
    %21 = vector.shape_cast %20 : vector<1x1x1x8x8x8xbf16> to vector<8x8x8xbf16>
    %c0_35 = arith.constant 0 : index
    %c0_36 = arith.constant 0 : index
    %22 = vector.load %arg6[%c0_35, %c0_36] : memref<64x8xf32, #tpu.memory_space<vmem>>, vector<64x8xf32>
    %23 = vector.shape_cast %21 : vector<8x8x8xbf16> to vector<64x8xbf16>
    %c0_37 = arith.constant 0 : index
    %c2_38 = arith.constant 2 : index
    %c0_39 = arith.constant 0 : index
    %c0_40 = arith.constant 0 : index
    %24 = vector.load %arg2[%c0_37, %c2_38, %c0_39, %c0_40] : memref<3x3x8x8xbf16, #tpu.memory_space<vmem>>, vector<1x1x8x8xbf16>
    %25 = vector.shape_cast %24 : vector<1x1x8x8xbf16> to vector<8x8xbf16>
    %cst_41 = arith.constant dense<0.000000e+00> : vector<64x8xf32>
    %26 = tpu.matmul %23, %25, %cst_41 {dimension_numbers = #tpu.dot_dimension_numbers<[1], [0], [0], [1], [0, 0, 1, 1], [], []>} : vector<64x8xbf16>, vector<8x8xbf16>, vector<64x8xf32> -> vector<64x8xf32>
    %27 = arith.addf %22, %26 : vector<64x8xf32>
    %c0_42 = arith.constant 0 : index
    %c0_43 = arith.constant 0 : index
    %28 = vector.load %arg6[%c0_42, %c0_43] : memref<64x8xf32, #tpu.memory_space<vmem>>, vector<64x8xf32>
    tpu.vector_store %arg6[%c0_42, %c0_43], %27 {strides = array<i32>} : memref<64x8xf32, #tpu.memory_space<vmem>>, vector<64x8xf32>,
    %c0_44 = arith.constant 0 : index
    %c0_45 = arith.constant 0 : index
    %c0_46 = arith.constant 0 : index
    %c1_47 = arith.constant 1 : index
    %c0_48 = arith.constant 0 : index
    %c0_49 = arith.constant 0 : index
    %29 = vector.load %arg1[%c0_44, %c0_45, %c0_46, %c1_47, %c0_48, %c0_49] : memref<1x1x1x10x10x8xbf16, #tpu.memory_space<vmem>>, vector<1x1x1x8x8x8xbf16>
    %30 = vector.shape_cast %29 : vector<1x1x1x8x8x8xbf16> to vector<8x8x8xbf16>
    %c0_50 = arith.constant 0 : index
    %c0_51 = arith.constant 0 : index
    %31 = vector.load %arg6[%c0_50, %c0_51] : memref<64x8xf32, #tpu.memory_space<vmem>>, vector<64x8xf32>
    %32 = vector.shape_cast %30 : vector<8x8x8xbf16> to vector<64x8xbf16>
    %c1_52 = arith.constant 1 : index
    %c0_53 = arith.constant 0 : index
    %c0_54 = arith.constant 0 : index
    %c0_55 = arith.constant 0 : index
    %33 = vector.load %arg2[%c1_52, %c0_53, %c0_54, %c0_55] : memref<3x3x8x8xbf16, #tpu.memory_space<vmem>>, vector<1x1x8x8xbf16>
    %34 = vector.shape_cast %33 : vector<1x1x8x8xbf16> to vector<8x8xbf16>
    %cst_56 = arith.constant dense<0.000000e+00> : vector<64x8xf32>
    %35 = tpu.matmul %32, %34, %cst_56 {dimension_numbers = #tpu.dot_dimension_numbers<[1], [0], [0], [1], [0, 0, 1, 1], [], []>} : vector<64x8xbf16>, vector<8x8xbf16>, vector<64x8xf32> -> vector<64x8xf32>
    %36 = arith.addf %31, %35 : vector<64x8xf32>
    %c0_57 = arith.constant 0 : index
    %c0_58 = arith.constant 0 : index
    %37 = vector.load %arg6[%c0_57, %c0_58] : memref<64x8xf32, #tpu.memory_space<vmem>>, vector<64x8xf32>
    tpu.vector_store %arg6[%c0_57, %c0_58], %36 {strides = array<i32>} : memref<64x8xf32, #tpu.memory_space<vmem>>, vector<64x8xf32>,
    %c0_59 = arith.constant 0 : index
    %c0_60 = arith.constant 0 : index
    %c0_61 = arith.constant 0 : index
    %c1_62 = arith.constant 1 : index
    %c1_63 = arith.constant 1 : index
    %c0_64 = arith.constant 0 : index
    %38 = vector.load %arg1[%c0_59, %c0_60, %c0_61, %c1_62, %c1_63, %c0_64] : memref<1x1x1x10x10x8xbf16, #tpu.memory_space<vmem>>, vector<1x1x1x8x8x8xbf16>
    %39 = vector.shape_cast %38 : vector<1x1x1x8x8x8xbf16> to vector<8x8x8xbf16>
    %c0_65 = arith.constant 0 : index
    %c0_66 = arith.constant 0 : index
    %40 = vector.load %arg6[%c0_65, %c0_66] : memref<64x8xf32, #tpu.memory_space<vmem>>, vector<64x8xf32>
    %41 = vector.shape_cast %39 : vector<8x8x8xbf16> to vector<64x8xbf16>
    %c1_67 = arith.constant 1 : index
    %c1_68 = arith.constant 1 : index
    %c0_69 = arith.constant 0 : index
    %c0_70 = arith.constant 0 : index
    %42 = vector.load %arg2[%c1_67, %c1_68, %c0_69, %c0_70] : memref<3x3x8x8xbf16, #tpu.memory_space<vmem>>, vector<1x1x8x8xbf16>
    %43 = vector.shape_cast %42 : vector<1x1x8x8xbf16> to vector<8x8xbf16>
    %cst_71 = arith.constant dense<0.000000e+00> : vector<64x8xf32>
    %44 = tpu.matmul %41, %43, %cst_71 {dimension_numbers = #tpu.dot_dimension_numbers<[1], [0], [0], [1], [0, 0, 1, 1], [], []>} : vector<64x8xbf16>, vector<8x8xbf16>, vector<64x8xf32> -> vector<64x8xf32>
    %45 = arith.addf %40, %44 : vector<64x8xf32>
    %c0_72 = arith.constant 0 : index
    %c0_73 = arith.constant 0 : index
    %46 = vector.load %arg6[%c0_72, %c0_73] : memref<64x8xf32, #tpu.memory_space<vmem>>, vector<64x8xf32>
    tpu.vector_store %arg6[%c0_72, %c0_73], %45 {strides = array<i32>} : memref<64x8xf32, #tpu.memory_space<vmem>>, vector<64x8xf32>,
    %c0_74 = arith.constant 0 : index
    %c0_75 = arith.constant 0 : index
    %c0_76 = arith.constant 0 : index
    %c1_77 = arith.constant 1 : index
    %c2_78 = arith.constant 2 : index
    %c0_79 = arith.constant 0 : index
    %47 = vector.load %arg1[%c0_74, %c0_75, %c0_76, %c1_77, %c2_78, %c0_79] : memref<1x1x1x10x10x8xbf16, #tpu.memory_space<vmem>>, vector<1x1x1x8x8x8xbf16>
    %48 = vector.shape_cast %47 : vector<1x1x1x8x8x8xbf16> to vector<8x8x8xbf16>
    %c0_80 = arith.constant 0 : index
    %c0_81 = arith.constant 0 : index
    %49 = vector.load %arg6[%c0_80, %c0_81] : memref<64x8xf32, #tpu.memory_space<vmem>>, vector<64x8xf32>
    %50 = vector.shape_cast %48 : vector<8x8x8xbf16> to vector<64x8xbf16>
    %c1_82 = arith.constant 1 : index
    %c2_83 = arith.constant 2 : index
    %c0_84 = arith.constant 0 : index
    %c0_85 = arith.constant 0 : index
    %51 = vector.load %arg2[%c1_82, %c2_83, %c0_84, %c0_85] : memref<3x3x8x8xbf16, #tpu.memory_space<vmem>>, vector<1x1x8x8xbf16>
    %52 = vector.shape_cast %51 : vector<1x1x8x8xbf16> to vector<8x8xbf16>
    %cst_86 = arith.constant dense<0.000000e+00> : vector<64x8xf32>
    %53 = tpu.matmul %50, %52, %cst_86 {dimension_numbers = #tpu.dot_dimension_numbers<[1], [0], [0], [1], [0, 0, 1, 1], [], []>} : vector<64x8xbf16>, vector<8x8xbf16>, vector<64x8xf32> -> vector<64x8xf32>
    %54 = arith.addf %49, %53 : vector<64x8xf32>
    %c0_87 = arith.constant 0 : index
    %c0_88 = arith.constant 0 : index
    %55 = vector.load %arg6[%c0_87, %c0_88] : memref<64x8xf32, #tpu.memory_space<vmem>>, vector<64x8xf32>
    tpu.vector_store %arg6[%c0_87, %c0_88], %54 {strides = array<i32>} : memref<64x8xf32, #tpu.memory_space<vmem>>, vector<64x8xf32>,
    %c0_89 = arith.constant 0 : index
    %c0_90 = arith.constant 0 : index
    %c0_91 = arith.constant 0 : index
    %c2_92 = arith.constant 2 : index
    %c0_93 = arith.constant 0 : index
    %c0_94 = arith.constant 0 : index
    %56 = vector.load %arg1[%c0_89, %c0_90, %c0_91, %c2_92, %c0_93, %c0_94] : memref<1x1x1x10x10x8xbf16, #tpu.memory_space<vmem>>, vector<1x1x1x8x8x8xbf16>
    %57 = vector.shape_cast %56 : vector<1x1x1x8x8x8xbf16> to vector<8x8x8xbf16>
    %c0_95 = arith.constant 0 : index
    %c0_96 = arith.constant 0 : index
    %58 = vector.load %arg6[%c0_95, %c0_96] : memref<64x8xf32, #tpu.memory_space<vmem>>, vector<64x8xf32>
    %59 = vector.shape_cast %57 : vector<8x8x8xbf16> to vector<64x8xbf16>
    %c2_97 = arith.constant 2 : index
    %c0_98 = arith.constant 0 : index
    %c0_99 = arith.constant 0 : index
    %c0_100 = arith.constant 0 : index
    %60 = vector.load %arg2[%c2_97, %c0_98, %c0_99, %c0_100] : memref<3x3x8x8xbf16, #tpu.memory_space<vmem>>, vector<1x1x8x8xbf16>
    %61 = vector.shape_cast %60 : vector<1x1x8x8xbf16> to vector<8x8xbf16>
    %cst_101 = arith.constant dense<0.000000e+00> : vector<64x8xf32>
    %62 = tpu.matmul %59, %61, %cst_101 {dimension_numbers = #tpu.dot_dimension_numbers<[1], [0], [0], [1], [0, 0, 1, 1], [], []>} : vector<64x8xbf16>, vector<8x8xbf16>, vector<64x8xf32> -> vector<64x8xf32>
    %63 = arith.addf %58, %62 : vector<64x8xf32>
    %c0_102 = arith.constant 0 : index
    %c0_103 = arith.constant 0 : index
    %64 = vector.load %arg6[%c0_102, %c0_103] : memref<64x8xf32, #tpu.memory_space<vmem>>, vector<64x8xf32>
    tpu.vector_store %arg6[%c0_102, %c0_103], %63 {strides = array<i32>} : memref<64x8xf32, #tpu.memory_space<vmem>>, vector<64x8xf32>,
    %c0_104 = arith.constant 0 : index
    %c0_105 = arith.constant 0 : index
    %c0_106 = arith.constant 0 : index
    %c2_107 = arith.constant 2 : index
    %c1_108 = arith.constant 1 : index
    %c0_109 = arith.constant 0 : index
    %65 = vector.load %arg1[%c0_104, %c0_105, %c0_106, %c2_107, %c1_108, %c0_109] : memref<1x1x1x10x10x8xbf16, #tpu.memory_space<vmem>>, vector<1x1x1x8x8x8xbf16>
    %66 = vector.shape_cast %65 : vector<1x1x1x8x8x8xbf16> to vector<8x8x8xbf16>
    %c0_110 = arith.constant 0 : index
    %c0_111 = arith.constant 0 : index
    %67 = vector.load %arg6[%c0_110, %c0_111] : memref<64x8xf32, #tpu.memory_space<vmem>>, vector<64x8xf32>
    %68 = vector.shape_cast %66 : vector<8x8x8xbf16> to vector<64x8xbf16>
    %c2_112 = arith.constant 2 : index
    %c1_113 = arith.constant 1 : index
    %c0_114 = arith.constant 0 : index
    %c0_115 = arith.constant 0 : index
    %69 = vector.load %arg2[%c2_112, %c1_113, %c0_114, %c0_115] : memref<3x3x8x8xbf16, #tpu.memory_space<vmem>>, vector<1x1x8x8xbf16>
    %70 = vector.shape_cast %69 : vector<1x1x8x8xbf16> to vector<8x8xbf16>
    %cst_116 = arith.constant dense<0.000000e+00> : vector<64x8xf32>
    %71 = tpu.matmul %68, %70, %cst_116 {dimension_numbers = #tpu.dot_dimension_numbers<[1], [0], [0], [1], [0, 0, 1, 1], [], []>} : vector<64x8xbf16>, vector<8x8xbf16>, vector<64x8xf32> -> vector<64x8xf32>
    %72 = arith.addf %67, %71 : vector<64x8xf32>
    %c0_117 = arith.constant 0 : index
    %c0_118 = arith.constant 0 : index
    %73 = vector.load %arg6[%c0_117, %c0_118] : memref<64x8xf32, #tpu.memory_space<vmem>>, vector<64x8xf32>
    tpu.vector_store %arg6[%c0_117, %c0_118], %72 {strides = array<i32>} : memref<64x8xf32, #tpu.memory_space<vmem>>, vector<64x8xf32>,
    %c0_119 = arith.constant 0 : index
    %c0_120 = arith.constant 0 : index
    %c0_121 = arith.constant 0 : index
    %c2_122 = arith.constant 2 : index
    %c2_123 = arith.constant 2 : index
    %c0_124 = arith.constant 0 : index
    %74 = vector.load %arg1[%c0_119, %c0_120, %c0_121, %c2_122, %c2_123, %c0_124] : memref<1x1x1x10x10x8xbf16, #tpu.memory_space<vmem>>, vector<1x1x1x8x8x8xbf16>
    %75 = vector.shape_cast %74 : vector<1x1x1x8x8x8xbf16> to vector<8x8x8xbf16>
    %c0_125 = arith.constant 0 : index
    %c0_126 = arith.constant 0 : index
    %76 = vector.load %arg6[%c0_125, %c0_126] : memref<64x8xf32, #tpu.memory_space<vmem>>, vector<64x8xf32>
    %77 = vector.shape_cast %75 : vector<8x8x8xbf16> to vector<64x8xbf16>
    %c2_127 = arith.constant 2 : index
    %c2_128 = arith.constant 2 : index
    %c0_129 = arith.constant 0 : index
    %c0_130 = arith.constant 0 : index
    %78 = vector.load %arg2[%c2_127, %c2_128, %c0_129, %c0_130] : memref<3x3x8x8xbf16, #tpu.memory_space<vmem>>, vector<1x1x8x8xbf16>
    %79 = vector.shape_cast %78 : vector<1x1x8x8xbf16> to vector<8x8xbf16>
    %cst_131 = arith.constant dense<0.000000e+00> : vector<64x8xf32>
    %80 = tpu.matmul %77, %79, %cst_131 {dimension_numbers = #tpu.dot_dimension_numbers<[1], [0], [0], [1], [0, 0, 1, 1], [], []>} : vector<64x8xbf16>, vector<8x8xbf16>, vector<64x8xf32> -> vector<64x8xf32>
    %81 = arith.addf %76, %80 : vector<64x8xf32>
    %c0_132 = arith.constant 0 : index
    %c0_133 = arith.constant 0 : index
    %82 = vector.load %arg6[%c0_132, %c0_133] : memref<64x8xf32, #tpu.memory_space<vmem>>, vector<64x8xf32>
    tpu.vector_store %arg6[%c0_132, %c0_133], %81 {strides = array<i32>} : memref<64x8xf32, #tpu.memory_space<vmem>>, vector<64x8xf32>,
    %c0_134 = arith.constant 0 : index
    %c0_135 = arith.constant 0 : index
    %83 = vector.load %arg6[%c0_134, %c0_135] : memref<64x8xf32, #tpu.memory_space<vmem>>, vector<64x8xf32>
    %c0_136 = arith.constant 0 : index
    %c0_137 = arith.constant 0 : index
    %c0_138 = arith.constant 0 : index
    %c1_139 = arith.constant 1 : index
    %c1_140 = arith.constant 1 : index
    %c0_141 = arith.constant 0 : index
    %84 = vector.load %arg3[%c0_136, %c0_137, %c0_138, %c1_139, %c1_140, %c0_141] : memref<1x2x2x9x9x4xbf16, #tpu.memory_space<vmem>>, vector<1x1x1x8x8x4xbf16>
    %85 = vector.shape_cast %84 : vector<1x1x1x8x8x4xbf16> to vector<8x8x4xbf16>
    %86 = vector.shape_cast %85 : vector<8x8x4xbf16> to vector<64x4xbf16>
    %c0_142 = arith.constant 0 : index
    %c0_143 = arith.constant 0 : index
    %87 = vector.load %arg4[%c0_142, %c0_143] : memref<4x8xbf16, #tpu.memory_space<vmem>>, vector<4x8xbf16>
    %cst_144 = arith.constant dense<0.000000e+00> : vector<64x8xf32>
    %88 = tpu.matmul %86, %87, %cst_144 {dimension_numbers = #tpu.dot_dimension_numbers<[1], [0], [0], [1], [0, 0, 1, 1], [], []>} : vector<64x4xbf16>, vector<4x8xbf16>, vector<64x8xf32> -> vector<64x8xf32>
    %89 = arith.addf %83, %88 : vector<64x8xf32>
    %90 = vector.shape_cast %89 : vector<64x8xf32> to vector<1x8x8x8xf32>
    %91 = arith.truncf %90 : vector<1x8x8x8xf32> to vector<1x8x8x8xbf16>
    %c0_145 = arith.constant 0 : index
    %c0_146 = arith.constant 0 : index
    %c0_147 = arith.constant 0 : index
    %c0_148 = arith.constant 0 : index
    %92 = vector.load %arg5[%c0_145, %c0_146, %c0_147, %c0_148] : memref<1x8x8x8xbf16, #tpu.memory_space<vmem>>, vector<1x8x8x8xbf16>
    tpu.vector_store %arg5[%c0_145, %c0_146, %c0_147, %c0_148], %91 {strides = array<i32>} : memref<1x8x8x8xbf16, #tpu.memory_space<vmem>>, vector<1x8x8x8xbf16>,
    return
  }
  func.func @transform_0(%arg0: i32) -> (i32, i32, i32, i32, i32, i32) {
    %c0_i32 = arith.constant 0 : i32
    %c0_i32_0 = arith.constant 0 : i32
    %c0_i32_1 = arith.constant 0 : i32
    %c0_i32_2 = arith.constant 0 : i32
    %c0_i32_3 = arith.constant 0 : i32
    %c0_i32_4 = arith.constant 0 : i32
    return %arg0, %c0_i32, %c0_i32_0, %c0_i32_1, %c0_i32_2, %c0_i32_3 : i32, i32, i32, i32, i32, i32
  }
  func.func @transform_1(%arg0: i32) -> (i32, i32, i32, i32) {
    %c0_i32 = arith.constant 0 : i32
    %c0_i32_0 = arith.constant 0 : i32
    %c0_i32_1 = arith.constant 0 : i32
    %c0_i32_2 = arith.constant 0 : i32
    %c0_i32_3 = arith.constant 0 : i32
    return %c0_i32, %c0_i32_0, %c0_i32_1, %c0_i32_2 : i32, i32, i32, i32
  }
  func.func @transform_2(%arg0: i32) -> (i32, i32, i32, i32, i32, i32) {
    %c0_i32 = arith.constant 0 : i32
    %c0_i32_0 = arith.constant 0 : i32
    %c0_i32_1 = arith.constant 0 : i32
    %c0_i32_2 = arith.constant 0 : i32
    %c0_i32_3 = arith.constant 0 : i32
    %c0_i32_4 = arith.constant 0 : i32
    return %arg0, %c0_i32, %c0_i32_0, %c0_i32_1, %c0_i32_2, %c0_i32_3 : i32, i32, i32, i32, i32, i32
  }
  func.func @transform_3(%arg0: i32) -> (i32, i32) {
    %c0_i32 = arith.constant 0 : i32
    %c0_i32_0 = arith.constant 0 : i32
    %c0_i32_1 = arith.constant 0 : i32
    return %c0_i32, %c0_i32_0 : i32, i32
  }
  func.func @transform_4(%arg0: i32) -> (i32, i32, i32, i32) {
    %c0_i32 = arith.constant 0 : i32
    %c0_i32_0 = arith.constant 0 : i32
    %c0_i32_1 = arith.constant 0 : i32
    %c0_i32_2 = arith.constant 0 : i32
    return %arg0, %c0_i32, %c0_i32_0, %c0_i32_1 : i32, i32, i32, i32
  }
}

module attributes {stable_mosaic.version = 11 : i64} {
  func.func @kernel(%arg0: i32, %arg1: memref<1x2x2x9x9x4xbf16, #tpu.memory_space<vmem>>, %arg2: memref<3x3x4x8xbf16, #tpu.memory_space<vmem>>, %arg3: memref<1x8xf32, #tpu.memory_space<vmem>>, %arg4: memref<1x8xf32, #tpu.memory_space<vmem>>, %arg5: memref<1x8x8x8xbf16, #tpu.memory_space<vmem>>, %arg6: memref<64x8xf32, #tpu.memory_space<vmem>>) attributes {dimension_semantics = [#tpu.dimension_semantics<parallel>], iteration_bounds = array<i64: 2>, scalar_prefetch = 0 : i64, scratch_operands = 1 : i64, tpu.core_type = #tpu.core_type<tc>, window_params = [{transform_indices = @transform_0, window_bounds = array<i64: 1, 2, 2, 9, 9, 4>}, {pipeline_mode = #tpu.pipeline_mode<synchronous>, transform_indices = @transform_1, window_bounds = array<i64: 3, 3, 4, 8>}, {pipeline_mode = #tpu.pipeline_mode<synchronous>, transform_indices = @transform_2, window_bounds = array<i64: 1, 8>}, {pipeline_mode = #tpu.pipeline_mode<synchronous>, transform_indices = @transform_3, window_bounds = array<i64: 1, 8>}, {transform_indices = @transform_4, window_bounds = array<i64: 1, 8, 8, 8>}]} {
    %cst = arith.constant 0.000000e+00 : f32
    %0 = vector.broadcast %cst : f32 to vector<64x8xf32>
    %c0 = arith.constant 0 : index
    %c0_0 = arith.constant 0 : index
    %1 = vector.load %arg6[%c0, %c0_0] : memref<64x8xf32, #tpu.memory_space<vmem>>, vector<64x8xf32>
    tpu.vector_store %arg6[%c0, %c0_0], %0 {strides = array<i32>} : memref<64x8xf32, #tpu.memory_space<vmem>>, vector<64x8xf32>,
    %c0_1 = arith.constant 0 : index
    %c1 = arith.constant 1 : index
    %c1_2 = arith.constant 1 : index
    %c0_3 = arith.constant 0 : index
    %c0_4 = arith.constant 0 : index
    %c0_5 = arith.constant 0 : index
    %2 = vector.load %arg1[%c0_1, %c1, %c1_2, %c0_3, %c0_4, %c0_5] : memref<1x2x2x9x9x4xbf16, #tpu.memory_space<vmem>>, vector<1x1x1x8x8x4xbf16>
    %3 = vector.shape_cast %2 : vector<1x1x1x8x8x4xbf16> to vector<8x8x4xbf16>
    %c0_6 = arith.constant 0 : index
    %c0_7 = arith.constant 0 : index
    %4 = vector.load %arg6[%c0_6, %c0_7] : memref<64x8xf32, #tpu.memory_space<vmem>>, vector<64x8xf32>
    %5 = vector.shape_cast %3 : vector<8x8x4xbf16> to vector<64x4xbf16>
    %c0_8 = arith.constant 0 : index
    %c0_9 = arith.constant 0 : index
    %c0_10 = arith.constant 0 : index
    %c0_11 = arith.constant 0 : index
    %6 = vector.load %arg2[%c0_8, %c0_9, %c0_10, %c0_11] : memref<3x3x4x8xbf16, #tpu.memory_space<vmem>>, vector<1x1x4x8xbf16>
    %7 = vector.shape_cast %6 : vector<1x1x4x8xbf16> to vector<4x8xbf16>
    %cst_12 = arith.constant dense<0.000000e+00> : vector<64x8xf32>
    %8 = tpu.matmul %5, %7, %cst_12 {dimension_numbers = #tpu.dot_dimension_numbers<[1], [0], [0], [1], [0, 0, 1, 1], [], []>} : vector<64x4xbf16>, vector<4x8xbf16>, vector<64x8xf32> -> vector<64x8xf32>
    %9 = arith.addf %4, %8 : vector<64x8xf32>
    %c0_13 = arith.constant 0 : index
    %c0_14 = arith.constant 0 : index
    %10 = vector.load %arg6[%c0_13, %c0_14] : memref<64x8xf32, #tpu.memory_space<vmem>>, vector<64x8xf32>
    tpu.vector_store %arg6[%c0_13, %c0_14], %9 {strides = array<i32>} : memref<64x8xf32, #tpu.memory_space<vmem>>, vector<64x8xf32>,
    %c0_15 = arith.constant 0 : index
    %c1_16 = arith.constant 1 : index
    %c0_17 = arith.constant 0 : index
    %c0_18 = arith.constant 0 : index
    %c1_19 = arith.constant 1 : index
    %c0_20 = arith.constant 0 : index
    %11 = vector.load %arg1[%c0_15, %c1_16, %c0_17, %c0_18, %c1_19, %c0_20] : memref<1x2x2x9x9x4xbf16, #tpu.memory_space<vmem>>, vector<1x1x1x8x8x4xbf16>
    %12 = vector.shape_cast %11 : vector<1x1x1x8x8x4xbf16> to vector<8x8x4xbf16>
    %c0_21 = arith.constant 0 : index
    %c0_22 = arith.constant 0 : index
    %13 = vector.load %arg6[%c0_21, %c0_22] : memref<64x8xf32, #tpu.memory_space<vmem>>, vector<64x8xf32>
    %14 = vector.shape_cast %12 : vector<8x8x4xbf16> to vector<64x4xbf16>
    %c0_23 = arith.constant 0 : index
    %c1_24 = arith.constant 1 : index
    %c0_25 = arith.constant 0 : index
    %c0_26 = arith.constant 0 : index
    %15 = vector.load %arg2[%c0_23, %c1_24, %c0_25, %c0_26] : memref<3x3x4x8xbf16, #tpu.memory_space<vmem>>, vector<1x1x4x8xbf16>
    %16 = vector.shape_cast %15 : vector<1x1x4x8xbf16> to vector<4x8xbf16>
    %cst_27 = arith.constant dense<0.000000e+00> : vector<64x8xf32>
    %17 = tpu.matmul %14, %16, %cst_27 {dimension_numbers = #tpu.dot_dimension_numbers<[1], [0], [0], [1], [0, 0, 1, 1], [], []>} : vector<64x4xbf16>, vector<4x8xbf16>, vector<64x8xf32> -> vector<64x8xf32>
    %18 = arith.addf %13, %17 : vector<64x8xf32>
    %c0_28 = arith.constant 0 : index
    %c0_29 = arith.constant 0 : index
    %19 = vector.load %arg6[%c0_28, %c0_29] : memref<64x8xf32, #tpu.memory_space<vmem>>, vector<64x8xf32>
    tpu.vector_store %arg6[%c0_28, %c0_29], %18 {strides = array<i32>} : memref<64x8xf32, #tpu.memory_space<vmem>>, vector<64x8xf32>,
    %c0_30 = arith.constant 0 : index
    %c1_31 = arith.constant 1 : index
    %c1_32 = arith.constant 1 : index
    %c0_33 = arith.constant 0 : index
    %c1_34 = arith.constant 1 : index
    %c0_35 = arith.constant 0 : index
    %20 = vector.load %arg1[%c0_30, %c1_31, %c1_32, %c0_33, %c1_34, %c0_35] : memref<1x2x2x9x9x4xbf16, #tpu.memory_space<vmem>>, vector<1x1x1x8x8x4xbf16>
    %21 = vector.shape_cast %20 : vector<1x1x1x8x8x4xbf16> to vector<8x8x4xbf16>
    %c0_36 = arith.constant 0 : index
    %c0_37 = arith.constant 0 : index
    %22 = vector.load %arg6[%c0_36, %c0_37] : memref<64x8xf32, #tpu.memory_space<vmem>>, vector<64x8xf32>
    %23 = vector.shape_cast %21 : vector<8x8x4xbf16> to vector<64x4xbf16>
    %c0_38 = arith.constant 0 : index
    %c2 = arith.constant 2 : index
    %c0_39 = arith.constant 0 : index
    %c0_40 = arith.constant 0 : index
    %24 = vector.load %arg2[%c0_38, %c2, %c0_39, %c0_40] : memref<3x3x4x8xbf16, #tpu.memory_space<vmem>>, vector<1x1x4x8xbf16>
    %25 = vector.shape_cast %24 : vector<1x1x4x8xbf16> to vector<4x8xbf16>
    %cst_41 = arith.constant dense<0.000000e+00> : vector<64x8xf32>
    %26 = tpu.matmul %23, %25, %cst_41 {dimension_numbers = #tpu.dot_dimension_numbers<[1], [0], [0], [1], [0, 0, 1, 1], [], []>} : vector<64x4xbf16>, vector<4x8xbf16>, vector<64x8xf32> -> vector<64x8xf32>
    %27 = arith.addf %22, %26 : vector<64x8xf32>
    %c0_42 = arith.constant 0 : index
    %c0_43 = arith.constant 0 : index
    %28 = vector.load %arg6[%c0_42, %c0_43] : memref<64x8xf32, #tpu.memory_space<vmem>>, vector<64x8xf32>
    tpu.vector_store %arg6[%c0_42, %c0_43], %27 {strides = array<i32>} : memref<64x8xf32, #tpu.memory_space<vmem>>, vector<64x8xf32>,
    %c0_44 = arith.constant 0 : index
    %c0_45 = arith.constant 0 : index
    %c1_46 = arith.constant 1 : index
    %c1_47 = arith.constant 1 : index
    %c0_48 = arith.constant 0 : index
    %c0_49 = arith.constant 0 : index
    %29 = vector.load %arg1[%c0_44, %c0_45, %c1_46, %c1_47, %c0_48, %c0_49] : memref<1x2x2x9x9x4xbf16, #tpu.memory_space<vmem>>, vector<1x1x1x8x8x4xbf16>
    %30 = vector.shape_cast %29 : vector<1x1x1x8x8x4xbf16> to vector<8x8x4xbf16>
    %c0_50 = arith.constant 0 : index
    %c0_51 = arith.constant 0 : index
    %31 = vector.load %arg6[%c0_50, %c0_51] : memref<64x8xf32, #tpu.memory_space<vmem>>, vector<64x8xf32>
    %32 = vector.shape_cast %30 : vector<8x8x4xbf16> to vector<64x4xbf16>
    %c1_52 = arith.constant 1 : index
    %c0_53 = arith.constant 0 : index
    %c0_54 = arith.constant 0 : index
    %c0_55 = arith.constant 0 : index
    %33 = vector.load %arg2[%c1_52, %c0_53, %c0_54, %c0_55] : memref<3x3x4x8xbf16, #tpu.memory_space<vmem>>, vector<1x1x4x8xbf16>
    %34 = vector.shape_cast %33 : vector<1x1x4x8xbf16> to vector<4x8xbf16>
    %cst_56 = arith.constant dense<0.000000e+00> : vector<64x8xf32>
    %35 = tpu.matmul %32, %34, %cst_56 {dimension_numbers = #tpu.dot_dimension_numbers<[1], [0], [0], [1], [0, 0, 1, 1], [], []>} : vector<64x4xbf16>, vector<4x8xbf16>, vector<64x8xf32> -> vector<64x8xf32>
    %36 = arith.addf %31, %35 : vector<64x8xf32>
    %c0_57 = arith.constant 0 : index
    %c0_58 = arith.constant 0 : index
    %37 = vector.load %arg6[%c0_57, %c0_58] : memref<64x8xf32, #tpu.memory_space<vmem>>, vector<64x8xf32>
    tpu.vector_store %arg6[%c0_57, %c0_58], %36 {strides = array<i32>} : memref<64x8xf32, #tpu.memory_space<vmem>>, vector<64x8xf32>,
    %c0_59 = arith.constant 0 : index
    %c0_60 = arith.constant 0 : index
    %c0_61 = arith.constant 0 : index
    %c1_62 = arith.constant 1 : index
    %c1_63 = arith.constant 1 : index
    %c0_64 = arith.constant 0 : index
    %38 = vector.load %arg1[%c0_59, %c0_60, %c0_61, %c1_62, %c1_63, %c0_64] : memref<1x2x2x9x9x4xbf16, #tpu.memory_space<vmem>>, vector<1x1x1x8x8x4xbf16>
    %39 = vector.shape_cast %38 : vector<1x1x1x8x8x4xbf16> to vector<8x8x4xbf16>
    %c0_65 = arith.constant 0 : index
    %c0_66 = arith.constant 0 : index
    %40 = vector.load %arg6[%c0_65, %c0_66] : memref<64x8xf32, #tpu.memory_space<vmem>>, vector<64x8xf32>
    %41 = vector.shape_cast %39 : vector<8x8x4xbf16> to vector<64x4xbf16>
    %c1_67 = arith.constant 1 : index
    %c1_68 = arith.constant 1 : index
    %c0_69 = arith.constant 0 : index
    %c0_70 = arith.constant 0 : index
    %42 = vector.load %arg2[%c1_67, %c1_68, %c0_69, %c0_70] : memref<3x3x4x8xbf16, #tpu.memory_space<vmem>>, vector<1x1x4x8xbf16>
    %43 = vector.shape_cast %42 : vector<1x1x4x8xbf16> to vector<4x8xbf16>
    %cst_71 = arith.constant dense<0.000000e+00> : vector<64x8xf32>
    %44 = tpu.matmul %41, %43, %cst_71 {dimension_numbers = #tpu.dot_dimension_numbers<[1], [0], [0], [1], [0, 0, 1, 1], [], []>} : vector<64x4xbf16>, vector<4x8xbf16>, vector<64x8xf32> -> vector<64x8xf32>
    %45 = arith.addf %40, %44 : vector<64x8xf32>
    %c0_72 = arith.constant 0 : index
    %c0_73 = arith.constant 0 : index
    %46 = vector.load %arg6[%c0_72, %c0_73] : memref<64x8xf32, #tpu.memory_space<vmem>>, vector<64x8xf32>
    tpu.vector_store %arg6[%c0_72, %c0_73], %45 {strides = array<i32>} : memref<64x8xf32, #tpu.memory_space<vmem>>, vector<64x8xf32>,
    %c0_74 = arith.constant 0 : index
    %c0_75 = arith.constant 0 : index
    %c1_76 = arith.constant 1 : index
    %c1_77 = arith.constant 1 : index
    %c1_78 = arith.constant 1 : index
    %c0_79 = arith.constant 0 : index
    %47 = vector.load %arg1[%c0_74, %c0_75, %c1_76, %c1_77, %c1_78, %c0_79] : memref<1x2x2x9x9x4xbf16, #tpu.memory_space<vmem>>, vector<1x1x1x8x8x4xbf16>
    %48 = vector.shape_cast %47 : vector<1x1x1x8x8x4xbf16> to vector<8x8x4xbf16>
    %c0_80 = arith.constant 0 : index
    %c0_81 = arith.constant 0 : index
    %49 = vector.load %arg6[%c0_80, %c0_81] : memref<64x8xf32, #tpu.memory_space<vmem>>, vector<64x8xf32>
    %50 = vector.shape_cast %48 : vector<8x8x4xbf16> to vector<64x4xbf16>
    %c1_82 = arith.constant 1 : index
    %c2_83 = arith.constant 2 : index
    %c0_84 = arith.constant 0 : index
    %c0_85 = arith.constant 0 : index
    %51 = vector.load %arg2[%c1_82, %c2_83, %c0_84, %c0_85] : memref<3x3x4x8xbf16, #tpu.memory_space<vmem>>, vector<1x1x4x8xbf16>
    %52 = vector.shape_cast %51 : vector<1x1x4x8xbf16> to vector<4x8xbf16>
    %cst_86 = arith.constant dense<0.000000e+00> : vector<64x8xf32>
    %53 = tpu.matmul %50, %52, %cst_86 {dimension_numbers = #tpu.dot_dimension_numbers<[1], [0], [0], [1], [0, 0, 1, 1], [], []>} : vector<64x4xbf16>, vector<4x8xbf16>, vector<64x8xf32> -> vector<64x8xf32>
    %54 = arith.addf %49, %53 : vector<64x8xf32>
    %c0_87 = arith.constant 0 : index
    %c0_88 = arith.constant 0 : index
    %55 = vector.load %arg6[%c0_87, %c0_88] : memref<64x8xf32, #tpu.memory_space<vmem>>, vector<64x8xf32>
    tpu.vector_store %arg6[%c0_87, %c0_88], %54 {strides = array<i32>} : memref<64x8xf32, #tpu.memory_space<vmem>>, vector<64x8xf32>,
    %c0_89 = arith.constant 0 : index
    %c1_90 = arith.constant 1 : index
    %c1_91 = arith.constant 1 : index
    %c1_92 = arith.constant 1 : index
    %c0_93 = arith.constant 0 : index
    %c0_94 = arith.constant 0 : index
    %56 = vector.load %arg1[%c0_89, %c1_90, %c1_91, %c1_92, %c0_93, %c0_94] : memref<1x2x2x9x9x4xbf16, #tpu.memory_space<vmem>>, vector<1x1x1x8x8x4xbf16>
    %57 = vector.shape_cast %56 : vector<1x1x1x8x8x4xbf16> to vector<8x8x4xbf16>
    %c0_95 = arith.constant 0 : index
    %c0_96 = arith.constant 0 : index
    %58 = vector.load %arg6[%c0_95, %c0_96] : memref<64x8xf32, #tpu.memory_space<vmem>>, vector<64x8xf32>
    %59 = vector.shape_cast %57 : vector<8x8x4xbf16> to vector<64x4xbf16>
    %c2_97 = arith.constant 2 : index
    %c0_98 = arith.constant 0 : index
    %c0_99 = arith.constant 0 : index
    %c0_100 = arith.constant 0 : index
    %60 = vector.load %arg2[%c2_97, %c0_98, %c0_99, %c0_100] : memref<3x3x4x8xbf16, #tpu.memory_space<vmem>>, vector<1x1x4x8xbf16>
    %61 = vector.shape_cast %60 : vector<1x1x4x8xbf16> to vector<4x8xbf16>
    %cst_101 = arith.constant dense<0.000000e+00> : vector<64x8xf32>
    %62 = tpu.matmul %59, %61, %cst_101 {dimension_numbers = #tpu.dot_dimension_numbers<[1], [0], [0], [1], [0, 0, 1, 1], [], []>} : vector<64x4xbf16>, vector<4x8xbf16>, vector<64x8xf32> -> vector<64x8xf32>
    %63 = arith.addf %58, %62 : vector<64x8xf32>
    %c0_102 = arith.constant 0 : index
    %c0_103 = arith.constant 0 : index
    %64 = vector.load %arg6[%c0_102, %c0_103] : memref<64x8xf32, #tpu.memory_space<vmem>>, vector<64x8xf32>
    tpu.vector_store %arg6[%c0_102, %c0_103], %63 {strides = array<i32>} : memref<64x8xf32, #tpu.memory_space<vmem>>, vector<64x8xf32>,
    %c0_104 = arith.constant 0 : index
    %c1_105 = arith.constant 1 : index
    %c0_106 = arith.constant 0 : index
    %c1_107 = arith.constant 1 : index
    %c1_108 = arith.constant 1 : index
    %c0_109 = arith.constant 0 : index
    %65 = vector.load %arg1[%c0_104, %c1_105, %c0_106, %c1_107, %c1_108, %c0_109] : memref<1x2x2x9x9x4xbf16, #tpu.memory_space<vmem>>, vector<1x1x1x8x8x4xbf16>
    %66 = vector.shape_cast %65 : vector<1x1x1x8x8x4xbf16> to vector<8x8x4xbf16>
    %c0_110 = arith.constant 0 : index
    %c0_111 = arith.constant 0 : index
    %67 = vector.load %arg6[%c0_110, %c0_111] : memref<64x8xf32, #tpu.memory_space<vmem>>, vector<64x8xf32>
    %68 = vector.shape_cast %66 : vector<8x8x4xbf16> to vector<64x4xbf16>
    %c2_112 = arith.constant 2 : index
    %c1_113 = arith.constant 1 : index
    %c0_114 = arith.constant 0 : index
    %c0_115 = arith.constant 0 : index
    %69 = vector.load %arg2[%c2_112, %c1_113, %c0_114, %c0_115] : memref<3x3x4x8xbf16, #tpu.memory_space<vmem>>, vector<1x1x4x8xbf16>
    %70 = vector.shape_cast %69 : vector<1x1x4x8xbf16> to vector<4x8xbf16>
    %cst_116 = arith.constant dense<0.000000e+00> : vector<64x8xf32>
    %71 = tpu.matmul %68, %70, %cst_116 {dimension_numbers = #tpu.dot_dimension_numbers<[1], [0], [0], [1], [0, 0, 1, 1], [], []>} : vector<64x4xbf16>, vector<4x8xbf16>, vector<64x8xf32> -> vector<64x8xf32>
    %72 = arith.addf %67, %71 : vector<64x8xf32>
    %c0_117 = arith.constant 0 : index
    %c0_118 = arith.constant 0 : index
    %73 = vector.load %arg6[%c0_117, %c0_118] : memref<64x8xf32, #tpu.memory_space<vmem>>, vector<64x8xf32>
    tpu.vector_store %arg6[%c0_117, %c0_118], %72 {strides = array<i32>} : memref<64x8xf32, #tpu.memory_space<vmem>>, vector<64x8xf32>,
    %c0_119 = arith.constant 0 : index
    %c1_120 = arith.constant 1 : index
    %c1_121 = arith.constant 1 : index
    %c1_122 = arith.constant 1 : index
    %c1_123 = arith.constant 1 : index
    %c0_124 = arith.constant 0 : index
    %74 = vector.load %arg1[%c0_119, %c1_120, %c1_121, %c1_122, %c1_123, %c0_124] : memref<1x2x2x9x9x4xbf16, #tpu.memory_space<vmem>>, vector<1x1x1x8x8x4xbf16>
    %75 = vector.shape_cast %74 : vector<1x1x1x8x8x4xbf16> to vector<8x8x4xbf16>
    %c0_125 = arith.constant 0 : index
    %c0_126 = arith.constant 0 : index
    %76 = vector.load %arg6[%c0_125, %c0_126] : memref<64x8xf32, #tpu.memory_space<vmem>>, vector<64x8xf32>
    %77 = vector.shape_cast %75 : vector<8x8x4xbf16> to vector<64x4xbf16>
    %c2_127 = arith.constant 2 : index
    %c2_128 = arith.constant 2 : index
    %c0_129 = arith.constant 0 : index
    %c0_130 = arith.constant 0 : index
    %78 = vector.load %arg2[%c2_127, %c2_128, %c0_129, %c0_130] : memref<3x3x4x8xbf16, #tpu.memory_space<vmem>>, vector<1x1x4x8xbf16>
    %79 = vector.shape_cast %78 : vector<1x1x4x8xbf16> to vector<4x8xbf16>
    %cst_131 = arith.constant dense<0.000000e+00> : vector<64x8xf32>
    %80 = tpu.matmul %77, %79, %cst_131 {dimension_numbers = #tpu.dot_dimension_numbers<[1], [0], [0], [1], [0, 0, 1, 1], [], []>} : vector<64x4xbf16>, vector<4x8xbf16>, vector<64x8xf32> -> vector<64x8xf32>
    %81 = arith.addf %76, %80 : vector<64x8xf32>
    %c0_132 = arith.constant 0 : index
    %c0_133 = arith.constant 0 : index
    %82 = vector.load %arg6[%c0_132, %c0_133] : memref<64x8xf32, #tpu.memory_space<vmem>>, vector<64x8xf32>
    tpu.vector_store %arg6[%c0_132, %c0_133], %81 {strides = array<i32>} : memref<64x8xf32, #tpu.memory_space<vmem>>, vector<64x8xf32>,
    %c0_134 = arith.constant 0 : index
    %c0_135 = arith.constant 0 : index
    %83 = vector.load %arg6[%c0_134, %c0_135] : memref<64x8xf32, #tpu.memory_space<vmem>>, vector<64x8xf32>
    %c0_136 = arith.constant 0 : index
    %c0_137 = arith.constant 0 : index
    %84 = vector.load %arg3[%c0_136, %c0_137] : memref<1x8xf32, #tpu.memory_space<vmem>>, vector<1x8xf32>
    %85 = vector.broadcast %84 : vector<1x8xf32> to vector<64x8xf32>
    %86 = arith.mulf %83, %85 : vector<64x8xf32>
    %c0_138 = arith.constant 0 : index
    %c0_139 = arith.constant 0 : index
    %87 = vector.load %arg4[%c0_138, %c0_139] : memref<1x8xf32, #tpu.memory_space<vmem>>, vector<1x8xf32>
    %88 = vector.broadcast %87 : vector<1x8xf32> to vector<64x8xf32>
    %89 = arith.addf %86, %88 : vector<64x8xf32>
    %cst_140 = arith.constant 0.000000e+00 : f32
    %90 = vector.broadcast %cst_140 : f32 to vector<64x8xf32>
    %91 = arith.maximumf %89, %90 : vector<64x8xf32>
    %92 = vector.shape_cast %91 : vector<64x8xf32> to vector<1x8x8x8xf32>
    %93 = arith.truncf %92 : vector<1x8x8x8xf32> to vector<1x8x8x8xbf16>
    %c0_141 = arith.constant 0 : index
    %c0_142 = arith.constant 0 : index
    %c0_143 = arith.constant 0 : index
    %c0_144 = arith.constant 0 : index
    %94 = vector.load %arg5[%c0_141, %c0_142, %c0_143, %c0_144] : memref<1x8x8x8xbf16, #tpu.memory_space<vmem>>, vector<1x8x8x8xbf16>
    tpu.vector_store %arg5[%c0_141, %c0_142, %c0_143, %c0_144], %93 {strides = array<i32>} : memref<1x8x8x8xbf16, #tpu.memory_space<vmem>>, vector<1x8x8x8xbf16>,
    return
  }
  func.func @transform_0(%arg0: i32) -> (i32, i32, i32, i32, i32, i32) {
    %c0_i32 = arith.constant 0 : i32
    %c0_i32_0 = arith.constant 0 : i32
    %c0_i32_1 = arith.constant 0 : i32
    %c0_i32_2 = arith.constant 0 : i32
    %c0_i32_3 = arith.constant 0 : i32
    %c0_i32_4 = arith.constant 0 : i32
    return %arg0, %c0_i32, %c0_i32_0, %c0_i32_1, %c0_i32_2, %c0_i32_3 : i32, i32, i32, i32, i32, i32
  }
  func.func @transform_1(%arg0: i32) -> (i32, i32, i32, i32) {
    %c0_i32 = arith.constant 0 : i32
    %c0_i32_0 = arith.constant 0 : i32
    %c0_i32_1 = arith.constant 0 : i32
    %c0_i32_2 = arith.constant 0 : i32
    %c0_i32_3 = arith.constant 0 : i32
    return %c0_i32, %c0_i32_0, %c0_i32_1, %c0_i32_2 : i32, i32, i32, i32
  }
  func.func @transform_2(%arg0: i32) -> (i32, i32) {
    %c0_i32 = arith.constant 0 : i32
    %c0_i32_0 = arith.constant 0 : i32
    %c0_i32_1 = arith.constant 0 : i32
    return %c0_i32, %c0_i32_0 : i32, i32
  }
  func.func @transform_3(%arg0: i32) -> (i32, i32) {
    %c0_i32 = arith.constant 0 : i32
    %c0_i32_0 = arith.constant 0 : i32
    %c0_i32_1 = arith.constant 0 : i32
    return %c0_i32, %c0_i32_0 : i32, i32
  }
  func.func @transform_4(%arg0: i32) -> (i32, i32, i32, i32) {
    %c0_i32 = arith.constant 0 : i32
    %c0_i32_0 = arith.constant 0 : i32
    %c0_i32_1 = arith.constant 0 : i32
    %c0_i32_2 = arith.constant 0 : i32
    return %arg0, %c0_i32, %c0_i32_0, %c0_i32_1 : i32, i32, i32, i32
  }
}

module attributes {stable_mosaic.version = 11 : i64} {
  func.func @kernel(%arg0: i32, %arg1: memref<1x1x1x10x10x8xbf16, #tpu.memory_space<vmem>>, %arg2: memref<3x3x8x8xbf16, #tpu.memory_space<vmem>>, %arg3: memref<1x8xf32, #tpu.memory_space<vmem>>, %arg4: memref<1x8xf32, #tpu.memory_space<vmem>>, %arg5: memref<1x8x8x8xbf16, #tpu.memory_space<vmem>>, %arg6: memref<64x8xf32, #tpu.memory_space<vmem>>) attributes {dimension_semantics = [#tpu.dimension_semantics<parallel>], iteration_bounds = array<i64: 2>, scalar_prefetch = 0 : i64, scratch_operands = 1 : i64, tpu.core_type = #tpu.core_type<tc>, window_params = [{transform_indices = @transform_0, window_bounds = array<i64: 1, 1, 1, 10, 10, 8>}, {pipeline_mode = #tpu.pipeline_mode<synchronous>, transform_indices = @transform_1, window_bounds = array<i64: 3, 3, 8, 8>}, {pipeline_mode = #tpu.pipeline_mode<synchronous>, transform_indices = @transform_2, window_bounds = array<i64: 1, 8>}, {pipeline_mode = #tpu.pipeline_mode<synchronous>, transform_indices = @transform_3, window_bounds = array<i64: 1, 8>}, {transform_indices = @transform_4, window_bounds = array<i64: 1, 8, 8, 8>}]} {
    %cst = arith.constant 0.000000e+00 : f32
    %0 = vector.broadcast %cst : f32 to vector<64x8xf32>
    %c0 = arith.constant 0 : index
    %c0_0 = arith.constant 0 : index
    %1 = vector.load %arg6[%c0, %c0_0] : memref<64x8xf32, #tpu.memory_space<vmem>>, vector<64x8xf32>
    tpu.vector_store %arg6[%c0, %c0_0], %0 {strides = array<i32>} : memref<64x8xf32, #tpu.memory_space<vmem>>, vector<64x8xf32>,
    %c0_1 = arith.constant 0 : index
    %c0_2 = arith.constant 0 : index
    %c0_3 = arith.constant 0 : index
    %c0_4 = arith.constant 0 : index
    %c0_5 = arith.constant 0 : index
    %c0_6 = arith.constant 0 : index
    %2 = vector.load %arg1[%c0_1, %c0_2, %c0_3, %c0_4, %c0_5, %c0_6] : memref<1x1x1x10x10x8xbf16, #tpu.memory_space<vmem>>, vector<1x1x1x8x8x8xbf16>
    %3 = vector.shape_cast %2 : vector<1x1x1x8x8x8xbf16> to vector<8x8x8xbf16>
    %c0_7 = arith.constant 0 : index
    %c0_8 = arith.constant 0 : index
    %4 = vector.load %arg6[%c0_7, %c0_8] : memref<64x8xf32, #tpu.memory_space<vmem>>, vector<64x8xf32>
    %5 = vector.shape_cast %3 : vector<8x8x8xbf16> to vector<64x8xbf16>
    %c0_9 = arith.constant 0 : index
    %c0_10 = arith.constant 0 : index
    %c0_11 = arith.constant 0 : index
    %c0_12 = arith.constant 0 : index
    %6 = vector.load %arg2[%c0_9, %c0_10, %c0_11, %c0_12] : memref<3x3x8x8xbf16, #tpu.memory_space<vmem>>, vector<1x1x8x8xbf16>
    %7 = vector.shape_cast %6 : vector<1x1x8x8xbf16> to vector<8x8xbf16>
    %cst_13 = arith.constant dense<0.000000e+00> : vector<64x8xf32>
    %8 = tpu.matmul %5, %7, %cst_13 {dimension_numbers = #tpu.dot_dimension_numbers<[1], [0], [0], [1], [0, 0, 1, 1], [], []>} : vector<64x8xbf16>, vector<8x8xbf16>, vector<64x8xf32> -> vector<64x8xf32>
    %9 = arith.addf %4, %8 : vector<64x8xf32>
    %c0_14 = arith.constant 0 : index
    %c0_15 = arith.constant 0 : index
    %10 = vector.load %arg6[%c0_14, %c0_15] : memref<64x8xf32, #tpu.memory_space<vmem>>, vector<64x8xf32>
    tpu.vector_store %arg6[%c0_14, %c0_15], %9 {strides = array<i32>} : memref<64x8xf32, #tpu.memory_space<vmem>>, vector<64x8xf32>,
    %c0_16 = arith.constant 0 : index
    %c0_17 = arith.constant 0 : index
    %c0_18 = arith.constant 0 : index
    %c0_19 = arith.constant 0 : index
    %c1 = arith.constant 1 : index
    %c0_20 = arith.constant 0 : index
    %11 = vector.load %arg1[%c0_16, %c0_17, %c0_18, %c0_19, %c1, %c0_20] : memref<1x1x1x10x10x8xbf16, #tpu.memory_space<vmem>>, vector<1x1x1x8x8x8xbf16>
    %12 = vector.shape_cast %11 : vector<1x1x1x8x8x8xbf16> to vector<8x8x8xbf16>
    %c0_21 = arith.constant 0 : index
    %c0_22 = arith.constant 0 : index
    %13 = vector.load %arg6[%c0_21, %c0_22] : memref<64x8xf32, #tpu.memory_space<vmem>>, vector<64x8xf32>
    %14 = vector.shape_cast %12 : vector<8x8x8xbf16> to vector<64x8xbf16>
    %c0_23 = arith.constant 0 : index
    %c1_24 = arith.constant 1 : index
    %c0_25 = arith.constant 0 : index
    %c0_26 = arith.constant 0 : index
    %15 = vector.load %arg2[%c0_23, %c1_24, %c0_25, %c0_26] : memref<3x3x8x8xbf16, #tpu.memory_space<vmem>>, vector<1x1x8x8xbf16>
    %16 = vector.shape_cast %15 : vector<1x1x8x8xbf16> to vector<8x8xbf16>
    %cst_27 = arith.constant dense<0.000000e+00> : vector<64x8xf32>
    %17 = tpu.matmul %14, %16, %cst_27 {dimension_numbers = #tpu.dot_dimension_numbers<[1], [0], [0], [1], [0, 0, 1, 1], [], []>} : vector<64x8xbf16>, vector<8x8xbf16>, vector<64x8xf32> -> vector<64x8xf32>
    %18 = arith.addf %13, %17 : vector<64x8xf32>
    %c0_28 = arith.constant 0 : index
    %c0_29 = arith.constant 0 : index
    %19 = vector.load %arg6[%c0_28, %c0_29] : memref<64x8xf32, #tpu.memory_space<vmem>>, vector<64x8xf32>
    tpu.vector_store %arg6[%c0_28, %c0_29], %18 {strides = array<i32>} : memref<64x8xf32, #tpu.memory_space<vmem>>, vector<64x8xf32>,
    %c0_30 = arith.constant 0 : index
    %c0_31 = arith.constant 0 : index
    %c0_32 = arith.constant 0 : index
    %c0_33 = arith.constant 0 : index
    %c2 = arith.constant 2 : index
    %c0_34 = arith.constant 0 : index
    %20 = vector.load %arg1[%c0_30, %c0_31, %c0_32, %c0_33, %c2, %c0_34] : memref<1x1x1x10x10x8xbf16, #tpu.memory_space<vmem>>, vector<1x1x1x8x8x8xbf16>
    %21 = vector.shape_cast %20 : vector<1x1x1x8x8x8xbf16> to vector<8x8x8xbf16>
    %c0_35 = arith.constant 0 : index
    %c0_36 = arith.constant 0 : index
    %22 = vector.load %arg6[%c0_35, %c0_36] : memref<64x8xf32, #tpu.memory_space<vmem>>, vector<64x8xf32>
    %23 = vector.shape_cast %21 : vector<8x8x8xbf16> to vector<64x8xbf16>
    %c0_37 = arith.constant 0 : index
    %c2_38 = arith.constant 2 : index
    %c0_39 = arith.constant 0 : index
    %c0_40 = arith.constant 0 : index
    %24 = vector.load %arg2[%c0_37, %c2_38, %c0_39, %c0_40] : memref<3x3x8x8xbf16, #tpu.memory_space<vmem>>, vector<1x1x8x8xbf16>
    %25 = vector.shape_cast %24 : vector<1x1x8x8xbf16> to vector<8x8xbf16>
    %cst_41 = arith.constant dense<0.000000e+00> : vector<64x8xf32>
    %26 = tpu.matmul %23, %25, %cst_41 {dimension_numbers = #tpu.dot_dimension_numbers<[1], [0], [0], [1], [0, 0, 1, 1], [], []>} : vector<64x8xbf16>, vector<8x8xbf16>, vector<64x8xf32> -> vector<64x8xf32>
    %27 = arith.addf %22, %26 : vector<64x8xf32>
    %c0_42 = arith.constant 0 : index
    %c0_43 = arith.constant 0 : index
    %28 = vector.load %arg6[%c0_42, %c0_43] : memref<64x8xf32, #tpu.memory_space<vmem>>, vector<64x8xf32>
    tpu.vector_store %arg6[%c0_42, %c0_43], %27 {strides = array<i32>} : memref<64x8xf32, #tpu.memory_space<vmem>>, vector<64x8xf32>,
    %c0_44 = arith.constant 0 : index
    %c0_45 = arith.constant 0 : index
    %c0_46 = arith.constant 0 : index
    %c1_47 = arith.constant 1 : index
    %c0_48 = arith.constant 0 : index
    %c0_49 = arith.constant 0 : index
    %29 = vector.load %arg1[%c0_44, %c0_45, %c0_46, %c1_47, %c0_48, %c0_49] : memref<1x1x1x10x10x8xbf16, #tpu.memory_space<vmem>>, vector<1x1x1x8x8x8xbf16>
    %30 = vector.shape_cast %29 : vector<1x1x1x8x8x8xbf16> to vector<8x8x8xbf16>
    %c0_50 = arith.constant 0 : index
    %c0_51 = arith.constant 0 : index
    %31 = vector.load %arg6[%c0_50, %c0_51] : memref<64x8xf32, #tpu.memory_space<vmem>>, vector<64x8xf32>
    %32 = vector.shape_cast %30 : vector<8x8x8xbf16> to vector<64x8xbf16>
    %c1_52 = arith.constant 1 : index
    %c0_53 = arith.constant 0 : index
    %c0_54 = arith.constant 0 : index
    %c0_55 = arith.constant 0 : index
    %33 = vector.load %arg2[%c1_52, %c0_53, %c0_54, %c0_55] : memref<3x3x8x8xbf16, #tpu.memory_space<vmem>>, vector<1x1x8x8xbf16>
    %34 = vector.shape_cast %33 : vector<1x1x8x8xbf16> to vector<8x8xbf16>
    %cst_56 = arith.constant dense<0.000000e+00> : vector<64x8xf32>
    %35 = tpu.matmul %32, %34, %cst_56 {dimension_numbers = #tpu.dot_dimension_numbers<[1], [0], [0], [1], [0, 0, 1, 1], [], []>} : vector<64x8xbf16>, vector<8x8xbf16>, vector<64x8xf32> -> vector<64x8xf32>
    %36 = arith.addf %31, %35 : vector<64x8xf32>
    %c0_57 = arith.constant 0 : index
    %c0_58 = arith.constant 0 : index
    %37 = vector.load %arg6[%c0_57, %c0_58] : memref<64x8xf32, #tpu.memory_space<vmem>>, vector<64x8xf32>
    tpu.vector_store %arg6[%c0_57, %c0_58], %36 {strides = array<i32>} : memref<64x8xf32, #tpu.memory_space<vmem>>, vector<64x8xf32>,
    %c0_59 = arith.constant 0 : index
    %c0_60 = arith.constant 0 : index
    %c0_61 = arith.constant 0 : index
    %c1_62 = arith.constant 1 : index
    %c1_63 = arith.constant 1 : index
    %c0_64 = arith.constant 0 : index
    %38 = vector.load %arg1[%c0_59, %c0_60, %c0_61, %c1_62, %c1_63, %c0_64] : memref<1x1x1x10x10x8xbf16, #tpu.memory_space<vmem>>, vector<1x1x1x8x8x8xbf16>
    %39 = vector.shape_cast %38 : vector<1x1x1x8x8x8xbf16> to vector<8x8x8xbf16>
    %c0_65 = arith.constant 0 : index
    %c0_66 = arith.constant 0 : index
    %40 = vector.load %arg6[%c0_65, %c0_66] : memref<64x8xf32, #tpu.memory_space<vmem>>, vector<64x8xf32>
    %41 = vector.shape_cast %39 : vector<8x8x8xbf16> to vector<64x8xbf16>
    %c1_67 = arith.constant 1 : index
    %c1_68 = arith.constant 1 : index
    %c0_69 = arith.constant 0 : index
    %c0_70 = arith.constant 0 : index
    %42 = vector.load %arg2[%c1_67, %c1_68, %c0_69, %c0_70] : memref<3x3x8x8xbf16, #tpu.memory_space<vmem>>, vector<1x1x8x8xbf16>
    %43 = vector.shape_cast %42 : vector<1x1x8x8xbf16> to vector<8x8xbf16>
    %cst_71 = arith.constant dense<0.000000e+00> : vector<64x8xf32>
    %44 = tpu.matmul %41, %43, %cst_71 {dimension_numbers = #tpu.dot_dimension_numbers<[1], [0], [0], [1], [0, 0, 1, 1], [], []>} : vector<64x8xbf16>, vector<8x8xbf16>, vector<64x8xf32> -> vector<64x8xf32>
    %45 = arith.addf %40, %44 : vector<64x8xf32>
    %c0_72 = arith.constant 0 : index
    %c0_73 = arith.constant 0 : index
    %46 = vector.load %arg6[%c0_72, %c0_73] : memref<64x8xf32, #tpu.memory_space<vmem>>, vector<64x8xf32>
    tpu.vector_store %arg6[%c0_72, %c0_73], %45 {strides = array<i32>} : memref<64x8xf32, #tpu.memory_space<vmem>>, vector<64x8xf32>,
    %c0_74 = arith.constant 0 : index
    %c0_75 = arith.constant 0 : index
    %c0_76 = arith.constant 0 : index
    %c1_77 = arith.constant 1 : index
    %c2_78 = arith.constant 2 : index
    %c0_79 = arith.constant 0 : index
    %47 = vector.load %arg1[%c0_74, %c0_75, %c0_76, %c1_77, %c2_78, %c0_79] : memref<1x1x1x10x10x8xbf16, #tpu.memory_space<vmem>>, vector<1x1x1x8x8x8xbf16>
    %48 = vector.shape_cast %47 : vector<1x1x1x8x8x8xbf16> to vector<8x8x8xbf16>
    %c0_80 = arith.constant 0 : index
    %c0_81 = arith.constant 0 : index
    %49 = vector.load %arg6[%c0_80, %c0_81] : memref<64x8xf32, #tpu.memory_space<vmem>>, vector<64x8xf32>
    %50 = vector.shape_cast %48 : vector<8x8x8xbf16> to vector<64x8xbf16>
    %c1_82 = arith.constant 1 : index
    %c2_83 = arith.constant 2 : index
    %c0_84 = arith.constant 0 : index
    %c0_85 = arith.constant 0 : index
    %51 = vector.load %arg2[%c1_82, %c2_83, %c0_84, %c0_85] : memref<3x3x8x8xbf16, #tpu.memory_space<vmem>>, vector<1x1x8x8xbf16>
    %52 = vector.shape_cast %51 : vector<1x1x8x8xbf16> to vector<8x8xbf16>
    %cst_86 = arith.constant dense<0.000000e+00> : vector<64x8xf32>
    %53 = tpu.matmul %50, %52, %cst_86 {dimension_numbers = #tpu.dot_dimension_numbers<[1], [0], [0], [1], [0, 0, 1, 1], [], []>} : vector<64x8xbf16>, vector<8x8xbf16>, vector<64x8xf32> -> vector<64x8xf32>
    %54 = arith.addf %49, %53 : vector<64x8xf32>
    %c0_87 = arith.constant 0 : index
    %c0_88 = arith.constant 0 : index
    %55 = vector.load %arg6[%c0_87, %c0_88] : memref<64x8xf32, #tpu.memory_space<vmem>>, vector<64x8xf32>
    tpu.vector_store %arg6[%c0_87, %c0_88], %54 {strides = array<i32>} : memref<64x8xf32, #tpu.memory_space<vmem>>, vector<64x8xf32>,
    %c0_89 = arith.constant 0 : index
    %c0_90 = arith.constant 0 : index
    %c0_91 = arith.constant 0 : index
    %c2_92 = arith.constant 2 : index
    %c0_93 = arith.constant 0 : index
    %c0_94 = arith.constant 0 : index
    %56 = vector.load %arg1[%c0_89, %c0_90, %c0_91, %c2_92, %c0_93, %c0_94] : memref<1x1x1x10x10x8xbf16, #tpu.memory_space<vmem>>, vector<1x1x1x8x8x8xbf16>
    %57 = vector.shape_cast %56 : vector<1x1x1x8x8x8xbf16> to vector<8x8x8xbf16>
    %c0_95 = arith.constant 0 : index
    %c0_96 = arith.constant 0 : index
    %58 = vector.load %arg6[%c0_95, %c0_96] : memref<64x8xf32, #tpu.memory_space<vmem>>, vector<64x8xf32>
    %59 = vector.shape_cast %57 : vector<8x8x8xbf16> to vector<64x8xbf16>
    %c2_97 = arith.constant 2 : index
    %c0_98 = arith.constant 0 : index
    %c0_99 = arith.constant 0 : index
    %c0_100 = arith.constant 0 : index
    %60 = vector.load %arg2[%c2_97, %c0_98, %c0_99, %c0_100] : memref<3x3x8x8xbf16, #tpu.memory_space<vmem>>, vector<1x1x8x8xbf16>
    %61 = vector.shape_cast %60 : vector<1x1x8x8xbf16> to vector<8x8xbf16>
    %cst_101 = arith.constant dense<0.000000e+00> : vector<64x8xf32>
    %62 = tpu.matmul %59, %61, %cst_101 {dimension_numbers = #tpu.dot_dimension_numbers<[1], [0], [0], [1], [0, 0, 1, 1], [], []>} : vector<64x8xbf16>, vector<8x8xbf16>, vector<64x8xf32> -> vector<64x8xf32>
    %63 = arith.addf %58, %62 : vector<64x8xf32>
    %c0_102 = arith.constant 0 : index
    %c0_103 = arith.constant 0 : index
    %64 = vector.load %arg6[%c0_102, %c0_103] : memref<64x8xf32, #tpu.memory_space<vmem>>, vector<64x8xf32>
    tpu.vector_store %arg6[%c0_102, %c0_103], %63 {strides = array<i32>} : memref<64x8xf32, #tpu.memory_space<vmem>>, vector<64x8xf32>,
    %c0_104 = arith.constant 0 : index
    %c0_105 = arith.constant 0 : index
    %c0_106 = arith.constant 0 : index
    %c2_107 = arith.constant 2 : index
    %c1_108 = arith.constant 1 : index
    %c0_109 = arith.constant 0 : index
    %65 = vector.load %arg1[%c0_104, %c0_105, %c0_106, %c2_107, %c1_108, %c0_109] : memref<1x1x1x10x10x8xbf16, #tpu.memory_space<vmem>>, vector<1x1x1x8x8x8xbf16>
    %66 = vector.shape_cast %65 : vector<1x1x1x8x8x8xbf16> to vector<8x8x8xbf16>
    %c0_110 = arith.constant 0 : index
    %c0_111 = arith.constant 0 : index
    %67 = vector.load %arg6[%c0_110, %c0_111] : memref<64x8xf32, #tpu.memory_space<vmem>>, vector<64x8xf32>
    %68 = vector.shape_cast %66 : vector<8x8x8xbf16> to vector<64x8xbf16>
    %c2_112 = arith.constant 2 : index
    %c1_113 = arith.constant 1 : index
    %c0_114 = arith.constant 0 : index
    %c0_115 = arith.constant 0 : index
    %69 = vector.load %arg2[%c2_112, %c1_113, %c0_114, %c0_115] : memref<3x3x8x8xbf16, #tpu.memory_space<vmem>>, vector<1x1x8x8xbf16>
    %70 = vector.shape_cast %69 : vector<1x1x8x8xbf16> to vector<8x8xbf16>
    %cst_116 = arith.constant dense<0.000000e+00> : vector<64x8xf32>
    %71 = tpu.matmul %68, %70, %cst_116 {dimension_numbers = #tpu.dot_dimension_numbers<[1], [0], [0], [1], [0, 0, 1, 1], [], []>} : vector<64x8xbf16>, vector<8x8xbf16>, vector<64x8xf32> -> vector<64x8xf32>
    %72 = arith.addf %67, %71 : vector<64x8xf32>
    %c0_117 = arith.constant 0 : index
    %c0_118 = arith.constant 0 : index
    %73 = vector.load %arg6[%c0_117, %c0_118] : memref<64x8xf32, #tpu.memory_space<vmem>>, vector<64x8xf32>
    tpu.vector_store %arg6[%c0_117, %c0_118], %72 {strides = array<i32>} : memref<64x8xf32, #tpu.memory_space<vmem>>, vector<64x8xf32>,
    %c0_119 = arith.constant 0 : index
    %c0_120 = arith.constant 0 : index
    %c0_121 = arith.constant 0 : index
    %c2_122 = arith.constant 2 : index
    %c2_123 = arith.constant 2 : index
    %c0_124 = arith.constant 0 : index
    %74 = vector.load %arg1[%c0_119, %c0_120, %c0_121, %c2_122, %c2_123, %c0_124] : memref<1x1x1x10x10x8xbf16, #tpu.memory_space<vmem>>, vector<1x1x1x8x8x8xbf16>
    %75 = vector.shape_cast %74 : vector<1x1x1x8x8x8xbf16> to vector<8x8x8xbf16>
    %c0_125 = arith.constant 0 : index
    %c0_126 = arith.constant 0 : index
    %76 = vector.load %arg6[%c0_125, %c0_126] : memref<64x8xf32, #tpu.memory_space<vmem>>, vector<64x8xf32>
    %77 = vector.shape_cast %75 : vector<8x8x8xbf16> to vector<64x8xbf16>
    %c2_127 = arith.constant 2 : index
    %c2_128 = arith.constant 2 : index
    %c0_129 = arith.constant 0 : index
    %c0_130 = arith.constant 0 : index
    %78 = vector.load %arg2[%c2_127, %c2_128, %c0_129, %c0_130] : memref<3x3x8x8xbf16, #tpu.memory_space<vmem>>, vector<1x1x8x8xbf16>
    %79 = vector.shape_cast %78 : vector<1x1x8x8xbf16> to vector<8x8xbf16>
    %cst_131 = arith.constant dense<0.000000e+00> : vector<64x8xf32>
    %80 = tpu.matmul %77, %79, %cst_131 {dimension_numbers = #tpu.dot_dimension_numbers<[1], [0], [0], [1], [0, 0, 1, 1], [], []>} : vector<64x8xbf16>, vector<8x8xbf16>, vector<64x8xf32> -> vector<64x8xf32>
    %81 = arith.addf %76, %80 : vector<64x8xf32>
    %c0_132 = arith.constant 0 : index
    %c0_133 = arith.constant 0 : index
    %82 = vector.load %arg6[%c0_132, %c0_133] : memref<64x8xf32, #tpu.memory_space<vmem>>, vector<64x8xf32>
    tpu.vector_store %arg6[%c0_132, %c0_133], %81 {strides = array<i32>} : memref<64x8xf32, #tpu.memory_space<vmem>>, vector<64x8xf32>,
    %c0_134 = arith.constant 0 : index
    %c0_135 = arith.constant 0 : index
    %83 = vector.load %arg6[%c0_134, %c0_135] : memref<64x8xf32, #tpu.memory_space<vmem>>, vector<64x8xf32>
    %c0_136 = arith.constant 0 : index
    %c0_137 = arith.constant 0 : index
    %84 = vector.load %arg3[%c0_136, %c0_137] : memref<1x8xf32, #tpu.memory_space<vmem>>, vector<1x8xf32>
    %85 = vector.broadcast %84 : vector<1x8xf32> to vector<64x8xf32>
    %86 = arith.mulf %83, %85 : vector<64x8xf32>
    %c0_138 = arith.constant 0 : index
    %c0_139 = arith.constant 0 : index
    %87 = vector.load %arg4[%c0_138, %c0_139] : memref<1x8xf32, #tpu.memory_space<vmem>>, vector<1x8xf32>
    %88 = vector.broadcast %87 : vector<1x8xf32> to vector<64x8xf32>
    %89 = arith.addf %86, %88 : vector<64x8xf32>
    %cst_140 = arith.constant 0.000000e+00 : f32
    %90 = vector.broadcast %cst_140 : f32 to vector<64x8xf32>
    %91 = arith.maximumf %89, %90 : vector<64x8xf32>
    %92 = vector.shape_cast %91 : vector<64x8xf32> to vector<1x8x8x8xf32>
    %93 = arith.truncf %92 : vector<1x8x8x8xf32> to vector<1x8x8x8xbf16>
    %c0_141 = arith.constant 0 : index
    %c0_142 = arith.constant 0 : index
    %c0_143 = arith.constant 0 : index
    %c0_144 = arith.constant 0 : index
    %94 = vector.load %arg5[%c0_141, %c0_142, %c0_143, %c0_144] : memref<1x8x8x8xbf16, #tpu.memory_space<vmem>>, vector<1x8x8x8xbf16>
    tpu.vector_store %arg5[%c0_141, %c0_142, %c0_143, %c0_144], %93 {strides = array<i32>} : memref<1x8x8x8xbf16, #tpu.memory_space<vmem>>, vector<1x8x8x8xbf16>,
    return
  }
  func.func @transform_0(%arg0: i32) -> (i32, i32, i32, i32, i32, i32) {
    %c0_i32 = arith.constant 0 : i32
    %c0_i32_0 = arith.constant 0 : i32
    %c0_i32_1 = arith.constant 0 : i32
    %c0_i32_2 = arith.constant 0 : i32
    %c0_i32_3 = arith.constant 0 : i32
    %c0_i32_4 = arith.constant 0 : i32
    return %arg0, %c0_i32, %c0_i32_0, %c0_i32_1, %c0_i32_2, %c0_i32_3 : i32, i32, i32, i32, i32, i32
  }
  func.func @transform_1(%arg0: i32) -> (i32, i32, i32, i32) {
    %c0_i32 = arith.constant 0 : i32
    %c0_i32_0 = arith.constant 0 : i32
    %c0_i32_1 = arith.constant 0 : i32
    %c0_i32_2 = arith.constant 0 : i32
    %c0_i32_3 = arith.constant 0 : i32
    return %c0_i32, %c0_i32_0, %c0_i32_1, %c0_i32_2 : i32, i32, i32, i32
  }
  func.func @transform_2(%arg0: i32) -> (i32, i32) {
    %c0_i32 = arith.constant 0 : i32
    %c0_i32_0 = arith.constant 0 : i32
    %c0_i32_1 = arith.constant 0 : i32
    return %c0_i32, %c0_i32_0 : i32, i32
  }
  func.func @transform_3(%arg0: i32) -> (i32, i32) {
    %c0_i32 = arith.constant 0 : i32
    %c0_i32_0 = arith.constant 0 : i32
    %c0_i32_1 = arith.constant 0 : i32
    return %c0_i32, %c0_i32_0 : i32, i32
  }
  func.func @transform_4(%arg0: i32) -> (i32, i32, i32, i32) {
    %c0_i32 = arith.constant 0 : i32
    %c0_i32_0 = arith.constant 0 : i32
    %c0_i32_1 = arith.constant 0 : i32
    %c0_i32_2 = arith.constant 0 : i32
    return %arg0, %c0_i32, %c0_i32_0, %c0_i32_1 : i32, i32, i32, i32
  }
}

module attributes {stable_mosaic.version = 11 : i64} {
  func.func @kernel(%arg0: i32, %arg1: memref<1x1x1x10x10x8xbf16, #tpu.memory_space<vmem>>, %arg2: memref<3x3x8x8xbf16, #tpu.memory_space<vmem>>, %arg3: memref<1x8x8x8xbf16, #tpu.memory_space<vmem>>, %arg4: memref<1x8x8x8xbf16, #tpu.memory_space<vmem>>, %arg5: memref<64x8xf32, #tpu.memory_space<vmem>>) attributes {dimension_semantics = [#tpu.dimension_semantics<parallel>], iteration_bounds = array<i64: 2>, scalar_prefetch = 0 : i64, scratch_operands = 1 : i64, tpu.core_type = #tpu.core_type<tc>, window_params = [{transform_indices = @transform_0, window_bounds = array<i64: 1, 1, 1, 10, 10, 8>}, {pipeline_mode = #tpu.pipeline_mode<synchronous>, transform_indices = @transform_1, window_bounds = array<i64: 3, 3, 8, 8>}, {transform_indices = @transform_2, window_bounds = array<i64: 1, 8, 8, 8>}, {transform_indices = @transform_3, window_bounds = array<i64: 1, 8, 8, 8>}]} {
    %cst = arith.constant 0.000000e+00 : f32
    %0 = vector.broadcast %cst : f32 to vector<64x8xf32>
    %c0 = arith.constant 0 : index
    %c0_0 = arith.constant 0 : index
    %1 = vector.load %arg5[%c0, %c0_0] : memref<64x8xf32, #tpu.memory_space<vmem>>, vector<64x8xf32>
    tpu.vector_store %arg5[%c0, %c0_0], %0 {strides = array<i32>} : memref<64x8xf32, #tpu.memory_space<vmem>>, vector<64x8xf32>,
    %c0_1 = arith.constant 0 : index
    %c0_2 = arith.constant 0 : index
    %c0_3 = arith.constant 0 : index
    %c0_4 = arith.constant 0 : index
    %c0_5 = arith.constant 0 : index
    %c0_6 = arith.constant 0 : index
    %2 = vector.load %arg1[%c0_1, %c0_2, %c0_3, %c0_4, %c0_5, %c0_6] : memref<1x1x1x10x10x8xbf16, #tpu.memory_space<vmem>>, vector<1x1x1x8x8x8xbf16>
    %3 = vector.shape_cast %2 : vector<1x1x1x8x8x8xbf16> to vector<8x8x8xbf16>
    %c0_7 = arith.constant 0 : index
    %c0_8 = arith.constant 0 : index
    %4 = vector.load %arg5[%c0_7, %c0_8] : memref<64x8xf32, #tpu.memory_space<vmem>>, vector<64x8xf32>
    %5 = vector.shape_cast %3 : vector<8x8x8xbf16> to vector<64x8xbf16>
    %c0_9 = arith.constant 0 : index
    %c0_10 = arith.constant 0 : index
    %c0_11 = arith.constant 0 : index
    %c0_12 = arith.constant 0 : index
    %6 = vector.load %arg2[%c0_9, %c0_10, %c0_11, %c0_12] : memref<3x3x8x8xbf16, #tpu.memory_space<vmem>>, vector<1x1x8x8xbf16>
    %7 = vector.shape_cast %6 : vector<1x1x8x8xbf16> to vector<8x8xbf16>
    %cst_13 = arith.constant dense<0.000000e+00> : vector<64x8xf32>
    %8 = tpu.matmul %5, %7, %cst_13 {dimension_numbers = #tpu.dot_dimension_numbers<[1], [0], [0], [1], [0, 0, 1, 1], [], []>} : vector<64x8xbf16>, vector<8x8xbf16>, vector<64x8xf32> -> vector<64x8xf32>
    %9 = arith.addf %4, %8 : vector<64x8xf32>
    %c0_14 = arith.constant 0 : index
    %c0_15 = arith.constant 0 : index
    %10 = vector.load %arg5[%c0_14, %c0_15] : memref<64x8xf32, #tpu.memory_space<vmem>>, vector<64x8xf32>
    tpu.vector_store %arg5[%c0_14, %c0_15], %9 {strides = array<i32>} : memref<64x8xf32, #tpu.memory_space<vmem>>, vector<64x8xf32>,
    %c0_16 = arith.constant 0 : index
    %c0_17 = arith.constant 0 : index
    %c0_18 = arith.constant 0 : index
    %c0_19 = arith.constant 0 : index
    %c1 = arith.constant 1 : index
    %c0_20 = arith.constant 0 : index
    %11 = vector.load %arg1[%c0_16, %c0_17, %c0_18, %c0_19, %c1, %c0_20] : memref<1x1x1x10x10x8xbf16, #tpu.memory_space<vmem>>, vector<1x1x1x8x8x8xbf16>
    %12 = vector.shape_cast %11 : vector<1x1x1x8x8x8xbf16> to vector<8x8x8xbf16>
    %c0_21 = arith.constant 0 : index
    %c0_22 = arith.constant 0 : index
    %13 = vector.load %arg5[%c0_21, %c0_22] : memref<64x8xf32, #tpu.memory_space<vmem>>, vector<64x8xf32>
    %14 = vector.shape_cast %12 : vector<8x8x8xbf16> to vector<64x8xbf16>
    %c0_23 = arith.constant 0 : index
    %c1_24 = arith.constant 1 : index
    %c0_25 = arith.constant 0 : index
    %c0_26 = arith.constant 0 : index
    %15 = vector.load %arg2[%c0_23, %c1_24, %c0_25, %c0_26] : memref<3x3x8x8xbf16, #tpu.memory_space<vmem>>, vector<1x1x8x8xbf16>
    %16 = vector.shape_cast %15 : vector<1x1x8x8xbf16> to vector<8x8xbf16>
    %cst_27 = arith.constant dense<0.000000e+00> : vector<64x8xf32>
    %17 = tpu.matmul %14, %16, %cst_27 {dimension_numbers = #tpu.dot_dimension_numbers<[1], [0], [0], [1], [0, 0, 1, 1], [], []>} : vector<64x8xbf16>, vector<8x8xbf16>, vector<64x8xf32> -> vector<64x8xf32>
    %18 = arith.addf %13, %17 : vector<64x8xf32>
    %c0_28 = arith.constant 0 : index
    %c0_29 = arith.constant 0 : index
    %19 = vector.load %arg5[%c0_28, %c0_29] : memref<64x8xf32, #tpu.memory_space<vmem>>, vector<64x8xf32>
    tpu.vector_store %arg5[%c0_28, %c0_29], %18 {strides = array<i32>} : memref<64x8xf32, #tpu.memory_space<vmem>>, vector<64x8xf32>,
    %c0_30 = arith.constant 0 : index
    %c0_31 = arith.constant 0 : index
    %c0_32 = arith.constant 0 : index
    %c0_33 = arith.constant 0 : index
    %c2 = arith.constant 2 : index
    %c0_34 = arith.constant 0 : index
    %20 = vector.load %arg1[%c0_30, %c0_31, %c0_32, %c0_33, %c2, %c0_34] : memref<1x1x1x10x10x8xbf16, #tpu.memory_space<vmem>>, vector<1x1x1x8x8x8xbf16>
    %21 = vector.shape_cast %20 : vector<1x1x1x8x8x8xbf16> to vector<8x8x8xbf16>
    %c0_35 = arith.constant 0 : index
    %c0_36 = arith.constant 0 : index
    %22 = vector.load %arg5[%c0_35, %c0_36] : memref<64x8xf32, #tpu.memory_space<vmem>>, vector<64x8xf32>
    %23 = vector.shape_cast %21 : vector<8x8x8xbf16> to vector<64x8xbf16>
    %c0_37 = arith.constant 0 : index
    %c2_38 = arith.constant 2 : index
    %c0_39 = arith.constant 0 : index
    %c0_40 = arith.constant 0 : index
    %24 = vector.load %arg2[%c0_37, %c2_38, %c0_39, %c0_40] : memref<3x3x8x8xbf16, #tpu.memory_space<vmem>>, vector<1x1x8x8xbf16>
    %25 = vector.shape_cast %24 : vector<1x1x8x8xbf16> to vector<8x8xbf16>
    %cst_41 = arith.constant dense<0.000000e+00> : vector<64x8xf32>
    %26 = tpu.matmul %23, %25, %cst_41 {dimension_numbers = #tpu.dot_dimension_numbers<[1], [0], [0], [1], [0, 0, 1, 1], [], []>} : vector<64x8xbf16>, vector<8x8xbf16>, vector<64x8xf32> -> vector<64x8xf32>
    %27 = arith.addf %22, %26 : vector<64x8xf32>
    %c0_42 = arith.constant 0 : index
    %c0_43 = arith.constant 0 : index
    %28 = vector.load %arg5[%c0_42, %c0_43] : memref<64x8xf32, #tpu.memory_space<vmem>>, vector<64x8xf32>
    tpu.vector_store %arg5[%c0_42, %c0_43], %27 {strides = array<i32>} : memref<64x8xf32, #tpu.memory_space<vmem>>, vector<64x8xf32>,
    %c0_44 = arith.constant 0 : index
    %c0_45 = arith.constant 0 : index
    %c0_46 = arith.constant 0 : index
    %c1_47 = arith.constant 1 : index
    %c0_48 = arith.constant 0 : index
    %c0_49 = arith.constant 0 : index
    %29 = vector.load %arg1[%c0_44, %c0_45, %c0_46, %c1_47, %c0_48, %c0_49] : memref<1x1x1x10x10x8xbf16, #tpu.memory_space<vmem>>, vector<1x1x1x8x8x8xbf16>
    %30 = vector.shape_cast %29 : vector<1x1x1x8x8x8xbf16> to vector<8x8x8xbf16>
    %c0_50 = arith.constant 0 : index
    %c0_51 = arith.constant 0 : index
    %31 = vector.load %arg5[%c0_50, %c0_51] : memref<64x8xf32, #tpu.memory_space<vmem>>, vector<64x8xf32>
    %32 = vector.shape_cast %30 : vector<8x8x8xbf16> to vector<64x8xbf16>
    %c1_52 = arith.constant 1 : index
    %c0_53 = arith.constant 0 : index
    %c0_54 = arith.constant 0 : index
    %c0_55 = arith.constant 0 : index
    %33 = vector.load %arg2[%c1_52, %c0_53, %c0_54, %c0_55] : memref<3x3x8x8xbf16, #tpu.memory_space<vmem>>, vector<1x1x8x8xbf16>
    %34 = vector.shape_cast %33 : vector<1x1x8x8xbf16> to vector<8x8xbf16>
    %cst_56 = arith.constant dense<0.000000e+00> : vector<64x8xf32>
    %35 = tpu.matmul %32, %34, %cst_56 {dimension_numbers = #tpu.dot_dimension_numbers<[1], [0], [0], [1], [0, 0, 1, 1], [], []>} : vector<64x8xbf16>, vector<8x8xbf16>, vector<64x8xf32> -> vector<64x8xf32>
    %36 = arith.addf %31, %35 : vector<64x8xf32>
    %c0_57 = arith.constant 0 : index
    %c0_58 = arith.constant 0 : index
    %37 = vector.load %arg5[%c0_57, %c0_58] : memref<64x8xf32, #tpu.memory_space<vmem>>, vector<64x8xf32>
    tpu.vector_store %arg5[%c0_57, %c0_58], %36 {strides = array<i32>} : memref<64x8xf32, #tpu.memory_space<vmem>>, vector<64x8xf32>,
    %c0_59 = arith.constant 0 : index
    %c0_60 = arith.constant 0 : index
    %c0_61 = arith.constant 0 : index
    %c1_62 = arith.constant 1 : index
    %c1_63 = arith.constant 1 : index
    %c0_64 = arith.constant 0 : index
    %38 = vector.load %arg1[%c0_59, %c0_60, %c0_61, %c1_62, %c1_63, %c0_64] : memref<1x1x1x10x10x8xbf16, #tpu.memory_space<vmem>>, vector<1x1x1x8x8x8xbf16>
    %39 = vector.shape_cast %38 : vector<1x1x1x8x8x8xbf16> to vector<8x8x8xbf16>
    %c0_65 = arith.constant 0 : index
    %c0_66 = arith.constant 0 : index
    %40 = vector.load %arg5[%c0_65, %c0_66] : memref<64x8xf32, #tpu.memory_space<vmem>>, vector<64x8xf32>
    %41 = vector.shape_cast %39 : vector<8x8x8xbf16> to vector<64x8xbf16>
    %c1_67 = arith.constant 1 : index
    %c1_68 = arith.constant 1 : index
    %c0_69 = arith.constant 0 : index
    %c0_70 = arith.constant 0 : index
    %42 = vector.load %arg2[%c1_67, %c1_68, %c0_69, %c0_70] : memref<3x3x8x8xbf16, #tpu.memory_space<vmem>>, vector<1x1x8x8xbf16>
    %43 = vector.shape_cast %42 : vector<1x1x8x8xbf16> to vector<8x8xbf16>
    %cst_71 = arith.constant dense<0.000000e+00> : vector<64x8xf32>
    %44 = tpu.matmul %41, %43, %cst_71 {dimension_numbers = #tpu.dot_dimension_numbers<[1], [0], [0], [1], [0, 0, 1, 1], [], []>} : vector<64x8xbf16>, vector<8x8xbf16>, vector<64x8xf32> -> vector<64x8xf32>
    %45 = arith.addf %40, %44 : vector<64x8xf32>
    %c0_72 = arith.constant 0 : index
    %c0_73 = arith.constant 0 : index
    %46 = vector.load %arg5[%c0_72, %c0_73] : memref<64x8xf32, #tpu.memory_space<vmem>>, vector<64x8xf32>
    tpu.vector_store %arg5[%c0_72, %c0_73], %45 {strides = array<i32>} : memref<64x8xf32, #tpu.memory_space<vmem>>, vector<64x8xf32>,
    %c0_74 = arith.constant 0 : index
    %c0_75 = arith.constant 0 : index
    %c0_76 = arith.constant 0 : index
    %c1_77 = arith.constant 1 : index
    %c2_78 = arith.constant 2 : index
    %c0_79 = arith.constant 0 : index
    %47 = vector.load %arg1[%c0_74, %c0_75, %c0_76, %c1_77, %c2_78, %c0_79] : memref<1x1x1x10x10x8xbf16, #tpu.memory_space<vmem>>, vector<1x1x1x8x8x8xbf16>
    %48 = vector.shape_cast %47 : vector<1x1x1x8x8x8xbf16> to vector<8x8x8xbf16>
    %c0_80 = arith.constant 0 : index
    %c0_81 = arith.constant 0 : index
    %49 = vector.load %arg5[%c0_80, %c0_81] : memref<64x8xf32, #tpu.memory_space<vmem>>, vector<64x8xf32>
    %50 = vector.shape_cast %48 : vector<8x8x8xbf16> to vector<64x8xbf16>
    %c1_82 = arith.constant 1 : index
    %c2_83 = arith.constant 2 : index
    %c0_84 = arith.constant 0 : index
    %c0_85 = arith.constant 0 : index
    %51 = vector.load %arg2[%c1_82, %c2_83, %c0_84, %c0_85] : memref<3x3x8x8xbf16, #tpu.memory_space<vmem>>, vector<1x1x8x8xbf16>
    %52 = vector.shape_cast %51 : vector<1x1x8x8xbf16> to vector<8x8xbf16>
    %cst_86 = arith.constant dense<0.000000e+00> : vector<64x8xf32>
    %53 = tpu.matmul %50, %52, %cst_86 {dimension_numbers = #tpu.dot_dimension_numbers<[1], [0], [0], [1], [0, 0, 1, 1], [], []>} : vector<64x8xbf16>, vector<8x8xbf16>, vector<64x8xf32> -> vector<64x8xf32>
    %54 = arith.addf %49, %53 : vector<64x8xf32>
    %c0_87 = arith.constant 0 : index
    %c0_88 = arith.constant 0 : index
    %55 = vector.load %arg5[%c0_87, %c0_88] : memref<64x8xf32, #tpu.memory_space<vmem>>, vector<64x8xf32>
    tpu.vector_store %arg5[%c0_87, %c0_88], %54 {strides = array<i32>} : memref<64x8xf32, #tpu.memory_space<vmem>>, vector<64x8xf32>,
    %c0_89 = arith.constant 0 : index
    %c0_90 = arith.constant 0 : index
    %c0_91 = arith.constant 0 : index
    %c2_92 = arith.constant 2 : index
    %c0_93 = arith.constant 0 : index
    %c0_94 = arith.constant 0 : index
    %56 = vector.load %arg1[%c0_89, %c0_90, %c0_91, %c2_92, %c0_93, %c0_94] : memref<1x1x1x10x10x8xbf16, #tpu.memory_space<vmem>>, vector<1x1x1x8x8x8xbf16>
    %57 = vector.shape_cast %56 : vector<1x1x1x8x8x8xbf16> to vector<8x8x8xbf16>
    %c0_95 = arith.constant 0 : index
    %c0_96 = arith.constant 0 : index
    %58 = vector.load %arg5[%c0_95, %c0_96] : memref<64x8xf32, #tpu.memory_space<vmem>>, vector<64x8xf32>
    %59 = vector.shape_cast %57 : vector<8x8x8xbf16> to vector<64x8xbf16>
    %c2_97 = arith.constant 2 : index
    %c0_98 = arith.constant 0 : index
    %c0_99 = arith.constant 0 : index
    %c0_100 = arith.constant 0 : index
    %60 = vector.load %arg2[%c2_97, %c0_98, %c0_99, %c0_100] : memref<3x3x8x8xbf16, #tpu.memory_space<vmem>>, vector<1x1x8x8xbf16>
    %61 = vector.shape_cast %60 : vector<1x1x8x8xbf16> to vector<8x8xbf16>
    %cst_101 = arith.constant dense<0.000000e+00> : vector<64x8xf32>
    %62 = tpu.matmul %59, %61, %cst_101 {dimension_numbers = #tpu.dot_dimension_numbers<[1], [0], [0], [1], [0, 0, 1, 1], [], []>} : vector<64x8xbf16>, vector<8x8xbf16>, vector<64x8xf32> -> vector<64x8xf32>
    %63 = arith.addf %58, %62 : vector<64x8xf32>
    %c0_102 = arith.constant 0 : index
    %c0_103 = arith.constant 0 : index
    %64 = vector.load %arg5[%c0_102, %c0_103] : memref<64x8xf32, #tpu.memory_space<vmem>>, vector<64x8xf32>
    tpu.vector_store %arg5[%c0_102, %c0_103], %63 {strides = array<i32>} : memref<64x8xf32, #tpu.memory_space<vmem>>, vector<64x8xf32>,
    %c0_104 = arith.constant 0 : index
    %c0_105 = arith.constant 0 : index
    %c0_106 = arith.constant 0 : index
    %c2_107 = arith.constant 2 : index
    %c1_108 = arith.constant 1 : index
    %c0_109 = arith.constant 0 : index
    %65 = vector.load %arg1[%c0_104, %c0_105, %c0_106, %c2_107, %c1_108, %c0_109] : memref<1x1x1x10x10x8xbf16, #tpu.memory_space<vmem>>, vector<1x1x1x8x8x8xbf16>
    %66 = vector.shape_cast %65 : vector<1x1x1x8x8x8xbf16> to vector<8x8x8xbf16>
    %c0_110 = arith.constant 0 : index
    %c0_111 = arith.constant 0 : index
    %67 = vector.load %arg5[%c0_110, %c0_111] : memref<64x8xf32, #tpu.memory_space<vmem>>, vector<64x8xf32>
    %68 = vector.shape_cast %66 : vector<8x8x8xbf16> to vector<64x8xbf16>
    %c2_112 = arith.constant 2 : index
    %c1_113 = arith.constant 1 : index
    %c0_114 = arith.constant 0 : index
    %c0_115 = arith.constant 0 : index
    %69 = vector.load %arg2[%c2_112, %c1_113, %c0_114, %c0_115] : memref<3x3x8x8xbf16, #tpu.memory_space<vmem>>, vector<1x1x8x8xbf16>
    %70 = vector.shape_cast %69 : vector<1x1x8x8xbf16> to vector<8x8xbf16>
    %cst_116 = arith.constant dense<0.000000e+00> : vector<64x8xf32>
    %71 = tpu.matmul %68, %70, %cst_116 {dimension_numbers = #tpu.dot_dimension_numbers<[1], [0], [0], [1], [0, 0, 1, 1], [], []>} : vector<64x8xbf16>, vector<8x8xbf16>, vector<64x8xf32> -> vector<64x8xf32>
    %72 = arith.addf %67, %71 : vector<64x8xf32>
    %c0_117 = arith.constant 0 : index
    %c0_118 = arith.constant 0 : index
    %73 = vector.load %arg5[%c0_117, %c0_118] : memref<64x8xf32, #tpu.memory_space<vmem>>, vector<64x8xf32>
    tpu.vector_store %arg5[%c0_117, %c0_118], %72 {strides = array<i32>} : memref<64x8xf32, #tpu.memory_space<vmem>>, vector<64x8xf32>,
    %c0_119 = arith.constant 0 : index
    %c0_120 = arith.constant 0 : index
    %c0_121 = arith.constant 0 : index
    %c2_122 = arith.constant 2 : index
    %c2_123 = arith.constant 2 : index
    %c0_124 = arith.constant 0 : index
    %74 = vector.load %arg1[%c0_119, %c0_120, %c0_121, %c2_122, %c2_123, %c0_124] : memref<1x1x1x10x10x8xbf16, #tpu.memory_space<vmem>>, vector<1x1x1x8x8x8xbf16>
    %75 = vector.shape_cast %74 : vector<1x1x1x8x8x8xbf16> to vector<8x8x8xbf16>
    %c0_125 = arith.constant 0 : index
    %c0_126 = arith.constant 0 : index
    %76 = vector.load %arg5[%c0_125, %c0_126] : memref<64x8xf32, #tpu.memory_space<vmem>>, vector<64x8xf32>
    %77 = vector.shape_cast %75 : vector<8x8x8xbf16> to vector<64x8xbf16>
    %c2_127 = arith.constant 2 : index
    %c2_128 = arith.constant 2 : index
    %c0_129 = arith.constant 0 : index
    %c0_130 = arith.constant 0 : index
    %78 = vector.load %arg2[%c2_127, %c2_128, %c0_129, %c0_130] : memref<3x3x8x8xbf16, #tpu.memory_space<vmem>>, vector<1x1x8x8xbf16>
    %79 = vector.shape_cast %78 : vector<1x1x8x8xbf16> to vector<8x8xbf16>
    %cst_131 = arith.constant dense<0.000000e+00> : vector<64x8xf32>
    %80 = tpu.matmul %77, %79, %cst_131 {dimension_numbers = #tpu.dot_dimension_numbers<[1], [0], [0], [1], [0, 0, 1, 1], [], []>} : vector<64x8xbf16>, vector<8x8xbf16>, vector<64x8xf32> -> vector<64x8xf32>
    %81 = arith.addf %76, %80 : vector<64x8xf32>
    %c0_132 = arith.constant 0 : index
    %c0_133 = arith.constant 0 : index
    %82 = vector.load %arg5[%c0_132, %c0_133] : memref<64x8xf32, #tpu.memory_space<vmem>>, vector<64x8xf32>
    tpu.vector_store %arg5[%c0_132, %c0_133], %81 {strides = array<i32>} : memref<64x8xf32, #tpu.memory_space<vmem>>, vector<64x8xf32>,
    %c0_134 = arith.constant 0 : index
    %c0_135 = arith.constant 0 : index
    %83 = vector.load %arg5[%c0_134, %c0_135] : memref<64x8xf32, #tpu.memory_space<vmem>>, vector<64x8xf32>
    %c0_136 = arith.constant 0 : index
    %c0_137 = arith.constant 0 : index
    %c0_138 = arith.constant 0 : index
    %c0_139 = arith.constant 0 : index
    %84 = vector.load %arg3[%c0_136, %c0_137, %c0_138, %c0_139] : memref<1x8x8x8xbf16, #tpu.memory_space<vmem>>, vector<1x8x8x8xbf16>
    %85 = vector.shape_cast %84 : vector<1x8x8x8xbf16> to vector<8x8x8xbf16>
    %86 = vector.shape_cast %85 : vector<8x8x8xbf16> to vector<64x8xbf16>
    %87 = arith.extf %86 : vector<64x8xbf16> to vector<64x8xf32>
    %88 = arith.addf %83, %87 : vector<64x8xf32>
    %89 = vector.shape_cast %88 : vector<64x8xf32> to vector<1x8x8x8xf32>
    %90 = arith.truncf %89 : vector<1x8x8x8xf32> to vector<1x8x8x8xbf16>
    %c0_140 = arith.constant 0 : index
    %c0_141 = arith.constant 0 : index
    %c0_142 = arith.constant 0 : index
    %c0_143 = arith.constant 0 : index
    %91 = vector.load %arg4[%c0_140, %c0_141, %c0_142, %c0_143] : memref<1x8x8x8xbf16, #tpu.memory_space<vmem>>, vector<1x8x8x8xbf16>
    tpu.vector_store %arg4[%c0_140, %c0_141, %c0_142, %c0_143], %90 {strides = array<i32>} : memref<1x8x8x8xbf16, #tpu.memory_space<vmem>>, vector<1x8x8x8xbf16>,
    return
  }
  func.func @transform_0(%arg0: i32) -> (i32, i32, i32, i32, i32, i32) {
    %c0_i32 = arith.constant 0 : i32
    %c0_i32_0 = arith.constant 0 : i32
    %c0_i32_1 = arith.constant 0 : i32
    %c0_i32_2 = arith.constant 0 : i32
    %c0_i32_3 = arith.constant 0 : i32
    %c0_i32_4 = arith.constant 0 : i32
    return %arg0, %c0_i32, %c0_i32_0, %c0_i32_1, %c0_i32_2, %c0_i32_3 : i32, i32, i32, i32, i32, i32
  }
  func.func @transform_1(%arg0: i32) -> (i32, i32, i32, i32) {
    %c0_i32 = arith.constant 0 : i32
    %c0_i32_0 = arith.constant 0 : i32
    %c0_i32_1 = arith.constant 0 : i32
    %c0_i32_2 = arith.constant 0 : i32
    %c0_i32_3 = arith.constant 0 : i32
    return %c0_i32, %c0_i32_0, %c0_i32_1, %c0_i32_2 : i32, i32, i32, i32
  }
  func.func @transform_2(%arg0: i32) -> (i32, i32, i32, i32) {
    %c0_i32 = arith.constant 0 : i32
    %c0_i32_0 = arith.constant 0 : i32
    %c0_i32_1 = arith.constant 0 : i32
    %c0_i32_2 = arith.constant 0 : i32
    return %arg0, %c0_i32, %c0_i32_0, %c0_i32_1 : i32, i32, i32, i32
  }
  func.func @transform_3(%arg0: i32) -> (i32, i32, i32, i32) {
    %c0_i32 = arith.constant 0 : i32
    %c0_i32_0 = arith.constant 0 : i32
    %c0_i32_1 = arith.constant 0 : i32
    %c0_i32_2 = arith.constant 0 : i32
    return %arg0, %c0_i32, %c0_i32_0, %c0_i32_1 : i32, i32, i32, i32
  }
}

</mosaic_0001>

<bundles_post_ra>
// kernel: _lambda_.6
= control target key start
LH: loop header
LB: loop body
LE: loop exit
PB: predicated region body
PF: predicated region fallthrough
CT: control target
= control target key end

     0   :  { %s2420_s15 = smov 0   ;;  %s2872_s0 = inlined_call_operand.vmem [shape: bf16[2,1,1,10,10,8], index: 0, kind: input, shape index: {}]   ;;  %s2873_s1 = inlined_call_operand.vmem [shape: bf16[3,3,8,8], index: 1, kind: input, shape index: {}]   ;;  %s2874_s2 = inlined_call_operand.vmem [shape: f32[1,8], index: 2, kind: input, shape index: {}]   ;;  %s2875_s3 = inlined_call_operand.vmem [shape: f32[1,8], index: 3, kind: input, shape index: {}]   ;;  %s2876_s4 = inlined_call_operand.vmem [shape: bf16[2,8,8,8], index: 4, kind: output, shape index: {}]  }
   0x1 LB: > { %s2020_s16 = sadd.s32 4294967295, %s2392_s15   ;;  %p2024_p0 = scmp.ge.s32.totalorder %s2392_s15, 1  ;;  %s2392_s15 = sphi %s2420_s15, %s14_s15  }
   0x2   : > { %p162_p1 = scmp.lt.s32.totalorder %s2392_s15, 3 }
   0x4   : > { %p163_p2 = pnand %p2024_p0, %p162_p1 }
   0x5   : > { %v224_v0 = vld [vmem:[%s2873_s1] sm:$0xf] (!%p163_p2)  ;;  %vm257_vm0 = vcmask (!%p163_p2), 1043456   ;;  %p188_p3 = scmp.lt.s32.totalorder (!%p163_p2), %s2020_s16, 1  ;;  %v2036_v2 = vld [vmem:[%s2873_s1 + $0x4] sm:$0xf] (!%p163_p2) }
   0x6   : > { %166 = sbr.rel (%p163_p2) target bundleno = 354 (0x162), region = 36  ;;  %2354 = vmatprep.subr.msk.bf16.mxu0 (!%p163_p2), %vm257_vm0, %v224_v0  ;;  %2355 = vmatprep.subr.msk.bf16.mxu1 (!%p163_p2), %vm257_vm0, %v224_v0  ;;  %v259_v1 = vsel (!%p163_p2), %vm257_vm0, %v224_v0, 0  ;;  %v2053_v3 = vld [vmem:[%s2873_s1 + $0x8] sm:$0xf] (!%p163_p2)  ;;  %vm199_vm1 = vcmask (!%p163_p2), 64512   ;;  %v2394_v6 = vmov (!%p163_p2), 0.0  }
   0x7   : > { %2263 = vmatpush3.bf16.msra.mxu0 (!%p163_p2), %v259_v1  ;;  %2353 = vmatpush3.bf16.msra.mxu1 (!%p163_p2), %v259_v1  ;;  %v2070_v4 = vld [vmem:[%s2873_s1 + $0xc] sm:$0xf] (!%p163_p2)  ;;  %v2095_v5 = vld [vmem:[%s2873_s1 + $0x10] sm:$0xf] (!%p163_p2)  ;;  %202 = vst.msk [vmem:[#allocation2 + $0x10] sm:$0xff] (!%p163_p2), %vm199_vm1, %v2394_v6  ;;  %200 = vst.msk [vmem:[#allocation2] sm:$0xff] (!%p163_p2), %vm199_vm1, %v2394_v6 }
   0x8   : > { %2356 = vmatprep.subr.msk.bf16.mxu1 (!%p163_p2), %vm257_vm0, %v2036_v2  ;;  %2357 = vmatprep.subr.msk.bf16.mxu0 (!%p163_p2), %vm257_vm0, %v2053_v3  ;;  %201 = vst.msk [vmem:[#allocation2 + $0x8] sm:$0xff] (!%p163_p2), %vm199_vm1, %v2394_v6  ;;  %203 = vst.msk [vmem:[#allocation2 + $0x18] sm:$0xff] (!%p163_p2), %vm199_vm1, %v2394_v6  ;;  %v508_v7 = vsel (!%p163_p2), %vm257_vm0, %v2036_v2, 0  ;;  %vm366_vm2 = vsmask.f32 (!%p163_p2), 3328  ;;  %v693_v8 = vsel (!%p163_p2), %vm257_vm0, %v2053_v3, 0 }
   0x9   : > { %204 = vst.msk [vmem:[#allocation2 + $0x20] sm:$0xff] (!%p163_p2), %vm199_vm1, %v2394_v6  ;;  %205 = vst.msk [vmem:[#allocation2 + $0x28] sm:$0xff] (!%p163_p2), %vm199_vm1, %v2394_v6  ;;  %vm367_vm3 = vsmask.f32 (!%p163_p2), 7440  ;;  %v2467_v9 = vsel (!%p163_p2), %vm257_vm0, %v2070_v4, 0  ;;  %v2470_v10 = vsel (!%p163_p2), %vm257_vm0, %v2095_v5, 0 }
   0xa   : > { %206 = vst.msk [vmem:[#allocation2 + $0x30] sm:$0xff] (!%p163_p2), %vm199_vm1, %v2394_v6  ;;  %207 = vst.msk [vmem:[#allocation2 + $0x38] sm:$0xff] (!%p163_p2), %vm199_vm1, %v2394_v6  ;;  %vm631_vm4 = vcmask (!%p163_p2), 1042432   ;;  %vm632_vm5 = vcmask (!%p163_p2), 1046532   ;;  %v2494_v42 = vld [vmem:[%s2873_s1 + $0x14] sm:$0xf] (!%p163_p2) }
   0xb   : > { %vm2498_vm6 = vmor (!%p163_p2), %vm366_vm2, %vm367_vm3  ;;  %v2520_v6 = vsel (!%p163_p2), %vm257_vm0, %v2494_v42, 0  ;;  %vm1956_vm8 = vcmask (!%p163_p2), 60416  }
   0xc   : > { %vm2507_vm7 = vmor (!%p163_p2), %vm631_vm4, %vm632_vm5 }
   0xd   : > { %s2882_s16 = smov (!%p188_p3, %s2020_s16), 1 }
   0xe   : > { %s2364_s27 = smul.u32 80, %s2882_s16  ;;  %s2216_s19 = sshll.u32 %s2882_s16, 5 }
   0xf   : > { %s2848_s22 = scalar_lea.vmem %s2876_s4, %s2216_s19 }
  0x10   : > { %s2463_s30 = scalar_lea.vmem %s2872_s0, %s2364_s27 }
  0x11   : > { %v2374_v11 = vld [vmem:[%s2463_s30] ss:$8 sps:$4 sm:$0xff]   ;;  %v2376_v13 = vld [vmem:[%s2463_s30 + $0x10] ss:$8 sps:$4 sm:$0xff]   ;;  %v343_v16 = vld [vmem:[%s2463_s30 + $0x4] sm:$0x1] }
  0x12   : > { %v2375_v12 = vld [vmem:[%s2463_s30 + $0x20] ss:$8 sps:$4 sm:$0xff]   ;;  %2264 = vmatprep.mubr.msk.bf16.mxu0 %vm199_vm1, %v2374_v11  ;;  %v2377_v14 = vld [vmem:[%s2463_s30 + $0x30] ss:$8 sps:$4 sm:$0xff]   ;;  %v345_v18 = vld [vmem:[%s2463_s30 + $0xc] sm:$0x1] }
  0x13   : > { %2268 = vmatprep.mubr.msk.bf16.mxu1 %vm199_vm1, %v2375_v12  ;;  %2265 = vmatmul.mubr.msk.bf16.vlgmr.msra.gmra.mrb[0].mxu0 %vm199_vm1, %v2376_v13  ;;  %v342_v15 = vld [vmem:[%s2463_s30] sm:$0xf]  ;;  %v344_v17 = vld [vmem:[%s2463_s30 + $0x8] sm:$0xf]  ;;  %v379_v21 = vshll.u32 %v343_v16, 16  ;;  %v393_v24 = vshll.u32 %v345_v18, 16 }
  0x14   : > { %2269 = vmatmul.mubr.msk.bf16.vlgmr.msra.gmra.mrb[0].mxu1 %vm199_vm1, %v2377_v14  ;;  %v370_v19 = vshrl.u32 %v342_v15, 16  ;;  %v373_v20 = vshll.u32 %v342_v15, 16  ;;  %v384_v22 = vshrl.u32 %v344_v17, 16  ;;  %2283 = vmatpush3.bf16.msra.mxu0 %v693_v8  ;;  %v387_v23 = vshll.u32 %v344_v17, 16  ;;  %v346_v25 = vld [vmem:[%s2463_s30 + $0x10] sm:$0xf] }
  0x15   : > { %2273 = vmatpush3.bf16.msra.mxu1 %v508_v7  ;;  %v347_v26 = vld [vmem:[%s2463_s30 + $0x14] sm:$0x1]  ;;  %2359 = vmatprep.subr.msk.bf16.mxu0 %vm257_vm0, %v2095_v5  ;;  %v381_v29 = vrot.slane %v379_v21, 5  ;;  %v348_v31 = vld [vmem:[%s2463_s30 + $0x18] sm:$0xf]  ;;  %v395_v33 = vrot.slane %v393_v24, 5 }
  0x16   : > { %v372_v27 = vrot.slane %v370_v19, 4  ;;  %v375_v28 = vrot.slane %v373_v20, 5  ;;  %v386_v30 = vrot.slane %v384_v22, 4  ;;  %2358 = vmatprep.subr.msk.bf16.mxu1 %vm257_vm0, %v2070_v4  ;;  %v389_v32 = vrot.slane %v387_v23, 5  ;;  %v349_v34 = vld [vmem:[%s2463_s30 + $0x1c] sm:$0x1] }
  0x17   : > { %v398_v35 = vshrl.u32 %v346_v25, 16  ;;  %v401_v36 = vshll.u32 %v346_v25, 16  ;;  %v407_v38 = vshll.u32 %v347_v26, 16  ;;  %v412_v39 = vshrl.u32 %v348_v31, 16  ;;  %v591_v41 = vld [vmem:[%s2463_s30] sm:$0xe] }
  0x18   : > { %v376_v37 = vor.u32 %v375_v28, %v372_v27  ;;  %v415_v40 = vshll.u32 %v348_v31, 16  ;;  %v390_v44 = vor.u32 %v389_v32, %v386_v30  ;;  %v421_v47 = vshll.u32 %v349_v34, 16  ;;  %v592_v48 = vld [vmem:[%s2463_s30 + $0x4] sm:$0x1]  ;;  %v593_v53 = vld [vmem:[%s2463_s30 + $0x8] sm:$0xe] }
  0x19   : > { %v400_v45 = vrot.slane %v398_v35, 4  ;;  %v403_v46 = vrot.slane %v401_v36, 5  ;;  %v409_v50 = vrot.slane %v407_v38, 5  ;;  %v414_v51 = vrot.slane %v412_v39, 4  ;;  %v594_v57 = vld [vmem:[%s2463_s30 + $0xc] sm:$0x1] }
  0x1a   : > { %v377_v49 = vrot.slane %v376_v37, 4  ;;  %v417_v52 = vrot.slane %v415_v40, 5  ;;  %v391_v54 = vrot.slane %v390_v44, 4  ;;  %v423_v56 = vrot.slane %v421_v47, 5  ;;  %v350_v0 = vld [vmem:[%s2463_s30 + $0x20] sm:$0xf] }
  0x1b   : > { %v404_v55 = vor.u32 %v403_v46, %v400_v45  ;;  %v2045_v59 = vrot.slane %v591_v41, 9  ;;  %v636_v62 = vrot.slane %v592_v48, 5  ;;  %v2046_v63 = vrot.slane %v593_v53, 9  ;;  %v351_v1 = vld [vmem:[%s2463_s30 + $0x24] sm:$0x1] }
  0x1c   : > { %v382_v60 = vsel %vm2498_vm6, %v377_v49, %v381_v29  ;;  %v418_v61 = vor.u32 %v417_v52, %v414_v51  ;;  %v396_v2 = vsel %vm2498_vm6, %v391_v54, %v395_v33  ;;  %v640_v4 = vrot.slane %v594_v57, 5  ;;  %v352_v5 = vld [vmem:[%s2463_s30 + $0x28] sm:$0xf]  ;;  %v353_v12 = vld [vmem:[%s2463_s30 + $0x2c] sm:$0x1] }
  0x1d   : > { %v405_v3 = vrot.slane %v404_v55, 4  ;;  %v2037_v7 = vcombine.low %v382_v60, %v396_v2  ;;  %v637_v11 = vsel %vm2507_vm7, %v2045_v59, %v636_v62  ;;  %v426_v13 = vshrl.u32 %v350_v0, 16  ;;  %v595_v14 = vld [vmem:[%s2463_s30 + $0x10] sm:$0xe]  ;;  %v596_v19 = vld [vmem:[%s2463_s30 + $0x14] sm:$0x1] }
  0x1e   : > { %v419_v8 = vrot.slane %v418_v61, 4  ;;  %v641_v16 = vsel %vm2507_vm7, %v2046_v63, %v640_v4  ;;  %v429_v17 = vshll.u32 %v350_v0, 16  ;;  %v435_v18 = vshll.u32 %v351_v1, 16  ;;  %v597_v20 = vld [vmem:[%s2463_s30 + $0x18] sm:$0xe] }
  0x1f   : > { %v410_v15 = vsel %vm2498_vm6, %v405_v3, %v409_v50  ;;  %2274 = vmatprep.mubr.msk.bf16.mxu1 %vm199_vm1, %v2037_v7  ;;  %v2054_v22 = vcombine.low %v637_v11, %v641_v16  ;;  %v428_v23 = vrot.slane %v426_v13, 4  ;;  %v440_v24 = vshrl.u32 %v352_v5, 16  ;;  %v598_v25 = vld [vmem:[%s2463_s30 + $0x1c] sm:$0x1]  ;;  %v354_v26 = vld [vmem:[%s2463_s30 + $0x30] sm:$0xf] }
  0x20   : > { %v424_v21 = vsel %vm2498_vm6, %v419_v8, %v423_v56  ;;  %v431_v28 = vrot.slane %v429_v17, 5  ;;  %v437_v29 = vrot.slane %v435_v18, 5  ;;  %v443_v30 = vshll.u32 %v352_v5, 16  ;;  %v355_v31 = vld [vmem:[%s2463_s30 + $0x34] sm:$0x1] }
  0x21   : > { %v2038_v27 = vcombine.low %v410_v15, %v424_v21  ;;  %2284 = vmatprep.mubr.msk.bf16.mxu0 %vm199_vm1, %v2054_v22  ;;  %v442_v32 = vrot.slane %v440_v24, 4  ;;  %v449_v33 = vshll.u32 %v353_v12, 16  ;;  %v2047_v34 = vrot.slane %v595_v14, 9  ;;  %v356_v36 = vld [vmem:[%s2463_s30 + $0x38] sm:$0xf] }
  0x22   : > { %v644_v35 = vrot.slane %v596_v19, 5  ;;  %v432_v37 = vor.u32 %v431_v28, %v428_v23  ;;  %v445_v38 = vrot.slane %v443_v30, 5  ;;  %v2048_v39 = vrot.slane %v597_v20, 9  ;;  %v357_v41 = vld [vmem:[%s2463_s30 + $0x3c] sm:$0x1] }
  0x23   : > { %2275 = vmatmul.mubr.msk.bf16.vlgmr.msra.gmra.mrb[4].mxu1 %vm199_vm1, %v2038_v27  ;;  %v648_v40 = vrot.slane %v598_v25, 5  ;;  %v599_v44 = vld [vmem:[%s2463_s30 + $0x20] sm:$0xe]  ;;  %v451_v45 = vrot.slane %v449_v33, 5  ;;  %v454_v47 = vshrl.u32 %v354_v26, 16  ;;  %v457_v48 = vshll.u32 %v354_v26, 16 }
  0x24   : > { %2293 = vmatpush3.bf16.msra.mxu1 %v2467_v9  ;;  %v645_v46 = vsel %vm2507_vm7, %v2047_v34, %v644_v35  ;;  %v600_v49 = vld [vmem:[%s2463_s30 + $0x24] sm:$0x1]  ;;  %v433_v50 = vrot.slane %v432_v37, 4  ;;  %v446_v51 = vor.u32 %v445_v38, %v442_v32  ;;  %v463_v53 = vshll.u32 %v355_v31, 16  ;;  %v601_v54 = vld [vmem:[%s2463_s30 + $0x28] sm:$0xe] }
  0x25   : > { %v649_v52 = vsel %vm2507_vm7, %v2048_v39, %v648_v40  ;;  %v602_v55 = vld [vmem:[%s2463_s30 + $0x2c] sm:$0x1]  ;;  %2360 = vmatprep.subr.msk.bf16.mxu1 %vm257_vm0, %v2494_v42  ;;  %v2145_v9 = vld [vmem:[%s2873_s1 + $0x18] sm:$0xf]  ;;  %v456_v57 = vrot.slane %v454_v47, 4  ;;  %v459_v59 = vrot.slane %v457_v48, 5 }
  0x26   : > { %v2055_v56 = vcombine.low %v645_v46, %v649_v52  ;;  %v468_v60 = vshrl.u32 %v356_v36, 16  ;;  %v603_v61 = vld [vmem:[%s2463_s30 + $0x30] sm:$0xe]  ;;  %v438_v62 = vsel %vm2498_vm6, %v433_v50, %v437_v29  ;;  %v447_v63 = vrot.slane %v446_v51, 4  ;;  %v604_v2 = vld [vmem:[%s2463_s30 + $0x34] sm:$0x1] }
  0x27   : > { %v465_v0 = vrot.slane %v463_v53, 5  ;;  %v471_v1 = vshll.u32 %v356_v36, 16  ;;  %v460_v42 = vor.u32 %v459_v59, %v456_v57  ;;  %v477_v4 = vshll.u32 %v357_v41, 16  ;;  %v605_v7 = vld [vmem:[%s2463_s30 + $0x38] sm:$0xe] }
  0x28   : > { %2285 = vmatmul.mubr.msk.bf16.vlgmr.msra.gmra.mrb[4].mxu0 %vm199_vm1, %v2055_v56  ;;  %v470_v3 = vrot.slane %v468_v60, 4  ;;  %v2049_v5 = vrot.slane %v599_v44, 9  ;;  %v452_v8 = vsel %vm2498_vm6, %v447_v63, %v451_v45  ;;  %v652_v12 = vrot.slane %v600_v49, 5  ;;  %v606_v14 = vld [vmem:[%s2463_s30 + $0x3c] sm:$0x1] }
  0x29   : > { %v473_v11 = vrot.slane %v471_v1, 5  ;;  %v2050_v13 = vrot.slane %v601_v54, 9  ;;  %2303 = vmatpush3.bf16.msra.mxu0 %v2470_v10  ;;  %v2039_v15 = vcombine.low %v438_v62, %v452_v8  ;;  %v461_v16 = vrot.slane %v460_v42, 4  ;;  %v2572_v23 = vld [vmem:[%s2873_s1 + $0x1c] sm:$0xf] }
  0x2a   : > { %v479_v17 = vrot.slane %v477_v4, 5  ;;  %v656_v18 = vrot.slane %v602_v55, 5  ;;  %2361 = vmatprep.subr.msk.bf16.mxu0 %vm257_vm0, %v2145_v9  ;;  %v653_v20 = vsel %vm2507_vm7, %v2049_v5, %v652_v12  ;;  %v2051_v21 = vrot.slane %v603_v61, 9  ;;  %v2378_v35 = vld [vmem:[%s2463_s30 + $0x8] ss:$8 sps:$4 sm:$0xff]  }
  0x2b   : > { %v474_v19 = vor.u32 %v473_v11, %v470_v3  ;;  %v660_v22 = vrot.slane %v604_v2, 5  ;;  %2278 = vmatprep.mubr.msk.bf16.mxu1 %vm199_vm1, %v2039_v15  ;;  %v2052_v24 = vrot.slane %v605_v7, 9  ;;  %v664_v25 = vrot.slane %v606_v14, 5  ;;  %v2079_v36 = vld [vmem:[%s2463_s30 + $0x8] sm:$0xf] }
  0x2c   : > { %v657_v10 = vsel %vm2507_vm7, %v2050_v13, %v656_v18  ;;  %v466_v26 = vsel %vm2498_vm6, %v461_v16, %v465_v0  ;;  %v2584_v31 = vsel %vm257_vm0, %v2145_v9, 0  ;;  %v2588_v32 = vsel %vm257_vm0, %v2572_v23, 0  ;;  %v2080_v38 = vld [vmem:[%s2463_s30 + $0xc] sm:$0x1]  ;;  %v2081_v39 = vld [vmem:[%s2463_s30 + $0x10] sm:$0xf] }
  0x2d   : > { %v475_v27 = vrot.slane %v474_v19, 4  ;;  %v2056_v28 = vcombine.low %v653_v20, %v657_v10  ;;  %v661_v29 = vsel %vm2507_vm7, %v2051_v21, %v660_v22  ;;  %v665_v30 = vsel %vm2507_vm7, %v2052_v24, %v664_v25  ;;  %v2082_v40 = vld [vmem:[%s2463_s30 + $0x14] sm:$0x1]  ;;  %v2083_v47 = vld [vmem:[%s2463_s30 + $0x18] sm:$0xf] }
  0x2e   : > { %v2057_v34 = vcombine.low %v661_v29, %v665_v30  ;;  %v936_v41 = vshrl.u32 %v2079_v36, 16  ;;  %v939_v44 = vshll.u32 %v2079_v36, 16  ;;  %v945_v45 = vshll.u32 %v2080_v38, 16  ;;  %v2084_v50 = vld [vmem:[%s2463_s30 + $0x1c] sm:$0x1] }
  0x2f   : > { %v480_v33 = vsel %vm2498_vm6, %v475_v27, %v479_v17  ;;  %2288 = vmatprep.mubr.msk.bf16.mxu0 %vm199_vm1, %v2056_v28  ;;  %v950_v46 = vshrl.u32 %v2081_v39, 16  ;;  %v953_v48 = vshll.u32 %v2081_v39, 16  ;;  %v959_v49 = vshll.u32 %v2082_v40, 16  ;;  %v2085_v51 = vld [vmem:[%s2463_s30 + $0x20] sm:$0xf] }
  0x30   : > { %v2040_v37 = vcombine.low %v466_v26, %v480_v33  ;;  %2289 = vmatmul.mubr.msk.bf16.gmra.mrb[8].mxu0 %vm199_vm1, %v2057_v34  ;;  %v938_v52 = vrot.slane %v936_v41, 4  ;;  %v941_v53 = vrot.slane %v939_v44, 5  ;;  %v947_v54 = vrot.slane %v945_v45, 5  ;;  %v2086_v9 = vld [vmem:[%s2463_s30 + $0x24] sm:$0x1] }
  0x31   : > { %v952_v55 = vrot.slane %v950_v46, 4  ;;  %v2379_v56 = vld [vmem:[%s2463_s30 + $0x18] ss:$8 sps:$4 sm:$0xff]   ;;  %v955_v57 = vrot.slane %v953_v48, 5  ;;  %v961_v59 = vrot.slane %v959_v49, 5  ;;  %v964_v60 = vshrl.u32 %v2083_v47, 16 }
  0x32   : > { %2279 = vmatmul.mubr.msk.bf16.gmra.mrb[8].mxu1 %vm199_vm1, %v2040_v37  ;;  %v967_v61 = vshll.u32 %v2083_v47, 16  ;;  %v2380_v62 = vld [vmem:[%s2463_s30 + $0x28] ss:$8 sps:$4 sm:$0xff]   ;;  %v942_v63 = vor.u32 %v941_v53, %v938_v52  ;;  %v973_v0 = vshll.u32 %v2084_v50, 16  ;;  %v978_v1 = vshrl.u32 %v2085_v51, 16 }
  0x33   : > { %2294 = vmatprep.mubr.msk.bf16.mxu1 %vm199_vm1, %v2378_v35  ;;  %v981_v2 = vshll.u32 %v2085_v51, 16  ;;  %v2087_v42 = vld [vmem:[%s2463_s30 + $0x28] sm:$0xf]  ;;  %v956_v3 = vor.u32 %v955_v57, %v952_v55  ;;  %v966_v4 = vrot.slane %v964_v60, 4  ;;  %v987_v7 = vshll.u32 %v2086_v9, 16 }
  0x34   : > { %v969_v5 = vrot.slane %v967_v61, 5  ;;  %v2088_v8 = vld [vmem:[%s2463_s30 + $0x2c] sm:$0x1]  ;;  %v943_v11 = vrot.slane %v942_v63, 4  ;;  %v975_v12 = vrot.slane %v973_v0, 5  ;;  %v980_v13 = vrot.slane %v978_v1, 4 }
  0x35   : > { %v983_v14 = vrot.slane %v981_v2, 5  ;;  %v2089_v15 = vld [vmem:[%s2463_s30 + $0x30] sm:$0xf]  ;;  %v957_v16 = vrot.slane %v956_v3, 4  ;;  %v989_v18 = vrot.slane %v987_v7, 5  ;;  %v992_v19 = vshrl.u32 %v2087_v42, 16 }
  0x36   : > { %v970_v17 = vor.u32 %v969_v5, %v966_v4  ;;  %v948_v20 = vsel %vm2498_vm6, %v943_v11, %v947_v54  ;;  %v2090_v22 = vld [vmem:[%s2463_s30 + $0x34] sm:$0x1]  ;;  %v995_v10 = vshll.u32 %v2087_v42, 16  ;;  %v1001_v24 = vshll.u32 %v2088_v8, 16  ;;  %v2091_v25 = vld [vmem:[%s2463_s30 + $0x38] sm:$0xf] }
  0x37   : > { %v984_v21 = vor.u32 %v983_v14, %v980_v13  ;;  %v962_v26 = vsel %vm2498_vm6, %v957_v16, %v961_v59  ;;  %v994_v28 = vrot.slane %v992_v19, 4  ;;  %v1006_v29 = vshrl.u32 %v2089_v15, 16  ;;  %v2092_v30 = vld [vmem:[%s2463_s30 + $0x3c] sm:$0x1]  ;;  %v2093_v37 = vld [vmem:[%s2463_s30 + $0x40] sm:$0xf] }
  0x38   : > { %v971_v27 = vrot.slane %v970_v17, 4  ;;  %v2096_v33 = vcombine.low %v948_v20, %v962_v26  ;;  %v997_v35 = vrot.slane %v995_v10, 5  ;;  %v1003_v36 = vrot.slane %v1001_v24, 5  ;;  %v2381_v38 = vld [vmem:[%s2463_s30 + $0x38] ss:$8 sps:$4 sm:$0xff]  }
  0x39   : > { %v985_v34 = vrot.slane %v984_v21, 4  ;;  %v1008_v40 = vrot.slane %v1006_v29, 4  ;;  %v1009_v41 = vshll.u32 %v2089_v15, 16  ;;  %v1015_v44 = vshll.u32 %v2090_v22, 16  ;;  %v2094_v45 = vld [vmem:[%s2463_s30 + $0x44] sm:$0x1] }
  0x3a   : > { %2295 = vmatmul.mubr.msk.bf16.vlgmr.msra.gmra.mrb[12].mxu1 %vm199_vm1, %v2379_v56  ;;  %v976_v39 = vsel %vm2498_vm6, %v971_v27, %v975_v12  ;;  %2304 = vmatprep.mubr.msk.bf16.mxu0 %vm199_vm1, %v2096_v33  ;;  %v998_v46 = vor.u32 %v997_v35, %v994_v28  ;;  %v1020_v47 = vshrl.u32 %v2091_v25, 16  ;;  %v1023_v48 = vshll.u32 %v2091_v25, 16  ;;  %v2104_v49 = vld [vmem:[%s2463_s30 + $0x8] sm:$0xe]  ;;  %v2105_v50 = vld [vmem:[%s2463_s30 + $0xc] sm:$0x1] }
  0x3b   : > { %2298 = vmatprep.mubr.msk.bf16.mxu1 %vm199_vm1, %v2380_v62  ;;  %2313 = vmatpush3.bf16.msra.mxu1 %v2520_v6  ;;  %v990_v6 = vsel %vm2498_vm6, %v985_v34, %v989_v18  ;;  %v2635_v51 = vld [vmem:[%s2873_s1 + $0x20] sm:$0xf]  ;;  %v1011_v53 = vrot.slane %v1009_v41, 5  ;;  %v1029_v54 = vshll.u32 %v2092_v30, 16  ;;  %v2106_v55 = vld [vmem:[%s2463_s30 + $0x10] sm:$0xe] }
  0x3c   : > { %2362 = vmatprep.subr.msk.bf16.mxu1 %vm257_vm0, %v2572_v23  ;;  %v2097_v52 = vcombine.low %v976_v39, %v990_v6  ;;  %v1017_v23 = vrot.slane %v1015_v44, 5  ;;  %v2107_v9 = vld [vmem:[%s2463_s30 + $0x14] sm:$0x1]  ;;  %v999_v56 = vrot.slane %v998_v46, 4  ;;  %v1022_v57 = vrot.slane %v1020_v47, 4 }
  0x3d   : > { %v1025_v59 = vrot.slane %v1023_v48, 5  ;;  %v1034_v60 = vshrl.u32 %v2093_v37, 16  ;;  %v2108_v61 = vld [vmem:[%s2463_s30 + $0x18] sm:$0xe]  ;;  %v1012_v62 = vor.u32 %v1011_v53, %v1008_v40  ;;  %v1031_v63 = vrot.slane %v1029_v54, 5 }
  0x3e   : > { %2305 = vmatmul.mubr.msk.bf16.vlgmr.msra.gmra.mrb[12].mxu0 %vm199_vm1, %v2097_v52  ;;  %v1037_v0 = vshll.u32 %v2093_v37, 16  ;;  %v1043_v1 = vshll.u32 %v2094_v45, 16  ;;  %v2109_v2 = vld [vmem:[%s2463_s30 + $0x1c] sm:$0x1]  ;;  %v1004_v42 = vsel %vm2498_vm6, %v999_v56, %v1003_v36  ;;  %v2120_v5 = vrot.slane %v2104_v49, 9 }
  0x3f   : > { %2323 = vmatpush3.bf16.msra.mxu0 %v2584_v31  ;;  %v1026_v3 = vor.u32 %v1025_v59, %v1022_v57  ;;  %v1036_v4 = vrot.slane %v1034_v60, 4  ;;  %v2110_v7 = vld [vmem:[%s2463_s30 + $0x20] sm:$0xe]  ;;  %v2111_v8 = vld [vmem:[%s2463_s30 + $0x24] sm:$0x1]  ;;  %v1013_v11 = vrot.slane %v1012_v62, 4 }
  0x40   : > { %v1039_v12 = vrot.slane %v1037_v0, 5  ;;  %v1045_v13 = vrot.slane %v1043_v1, 5  ;;  %v1199_v14 = vrot.slane %v2105_v50, 5  ;;  %v2112_v15 = vld [vmem:[%s2463_s30 + $0x28] sm:$0xe]  ;;  %2363 = vmatprep.subr.msk.bf16.mxu0 %vm257_vm0, %v2635_v51  ;;  %v2121_v17 = vrot.slane %v2106_v55, 9 }
  0x41   : > { %v2113_v16 = vld [vmem:[%s2463_s30 + $0x2c] sm:$0x1]  ;;  %v1027_v31 = vrot.slane %v1026_v3, 4  ;;  %v1203_v18 = vrot.slane %v2107_v9, 5  ;;  %v2122_v19 = vrot.slane %v2108_v61, 9  ;;  %v1018_v21 = vsel %vm2498_vm6, %v1013_v11, %v1017_v23 }
  0x42   : > { %2299 = vmatmul.mubr.msk.bf16.gmra.mrb[16].mxu1 %vm199_vm1, %v2381_v38  ;;  %v2114_v20 = vld [vmem:[%s2463_s30 + $0x30] sm:$0xe]  ;;  %v1040_v22 = vor.u32 %v1039_v12, %v1036_v4  ;;  %v1200_v10 = vsel %vm2507_vm7, %v2120_v5, %v1199_v14  ;;  %v1207_v24 = vrot.slane %v2109_v2, 5  ;;  %v2115_v25 = vld [vmem:[%s2463_s30 + $0x34] sm:$0x1]  ;;  %v2098_v27 = vcombine.low %v1004_v42, %v1018_v21 }
  0x43   : > { %v2116_v26 = vld [vmem:[%s2463_s30 + $0x38] sm:$0xe]  ;;  %v1032_v28 = vsel %vm2498_vm6, %v1027_v31, %v1031_v63  ;;  %v1204_v29 = vsel %vm2507_vm7, %v2121_v17, %v1203_v18  ;;  %v2123_v30 = vrot.slane %v2110_v7, 9  ;;  %v2117_v33 = vld [vmem:[%s2463_s30 + $0x3c] sm:$0x1]  ;;  %v1211_v38 = vrot.slane %v2111_v8, 5 }
  0x44   : > { %v2118_v34 = vld [vmem:[%s2463_s30 + $0x40] sm:$0xe]  ;;  %v1041_v35 = vrot.slane %v1040_v22, 4  ;;  %v2129_v36 = vcombine.low %v1200_v10, %v1204_v29  ;;  %v1208_v37 = vsel %vm2507_vm7, %v2122_v19, %v1207_v24  ;;  %v2119_v39 = vld [vmem:[%s2463_s30 + $0x44] sm:$0x1]  ;;  %2308 = vmatprep.mubr.msk.bf16.mxu0 %vm199_vm1, %v2098_v27  ;;  %v2124_v40 = vrot.slane %v2112_v15, 9 }
  0x45   : > { %v1215_v41 = vrot.slane %v2113_v16, 5  ;;  %v2125_v44 = vrot.slane %v2114_v20, 9  ;;  %v1219_v45 = vrot.slane %v2115_v25, 5  ;;  %v1212_v46 = vsel %vm2507_vm7, %v2123_v30, %v1211_v38  ;;  %v2382_v23 = vld [vmem:[%s2463_s30 + $0x10] ss:$8 sps:$4 sm:$0xff]  }
  0x46   : > { %v1046_v6 = vsel %vm2498_vm6, %v1041_v35, %v1045_v13  ;;  %2314 = vmatprep.mubr.msk.bf16.mxu1 %vm199_vm1, %v2129_v36  ;;  %v2126_v47 = vrot.slane %v2116_v26, 9  ;;  %v1223_v48 = vrot.slane %v2117_v33, 5  ;;  %v2130_v50 = vcombine.low %v1208_v37, %v1212_v46  ;;  %v2154_v59 = vld [vmem:[%s2463_s30 + $0x10] sm:$0xf]  ;;  %v2155_v60 = vld [vmem:[%s2463_s30 + $0x14] sm:$0x1] }
  0x47   : > { %v2099_v49 = vcombine.low %v1032_v28, %v1046_v6  ;;  %v1216_v52 = vsel %vm2507_vm7, %v2124_v40, %v1215_v41  ;;  %v1220_v53 = vsel %vm2507_vm7, %v2125_v44, %v1219_v45  ;;  %v2127_v55 = vrot.slane %v2118_v34, 9  ;;  %v2156_v61 = vld [vmem:[%s2463_s30 + $0x18] sm:$0xf]  ;;  %v2383_v62 = vld [vmem:[%s2463_s30 + $0x20] ss:$8 sps:$4 sm:$0xff]  }
  0x48   : > { %v2131_v54 = vcombine.low %v1216_v52, %v1220_v53  ;;  %v1227_v9 = vrot.slane %v2119_v39, 5  ;;  %v1224_v56 = vsel %vm2507_vm7, %v2126_v47, %v1223_v48  ;;  %v1819_v63 = vsel %vm257_vm0, %v2635_v51, 0  ;;  %v2157_v0 = vld [vmem:[%s2463_s30 + $0x1c] sm:$0x1]  ;;  %v2384_v3 = vld [vmem:[%s2463_s30 + $0x30] ss:$8 sps:$4 sm:$0xff]  }
  0x49   : > { %2309 = vmatmul.mubr.msk.bf16.gmra.mrb[16].mxu0 %vm199_vm1, %v2099_v49  ;;  %v1499_v1 = vshrl.u32 %v2154_v59, 16  ;;  %v1502_v2 = vshll.u32 %v2154_v59, 16  ;;  %v1508_v42 = vshll.u32 %v2155_v60, 16  ;;  %v1513_v4 = vshrl.u32 %v2156_v61, 16  ;;  %v2158_v8 = vld [vmem:[%s2463_s30 + $0x20] sm:$0xf] }
  0x4a   : > { %2315 = vmatmul.mubr.msk.bf16.vlgmr.msra.gmra.mrb[20].mxu1 %vm199_vm1, %v2130_v50  ;;  %v1228_v57 = vsel %vm2507_vm7, %v2127_v55, %v1227_v9  ;;  %2324 = vmatprep.mubr.msk.bf16.mxu0 %vm199_vm1, %v2382_v23  ;;  %v1516_v5 = vshll.u32 %v2156_v61, 16  ;;  %v1522_v7 = vshll.u32 %v2157_v0, 16  ;;  %v2159_v14 = vld [vmem:[%s2463_s30 + $0x24] sm:$0x1]  ;;  %v1527_v15 = vshrl.u32 %v2158_v8, 16 }
  0x4b   : > { %2318 = vmatprep.mubr.msk.bf16.mxu1 %vm199_vm1, %v2131_v54  ;;  %2333 = vmatpush3.bf16.msra.mxu1 %v2588_v32  ;;  %v2132_v32 = vcombine.low %v1224_v56, %v1228_v57  ;;  %v1501_v11 = vrot.slane %v1499_v1, 4  ;;  %v1504_v12 = vrot.slane %v1502_v2, 5  ;;  %v1510_v13 = vrot.slane %v1508_v42, 5  ;;  %v2160_v17 = vld [vmem:[%s2463_s30 + $0x28] sm:$0xf] }
  0x4c   : > { %v1515_v16 = vrot.slane %v1513_v4, 4  ;;  %v1518_v51 = vrot.slane %v1516_v5, 5  ;;  %v1524_v31 = vrot.slane %v1522_v7, 5  ;;  %v1530_v18 = vshll.u32 %v2158_v8, 16  ;;  %v2161_v20 = vld [vmem:[%s2463_s30 + $0x2c] sm:$0x1] }
  0x4d   : > { %v1505_v19 = vor.u32 %v1504_v12, %v1501_v11  ;;  %v1529_v21 = vrot.slane %v1527_v15, 4  ;;  %v1536_v22 = vshll.u32 %v2159_v14, 16  ;;  %v1541_v10 = vshrl.u32 %v2160_v17, 16  ;;  %v2162_v28 = vld [vmem:[%s2463_s30 + $0x30] sm:$0xf] }
  0x4e   : > { %v1519_v24 = vor.u32 %v1518_v51, %v1515_v16  ;;  %v1532_v25 = vrot.slane %v1530_v18, 5  ;;  %v1544_v26 = vshll.u32 %v2160_v17, 16  ;;  %v1550_v27 = vshll.u32 %v2161_v20, 16  ;;  %v2163_v34 = vld [vmem:[%s2463_s30 + $0x34] sm:$0x1] }
  0x4f   : > { %v1506_v29 = vrot.slane %v1505_v19, 4  ;;  %v1538_v30 = vrot.slane %v1536_v22, 5  ;;  %v1543_v33 = vrot.slane %v1541_v10, 4  ;;  %v1555_v35 = vshrl.u32 %v2162_v28, 16  ;;  %v2164_v40 = vld [vmem:[%s2463_s30 + $0x38] sm:$0xf] }
  0x50   : > { %v1520_v36 = vrot.slane %v1519_v24, 4  ;;  %v1533_v37 = vor.u32 %v1532_v25, %v1529_v21  ;;  %v1546_v38 = vrot.slane %v1544_v26, 5  ;;  %v1552_v39 = vrot.slane %v1550_v27, 5  ;;  %v2385_v41 = vld [vmem:[%s2463_s30 + $0x40] ss:$8 sps:$4 sm:$0xff]  }
  0x51   : > { %2325 = vmatmul.mubr.msk.bf16.vlgmr.msra.gmra.mrb[20].mxu0 %vm199_vm1, %v2383_v62  ;;  %v1511_v44 = vsel %vm2498_vm6, %v1506_v29, %v1510_v13  ;;  %v2165_v45 = vld [vmem:[%s2463_s30 + $0x3c] sm:$0x1]  ;;  %v1557_v6 = vrot.slane %v1555_v35, 4  ;;  %v1558_v46 = vshll.u32 %v2162_v28, 16  ;;  %v1564_v47 = vshll.u32 %v2163_v34, 16 }
  0x52   : > { %2319 = vmatmul.mubr.msk.bf16.gmra.mrb[24].mxu1 %vm199_vm1, %v2132_v32  ;;  %2328 = vmatprep.mubr.msk.bf16.mxu0 %vm199_vm1, %v2384_v3  ;;  %v1525_v48 = vsel %vm2498_vm6, %v1520_v36, %v1524_v31  ;;  %v1534_v49 = vrot.slane %v1533_v37, 4  ;;  %v1547_v50 = vor.u32 %v1546_v38, %v1543_v33  ;;  %v1569_v52 = vshrl.u32 %v2164_v40, 16  ;;  %v2166_v53 = vld [vmem:[%s2463_s30 + $0x40] sm:$0xf]  ;;  %v2167_v23 = vld [vmem:[%s2463_s30 + $0x44] sm:$0x1] }
  0x53   : > { %2343 = vmatpush3.bf16.msra.mxu0 %v1819_v63  ;;  %v2171_v54 = vcombine.low %v1511_v44, %v1525_v48  ;;  %v1560_v55 = vrot.slane %v1558_v46, 5  ;;  %v1566_v9 = vrot.slane %v1564_v47, 5  ;;  %v1572_v56 = vshll.u32 %v2164_v40, 16  ;;  %v2168_v57 = vld [vmem:[%s2463_s30 + $0x48] sm:$0xf] }
  0x54   : > { %v1539_v59 = vsel %vm2498_vm6, %v1534_v49, %v1538_v30  ;;  %v1548_v60 = vrot.slane %v1547_v50, 4  ;;  %v1571_v61 = vrot.slane %v1569_v52, 4  ;;  %v1578_v62 = vshll.u32 %v2165_v45, 16  ;;  %v2169_v63 = vld [vmem:[%s2463_s30 + $0x4c] sm:$0x1] }
  0x55   : > { %2334 = vmatprep.mubr.msk.bf16.mxu1 %vm199_vm1, %v2171_v54  ;;  %v1561_v0 = vor.u32 %v1560_v55, %v1557_v6  ;;  %v1574_v1 = vrot.slane %v1572_v56, 5  ;;  %v1583_v2 = vshrl.u32 %v2166_v53, 16  ;;  %v1586_v42 = vshll.u32 %v2166_v53, 16  ;;  %v2179_v32 = vld [vmem:[%s2463_s30 + $0x10] sm:$0xe] }
  0x56   : > { %v1553_v3 = vsel %vm2498_vm6, %v1548_v60, %v1552_v39  ;;  %v1580_v4 = vrot.slane %v1578_v62, 5  ;;  %v1592_v5 = vshll.u32 %v2167_v23, 16  ;;  %v1597_v7 = vshrl.u32 %v2168_v57, 16  ;;  %v2180_v8 = vld [vmem:[%s2463_s30 + $0x14] sm:$0x1] }
  0x57   : > { %v2172_v11 = vcombine.low %v1539_v59, %v1553_v3  ;;  %v1562_v12 = vrot.slane %v1561_v0, 4  ;;  %v1575_v13 = vor.u32 %v1574_v1, %v1571_v61  ;;  %v1585_v14 = vrot.slane %v1583_v2, 4  ;;  %v2181_v15 = vld [vmem:[%s2463_s30 + $0x18] sm:$0xe]  ;;  %v2182_v16 = vld [vmem:[%s2463_s30 + $0x1c] sm:$0x1] }
  0x58   : > { %v1588_v51 = vrot.slane %v1586_v42, 5  ;;  %v1594_v31 = vrot.slane %v1592_v5, 5  ;;  %v1599_v17 = vrot.slane %v1597_v7, 4  ;;  %v1600_v18 = vshll.u32 %v2168_v57, 16  ;;  %v2183_v19 = vld [vmem:[%s2463_s30 + $0x20] sm:$0xe] }
  0x59   : > { %2329 = vmatmul.mubr.msk.bf16.gmra.mrb[24].mxu0 %vm199_vm1, %v2385_v41  ;;  %v1567_v20 = vsel %vm2498_vm6, %v1562_v12, %v1566_v9  ;;  %v1576_v21 = vrot.slane %v1575_v13, 4  ;;  %v1606_v22 = vshll.u32 %v2169_v63, 16  ;;  %v2195_v10 = vrot.slane %v2179_v32, 9  ;;  %v2184_v24 = vld [vmem:[%s2463_s30 + $0x24] sm:$0x1]  ;;  %v218_v12 = vld [vmem:[#allocation2 + $0x10] sm:$0xff] }
  0x5a   : > { %2335 = vmatmul.mubr.msk.bf16.vlgmr.msra.gmra.mrb[28].mxu1 %vm199_vm1, %v2172_v11  ;;  %v1589_v25 = vor.u32 %v1588_v51, %v1585_v14  ;;  %v1602_v26 = vrot.slane %v1600_v18, 5  ;;  %v1762_v27 = vrot.slane %v2180_v8, 5  ;;  %v2196_v28 = vrot.slane %v2181_v15, 9  ;;  %v2185_v29 = vld [vmem:[%s2463_s30 + $0x28] sm:$0xe]  ;;  %v222_v13 = vld [vmem:[#allocation2 + $0x30] sm:$0xff] }
  0x5b   : > { %v1581_v30 = vsel %vm2498_vm6, %v1576_v21, %v1580_v4  ;;  %v1608_v33 = vrot.slane %v1606_v22, 5  ;;  %v1766_v34 = vrot.slane %v2182_v16, 5  ;;  %v2186_v35 = vld [vmem:[%s2463_s30 + $0x2c] sm:$0x1]  ;;  %v2197_v36 = vrot.slane %v2183_v19, 9  ;;  %v216_v14 = vld [vmem:[#allocation2] sm:$0xff] }
  0x5c   : > { %v2173_v37 = vcombine.low %v1567_v20, %v1581_v30  ;;  %v1590_v38 = vrot.slane %v1589_v25, 4  ;;  %v1603_v39 = vor.u32 %v1602_v26, %v1599_v17  ;;  %v1763_v40 = vsel %vm2507_vm7, %v2195_v10, %v1762_v27  ;;  %v2187_v41 = vld [vmem:[%s2463_s30 + $0x30] sm:$0xe]  ;;  %v2188_v44 = vld [vmem:[%s2463_s30 + $0x34] sm:$0x1]  ;;  %v220_v16 = vld [vmem:[#allocation2 + $0x20] sm:$0xff] }
  0x5d   : > { %v1767_v45 = vsel %vm2507_vm7, %v2196_v28, %v1766_v34  ;;  %v1770_v6 = vrot.slane %v2184_v24, 5  ;;  %v2198_v46 = vrot.slane %v2185_v29, 9  ;;  %v1774_v47 = vrot.slane %v2186_v35, 5  ;;  %v2189_v48 = vld [vmem:[%s2463_s30 + $0x38] sm:$0xe]  ;;  %v217_v20 = vld [vmem:[#allocation2 + $0x8] sm:$0xff] }
  0x5e   : > { %2338 = vmatprep.mubr.msk.bf16.mxu1 %vm199_vm1, %v2173_v37  ;;  %v1595_v49 = vsel %vm2498_vm6, %v1590_v38, %v1594_v31  ;;  %v1604_v50 = vrot.slane %v1603_v39, 4  ;;  %v2204_v52 = vcombine.low %v1763_v40, %v1767_v45  ;;  %v2190_v53 = vld [vmem:[%s2463_s30 + $0x3c] sm:$0x1]  ;;  %v2199_v23 = vrot.slane %v2187_v41, 9  ;;  %v2191_v54 = vld [vmem:[%s2463_s30 + $0x40] sm:$0xe] }
  0x5f   : > { %v1771_v55 = vsel %vm2507_vm7, %v2197_v36, %v1770_v6  ;;  %v1775_v9 = vsel %vm2507_vm7, %v2198_v46, %v1774_v47  ;;  %v1778_v56 = vrot.slane %v2188_v44, 5  ;;  %v2200_v57 = vrot.slane %v2189_v48, 9  ;;  %v2192_v59 = vld [vmem:[%s2463_s30 + $0x44] sm:$0x1]  ;;  %v2193_v60 = vld [vmem:[%s2463_s30 + $0x48] sm:$0xe] }
  0x60   : > { %v1609_v61 = vsel %vm2498_vm6, %v1604_v50, %v1608_v33  ;;  %2344 = vmatprep.mubr.msk.bf16.mxu0 %vm199_vm1, %v2204_v52  ;;  %v2205_v62 = vcombine.low %v1771_v55, %v1775_v9  ;;  %v1782_v63 = vrot.slane %v2190_v53, 5  ;;  %v2194_v0 = vld [vmem:[%s2463_s30 + $0x4c] sm:$0x1]  ;;  %v2201_v1 = vrot.slane %v2191_v54, 9  ;;  %v219_v51 = vld [vmem:[#allocation2 + $0x18] sm:$0xff] }
  0x61   : > { %v2174_v2 = vcombine.low %v1595_v49, %v1609_v61  ;;  %v1779_v42 = vsel %vm2507_vm7, %v2199_v23, %v1778_v56  ;;  %v1786_v32 = vrot.slane %v2192_v59, 5  ;;  %v2202_v3 = vrot.slane %v2193_v60, 9  ;;  %v223_v19 = vld [vmem:[#allocation2 + $0x38] sm:$0xff]  ;;  %v221_v24 = vld [vmem:[#allocation2 + $0x28] sm:$0xff] }
  0x62   : > { %2345 = vmatmul.mubr.msk.bf16.vlgmr.msra.gmra.mrb[28].mxu0 %vm199_vm1, %v2205_v62  ;;  %v1783_v4 = vsel %vm2507_vm7, %v2200_v57, %v1782_v63  ;;  %v1790_v5 = vrot.slane %v2194_v0, 5 }
  0x63   : > { %2339 = vmatmul.mubr.msk.bf16.gmra.mrb[32].mxu1 %vm199_vm1, %v2174_v2  ;;  %v2206_v43 = vcombine.low %v1779_v42, %v1783_v4  ;;  %v1787_v7 = vsel %vm2507_vm7, %v2201_v1, %v1786_v32 }
  0x64   : > { %v1791_v8 = vsel %vm2507_vm7, %v2202_v3, %v1790_v5 }
  0x65   : > { %2348 = vmatprep.mubr.msk.bf16.mxu0 %vm199_vm1, %v2206_v43  ;;  %v2207_v11 = vcombine.low %v1787_v7, %v1791_v8 }
  0x6a   : > { %2349 = vmatmul.mubr.msk.bf16.gmra.mrb[32].mxu0 %vm199_vm1, %v2207_v11 }
  0xe6   : > { %v2266_v15 = vpop.f32.mrb[0].mxu0 }
  0xe7   : > { %v328_v31 = vadd.f32 %v2266_v15, %v218_v12  ;;  %v2270_v17 = vpop.f32.mrb[0].mxu1  ;;  %v295_v18 = vpop.f32.mrb[1].mxu0 }
  0xe8   : > { %v332_v21 = vadd.f32 %v2270_v17, %v222_v13  ;;  %v326_v22 = vadd.f32 %v295_v18, %v216_v14  ;;  %v311_v58 = vpop.f32.mrb[1].mxu1  ;;  %v2267_v10 = vpop.f32.mrb[2].mxu0 }
  0xe9   : > { %336 = vst.msk [vmem:[#allocation2 + $0x10] sm:$0xff] %vm199_vm1, %v328_v31  ;;  %v330_v25 = vadd.f32 %v311_v58, %v220_v16  ;;  %v329_v26 = vadd.f32 %v2267_v10, %v219_v51  ;;  %v2271_v27 = vpop.f32.mrb[2].mxu1  ;;  %v298_v28 = vpop.f32.mrb[3].mxu0 }
  0xea   : > { %340 = vst.msk [vmem:[#allocation2 + $0x30] sm:$0xff] %vm199_vm1, %v332_v21  ;;  %334 = vst.msk [vmem:[#allocation2] sm:$0xff] %vm199_vm1, %v326_v22  ;;  %v333_v29 = vadd.f32 %v2271_v27, %v223_v19  ;;  %v327_v30 = vadd.f32 %v298_v28, %v217_v20  ;;  %v314_v33 = vpop.f32.mrb[3].mxu1 }
  0xeb   : > { %338 = vst.msk [vmem:[#allocation2 + $0x20] sm:$0xff] %vm199_vm1, %v330_v25  ;;  %337 = vst.msk [vmem:[#allocation2 + $0x18] sm:$0xff] %vm199_vm1, %v329_v26  ;;  %v331_v34 = vadd.f32 %v314_v33, %v221_v24 }
  0xec   : > { %341 = vst.msk [vmem:[#allocation2 + $0x38] sm:$0xff] %vm199_vm1, %v333_v29  ;;  %335 = vst.msk [vmem:[#allocation2 + $0x8] sm:$0xff] %vm199_vm1, %v327_v30 }
  0xed   : > { %339 = vst.msk [vmem:[#allocation2 + $0x28] sm:$0xff] %vm199_vm1, %v331_v34 }
  0xf0   : > { %v360_v35 = vld [vmem:[#allocation2 + $0x10] sm:$0xff] }
  0xf1   : > { %v358_v36 = vld [vmem:[#allocation2] sm:$0xff]  ;;  %v364_v61 = vld [vmem:[#allocation2 + $0x30] sm:$0xff] }
  0xf2   : > { %v361_v38 = vld [vmem:[#allocation2 + $0x18] sm:$0xff]  ;;  %v362_v1 = vld [vmem:[#allocation2 + $0x20] sm:$0xff] }
  0xf3   : > { %v359_v41 = vld [vmem:[#allocation2 + $0x8] sm:$0xff]  ;;  %v365_v3 = vld [vmem:[#allocation2 + $0x38] sm:$0xff] }
  0xf4   : > { %v363_v7 = vld [vmem:[#allocation2 + $0x28] sm:$0xff] }
  0xf6   : > { %v2276_v37 = vpop.f32.mrb[4].mxu1 }
  0xf7   : > { %v577_v39 = vadd.f32 %v2276_v37, %v360_v35  ;;  %v544_v40 = vpop.f32.mrb[5].mxu1 }
  0xf8   : > { %v575_v44 = vadd.f32 %v544_v40, %v358_v36  ;;  %v2277_v45 = vpop.f32.mrb[6].mxu1 }
  0xf9   : > { %585 = vst.msk [vmem:[#allocation2 + $0x10] sm:$0xff] %vm199_vm1, %v577_v39  ;;  %v578_v6 = vadd.f32 %v2277_v45, %v361_v38  ;;  %v547_v46 = vpop.f32.mrb[7].mxu1 }
  0xfa   : > { %583 = vst.msk [vmem:[#allocation2] sm:$0xff] %vm199_vm1, %v575_v44  ;;  %v576_v47 = vadd.f32 %v547_v46, %v359_v41 }
  0xfb   : > { %586 = vst.msk [vmem:[#allocation2 + $0x18] sm:$0xff] %vm199_vm1, %v578_v6  ;;  %v2286_v48 = vpop.f32.mrb[4].mxu0 }
  0xfc   : > { %584 = vst.msk [vmem:[#allocation2 + $0x8] sm:$0xff] %vm199_vm1, %v576_v47  ;;  %v729_v49 = vpop.f32.mrb[5].mxu0 }
  0xfd   : > { %v2287_v50 = vpop.f32.mrb[6].mxu0 }
  0xfe   : > { %v732_v52 = vpop.f32.mrb[7].mxu0 }
 0x100   : > { %v609_v53 = vld [vmem:[#allocation2 + $0x10] sm:$0xff] }
 0x101   : > { %v762_v23 = vadd.f32 %v2286_v48, %v609_v53  ;;  %v607_v54 = vld [vmem:[#allocation2] sm:$0xff] }
 0x102   : > { %v760_v55 = vadd.f32 %v729_v49, %v607_v54  ;;  %v610_v9 = vld [vmem:[#allocation2 + $0x18] sm:$0xff] }
 0x103   : > { %770 = vst.msk [vmem:[#allocation2 + $0x10] sm:$0xff] %vm199_vm1, %v762_v23  ;;  %v763_v56 = vadd.f32 %v2287_v50, %v610_v9  ;;  %v608_v57 = vld [vmem:[#allocation2 + $0x8] sm:$0xff]  ;;  %v2290_v60 = vpop.f32.mrb[8].mxu0 }
 0x104   : > { %768 = vst.msk [vmem:[#allocation2] sm:$0xff] %vm199_vm1, %v760_v55  ;;  %v761_v59 = vadd.f32 %v732_v52, %v608_v57  ;;  %v745_v63 = vpop.f32.mrb[9].mxu0 }
 0x105   : > { %v2280_v62 = vpop.f32.mrb[8].mxu1  ;;  %771 = vst.msk [vmem:[#allocation2 + $0x18] sm:$0xff] %vm199_vm1, %v763_v56  ;;  %v2291_v42 = vpop.f32.mrb[10].mxu0 }
 0x106   : > { %v581_v0 = vadd.f32 %v2280_v62, %v364_v61  ;;  %v560_v2 = vpop.f32.mrb[9].mxu1  ;;  %769 = vst.msk [vmem:[#allocation2 + $0x8] sm:$0xff] %vm199_vm1, %v761_v59  ;;  %v748_v5 = vpop.f32.mrb[11].mxu0 }
 0x107   : > { %v579_v32 = vadd.f32 %v560_v2, %v362_v1  ;;  %v2281_v4 = vpop.f32.mrb[10].mxu1 }
 0x108   : > { %589 = vst.msk [vmem:[#allocation2 + $0x30] sm:$0xff] %vm199_vm1, %v581_v0  ;;  %v582_v43 = vadd.f32 %v2281_v4, %v365_v3  ;;  %v563_v8 = vpop.f32.mrb[11].mxu1 }
 0x109   : > { %587 = vst.msk [vmem:[#allocation2 + $0x20] sm:$0xff] %vm199_vm1, %v579_v32  ;;  %v580_v11 = vadd.f32 %v563_v8, %v363_v7 }
 0x10a   : > { %590 = vst.msk [vmem:[#allocation2 + $0x38] sm:$0xff] %vm199_vm1, %v582_v43  ;;  %v787_v12 = vld [vmem:[#allocation2 + $0x10] sm:$0xff] }
 0x10b   : > { %588 = vst.msk [vmem:[#allocation2 + $0x28] sm:$0xff] %vm199_vm1, %v580_v11  ;;  %v785_v13 = vld [vmem:[#allocation2] sm:$0xff] }
 0x10c   : > { %v788_v15 = vld [vmem:[#allocation2 + $0x18] sm:$0xff] }
 0x10d   : > { %v2296_v14 = vpop.f32.mrb[12].mxu1  ;;  %v786_v31 = vld [vmem:[#allocation2 + $0x8] sm:$0xff] }
 0x10e   : > { %v897_v16 = vadd.f32 %v2296_v14, %v787_v12  ;;  %v864_v51 = vpop.f32.mrb[13].mxu1 }
 0x10f   : > { %v613_v17 = vld [vmem:[#allocation2 + $0x30] sm:$0xff]  ;;  %v895_v18 = vadd.f32 %v864_v51, %v785_v13  ;;  %v2297_v19 = vpop.f32.mrb[14].mxu1 }
 0x110   : > { %v766_v20 = vadd.f32 %v2290_v60, %v613_v17  ;;  %v611_v21 = vld [vmem:[#allocation2 + $0x20] sm:$0xff]  ;;  %905 = vst.msk [vmem:[#allocation2 + $0x10] sm:$0xff] %vm199_vm1, %v897_v16  ;;  %v898_v22 = vadd.f32 %v2297_v19, %v788_v15  ;;  %v867_v58 = vpop.f32.mrb[15].mxu1 }
 0x111   : > { %v764_v10 = vadd.f32 %v745_v63, %v611_v21  ;;  %v614_v24 = vld [vmem:[#allocation2 + $0x38] sm:$0xff]  ;;  %903 = vst.msk [vmem:[#allocation2] sm:$0xff] %vm199_vm1, %v895_v18  ;;  %v896_v25 = vadd.f32 %v867_v58, %v786_v31  ;;  %v2306_v29 = vpop.f32.mrb[12].mxu0 }
 0x112   : > { %774 = vst.msk [vmem:[#allocation2 + $0x30] sm:$0xff] %vm199_vm1, %v766_v20  ;;  %v767_v26 = vadd.f32 %v2291_v42, %v614_v24  ;;  %v612_v27 = vld [vmem:[#allocation2 + $0x28] sm:$0xff]  ;;  %906 = vst.msk [vmem:[#allocation2 + $0x18] sm:$0xff] %vm199_vm1, %v898_v22  ;;  %v1110_v30 = vpop.f32.mrb[13].mxu0 }
 0x113   : > { %772 = vst.msk [vmem:[#allocation2 + $0x20] sm:$0xff] %vm199_vm1, %v764_v10  ;;  %v765_v28 = vadd.f32 %v748_v5, %v612_v27  ;;  %904 = vst.msk [vmem:[#allocation2 + $0x8] sm:$0xff] %vm199_vm1, %v896_v25  ;;  %v2307_v34 = vpop.f32.mrb[14].mxu0 }
 0x114   : > { %775 = vst.msk [vmem:[#allocation2 + $0x38] sm:$0xff] %vm199_vm1, %v767_v26  ;;  %v1113_v36 = vpop.f32.mrb[15].mxu0 }
 0x115   : > { %773 = vst.msk [vmem:[#allocation2 + $0x28] sm:$0xff] %vm199_vm1, %v765_v28  ;;  %v2300_v33 = vpop.f32.mrb[16].mxu1 }
 0x116   : > { %v880_v35 = vpop.f32.mrb[17].mxu1 }
 0x117   : > { %v2301_v37 = vpop.f32.mrb[18].mxu1  ;;  %v929_v38 = vld [vmem:[#allocation2 + $0x10] sm:$0xff] }
 0x118   : > { %v1143_v39 = vadd.f32 %v2306_v29, %v929_v38  ;;  %v883_v40 = vpop.f32.mrb[19].mxu1  ;;  %v927_v41 = vld [vmem:[#allocation2] sm:$0xff] }
 0x119   : > { %v791_v44 = vld [vmem:[#allocation2 + $0x30] sm:$0xff]  ;;  %v1141_v45 = vadd.f32 %v1110_v30, %v927_v41  ;;  %v930_v6 = vld [vmem:[#allocation2 + $0x18] sm:$0xff] }
 0x11a   : > { %v901_v46 = vadd.f32 %v2300_v33, %v791_v44  ;;  %v789_v47 = vld [vmem:[#allocation2 + $0x20] sm:$0xff]  ;;  %1151 = vst.msk [vmem:[#allocation2 + $0x10] sm:$0xff] %vm199_vm1, %v1143_v39  ;;  %v1144_v48 = vadd.f32 %v2307_v34, %v930_v6  ;;  %v928_v49 = vld [vmem:[#allocation2 + $0x8] sm:$0xff] }
 0x11b   : > { %v899_v50 = vadd.f32 %v880_v35, %v789_v47  ;;  %v792_v52 = vld [vmem:[#allocation2 + $0x38] sm:$0xff]  ;;  %1149 = vst.msk [vmem:[#allocation2] sm:$0xff] %vm199_vm1, %v1141_v45  ;;  %v1142_v53 = vadd.f32 %v1113_v36, %v928_v49 }
 0x11c   : > { %909 = vst.msk [vmem:[#allocation2 + $0x30] sm:$0xff] %vm199_vm1, %v901_v46  ;;  %v902_v23 = vadd.f32 %v2301_v37, %v792_v52  ;;  %v790_v54 = vld [vmem:[#allocation2 + $0x28] sm:$0xff]  ;;  %1152 = vst.msk [vmem:[#allocation2 + $0x18] sm:$0xff] %vm199_vm1, %v1144_v48  ;;  %v2310_v9 = vpop.f32.mrb[16].mxu0 }
 0x11d   : > { %907 = vst.msk [vmem:[#allocation2 + $0x20] sm:$0xff] %vm199_vm1, %v899_v50  ;;  %v900_v55 = vadd.f32 %v883_v40, %v790_v54  ;;  %1150 = vst.msk [vmem:[#allocation2 + $0x8] sm:$0xff] %vm199_vm1, %v1142_v53  ;;  %v2316_v56 = vpop.f32.mrb[20].mxu1  ;;  %v1126_v57 = vpop.f32.mrb[17].mxu0 }
 0x11e   : > { %910 = vst.msk [vmem:[#allocation2 + $0x38] sm:$0xff] %vm199_vm1, %v902_v23  ;;  %v1292_v59 = vpop.f32.mrb[21].mxu1  ;;  %v2311_v60 = vpop.f32.mrb[18].mxu0 }
 0x11f   : > { %908 = vst.msk [vmem:[#allocation2 + $0x28] sm:$0xff] %vm199_vm1, %v900_v55  ;;  %v2317_v61 = vpop.f32.mrb[22].mxu1  ;;  %v1129_v63 = vpop.f32.mrb[19].mxu0 }
 0x120   : > { %v1295_v0 = vpop.f32.mrb[23].mxu1 }
 0x121   : > { %v1175_v62 = vld [vmem:[#allocation2 + $0x10] sm:$0xff] }
 0x122   : > { %v1325_v1 = vadd.f32 %v2316_v56, %v1175_v62  ;;  %v1173_v2 = vld [vmem:[#allocation2] sm:$0xff] }
 0x123   : > { %v933_v42 = vld [vmem:[#allocation2 + $0x30] sm:$0xff]  ;;  %v1323_v32 = vadd.f32 %v1292_v59, %v1173_v2  ;;  %v1176_v3 = vld [vmem:[#allocation2 + $0x18] sm:$0xff] }
 0x124   : > { %v1147_v4 = vadd.f32 %v2310_v9, %v933_v42  ;;  %v931_v5 = vld [vmem:[#allocation2 + $0x20] sm:$0xff]  ;;  %1333 = vst.msk [vmem:[#allocation2 + $0x10] sm:$0xff] %vm199_vm1, %v1325_v1  ;;  %v1326_v43 = vadd.f32 %v2317_v61, %v1176_v3  ;;  %v1174_v7 = vld [vmem:[#allocation2 + $0x8] sm:$0xff]  ;;  %v2326_v16 = vpop.f32.mrb[20].mxu0 }
 0x125   : > { %v1145_v8 = vadd.f32 %v1126_v57, %v931_v5  ;;  %v934_v11 = vld [vmem:[#allocation2 + $0x38] sm:$0xff]  ;;  %1331 = vst.msk [vmem:[#allocation2] sm:$0xff] %vm199_vm1, %v1323_v32  ;;  %v1324_v12 = vadd.f32 %v1295_v0, %v1174_v7  ;;  %v2320_v15 = vpop.f32.mrb[24].mxu1  ;;  %v1427_v17 = vpop.f32.mrb[21].mxu0 }
 0x126   : > { %1155 = vst.msk [vmem:[#allocation2 + $0x30] sm:$0xff] %vm199_vm1, %v1147_v4  ;;  %v1148_v13 = vadd.f32 %v2311_v60, %v934_v11  ;;  %v932_v14 = vld [vmem:[#allocation2 + $0x28] sm:$0xff]  ;;  %1334 = vst.msk [vmem:[#allocation2 + $0x18] sm:$0xff] %vm199_vm1, %v1326_v43  ;;  %v1308_v31 = vpop.f32.mrb[25].mxu1  ;;  %v2327_v19 = vpop.f32.mrb[22].mxu0 }
 0x127   : > { %1153 = vst.msk [vmem:[#allocation2 + $0x20] sm:$0xff] %vm199_vm1, %v1145_v8  ;;  %v1146_v51 = vadd.f32 %v1129_v63, %v932_v14  ;;  %1332 = vst.msk [vmem:[#allocation2 + $0x8] sm:$0xff] %vm199_vm1, %v1324_v12  ;;  %v2321_v18 = vpop.f32.mrb[26].mxu1  ;;  %v1430_v21 = vpop.f32.mrb[23].mxu0 }
 0x128   : > { %1156 = vst.msk [vmem:[#allocation2 + $0x38] sm:$0xff] %vm199_vm1, %v1148_v13  ;;  %v1311_v20 = vpop.f32.mrb[27].mxu1 }
 0x129   : > { %1154 = vst.msk [vmem:[#allocation2 + $0x28] sm:$0xff] %vm199_vm1, %v1146_v51 }
 0x12b   : > { %v1350_v22 = vld [vmem:[#allocation2 + $0x10] sm:$0xff] }
 0x12c   : > { %v1460_v58 = vadd.f32 %v2326_v16, %v1350_v22  ;;  %v1348_v10 = vld [vmem:[#allocation2] sm:$0xff]  ;;  %v2330_v33 = vpop.f32.mrb[24].mxu0 }
 0x12d   : > { %v1179_v24 = vld [vmem:[#allocation2 + $0x30] sm:$0xff]  ;;  %v1458_v25 = vadd.f32 %v1427_v17, %v1348_v10  ;;  %v1351_v26 = vld [vmem:[#allocation2 + $0x18] sm:$0xff]  ;;  %v1443_v37 = vpop.f32.mrb[25].mxu0  ;;  %v2336_v41 = vpop.f32.mrb[28].mxu1 }
 0x12e   : > { %v1329_v27 = vadd.f32 %v2320_v15, %v1179_v24  ;;  %v1177_v28 = vld [vmem:[#allocation2 + $0x20] sm:$0xff]  ;;  %1468 = vst.msk [vmem:[#allocation2 + $0x10] sm:$0xff] %vm199_vm1, %v1460_v58  ;;  %v1461_v29 = vadd.f32 %v2327_v19, %v1351_v26  ;;  %v1349_v30 = vld [vmem:[#allocation2 + $0x8] sm:$0xff]  ;;  %v2331_v40 = vpop.f32.mrb[26].mxu0  ;;  %v1673_v6 = vpop.f32.mrb[29].mxu1 }
 0x12f   : > { %v1327_v34 = vadd.f32 %v1308_v31, %v1177_v28  ;;  %v1180_v35 = vld [vmem:[#allocation2 + $0x38] sm:$0xff]  ;;  %1466 = vst.msk [vmem:[#allocation2] sm:$0xff] %vm199_vm1, %v1458_v25  ;;  %v1459_v36 = vadd.f32 %v1430_v21, %v1349_v30  ;;  %v1446_v45 = vpop.f32.mrb[27].mxu0  ;;  %v2337_v46 = vpop.f32.mrb[30].mxu1  ;;  %v2212_v25 = vld [vmem:[%s2874_s2] ss:$0 sm:$0xff] }
 0x130   : > { %1337 = vst.msk [vmem:[#allocation2 + $0x30] sm:$0xff] %vm199_vm1, %v1329_v27  ;;  %v1330_v38 = vadd.f32 %v2321_v18, %v1180_v35  ;;  %v1178_v39 = vld [vmem:[#allocation2 + $0x28] sm:$0xff]  ;;  %1469 = vst.msk [vmem:[#allocation2 + $0x18] sm:$0xff] %vm199_vm1, %v1461_v29  ;;  %v1676_v47 = vpop.f32.mrb[31].mxu1  ;;  %v2213_v27 = vld [vmem:[%s2875_s3] ss:$0 sm:$0xff] }
 0x131   : > { %1335 = vst.msk [vmem:[#allocation2 + $0x20] sm:$0xff] %vm199_vm1, %v1327_v34  ;;  %v1328_v44 = vadd.f32 %v1311_v20, %v1178_v39  ;;  %1467 = vst.msk [vmem:[#allocation2 + $0x8] sm:$0xff] %vm199_vm1, %v1459_v36 }
 0x132   : > { %1338 = vst.msk [vmem:[#allocation2 + $0x38] sm:$0xff] %vm199_vm1, %v1330_v38 }
 0x133   : > { %1336 = vst.msk [vmem:[#allocation2 + $0x28] sm:$0xff] %vm199_vm1, %v1328_v44 }
 0x135   : > { %v1492_v48 = vld [vmem:[#allocation2 + $0x10] sm:$0xff]  ;;  %v2346_v61 = vpop.f32.mrb[28].mxu0 }
 0x136   : > { %v1706_v49 = vadd.f32 %v2336_v41, %v1492_v48  ;;  %v1490_v50 = vld [vmem:[#allocation2] sm:$0xff]  ;;  %v2340_v0 = vpop.f32.mrb[32].mxu1  ;;  %v1855_v1 = vpop.f32.mrb[29].mxu0 }
 0x137   : > { %v1354_v52 = vld [vmem:[#allocation2 + $0x30] sm:$0xff]  ;;  %v1704_v53 = vadd.f32 %v1673_v6, %v1490_v50  ;;  %v1493_v23 = vld [vmem:[#allocation2 + $0x18] sm:$0xff]  ;;  %v1689_v42 = vpop.f32.mrb[33].mxu1  ;;  %v2347_v32 = vpop.f32.mrb[30].mxu0 }
 0x138   : > { %v1464_v54 = vadd.f32 %v2330_v33, %v1354_v52  ;;  %v1352_v55 = vld [vmem:[#allocation2 + $0x20] sm:$0xff]  ;;  %1714 = vst.msk [vmem:[#allocation2 + $0x10] sm:$0xff] %vm199_vm1, %v1706_v49  ;;  %v1707_v9 = vadd.f32 %v2337_v46, %v1493_v23  ;;  %v1491_v56 = vld [vmem:[#allocation2 + $0x8] sm:$0xff]  ;;  %v2341_v3 = vpop.f32.mrb[34].mxu1  ;;  %v1858_v4 = vpop.f32.mrb[31].mxu0 }
 0x139   : > { %v1462_v57 = vadd.f32 %v1443_v37, %v1352_v55  ;;  %v1355_v59 = vld [vmem:[#allocation2 + $0x38] sm:$0xff]  ;;  %1712 = vst.msk [vmem:[#allocation2] sm:$0xff] %vm199_vm1, %v1704_v53  ;;  %v1705_v60 = vadd.f32 %v1676_v47, %v1491_v56  ;;  %v1692_v5 = vpop.f32.mrb[35].mxu1 }
 0x13a   : > { %1472 = vst.msk [vmem:[#allocation2 + $0x30] sm:$0xff] %vm199_vm1, %v1464_v54  ;;  %v1465_v62 = vadd.f32 %v2331_v40, %v1355_v59  ;;  %v1353_v63 = vld [vmem:[#allocation2 + $0x28] sm:$0xff]  ;;  %1715 = vst.msk [vmem:[#allocation2 + $0x18] sm:$0xff] %vm199_vm1, %v1707_v9 }
 0x13b   : > { %1470 = vst.msk [vmem:[#allocation2 + $0x20] sm:$0xff] %vm199_vm1, %v1462_v57  ;;  %v1463_v2 = vadd.f32 %v1446_v45, %v1353_v63  ;;  %1713 = vst.msk [vmem:[#allocation2 + $0x8] sm:$0xff] %vm199_vm1, %v1705_v60 }
 0x13c   : > { %1473 = vst.msk [vmem:[#allocation2 + $0x38] sm:$0xff] %vm199_vm1, %v1465_v62 }
 0x13d   : > { %1471 = vst.msk [vmem:[#allocation2 + $0x28] sm:$0xff] %vm199_vm1, %v1463_v2  ;;  %v2350_v14 = vpop.f32.mrb[32].mxu0 }
 0x13e   : > { %v1871_v17 = vpop.f32.mrb[33].mxu0 }
 0x13f   : > { %v1738_v43 = vld [vmem:[#allocation2 + $0x10] sm:$0xff]  ;;  %v2351_v21 = vpop.f32.mrb[34].mxu0 }
 0x140   : > { %v1888_v7 = vadd.f32 %v2346_v61, %v1738_v43  ;;  %v1736_v8 = vld [vmem:[#allocation2] sm:$0xff]  ;;  %v1874_v10 = vpop.f32.mrb[35].mxu0 }
 0x141   : > { %v1496_v11 = vld [vmem:[#allocation2 + $0x30] sm:$0xff]  ;;  %v1886_v12 = vadd.f32 %v1855_v1, %v1736_v8  ;;  %v1739_v13 = vld [vmem:[#allocation2 + $0x18] sm:$0xff] }
 0x142   : > { %v1710_v15 = vadd.f32 %v2340_v0, %v1496_v11  ;;  %v1494_v16 = vld [vmem:[#allocation2 + $0x20] sm:$0xff]  ;;  %1896 = vst.msk [vmem:[#allocation2 + $0x10] sm:$0xff] %vm199_vm1, %v1888_v7  ;;  %v1889_v51 = vadd.f32 %v2347_v32, %v1739_v13  ;;  %v1737_v31 = vld [vmem:[#allocation2 + $0x8] sm:$0xff] }
 0x143   : > { %v1708_v18 = vadd.f32 %v1689_v42, %v1494_v16  ;;  %v1497_v19 = vld [vmem:[#allocation2 + $0x38] sm:$0xff]  ;;  %1894 = vst.msk [vmem:[#allocation2] sm:$0xff] %vm199_vm1, %v1886_v12  ;;  %v1887_v20 = vadd.f32 %v1858_v4, %v1737_v31 }
 0x144   : > { %1718 = vst.msk [vmem:[#allocation2 + $0x30] sm:$0xff] %vm199_vm1, %v1710_v15  ;;  %v1711_v22 = vadd.f32 %v2341_v3, %v1497_v19  ;;  %v1495_v58 = vld [vmem:[#allocation2 + $0x28] sm:$0xff]  ;;  %1897 = vst.msk [vmem:[#allocation2 + $0x18] sm:$0xff] %vm199_vm1, %v1889_v51 }
 0x145   : > { %1716 = vst.msk [vmem:[#allocation2 + $0x20] sm:$0xff] %vm199_vm1, %v1708_v18  ;;  %v1709_v24 = vadd.f32 %v1692_v5, %v1495_v58  ;;  %1895 = vst.msk [vmem:[#allocation2 + $0x8] sm:$0xff] %vm199_vm1, %v1887_v20 }
 0x146   : > { %1719 = vst.msk [vmem:[#allocation2 + $0x38] sm:$0xff] %vm199_vm1, %v1711_v22 }
 0x147   : > { %1717 = vst.msk [vmem:[#allocation2 + $0x28] sm:$0xff] %vm199_vm1, %v1709_v24 }
 0x149   : > { %v1904_v26 = vld [vmem:[#allocation2 + $0x10] sm:$0xff] }
 0x14a   : > { %v1919_v28 = vmul.f32 %v2212_v25, %v1904_v26  ;;  %v1902_v29 = vld [vmem:[#allocation2] sm:$0xff] }
 0x14b   : > { %v1917_v30 = vmul.f32 %v2212_v25, %v1902_v29  ;;  %v1905_v33 = vld [vmem:[#allocation2 + $0x18] sm:$0xff]  ;;  %v1742_v34 = vld [vmem:[#allocation2 + $0x30] sm:$0xff] }
 0x14c   : > { %v1934_v35 = vadd.f32 %v2213_v27, %v1919_v28  ;;  %v1920_v36 = vmul.f32 %v2212_v25, %v1905_v33  ;;  %v1903_v37 = vld [vmem:[#allocation2 + $0x8] sm:$0xff]  ;;  %v1892_v38 = vadd.f32 %v2350_v14, %v1742_v34  ;;  %v1740_v39 = vld [vmem:[#allocation2 + $0x20] sm:$0xff] }
 0x14d   : > { %v1932_v40 = vadd.f32 %v2213_v27, %v1917_v30  ;;  %v1918_v41 = vmul.f32 %v2212_v25, %v1903_v37  ;;  %v1890_v44 = vadd.f32 %v1871_v17, %v1740_v39  ;;  %v1743_v45 = vld [vmem:[#allocation2 + $0x38] sm:$0xff] }
 0x14e   : > { %v1942_v6 = vmax.f32 %v1934_v35, 0.0  ;;  %v1935_v46 = vadd.f32 %v2213_v27, %v1920_v36  ;;  %1900 = vst.msk [vmem:[#allocation2 + $0x30] sm:$0xff] %vm199_vm1, %v1892_v38  ;;  %v1893_v47 = vadd.f32 %v2351_v21, %v1743_v45  ;;  %v1741_v48 = vld [vmem:[#allocation2 + $0x28] sm:$0xff] }
 0x14f   : > { %v1940_v49 = vmax.f32 %v1932_v40, 0.0  ;;  %v1933_v50 = vadd.f32 %v2213_v27, %v1918_v41  ;;  %1898 = vst.msk [vmem:[#allocation2 + $0x20] sm:$0xff] %vm199_vm1, %v1890_v44  ;;  %v1891_v52 = vadd.f32 %v1874_v10, %v1741_v48 }
 0x150   : > { %v1950_v53 = vpack.c.bf16 %v1942_v6, %v1942_v6  ;;  %v1943_v23 = vmax.f32 %v1935_v46, 0.0  ;;  %1901 = vst.msk [vmem:[#allocation2 + $0x38] sm:$0xff] %vm199_vm1, %v1893_v47 }
 0x151   : > { %v1948_v54 = vpack.c.bf16 %v1940_v49, %v1940_v49  ;;  %v1941_v55 = vmax.f32 %v1933_v50, 0.0  ;;  %1899 = vst.msk [vmem:[#allocation2 + $0x28] sm:$0xff] %vm199_vm1, %v1891_v52 }
 0x152   : > { %1959 = vst.msk [vmem:[%s2848_s22 + $0x8] sm:$0xf] %vm1956_vm8, %v1950_v53  ;;  %v1951_v9 = vpack.c.bf16 %v1943_v23, %v1943_v23 }
 0x153   : > { %1957 = vst.msk [vmem:[%s2848_s22] sm:$0xf] %vm1956_vm8, %v1948_v54  ;;  %v1949_v56 = vpack.c.bf16 %v1941_v55, %v1941_v55 }
 0x154   : > { %1960 = vst.msk [vmem:[%s2848_s22 + $0xc] sm:$0xf] %vm1956_vm8, %v1951_v9 }
 0x155   : > { %1958 = vst.msk [vmem:[%s2848_s22 + $0x4] sm:$0xf] %vm1956_vm8, %v1949_v56  ;;  %v1908_v57 = vld [vmem:[#allocation2 + $0x30] sm:$0xff] }
 0x156   : > { %v1923_v59 = vmul.f32 %v2212_v25, %v1908_v57  ;;  %v1906_v60 = vld [vmem:[#allocation2 + $0x20] sm:$0xff] }
 0x157   : > { %v1921_v61 = vmul.f32 %v2212_v25, %v1906_v60  ;;  %v1909_v62 = vld [vmem:[#allocation2 + $0x38] sm:$0xff] }
 0x158   : > { %v1938_v63 = vadd.f32 %v2213_v27, %v1923_v59  ;;  %v1924_v0 = vmul.f32 %v2212_v25, %v1909_v62  ;;  %v1907_v1 = vld [vmem:[#allocation2 + $0x28] sm:$0xff] }
 0x159   : > { %v1936_v2 = vadd.f32 %v2213_v27, %v1921_v61  ;;  %v1922_v42 = vmul.f32 %v2212_v25, %v1907_v1 }
 0x15a   : > { %v1946_v32 = vmax.f32 %v1938_v63, 0.0  ;;  %v1939_v3 = vadd.f32 %v2213_v27, %v1924_v0 }
 0x15b   : > { %v1944_v4 = vmax.f32 %v1936_v2, 0.0  ;;  %v1937_v5 = vadd.f32 %v2213_v27, %v1922_v42 }
 0x15c   : > { %v1954_v43 = vpack.c.bf16 %v1946_v32, %v1946_v32  ;;  %v1947_v7 = vmax.f32 %v1939_v3, 0.0 }
 0x15d   : > { %v1952_v8 = vpack.c.bf16 %v1944_v4, %v1944_v4  ;;  %v1945_v11 = vmax.f32 %v1937_v5, 0.0 }
 0x15e   : > { %1963 = vst.msk [vmem:[%s2848_s22 + $0x18] sm:$0xf] %vm1956_vm8, %v1954_v43  ;;  %v1955_v12 = vpack.c.bf16 %v1947_v7, %v1947_v7 }
 0x15f   : > { %1961 = vst.msk [vmem:[%s2848_s22 + $0x10] sm:$0xf] %vm1956_vm8, %v1952_v8  ;;  %v1953_v13 = vpack.c.bf16 %v1945_v11, %v1945_v11 }
 0x160   : > { %1964 = vst.msk [vmem:[%s2848_s22 + $0x1c] sm:$0xf] %vm1956_vm8, %v1955_v12 }
 0x161   : > { %1962 = vst.msk [vmem:[%s2848_s22 + $0x14] sm:$0xf] %vm1956_vm8, %v1953_v13 }
 0x162 PF: > { %s14_s15 = sadd.s32 1, %s2392_s15  }
 0x163   : > { %p11_p4 = scmp.ge.s32.totalorder %s14_s15, 4  }
 0x165   :  { %13 = sbr.rel (!%p11_p4) target bundleno = 1 (0x1), region = 76 }

// kernel: _lambda_.4
= control target key start
LH: loop header
LB: loop body
LE: loop exit
PB: predicated region body
PF: predicated region fallthrough
CT: control target
= control target key end

     0   :  { %s2630_s15 = smov 0   ;;  %s3080_s0 = inlined_call_operand.vmem [shape: bf16[2,2,2,9,9,4], index: 0, kind: input, shape index: {}]   ;;  %s3081_s1 = inlined_call_operand.vmem [shape: bf16[3,3,4,8], index: 1, kind: input, shape index: {}]   ;;  %s3082_s2 = inlined_call_operand.vmem [shape: f32[1,8], index: 2, kind: input, shape index: {}]   ;;  %s3083_s3 = inlined_call_operand.vmem [shape: f32[1,8], index: 3, kind: input, shape index: {}]   ;;  %s3084_s4 = inlined_call_operand.vmem [shape: bf16[2,8,8,8], index: 4, kind: output, shape index: {}]  }
   0x1 LB: > { %s2214_s16 = sadd.s32 4294967295, %s2602_s15   ;;  %p2218_p0 = scmp.ge.s32.totalorder %s2602_s15, 1  ;;  %s2602_s15 = sphi %s2630_s15, %s14_s15  }
   0x2   : > { %p162_p1 = scmp.lt.s32.totalorder %s2602_s15, 3 }
   0x4   : > { %p163_p2 = pnand %p2218_p0, %p162_p1 }
   0x5   : > { %v225_v0 = vld [vmem:[%s3081_s1] sm:$0x3] (!%p163_p2)  ;;  %vm259_vm0 = vcmask (!%p163_p2), 1041408   ;;  %p188_p3 = scmp.lt.s32.totalorder (!%p163_p2), %s2214_s16, 1  ;;  %v2254_v2 = vld [vmem:[%s3081_s1 + $0x2] sm:$0x3] (!%p163_p2) }
   0x6   : > { %166 = sbr.rel (%p163_p2) target bundleno = 375 (0x177), region = 36  ;;  %2564 = vmatprep.subr.msk.bf16.mxu0 (!%p163_p2), %vm259_vm0, %v225_v0  ;;  %2565 = vmatprep.subr.msk.bf16.mxu1 (!%p163_p2), %vm259_vm0, %v225_v0  ;;  %v261_v1 = vsel (!%p163_p2), %vm259_vm0, %v225_v0, 0  ;;  %v2279_v3 = vld [vmem:[%s3081_s1 + $0x4] sm:$0x3] (!%p163_p2)  ;;  %vm246_vm1 = vcmask (!%p163_p2), 31744   ;;  %v511_v6 = vsel (!%p163_p2), %vm259_vm0, %v2254_v2, 0 }
   0x7   : > { %2473 = vmatpush3.bf16.msra.mxu0 (!%p163_p2), %v261_v1  ;;  %2563 = vmatpush3.bf16.msra.mxu1 (!%p163_p2), %v261_v1  ;;  %v2296_v4 = vld [vmem:[%s3081_s1 + $0x6] sm:$0x3] (!%p163_p2)  ;;  %v2321_v5 = vld [vmem:[%s3081_s1 + $0x8] sm:$0x3] (!%p163_p2)  ;;  %v757_v7 = vsel (!%p163_p2), %vm259_vm0, %v2279_v3, 0  ;;  %vm199_vm4 = vcmask (!%p163_p2), 64512  }
   0x8   : > { %2566 = vmatprep.subr.msk.bf16.mxu1 (!%p163_p2), %vm259_vm0, %v2254_v2  ;;  %2567 = vmatprep.subr.msk.bf16.mxu0 (!%p163_p2), %vm259_vm0, %v2279_v3  ;;  %v2664_v8 = vsel (!%p163_p2), %vm259_vm0, %v2296_v4, 0  ;;  %v2669_v9 = vld [vmem:[%s3081_s1 + $0xa] sm:$0x3] (!%p163_p2)  ;;  %v2672_v10 = vsel (!%p163_p2), %vm259_vm0, %v2321_v5, 0  ;;  %v2681_v12 = vld [vmem:[%s3081_s1 + $0xc] sm:$0x3] (!%p163_p2) }
   0x9   : > { %v2676_v11 = vsel (!%p163_p2), %vm259_vm0, %v2669_v9, 0  ;;  %v2686_v13 = vld [vmem:[%s3081_s1 + $0xe] sm:$0x3] (!%p163_p2)  ;;  %vm369_vm2 = vsmask.f32 (!%p163_p2), 3328  ;;  %v2695_v14 = vsel (!%p163_p2), %vm259_vm0, %v2681_v12, 0 }
   0xa   : > { %vm370_vm3 = vsmask.f32 (!%p163_p2), 7440  ;;  %v2699_v15 = vsel (!%p163_p2), %vm259_vm0, %v2686_v13, 0  ;;  %v2604_v17 = vmov (!%p163_p2), 0.0   ;;  %vm2150_vm6 = vcmask (!%p163_p2), 60416  }
   0xb   : > { %202 = vst.msk [vmem:[#allocation2 + $0x10] sm:$0xff] (!%p163_p2), %vm199_vm4, %v2604_v17  ;;  %200 = vst.msk [vmem:[#allocation2] sm:$0xff] (!%p163_p2), %vm199_vm4, %v2604_v17 }
   0xc   : > { %201 = vst.msk [vmem:[#allocation2 + $0x8] sm:$0xff] (!%p163_p2), %vm199_vm4, %v2604_v17  ;;  %203 = vst.msk [vmem:[#allocation2 + $0x18] sm:$0xff] (!%p163_p2), %vm199_vm4, %v2604_v17 }
   0xd   : > { %s3088_s16 = smov (!%p188_p3, %s2214_s16), 1  ;;  %204 = vst.msk [vmem:[#allocation2 + $0x20] sm:$0xff] %vm199_vm4, %v2604_v17  ;;  %205 = vst.msk [vmem:[#allocation2 + $0x28] sm:$0xff] %vm199_vm4, %v2604_v17 }
   0xe   : > { %s2574_s27 = smul.u32 288, %s3088_s16  ;;  %206 = vst.msk [vmem:[#allocation2 + $0x30] sm:$0xff] %vm199_vm4, %v2604_v17  ;;  %207 = vst.msk [vmem:[#allocation2 + $0x38] sm:$0xff] %vm199_vm4, %v2604_v17  ;;  %s2426_s19 = sshll.u32 %s3088_s16, 5 }
   0xf   : > { %vm2730_vm5 = vmor %vm369_vm2, %vm370_vm3  ;;  %s3058_s16 = scalar_lea.vmem %s3084_s4, %s2426_s19 }
  0x10   : > { %s2691_s10 = scalar_lea.vmem %s3080_s0, %s2574_s27 }
  0x11   : > { %v2584_v16 = vld [vmem:[%s2691_s10 + $0xd8] ss:$8 sps:$4 sm:$0xff]   ;;  %v2586_v19 = vld [vmem:[%s2691_s10 + $0xe8] ss:$8 sps:$4 sm:$0xff]   ;;  %v2239_v22 = vld [vmem:[%s2691_s10 + $0x94] sm:$0x1] }
  0x12   : > { %v2585_v18 = vld [vmem:[%s2691_s10 + $0xf8] ss:$8 sps:$4 sm:$0xff]   ;;  %2474 = vmatprep.mubr.msk.bf16.mxu0 %vm246_vm1, %v2584_v16  ;;  %v2587_v20 = vld [vmem:[%s2691_s10 + $0x108] ss:$8 sps:$4 sm:$0xff]   ;;  %v2241_v24 = vld [vmem:[%s2691_s10 + $0x9c] sm:$0x1] }
  0x13   : > { %2478 = vmatprep.mubr.msk.bf16.mxu1 %vm246_vm1, %v2585_v18  ;;  %2475 = vmatmul.mubr.msk.bf16.vlgmr.msra.gmra.mrb[0].mxu0 %vm246_vm1, %v2586_v19  ;;  %v2238_v21 = vld [vmem:[%s2691_s10 + $0x90] sm:$0xf]  ;;  %v2240_v23 = vld [vmem:[%s2691_s10 + $0x98] sm:$0xf]  ;;  %v382_v27 = vshll.u32 %v2239_v22, 16  ;;  %v396_v30 = vshll.u32 %v2241_v24, 16 }
  0x14   : > { %2479 = vmatmul.mubr.msk.bf16.vlgmr.msra.gmra.mrb[0].mxu1 %vm246_vm1, %v2587_v20  ;;  %v373_v25 = vshrl.u32 %v2238_v21, 16  ;;  %v376_v26 = vshll.u32 %v2238_v21, 16  ;;  %v387_v28 = vshrl.u32 %v2240_v23, 16  ;;  %2493 = vmatpush3.bf16.msra.mxu0 %v757_v7  ;;  %v390_v29 = vshll.u32 %v2240_v23, 16  ;;  %v2242_v31 = vld [vmem:[%s2691_s10 + $0xa0] sm:$0xf] }
  0x15   : > { %2483 = vmatpush3.bf16.msra.mxu1 %v511_v6  ;;  %v2243_v32 = vld [vmem:[%s2691_s10 + $0xa4] sm:$0x1]  ;;  %2569 = vmatprep.subr.msk.bf16.mxu0 %vm259_vm0, %v2321_v5  ;;  %v384_v35 = vrot.slane %v382_v27, 5  ;;  %v2244_v37 = vld [vmem:[%s2691_s10 + $0xa8] sm:$0xf]  ;;  %v398_v39 = vrot.slane %v396_v30, 5 }
  0x16   : > { %v375_v33 = vrot.slane %v373_v25, 4  ;;  %v378_v34 = vrot.slane %v376_v26, 5  ;;  %v389_v36 = vrot.slane %v387_v28, 4  ;;  %2568 = vmatprep.subr.msk.bf16.mxu1 %vm259_vm0, %v2296_v4  ;;  %v392_v38 = vrot.slane %v390_v29, 5  ;;  %v2245_v40 = vld [vmem:[%s2691_s10 + $0xac] sm:$0x1] }
  0x17   : > { %v401_v41 = vshrl.u32 %v2242_v31, 16  ;;  %v404_v42 = vshll.u32 %v2242_v31, 16  ;;  %v410_v44 = vshll.u32 %v2243_v32, 16  ;;  %v415_v45 = vshrl.u32 %v2244_v37, 16  ;;  %v2263_v47 = vld [vmem:[%s2691_s10 + $0xd8] sm:$0xf] }
  0x18   : > { %v379_v43 = vor.u32 %v378_v34, %v375_v33  ;;  %v418_v46 = vshll.u32 %v2244_v37, 16  ;;  %v393_v49 = vor.u32 %v392_v38, %v389_v36  ;;  %v424_v52 = vshll.u32 %v2245_v40, 16  ;;  %v2264_v53 = vld [vmem:[%s2691_s10 + $0xdc] sm:$0x1]  ;;  %v2265_v58 = vld [vmem:[%s2691_s10 + $0xe0] sm:$0xf] }
  0x19   : > { %v403_v50 = vrot.slane %v401_v41, 4  ;;  %v406_v51 = vrot.slane %v404_v42, 5  ;;  %v412_v55 = vrot.slane %v410_v44, 5  ;;  %v417_v56 = vrot.slane %v415_v45, 4  ;;  %v2266_v1 = vld [vmem:[%s2691_s10 + $0xe4] sm:$0x1] }
  0x1a   : > { %v380_v54 = vrot.slane %v379_v43, 4  ;;  %v420_v57 = vrot.slane %v418_v46, 5  ;;  %v394_v59 = vrot.slane %v393_v49, 4  ;;  %v426_v61 = vrot.slane %v424_v52, 5  ;;  %v2246_v16 = vld [vmem:[%s2691_s10 + $0xb0] sm:$0xf] }
  0x1b   : > { %v407_v60 = vor.u32 %v406_v51, %v403_v50  ;;  %v619_v62 = vshrl.u32 %v2263_v47, 16  ;;  %v622_v2 = vshll.u32 %v2263_v47, 16  ;;  %v628_v3 = vshll.u32 %v2264_v53, 16  ;;  %v2247_v21 = vld [vmem:[%s2691_s10 + $0xb4] sm:$0x1]  ;;  %v222_v48 = vld [vmem:[#allocation2 + $0x28] sm:$0xff] }
  0x1c   : > { %v385_v63 = vsel %vm2730_vm5, %v380_v54, %v384_v35  ;;  %v421_v0 = vor.u32 %v420_v57, %v417_v56  ;;  %v399_v4 = vsel %vm2730_vm5, %v394_v59, %v398_v39  ;;  %v633_v7 = vshrl.u32 %v2265_v58, 16  ;;  %v2248_v26 = vld [vmem:[%s2691_s10 + $0xb8] sm:$0xf]  ;;  %v2249_v29 = vld [vmem:[%s2691_s10 + $0xbc] sm:$0x1] }
  0x1d   : > { %v408_v5 = vrot.slane %v407_v60, 4  ;;  %v621_v6 = vrot.slane %v619_v62, 4  ;;  %v2255_v17 = vcombine.low %v385_v63, %v399_v4  ;;  %v624_v19 = vrot.slane %v622_v2, 5  ;;  %v2267_v36 = vld [vmem:[%s2691_s10 + $0xe8] sm:$0xf] }
  0x1e   : > { %v422_v18 = vrot.slane %v421_v0, 4  ;;  %v630_v20 = vrot.slane %v628_v3, 5  ;;  %v635_v23 = vrot.slane %v633_v7, 4  ;;  %v636_v24 = vshll.u32 %v2265_v58, 16  ;;  %v2268_v41 = vld [vmem:[%s2691_s10 + $0xec] sm:$0x1] }
  0x1f   : > { %v413_v22 = vsel %vm2730_vm5, %v408_v5, %v412_v55  ;;  %v642_v25 = vshll.u32 %v2266_v1, 16  ;;  %2484 = vmatprep.mubr.msk.bf16.mxu1 %vm246_vm1, %v2255_v17  ;;  %v625_v28 = vor.u32 %v624_v19, %v621_v6  ;;  %v429_v30 = vshrl.u32 %v2246_v16, 16  ;;  %v2269_v46 = vld [vmem:[%s2691_s10 + $0xf0] sm:$0xf]  ;;  %v2270_v55 = vld [vmem:[%s2691_s10 + $0xf4] sm:$0x1] }
  0x20   : > { %v427_v27 = vsel %vm2730_vm5, %v422_v18, %v426_v61  ;;  %v432_v31 = vshll.u32 %v2246_v16, 16  ;;  %v638_v33 = vrot.slane %v636_v24, 5  ;;  %v438_v35 = vshll.u32 %v2247_v21, 16  ;;  %v2250_v60 = vld [vmem:[%s2691_s10 + $0xc0] sm:$0xf] }
  0x21   : > { %v2256_v32 = vcombine.low %v413_v22, %v427_v27  ;;  %v644_v34 = vrot.slane %v642_v25, 5  ;;  %v626_v37 = vrot.slane %v625_v28, 4  ;;  %v431_v38 = vrot.slane %v429_v30, 4  ;;  %v2251_v1 = vld [vmem:[%s2691_s10 + $0xc4] sm:$0x1] }
  0x22   : > { %v434_v39 = vrot.slane %v432_v31, 5  ;;  %v443_v40 = vshrl.u32 %v2248_v26, 16  ;;  %v639_v42 = vor.u32 %v638_v33, %v635_v23  ;;  %v440_v43 = vrot.slane %v438_v35, 5  ;;  %v2252_v2 = vld [vmem:[%s2691_s10 + $0xc8] sm:$0xf] }
  0x23   : > { %2485 = vmatmul.mubr.msk.bf16.vlgmr.msra.gmra.mrb[4].mxu1 %vm246_vm1, %v2256_v32  ;;  %v446_v44 = vshll.u32 %v2248_v26, 16  ;;  %v452_v45 = vshll.u32 %v2249_v29, 16  ;;  %v631_v47 = vsel %vm2730_vm5, %v626_v37, %v630_v20  ;;  %v647_v51 = vshrl.u32 %v2267_v36, 16  ;;  %v2253_v18 = vld [vmem:[%s2691_s10 + $0xcc] sm:$0x1] }
  0x24   : > { %2503 = vmatpush3.bf16.msra.mxu1 %v2664_v8  ;;  %v435_v49 = vor.u32 %v434_v39, %v431_v38  ;;  %v445_v50 = vrot.slane %v443_v40, 4  ;;  %v640_v52 = vrot.slane %v639_v42, 4  ;;  %v650_v56 = vshll.u32 %v2267_v36, 16  ;;  %v2271_v19 = vld [vmem:[%s2691_s10 + $0xf8] sm:$0xf] }
  0x25   : > { %v448_v53 = vrot.slane %v446_v44, 5  ;;  %v454_v54 = vrot.slane %v452_v45, 5  ;;  %2570 = vmatprep.subr.msk.bf16.mxu1 %vm259_vm0, %v2669_v9  ;;  %v649_v58 = vrot.slane %v647_v51, 4  ;;  %v656_v59 = vshll.u32 %v2268_v41, 16  ;;  %v2272_v24 = vld [vmem:[%s2691_s10 + $0xfc] sm:$0x1] }
  0x26   : > { %v436_v57 = vrot.slane %v435_v49, 4  ;;  %v661_v8 = vshrl.u32 %v2269_v46, 16  ;;  %v645_v61 = vsel %vm2730_vm5, %v640_v52, %v644_v34  ;;  %v652_v63 = vrot.slane %v650_v56, 5  ;;  %v2273_v33 = vld [vmem:[%s2691_s10 + $0x100] sm:$0xf] }
  0x27   : > { %v449_v62 = vor.u32 %v448_v53, %v445_v50  ;;  %v664_v0 = vshll.u32 %v2269_v46, 16  ;;  %v2280_v3 = vcombine.low %v631_v47, %v645_v61  ;;  %v658_v4 = vrot.slane %v656_v59, 5  ;;  %v2274_v38 = vld [vmem:[%s2691_s10 + $0x104] sm:$0x1]  ;;  %v2275_v39 = vld [vmem:[%s2691_s10 + $0x108] sm:$0xf] }
  0x28   : > { %v441_v9 = vsel %vm2730_vm5, %v436_v57, %v440_v43  ;;  %v663_v5 = vrot.slane %v661_v8, 4  ;;  %v653_v7 = vor.u32 %v652_v63, %v649_v58  ;;  %v670_v17 = vshll.u32 %v2270_v55, 16  ;;  %v2276_v44 = vld [vmem:[%s2691_s10 + $0x10c] sm:$0x1]  ;;  %v2277_v50 = vld [vmem:[%s2691_s10 + $0x110] sm:$0xf] }
  0x29   : > { %v450_v6 = vrot.slane %v449_v62, 4  ;;  %v666_v16 = vrot.slane %v664_v0, 5  ;;  %2494 = vmatprep.mubr.msk.bf16.mxu0 %vm246_vm1, %v2280_v3  ;;  %v457_v20 = vshrl.u32 %v2250_v60, 16  ;;  %v460_v21 = vshll.u32 %v2250_v60, 16  ;;  %v2278_v61 = vld [vmem:[%s2691_s10 + $0x114] sm:$0x1] }
  0x2a   : > { %v466_v22 = vshll.u32 %v2251_v1, 16  ;;  %v471_v23 = vshrl.u32 %v2252_v2, 16  ;;  %v654_v26 = vrot.slane %v653_v7, 4  ;;  %v672_v28 = vrot.slane %v670_v17, 5 }
  0x2b   : > { %v455_v25 = vsel %vm2730_vm5, %v450_v6, %v454_v54  ;;  %v667_v27 = vor.u32 %v666_v16, %v663_v5  ;;  %v459_v30 = vrot.slane %v457_v20, 4  ;;  %v462_v31 = vrot.slane %v460_v21, 5 }
  0x2c   : > { %v2257_v29 = vcombine.low %v441_v9, %v455_v25  ;;  %v468_v32 = vrot.slane %v466_v22, 5  ;;  %v659_v34 = vsel %vm2730_vm5, %v654_v26, %v658_v4  ;;  %v473_v36 = vrot.slane %v471_v23, 4  ;;  %v2305_v22 = vld [vmem:[%s2691_s10 + $0x8] sm:$0xf]  ;;  %v2306_v23 = vld [vmem:[%s2691_s10 + $0xc] sm:$0x1] }
  0x2d   : > { %v668_v35 = vrot.slane %v667_v27, 4  ;;  %v474_v37 = vshll.u32 %v2252_v2, 16  ;;  %v463_v40 = vor.u32 %v462_v31, %v459_v30  ;;  %v480_v41 = vshll.u32 %v2253_v18, 16  ;;  %v2307_v26 = vld [vmem:[%s2691_s10 + $0x10] sm:$0xf] }
  0x2e   : > { %2488 = vmatprep.mubr.msk.bf16.mxu1 %vm246_vm1, %v2257_v29  ;;  %v675_v42 = vshrl.u32 %v2271_v19, 16  ;;  %v678_v43 = vshll.u32 %v2271_v19, 16  ;;  %v684_v47 = vshll.u32 %v2272_v24, 16  ;;  %v689_v49 = vshrl.u32 %v2273_v33, 16  ;;  %v2308_v30 = vld [vmem:[%s2691_s10 + $0x14] sm:$0x1] }
  0x2f   : > { %v673_v45 = vsel %vm2730_vm5, %v668_v35, %v672_v28  ;;  %v476_v46 = vrot.slane %v474_v37, 5  ;;  %v464_v52 = vrot.slane %v463_v40, 4  ;;  %v482_v53 = vrot.slane %v480_v41, 5  ;;  %v2309_v37 = vld [vmem:[%s2691_s10 + $0x18] sm:$0xf] }
  0x30   : > { %v2281_v51 = vcombine.low %v659_v34, %v673_v45  ;;  %v677_v54 = vrot.slane %v675_v42, 4  ;;  %v680_v56 = vrot.slane %v678_v43, 5  ;;  %v686_v57 = vrot.slane %v684_v47, 5  ;;  %v2310_v42 = vld [vmem:[%s2691_s10 + $0x1c] sm:$0x1] }
  0x31   : > { %v477_v55 = vor.u32 %v476_v46, %v473_v36  ;;  %v691_v58 = vrot.slane %v689_v49, 4  ;;  %v469_v59 = vsel %vm2730_vm5, %v464_v52, %v468_v32  ;;  %v692_v8 = vshll.u32 %v2273_v33, 16  ;;  %v2311_v43 = vld [vmem:[%s2691_s10 + $0x20] sm:$0xf] }
  0x32   : > { %2495 = vmatmul.mubr.msk.bf16.vlgmr.msra.gmra.mrb[4].mxu0 %vm246_vm1, %v2281_v51  ;;  %v698_v60 = vshll.u32 %v2274_v38, 16  ;;  %v703_v62 = vshrl.u32 %v2275_v39, 16  ;;  %v681_v0 = vor.u32 %v680_v56, %v677_v54  ;;  %v706_v1 = vshll.u32 %v2275_v39, 16  ;;  %v2589_v46 = vld [vmem:[%s2691_s10 + $0x60] ss:$8 sps:$4 sm:$0xff]  }
  0x33   : > { %v478_v63 = vrot.slane %v477_v55, 4  ;;  %2513 = vmatpush3.bf16.msra.mxu0 %v2672_v10  ;;  %v712_v2 = vshll.u32 %v2276_v44, 16  ;;  %v694_v3 = vrot.slane %v692_v8, 5  ;;  %v717_v5 = vshrl.u32 %v2277_v50, 16  ;;  %v2588_v10 = vld [vmem:[%s2691_s10 + $0x50] ss:$8 sps:$4 sm:$0xff]  }
  0x34   : > { %v700_v9 = vrot.slane %v698_v60, 5  ;;  %v705_v4 = vrot.slane %v703_v62, 4  ;;  %2571 = vmatprep.subr.msk.bf16.mxu0 %vm259_vm0, %v2681_v12  ;;  %v682_v7 = vrot.slane %v681_v0, 4  ;;  %v708_v16 = vrot.slane %v706_v1, 5  ;;  %v2590_v51 = vld [vmem:[%s2691_s10 + $0x70] ss:$8 sps:$4 sm:$0xff]  }
  0x35   : > { %v483_v6 = vsel %vm2730_vm5, %v478_v63, %v482_v53  ;;  %v714_v17 = vrot.slane %v712_v2, 5  ;;  %v695_v19 = vor.u32 %v694_v3, %v691_v58  ;;  %v719_v20 = vrot.slane %v717_v5, 4  ;;  %v2312_v56 = vld [vmem:[%s2691_s10 + $0x24] sm:$0x1]  ;;  %v2313_v63 = vld [vmem:[%s2691_s10 + $0x28] sm:$0xf] }
  0x36   : > { %v2258_v18 = vcombine.low %v469_v59, %v483_v6  ;;  %v720_v21 = vshll.u32 %v2277_v50, 16  ;;  %v687_v24 = vsel %vm2730_vm5, %v682_v7, %v686_v57  ;;  %v709_v25 = vor.u32 %v708_v16, %v705_v4  ;;  %v2315_v4 = vld [vmem:[%s2691_s10 + $0x30] sm:$0xf] }
  0x37   : > { %v726_v12 = vshll.u32 %v2278_v61, 16  ;;  %v1001_v27 = vshrl.u32 %v2305_v22, 16  ;;  %v696_v28 = vrot.slane %v695_v19, 4  ;;  %v1004_v31 = vshll.u32 %v2305_v22, 16 }
  0x38   : > { %2489 = vmatmul.mubr.msk.bf16.gmra.mrb[8].mxu1 %vm246_vm1, %v2258_v18  ;;  %v722_v29 = vrot.slane %v720_v21, 5  ;;  %v1010_v32 = vshll.u32 %v2306_v23, 16  ;;  %v710_v33 = vrot.slane %v709_v25, 4  ;;  %v1015_v36 = vshrl.u32 %v2307_v26, 16  ;;  %v2316_v18 = vld [vmem:[%s2691_s10 + $0x34] sm:$0x1] }
  0x39   : > { %v728_v34 = vrot.slane %v726_v12, 5  ;;  %2504 = vmatprep.mubr.msk.bf16.mxu1 %vm246_vm1, %v2588_v10  ;;  %v1003_v35 = vrot.slane %v1001_v27, 4  ;;  %v701_v38 = vsel %vm2730_vm5, %v696_v28, %v700_v9  ;;  %v1006_v40 = vrot.slane %v1004_v31, 5  ;;  %v2314_v9 = vld [vmem:[%s2691_s10 + $0x2c] sm:$0x1] }
  0x3a   : > { %v723_v39 = vor.u32 %v722_v29, %v719_v20  ;;  %v1012_v41 = vrot.slane %v1010_v32, 5  ;;  %v2282_v44 = vcombine.low %v687_v24, %v701_v38  ;;  %v715_v45 = vsel %vm2730_vm5, %v710_v33, %v714_v17  ;;  %v2317_v25 = vld [vmem:[%s2691_s10 + $0x38] sm:$0xf]  ;;  %v2318_v29 = vld [vmem:[%s2691_s10 + $0x3c] sm:$0x1] }
  0x3b   : > { %v1017_v47 = vrot.slane %v1015_v36, 4  ;;  %v1018_v49 = vshll.u32 %v2307_v26, 16  ;;  %v1007_v52 = vor.u32 %v1006_v40, %v1003_v35  ;;  %v1024_v53 = vshll.u32 %v2308_v30, 16  ;;  %v2591_v30 = vld [vmem:[%s2691_s10 + $0x80] ss:$8 sps:$4 sm:$0xff]  }
  0x3c   : > { %v724_v50 = vrot.slane %v723_v39, 4  ;;  %v1029_v54 = vshrl.u32 %v2309_v37, 16  ;;  %2498 = vmatprep.mubr.msk.bf16.mxu0 %vm246_vm1, %v2282_v44  ;;  %v1032_v57 = vshll.u32 %v2309_v37, 16  ;;  %v1038_v58 = vshll.u32 %v2310_v42, 16  ;;  %v2320_v39 = vld [vmem:[%s2691_s10 + $0x44] sm:$0x1] }
  0x3d   : > { %v1020_v55 = vrot.slane %v1018_v49, 5  ;;  %v1043_v59 = vshrl.u32 %v2311_v43, 16  ;;  %v1008_v60 = vrot.slane %v1007_v52, 4  ;;  %v1026_v61 = vrot.slane %v1024_v53, 5  ;;  %v2331_v49 = vld [vmem:[%s2691_s10 + $0x54] sm:$0x1] }
  0x3e   : > { %v729_v8 = vsel %vm2730_vm5, %v724_v50, %v728_v34  ;;  %v1031_v62 = vrot.slane %v1029_v54, 4  ;;  %v1034_v2 = vrot.slane %v1032_v57, 5  ;;  %v1040_v3 = vrot.slane %v1038_v58, 5  ;;  %v2319_v34 = vld [vmem:[%s2691_s10 + $0x40] sm:$0xf] }
  0x3f   : > { %v2283_v0 = vcombine.low %v715_v45, %v729_v8  ;;  %v1021_v1 = vor.u32 %v1020_v55, %v1017_v47  ;;  %v1013_v5 = vsel %vm2730_vm5, %v1008_v60, %v1012_v41  ;;  %v1045_v6 = vrot.slane %v1043_v59, 4  ;;  %v2332_v54 = vld [vmem:[%s2691_s10 + $0x58] sm:$0xf]  ;;  %v2847_v59 = vld [vmem:[%s3081_s1 + $0x10] sm:$0x3] }
  0x40   : > { %2505 = vmatmul.mubr.msk.bf16.vlgmr.msra.gmra.mrb[12].mxu1 %vm246_vm1, %v2589_v46  ;;  %v1046_v7 = vshll.u32 %v2311_v43, 16  ;;  %v1052_v16 = vshll.u32 %v2312_v56, 16  ;;  %v1035_v10 = vor.u32 %v1034_v2, %v1031_v62  ;;  %v1057_v19 = vshrl.u32 %v2313_v63, 16  ;;  %v2330_v43 = vld [vmem:[%s2691_s10 + $0x50] sm:$0xf] }
  0x41   : > { %2499 = vmatmul.mubr.msk.bf16.gmra.mrb[8].mxu0 %vm246_vm1, %v2283_v0  ;;  %2508 = vmatprep.mubr.msk.bf16.mxu1 %vm246_vm1, %v2590_v51  ;;  %v1022_v17 = vrot.slane %v1021_v1, 4  ;;  %v1060_v20 = vshll.u32 %v2313_v63, 16  ;;  %v1066_v23 = vshll.u32 %v2314_v9, 16  ;;  %v1071_v24 = vshrl.u32 %v2315_v4, 16  ;;  %v2333_v62 = vld [vmem:[%s2691_s10 + $0x5c] sm:$0x1] }
  0x42   : > { %2523 = vmatpush3.bf16.msra.mxu1 %v2676_v11  ;;  %v1048_v21 = vrot.slane %v1046_v7, 5  ;;  %v1054_v22 = vrot.slane %v1052_v16, 5  ;;  %v1036_v26 = vrot.slane %v1035_v10, 4  ;;  %v1059_v27 = vrot.slane %v1057_v19, 4  ;;  %v2334_v9 = vld [vmem:[%s2691_s10 + $0x60] sm:$0xf] }
  0x43   : > { %v1027_v12 = vsel %vm2730_vm5, %v1022_v17, %v1026_v61  ;;  %v1062_v28 = vrot.slane %v1060_v20, 5  ;;  %2572 = vmatprep.subr.msk.bf16.mxu1 %vm259_vm0, %v2686_v13  ;;  %v1068_v32 = vrot.slane %v1066_v23, 5  ;;  %v1073_v33 = vrot.slane %v1071_v24, 4  ;;  %v2335_v16 = vld [vmem:[%s2691_s10 + $0x64] sm:$0x1] }
  0x44   : > { %v2322_v11 = vcombine.low %v1013_v5, %v1027_v12  ;;  %v1049_v31 = vor.u32 %v1048_v21, %v1045_v6  ;;  %v1041_v35 = vsel %vm2730_vm5, %v1036_v26, %v1040_v3  ;;  %v1074_v37 = vshll.u32 %v2315_v4, 16  ;;  %v2336_v20 = vld [vmem:[%s2691_s10 + $0x68] sm:$0xf]  ;;  %v2337_v12 = vld [vmem:[%s2691_s10 + $0x6c] sm:$0x1] }
  0x45   : > { %v1063_v36 = vor.u32 %v1062_v28, %v1059_v27  ;;  %v1080_v38 = vshll.u32 %v2316_v18, 16  ;;  %v1085_v13 = vshrl.u32 %v2317_v25, 16  ;;  %v1088_v41 = vshll.u32 %v2317_v25, 16  ;;  %v2338_v28 = vld [vmem:[%s2691_s10 + $0x70] sm:$0xf] }
  0x46   : > { %2514 = vmatprep.mubr.msk.bf16.mxu0 %vm246_vm1, %v2322_v11  ;;  %v1050_v40 = vrot.slane %v1049_v31, 4  ;;  %v1094_v42 = vshll.u32 %v2318_v29, 16  ;;  %v1076_v45 = vrot.slane %v1074_v37, 5  ;;  %v1099_v47 = vshrl.u32 %v2319_v34, 16 }
  0x47   : > { %v1064_v44 = vrot.slane %v1063_v36, 4  ;;  %v1082_v46 = vrot.slane %v1080_v38, 5  ;;  %v1087_v51 = vrot.slane %v1085_v13, 4  ;;  %v1090_v52 = vrot.slane %v1088_v41, 5  ;;  %v2592_v41 = vld [vmem:[%s2691_s10 + $0xe0] ss:$8 sps:$4 sm:$0xff]  }
  0x48   : > { %2509 = vmatmul.mubr.msk.bf16.gmra.mrb[16].mxu1 %vm246_vm1, %v2591_v30  ;;  %v1055_v50 = vsel %vm2730_vm5, %v1050_v40, %v1054_v22  ;;  %v1096_v53 = vrot.slane %v1094_v42, 5  ;;  %v1077_v57 = vor.u32 %v1076_v45, %v1073_v33  ;;  %v1101_v58 = vrot.slane %v1099_v47, 4  ;;  %v2340_v33 = vld [vmem:[%s2691_s10 + $0x78] sm:$0xf] }
  0x49   : > { %v2323_v55 = vcombine.low %v1041_v35, %v1055_v50  ;;  %v1069_v56 = vsel %vm2730_vm5, %v1064_v44, %v1068_v32  ;;  %v1091_v8 = vor.u32 %v1090_v52, %v1087_v51  ;;  %v1102_v60 = vshll.u32 %v2319_v34, 16  ;;  %v2339_v32 = vld [vmem:[%s2691_s10 + $0x74] sm:$0x1]  ;;  %v2342_v52 = vld [vmem:[%s2691_s10 + $0x80] sm:$0xf] }
  0x4a   : > { %v1108_v61 = vshll.u32 %v2320_v39, 16  ;;  %v1247_v63 = vshrl.u32 %v2330_v43, 16  ;;  %v1078_v0 = vrot.slane %v1077_v57, 4  ;;  %v1250_v1 = vshll.u32 %v2330_v43, 16 }
  0x4b   : > { %2515 = vmatmul.mubr.msk.bf16.vlgmr.msra.gmra.mrb[12].mxu0 %vm246_vm1, %v2323_v55  ;;  %v1256_v2 = vshll.u32 %v2331_v49, 16  ;;  %v1261_v3 = vshrl.u32 %v2332_v54, 16  ;;  %v1092_v4 = vrot.slane %v1091_v8, 4  ;;  %v1104_v5 = vrot.slane %v1102_v60, 5 }
  0x4c   : > { %2533 = vmatpush3.bf16.msra.mxu0 %v2695_v14  ;;  %v1110_v6 = vrot.slane %v1108_v61, 5  ;;  %v1249_v7 = vrot.slane %v1247_v63, 4  ;;  %v1083_v17 = vsel %vm2730_vm5, %v1078_v0, %v1082_v46  ;;  %v1252_v10 = vrot.slane %v1250_v1, 5  ;;  %v2341_v46 = vld [vmem:[%s2691_s10 + $0x7c] sm:$0x1] }
  0x4d   : > { %v1258_v18 = vrot.slane %v1256_v2, 5  ;;  %v1263_v19 = vrot.slane %v1261_v3, 4  ;;  %2573 = vmatprep.subr.msk.bf16.mxu0 %vm259_vm0, %v2847_v59  ;;  %v2324_v21 = vcombine.low %v1069_v56, %v1083_v17  ;;  %v1097_v14 = vsel %vm2730_vm5, %v1092_v4, %v1096_v53  ;;  %v2343_v61 = vld [vmem:[%s2691_s10 + $0x84] sm:$0x1]  ;;  %v2344_v2 = vld [vmem:[%s2691_s10 + $0x88] sm:$0xf] }
  0x4e   : > { %v1105_v22 = vor.u32 %v1104_v5, %v1101_v58  ;;  %v1264_v23 = vshll.u32 %v2332_v54, 16  ;;  %v1253_v24 = vor.u32 %v1252_v10, %v1249_v7  ;;  %v1270_v25 = vshll.u32 %v2333_v62, 16  ;;  %v2593_v7 = vld [vmem:[%s2691_s10 + $0xf0] ss:$8 sps:$4 sm:$0xff]  }
  0x4f   : > { %v1275_v26 = vshrl.u32 %v2334_v9, 16  ;;  %v1278_v27 = vshll.u32 %v2334_v9, 16  ;;  %2518 = vmatprep.mubr.msk.bf16.mxu0 %vm246_vm1, %v2324_v21  ;;  %v1284_v11 = vshll.u32 %v2335_v16, 16  ;;  %v1289_v31 = vshrl.u32 %v2336_v20, 16 }
  0x50   : > { %v1106_v29 = vrot.slane %v1105_v22, 4  ;;  %v1266_v30 = vrot.slane %v1264_v23, 5  ;;  %v1254_v34 = vrot.slane %v1253_v24, 4  ;;  %v1272_v35 = vrot.slane %v1270_v25, 5  ;;  %v2372_v23 = vld [vmem:[%s2691_s10 + $0x98] sm:$0xf] }
  0x51   : > { %v1277_v36 = vrot.slane %v1275_v26, 4  ;;  %v1280_v37 = vrot.slane %v1278_v27, 5  ;;  %v1286_v40 = vrot.slane %v1284_v11, 5  ;;  %v1291_v13 = vrot.slane %v1289_v31, 4  ;;  %v2373_v27 = vld [vmem:[%s2691_s10 + $0x9c] sm:$0x1] }
  0x52   : > { %v1111_v38 = vsel %vm2730_vm5, %v1106_v29, %v1110_v6  ;;  %v1267_v39 = vor.u32 %v1266_v30, %v1263_v19  ;;  %v1259_v43 = vsel %vm2730_vm5, %v1254_v34, %v1258_v18  ;;  %v1292_v45 = vshll.u32 %v2336_v20, 16  ;;  %v2345_v6 = vld [vmem:[%s2691_s10 + $0x8c] sm:$0x1]  ;;  %v2594_v19 = vld [vmem:[%s2691_s10 + $0x100] ss:$8 sps:$4 sm:$0xff]  }
  0x53   : > { %v2325_v42 = vcombine.low %v1097_v14, %v1111_v38  ;;  %v1281_v44 = vor.u32 %v1280_v37, %v1277_v36  ;;  %v1298_v49 = vshll.u32 %v2337_v12, 16  ;;  %v1303_v50 = vshrl.u32 %v2338_v28, 16  ;;  %v2374_v31 = vld [vmem:[%s2691_s10 + $0xa0] sm:$0xf]  ;;  %v2375_v36 = vld [vmem:[%s2691_s10 + $0xa4] sm:$0x1] }
  0x54   : > { %v1268_v47 = vrot.slane %v1267_v39, 4  ;;  %v1306_v51 = vshll.u32 %v2338_v28, 16  ;;  %v1294_v54 = vrot.slane %v1292_v45, 5  ;;  %v1312_v55 = vshll.u32 %v2339_v32, 16 }
  0x55   : > { %2519 = vmatmul.mubr.msk.bf16.gmra.mrb[16].mxu0 %vm246_vm1, %v2325_v42  ;;  %v1282_v53 = vrot.slane %v1281_v44, 4  ;;  %v1317_v56 = vshrl.u32 %v2340_v33, 16  ;;  %v1300_v58 = vrot.slane %v1298_v49, 5  ;;  %v1305_v8 = vrot.slane %v1303_v50, 4  ;;  %v2377_v44 = vld [vmem:[%s2691_s10 + $0xac] sm:$0x1] }
  0x56   : > { %v1273_v57 = vsel %vm2730_vm5, %v1268_v47, %v1272_v35  ;;  %v1308_v60 = vrot.slane %v1306_v51, 5  ;;  %2534 = vmatprep.mubr.msk.bf16.mxu0 %vm246_vm1, %v2592_v41  ;;  %v1295_v0 = vor.u32 %v1294_v54, %v1291_v13  ;;  %v1314_v1 = vrot.slane %v1312_v55, 5  ;;  %v2376_v13 = vld [vmem:[%s2691_s10 + $0xa8] sm:$0xf]  ;;  %v2378_v50 = vld [vmem:[%s2691_s10 + $0xb0] sm:$0xf] }
  0x57   : > { %v2347_v62 = vcombine.low %v1259_v43, %v1273_v57  ;;  %v1287_v63 = vsel %vm2730_vm5, %v1282_v53, %v1286_v40  ;;  %v1319_v9 = vrot.slane %v1317_v56, 4  ;;  %v1320_v4 = vshll.u32 %v2340_v33, 16  ;;  %v2595_v53 = vld [vmem:[%s2691_s10 + $0x110] ss:$8 sps:$4 sm:$0xff]  }
  0x58   : > { %v1309_v3 = vor.u32 %v1308_v60, %v1305_v8  ;;  %v1326_v5 = vshll.u32 %v2341_v46, 16  ;;  %v1296_v16 = vrot.slane %v1295_v0, 4  ;;  %v1331_v17 = vshrl.u32 %v2342_v52, 16  ;;  %v2380_v0 = vld [vmem:[%s2691_s10 + $0xb8] sm:$0xf] }
  0x59   : > { %2524 = vmatprep.mubr.msk.bf16.mxu1 %vm246_vm1, %v2347_v62  ;;  %v1334_v10 = vshll.u32 %v2342_v52, 16  ;;  %v1340_v18 = vshll.u32 %v2343_v61, 16  ;;  %v1322_v21 = vrot.slane %v1320_v4, 5  ;;  %v1345_v22 = vshrl.u32 %v2344_v2, 16  ;;  %v2381_v4 = vld [vmem:[%s2691_s10 + $0xbc] sm:$0x1] }
  0x5a   : > { %v1310_v20 = vrot.slane %v1309_v3, 4  ;;  %v1328_v14 = vrot.slane %v1326_v5, 5  ;;  %v1301_v24 = vsel %vm2730_vm5, %v1296_v16, %v1300_v58  ;;  %v1333_v25 = vrot.slane %v1331_v17, 4  ;;  %v2379_v58 = vld [vmem:[%s2691_s10 + $0xb4] sm:$0x1] }
  0x5b   : > { %v1336_v12 = vrot.slane %v1334_v10, 5  ;;  %v1342_v26 = vrot.slane %v1340_v18, 5  ;;  %v2348_v28 = vcombine.low %v1287_v63, %v1301_v24  ;;  %v1323_v30 = vor.u32 %v1322_v21, %v1319_v9  ;;  %v2382_v17 = vld [vmem:[%s2691_s10 + $0xc0] sm:$0xf] }
  0x5c   : > { %v1315_v29 = vsel %vm2730_vm5, %v1310_v20, %v1314_v1  ;;  %v1347_v11 = vrot.slane %v1345_v22, 4  ;;  %v1348_v33 = vshll.u32 %v2344_v2, 16  ;;  %v1354_v34 = vshll.u32 %v2345_v6, 16 }
  0x5d   : > { %v1337_v32 = vor.u32 %v1336_v12, %v1333_v25  ;;  %2535 = vmatmul.mubr.msk.bf16.vlgmr.msra.gmra.mrb[20].mxu0 %vm246_vm1, %v2593_v7  ;;  %v2013_v35 = vsel %vm259_vm0, %v2847_v59, 0  ;;  %2525 = vmatmul.mubr.msk.bf16.vlgmr.msra.gmra.mrb[20].mxu1 %vm246_vm1, %v2348_v28  ;;  %v1324_v37 = vrot.slane %v1323_v30, 4  ;;  %v1629_v38 = vshrl.u32 %v2372_v23, 16  ;;  %v2383_v12 = vld [vmem:[%s2691_s10 + $0xc4] sm:$0x1] }
  0x5e   : > { %2538 = vmatprep.mubr.msk.bf16.mxu0 %vm246_vm1, %v2594_v19  ;;  %v1632_v39 = vshll.u32 %v2372_v23, 16  ;;  %v1638_v40 = vshll.u32 %v2373_v27, 16  ;;  %2543 = vmatpush3.bf16.msra.mxu1 %v2699_v15  ;;  %v1350_v42 = vrot.slane %v1348_v33, 5  ;;  %v1356_v43 = vrot.slane %v1354_v34, 5 }
  0x5f   : > { %v1338_v41 = vrot.slane %v1337_v32, 4  ;;  %2553 = vmatpush3.bf16.msra.mxu0 %v2013_v35  ;;  %v1643_v59 = vshrl.u32 %v2374_v31, 16  ;;  %v1329_v45 = vsel %vm2730_vm5, %v1324_v37, %v1328_v14  ;;  %v1631_v46 = vrot.slane %v1629_v38, 4  ;;  %v2386_v37 = vld [vmem:[%s2691_s10 + $0xd0] sm:$0xf] }
  0x60   : > { %v1634_v47 = vrot.slane %v1632_v39, 5  ;;  %v1640_v49 = vrot.slane %v1638_v40, 5  ;;  %v2349_v51 = vcombine.low %v1315_v29, %v1329_v45  ;;  %v1351_v15 = vor.u32 %v1350_v42, %v1347_v11 }
  0x61   : > { %v1343_v52 = vsel %vm2730_vm5, %v1338_v41, %v1342_v26  ;;  %v1645_v54 = vrot.slane %v1643_v59, 4  ;;  %v1646_v56 = vshll.u32 %v2374_v31, 16  ;;  %v1652_v57 = vshll.u32 %v2375_v36, 16  ;;  %v2384_v31 = vld [vmem:[%s2691_s10 + $0xc8] sm:$0xf] }
  0x62   : > { %v1635_v55 = vor.u32 %v1634_v47, %v1631_v46  ;;  %v1657_v8 = vshrl.u32 %v2376_v13, 16  ;;  %2528 = vmatprep.mubr.msk.bf16.mxu1 %vm246_vm1, %v2349_v51  ;;  %v1352_v60 = vrot.slane %v1351_v15, 4  ;;  %v1660_v61 = vshll.u32 %v2376_v13, 16  ;;  %v2385_v36 = vld [vmem:[%s2691_s10 + $0xcc] sm:$0x1] }
  0x63   : > { %v1666_v62 = vshll.u32 %v2377_v44, 16  ;;  %v1671_v63 = vshrl.u32 %v2378_v50, 16  ;;  %v1648_v2 = vrot.slane %v1646_v56, 5  ;;  %v1654_v3 = vrot.slane %v1652_v57, 5  ;;  %v2387_v46 = vld [vmem:[%s2691_s10 + $0xd4] sm:$0x1] }
  0x64   : > { %v1636_v1 = vrot.slane %v1635_v55, 4  ;;  %v1659_v9 = vrot.slane %v1657_v8, 4  ;;  %v1357_v5 = vsel %vm2730_vm5, %v1352_v60, %v1356_v43  ;;  %v1662_v6 = vrot.slane %v1660_v61, 5  ;;  %v2397_v15 = vld [vmem:[%s2691_s10 + $0xe0] sm:$0xf] }
  0x65   : > { %2539 = vmatmul.mubr.msk.bf16.gmra.mrb[24].mxu0 %vm246_vm1, %v2595_v53  ;;  %v1668_v7 = vrot.slane %v1666_v62, 5  ;;  %v1673_v16 = vrot.slane %v1671_v63, 4  ;;  %v2350_v10 = vcombine.low %v1343_v52, %v1357_v5  ;;  %v1649_v19 = vor.u32 %v1648_v2, %v1645_v54  ;;  %v2398_v57 = vld [vmem:[%s2691_s10 + $0xe4] sm:$0x1]  ;;  %v2400_v63 = vld [vmem:[%s2691_s10 + $0xec] sm:$0x1] }
  0x66   : > { %v1641_v18 = vsel %vm2730_vm5, %v1636_v1, %v1640_v49  ;;  %v1674_v20 = vshll.u32 %v2378_v50, 16  ;;  %v1663_v21 = vor.u32 %v1662_v6, %v1659_v9  ;;  %v1680_v14 = vshll.u32 %v2379_v58, 16  ;;  %v2399_v58 = vld [vmem:[%s2691_s10 + $0xe8] sm:$0xf]  ;;  %v2401_v9 = vld [vmem:[%s2691_s10 + $0xf0] sm:$0xf] }
  0x67   : > { %v1685_v22 = vshrl.u32 %v2380_v0, 16  ;;  %v1688_v23 = vshll.u32 %v2380_v0, 16  ;;  %2529 = vmatmul.mubr.msk.bf16.gmra.mrb[24].mxu1 %vm246_vm1, %v2350_v10  ;;  %v1650_v24 = vrot.slane %v1649_v19, 4  ;;  %v1694_v26 = vshll.u32 %v2381_v4, 16 }
  0x68   : > { %v1676_v25 = vrot.slane %v1674_v20, 5  ;;  %v1699_v27 = vshrl.u32 %v2382_v17, 16  ;;  %v1664_v28 = vrot.slane %v1663_v21, 4  ;;  %v1682_v29 = vrot.slane %v1680_v14, 5  ;;  %v2403_v20 = vld [vmem:[%s2691_s10 + $0xf8] sm:$0xf] }
  0x69   : > { %v1687_v30 = vrot.slane %v1685_v22, 4  ;;  %v1690_v11 = vrot.slane %v1688_v23, 5  ;;  %v1655_v32 = vsel %vm2730_vm5, %v1650_v24, %v1654_v3  ;;  %v1696_v34 = vrot.slane %v1694_v26, 5 }
  0x6a   : > { %v1677_v33 = vor.u32 %v1676_v25, %v1673_v16  ;;  %v1701_v35 = vrot.slane %v1699_v27, 4  ;;  %v2389_v38 = vcombine.low %v1641_v18, %v1655_v32  ;;  %v1669_v39 = vsel %vm2730_vm5, %v1664_v28, %v1668_v7  ;;  %v2402_v16 = vld [vmem:[%s2691_s10 + $0xf4] sm:$0x1]  ;;  %v2404_v28 = vld [vmem:[%s2691_s10 + $0xfc] sm:$0x1] }
  0x6b   : > { %v1691_v40 = vor.u32 %v1690_v11, %v1687_v30  ;;  %v1702_v13 = vshll.u32 %v2382_v17, 16  ;;  %v1708_v42 = vshll.u32 %v2383_v12, 16  ;;  %v1713_v43 = vshrl.u32 %v2384_v31, 16 }
  0x6c   : > { %v1678_v41 = vrot.slane %v1677_v33, 4  ;;  %v1716_v59 = vshll.u32 %v2384_v31, 16  ;;  %2544 = vmatprep.mubr.msk.bf16.mxu1 %vm246_vm1, %v2389_v38  ;;  %v1722_v47 = vshll.u32 %v2385_v36, 16  ;;  %v1727_v49 = vshrl.u32 %v2386_v37, 16 }
  0x6d   : > { %v1692_v44 = vrot.slane %v1691_v40, 4  ;;  %v1704_v45 = vrot.slane %v1702_v13, 5  ;;  %v1715_v51 = vrot.slane %v1713_v43, 4  ;;  %v1710_v55 = vrot.slane %v1708_v42, 5  ;;  %v2407_v40 = vld [vmem:[%s2691_s10 + $0x108] sm:$0xf] }
  0x6e   : > { %v1683_v50 = vsel %vm2730_vm5, %v1678_v41, %v1682_v29  ;;  %v1718_v52 = vrot.slane %v1716_v59, 5  ;;  %v1724_v56 = vrot.slane %v1722_v47, 5  ;;  %v1729_v60 = vrot.slane %v1727_v49, 4  ;;  %v2406_v59 = vld [vmem:[%s2691_s10 + $0x104] sm:$0x1] }
  0x6f   : > { %v2390_v53 = vcombine.low %v1669_v39, %v1683_v50  ;;  %v1705_v54 = vor.u32 %v1704_v45, %v1701_v35  ;;  %v1730_v61 = vshll.u32 %v2386_v37, 16  ;;  %v1736_v62 = vshll.u32 %v2387_v46, 16  ;;  %v2405_v35 = vld [vmem:[%s2691_s10 + $0x100] sm:$0xf] }
  0x70   : > { %v1719_v8 = vor.u32 %v1718_v52, %v1715_v51  ;;  %v1697_v0 = vsel %vm2730_vm5, %v1692_v44, %v1696_v34  ;;  %v1875_v2 = vshrl.u32 %v2397_v15, 16  ;;  %v1878_v3 = vshll.u32 %v2397_v15, 16  ;;  %v2408_v52 = vld [vmem:[%s2691_s10 + $0x10c] sm:$0x1] }
  0x71   : > { %2545 = vmatmul.mubr.msk.bf16.vlgmr.msra.gmra.mrb[28].mxu1 %vm246_vm1, %v2390_v53  ;;  %v1706_v1 = vrot.slane %v1705_v54, 4  ;;  %v1732_v5 = vrot.slane %v1730_v61, 5  ;;  %v1884_v6 = vshll.u32 %v2398_v57, 16  ;;  %v1889_v7 = vshrl.u32 %v2399_v58, 16  ;;  %v2409_v57 = vld [vmem:[%s2691_s10 + $0x110] sm:$0xf] }
  0x72   : > { %v1720_v4 = vrot.slane %v1719_v8, 4  ;;  %v1738_v10 = vrot.slane %v1736_v62, 5  ;;  %v1877_v18 = vrot.slane %v1875_v2, 4  ;;  %v1880_v19 = vrot.slane %v1878_v3, 5  ;;  %v2411_v62 = vld [vmem:[%s2691_s10 + $0x118] sm:$0xf] }
  0x73   : > { %v1711_v17 = vsel %vm2730_vm5, %v1706_v1, %v1710_v55  ;;  %v1733_v22 = vor.u32 %v1732_v5, %v1729_v60  ;;  %v1891_v23 = vrot.slane %v1889_v7, 4  ;;  %v1892_v25 = vshll.u32 %v2399_v58, 16  ;;  %v2410_v3 = vld [vmem:[%s2691_s10 + $0x114] sm:$0x1] }
  0x74   : > { %v2391_v21 = vcombine.low %v1697_v0, %v1711_v17  ;;  %v1725_v14 = vsel %vm2730_vm5, %v1720_v4, %v1724_v56  ;;  %v1881_v24 = vor.u32 %v1880_v19, %v1877_v18  ;;  %v1898_v12 = vshll.u32 %v2400_v63, 16 }
  0x75   : > { %v1903_v26 = vshrl.u32 %v2401_v9, 16  ;;  %v1734_v27 = vrot.slane %v1733_v22, 4  ;;  %v1906_v29 = vshll.u32 %v2401_v9, 16  ;;  %v1912_v30 = vshll.u32 %v2402_v16, 16 }
  0x76   : > { %2548 = vmatprep.mubr.msk.bf16.mxu1 %vm246_vm1, %v2391_v21  ;;  %v1917_v11 = vshrl.u32 %v2403_v20, 16  ;;  %v1882_v31 = vrot.slane %v1881_v24, 4  ;;  %v1886_v32 = vrot.slane %v1884_v6, 5  ;;  %v1894_v33 = vrot.slane %v1892_v25, 5 }
  0x77   : > { %v1905_v34 = vrot.slane %v1903_v26, 4  ;;  %v1739_v36 = vsel %vm2730_vm5, %v1734_v27, %v1738_v10  ;;  %v1900_v37 = vrot.slane %v1898_v12, 5  ;;  %v1908_v38 = vrot.slane %v1906_v29, 5  ;;  %v2412_v10 = vld [vmem:[%s2691_s10 + $0x11c] sm:$0x1] }
  0x78   : > { %v1914_v39 = vrot.slane %v1912_v30, 5  ;;  %v2392_v13 = vcombine.low %v1725_v14, %v1739_v36  ;;  %v1895_v41 = vor.u32 %v1894_v33, %v1891_v23  ;;  %v1919_v42 = vrot.slane %v1917_v11, 4 }
  0x79   : > { %v1920_v43 = vshll.u32 %v2403_v20, 16  ;;  %v1909_v44 = vor.u32 %v1908_v38, %v1905_v34  ;;  %v1926_v45 = vshll.u32 %v2404_v28, 16  ;;  %v1931_v46 = vshrl.u32 %v2405_v35, 16 }
  0x7a   : > { %v1934_v47 = vshll.u32 %v2405_v35, 16  ;;  %2549 = vmatmul.mubr.msk.bf16.gmra.mrb[32].mxu1 %vm246_vm1, %v2392_v13  ;;  %v1887_v49 = vsel %vm2730_vm5, %v1882_v31, %v1886_v32  ;;  %v1896_v50 = vrot.slane %v1895_v41, 4  ;;  %v1945_v15 = vshrl.u32 %v2407_v40, 16  ;;  %v223_v13 = vld [vmem:[#allocation2 + $0x30] sm:$0xff]  ;;  %v217_v41 = vld [vmem:[#allocation2] sm:$0xff] }
  0x7b   : > { %v1922_v51 = vrot.slane %v1920_v43, 5  ;;  %v1910_v53 = vrot.slane %v1909_v44, 4  ;;  %v1933_v54 = vrot.slane %v1931_v46, 4  ;;  %v1940_v56 = vshll.u32 %v2406_v59, 16  ;;  %v221_v43 = vld [vmem:[#allocation2 + $0x20] sm:$0xff]  ;;  %v220_v59 = vld [vmem:[#allocation2 + $0x18] sm:$0xff] }
  0x7c   : > { %v1936_v55 = vrot.slane %v1934_v47, 5  ;;  %v1901_v58 = vsel %vm2730_vm5, %v1896_v50, %v1900_v37  ;;  %v1928_v60 = vrot.slane %v1926_v45, 5  ;;  %v1947_v61 = vrot.slane %v1945_v15, 4  ;;  %v224_v47 = vld [vmem:[#allocation2 + $0x38] sm:$0xff] }
  0x7d   : > { %v1923_v8 = vor.u32 %v1922_v51, %v1919_v42  ;;  %v2414_v63 = vcombine.low %v1887_v49, %v1901_v58  ;;  %v1915_v0 = vsel %vm2730_vm5, %v1910_v53, %v1914_v39  ;;  %v1948_v2 = vshll.u32 %v2407_v40, 16  ;;  %v219_v40 = vld [vmem:[#allocation2 + $0x10] sm:$0xff]  ;;  %v218_v49 = vld [vmem:[#allocation2 + $0x8] sm:$0xff] }
  0x7e   : > { %v1937_v1 = vor.u32 %v1936_v55, %v1933_v54  ;;  %v1954_v4 = vshll.u32 %v2408_v52, 16  ;;  %v1959_v5 = vshrl.u32 %v2409_v57, 16  ;;  %v1962_v6 = vshll.u32 %v2409_v57, 16 }
  0x7f   : > { %v1924_v9 = vrot.slane %v1923_v8, 4  ;;  %2554 = vmatprep.mubr.msk.bf16.mxu0 %vm246_vm1, %v2414_v63  ;;  %v1942_v16 = vrot.slane %v1940_v56, 5  ;;  %v1950_v17 = vrot.slane %v1948_v2, 5  ;;  %v1973_v18 = vshrl.u32 %v2411_v62, 16 }
  0x80   : > { %v1938_v7 = vrot.slane %v1937_v1, 4  ;;  %v1961_v20 = vrot.slane %v1959_v5, 4  ;;  %v1964_v21 = vrot.slane %v1962_v6, 5  ;;  %v1968_v14 = vshll.u32 %v2410_v3, 16 }
  0x81   : > { %v1929_v19 = vsel %vm2730_vm5, %v1924_v9, %v1928_v60  ;;  %v1951_v23 = vor.u32 %v1950_v17, %v1947_v61  ;;  %v1956_v24 = vrot.slane %v1954_v4, 5  ;;  %v1975_v12 = vrot.slane %v1973_v18, 4 }
  0x82   : > { %v2415_v22 = vcombine.low %v1915_v0, %v1929_v19  ;;  %v1965_v25 = vor.u32 %v1964_v21, %v1961_v20  ;;  %v1976_v26 = vshll.u32 %v2411_v62, 16  ;;  %v1982_v27 = vshll.u32 %v2412_v10, 16 }
  0x83   : > { %v1943_v28 = vsel %vm2730_vm5, %v1938_v7, %v1942_v16  ;;  %v1952_v29 = vrot.slane %v1951_v23, 4  ;;  %v1970_v11 = vrot.slane %v1968_v14, 5 }
  0x84   : > { %2555 = vmatmul.mubr.msk.bf16.vlgmr.msra.gmra.mrb[28].mxu0 %vm246_vm1, %v2415_v22  ;;  %v1966_v30 = vrot.slane %v1965_v25, 4  ;;  %v1978_v31 = vrot.slane %v1976_v26, 5  ;;  %v1984_v35 = vrot.slane %v1982_v27, 5 }
  0x85   : > { %v1957_v32 = vsel %vm2730_vm5, %v1952_v29, %v1956_v24 }
  0x86   : > { %v2416_v33 = vcombine.low %v1943_v28, %v1957_v32  ;;  %v1979_v34 = vor.u32 %v1978_v31, %v1975_v12  ;;  %v1971_v36 = vsel %vm2730_vm5, %v1966_v30, %v1970_v11 }
  0x88   : > { %2558 = vmatprep.mubr.msk.bf16.mxu0 %vm246_vm1, %v2416_v33  ;;  %v1980_v37 = vrot.slane %v1979_v34, 4 }
  0x8a   : > { %v1985_v38 = vsel %vm2730_vm5, %v1980_v37, %v1984_v35 }
  0x8b   : > { %v2417_v39 = vcombine.low %v1971_v36, %v1985_v38 }
  0x8d   : > { %2559 = vmatmul.mubr.msk.bf16.gmra.mrb[32].mxu0 %vm246_vm1, %v2417_v39 }
  0xe6   : > { %v2476_v42 = vpop.f32.mrb[0].mxu0 }
  0xe7   : > { %v330_v44 = vadd.f32 %v2476_v42, %v219_v40  ;;  %v2480_v45 = vpop.f32.mrb[0].mxu1  ;;  %v297_v46 = vpop.f32.mrb[1].mxu0 }
  0xe8   : > { %v334_v50 = vadd.f32 %v2480_v45, %v223_v13  ;;  %v328_v51 = vadd.f32 %v297_v46, %v217_v41  ;;  %v313_v52 = vpop.f32.mrb[1].mxu1  ;;  %v2477_v15 = vpop.f32.mrb[2].mxu0 }
  0xe9   : > { %338 = vst.msk [vmem:[#allocation2 + $0x10] sm:$0xff] %vm199_vm4, %v330_v44  ;;  %v332_v53 = vadd.f32 %v313_v52, %v221_v43  ;;  %v331_v54 = vadd.f32 %v2477_v15, %v220_v59  ;;  %v2481_v55 = vpop.f32.mrb[2].mxu1  ;;  %v300_v56 = vpop.f32.mrb[3].mxu0 }
  0xea   : > { %342 = vst.msk [vmem:[#allocation2 + $0x30] sm:$0xff] %vm199_vm4, %v334_v50  ;;  %336 = vst.msk [vmem:[#allocation2] sm:$0xff] %vm199_vm4, %v328_v51  ;;  %v335_v57 = vadd.f32 %v2481_v55, %v224_v47  ;;  %v329_v58 = vadd.f32 %v300_v56, %v218_v49  ;;  %v316_v8 = vpop.f32.mrb[3].mxu1 }
  0xeb   : > { %340 = vst.msk [vmem:[#allocation2 + $0x20] sm:$0xff] %vm199_vm4, %v332_v53  ;;  %339 = vst.msk [vmem:[#allocation2 + $0x18] sm:$0xff] %vm199_vm4, %v331_v54  ;;  %v333_v60 = vadd.f32 %v316_v8, %v222_v48 }
  0xec   : > { %343 = vst.msk [vmem:[#allocation2 + $0x38] sm:$0xff] %vm199_vm4, %v335_v57  ;;  %337 = vst.msk [vmem:[#allocation2 + $0x8] sm:$0xff] %vm199_vm4, %v329_v58 }
  0xed   : > { %341 = vst.msk [vmem:[#allocation2 + $0x28] sm:$0xff] %vm199_vm4, %v333_v60 }
  0xf0   : > { %v363_v61 = vld [vmem:[#allocation2 + $0x10] sm:$0xff] }
  0xf1   : > { %v361_v62 = vld [vmem:[#allocation2] sm:$0xff]  ;;  %v367_v12 = vld [vmem:[#allocation2 + $0x30] sm:$0xff] }
  0xf2   : > { %v364_v0 = vld [vmem:[#allocation2 + $0x18] sm:$0xff]  ;;  %v365_v28 = vld [vmem:[#allocation2 + $0x20] sm:$0xff] }
  0xf3   : > { %v362_v3 = vld [vmem:[#allocation2 + $0x8] sm:$0xff]  ;;  %v368_v11 = vld [vmem:[#allocation2 + $0x38] sm:$0xff] }
  0xf4   : > { %v366_v33 = vld [vmem:[#allocation2 + $0x28] sm:$0xff] }
  0xf6   : > { %v2486_v63 = vpop.f32.mrb[4].mxu1 }
  0xf7   : > { %v580_v1 = vadd.f32 %v2486_v63, %v363_v61  ;;  %v547_v2 = vpop.f32.mrb[5].mxu1 }
  0xf8   : > { %v578_v9 = vadd.f32 %v547_v2, %v361_v62  ;;  %v2487_v4 = vpop.f32.mrb[6].mxu1 }
  0xf9   : > { %588 = vst.msk [vmem:[#allocation2 + $0x10] sm:$0xff] %vm199_vm4, %v580_v1  ;;  %v581_v5 = vadd.f32 %v2487_v4, %v364_v0  ;;  %v550_v6 = vpop.f32.mrb[7].mxu1 }
  0xfa   : > { %586 = vst.msk [vmem:[#allocation2] sm:$0xff] %vm199_vm4, %v578_v9  ;;  %v579_v7 = vadd.f32 %v550_v6, %v362_v3 }
  0xfb   : > { %589 = vst.msk [vmem:[#allocation2 + $0x18] sm:$0xff] %vm199_vm4, %v581_v5 }
  0xfc   : > { %587 = vst.msk [vmem:[#allocation2 + $0x8] sm:$0xff] %vm199_vm4, %v579_v7 }
 0x100   : > { %v612_v16 = vld [vmem:[#allocation2 + $0x10] sm:$0xff] }
 0x101   : > { %v610_v17 = vld [vmem:[#allocation2] sm:$0xff] }
 0x102   : > { %v613_v18 = vld [vmem:[#allocation2 + $0x18] sm:$0xff] }
 0x103   : > { %v611_v21 = vld [vmem:[#allocation2 + $0x8] sm:$0xff] }
 0x105   : > { %v2496_v10 = vpop.f32.mrb[4].mxu0 }
 0x106   : > { %v826_v19 = vadd.f32 %v2496_v10, %v612_v16  ;;  %v793_v20 = vpop.f32.mrb[5].mxu0 }
 0x107   : > { %v824_v14 = vadd.f32 %v793_v20, %v610_v17  ;;  %v2497_v22 = vpop.f32.mrb[6].mxu0 }
 0x108   : > { %834 = vst.msk [vmem:[#allocation2 + $0x10] sm:$0xff] %vm199_vm4, %v826_v19  ;;  %v827_v23 = vadd.f32 %v2497_v22, %v613_v18  ;;  %v796_v24 = vpop.f32.mrb[7].mxu0 }
 0x109   : > { %832 = vst.msk [vmem:[#allocation2] sm:$0xff] %vm199_vm4, %v824_v14  ;;  %v825_v25 = vadd.f32 %v796_v24, %v611_v21 }
 0x10a   : > { %835 = vst.msk [vmem:[#allocation2 + $0x18] sm:$0xff] %vm199_vm4, %v827_v23 }
 0x10b   : > { %v2490_v26 = vpop.f32.mrb[8].mxu1  ;;  %833 = vst.msk [vmem:[#allocation2 + $0x8] sm:$0xff] %vm199_vm4, %v825_v25 }
 0x10c   : > { %v584_v27 = vadd.f32 %v2490_v26, %v367_v12  ;;  %v563_v29 = vpop.f32.mrb[9].mxu1 }
 0x10d   : > { %v582_v30 = vadd.f32 %v563_v29, %v365_v28  ;;  %v2491_v31 = vpop.f32.mrb[10].mxu1 }
 0x10e   : > { %592 = vst.msk [vmem:[#allocation2 + $0x30] sm:$0xff] %vm199_vm4, %v584_v27  ;;  %v585_v32 = vadd.f32 %v2491_v31, %v368_v11  ;;  %v566_v34 = vpop.f32.mrb[11].mxu1 }
 0x10f   : > { %590 = vst.msk [vmem:[#allocation2 + $0x20] sm:$0xff] %vm199_vm4, %v582_v30  ;;  %v583_v35 = vadd.f32 %v566_v34, %v366_v33  ;;  %v851_v36 = vld [vmem:[#allocation2 + $0x10] sm:$0xff] }
 0x110   : > { %593 = vst.msk [vmem:[#allocation2 + $0x38] sm:$0xff] %vm199_vm4, %v585_v32  ;;  %v849_v37 = vld [vmem:[#allocation2] sm:$0xff] }
 0x111   : > { %591 = vst.msk [vmem:[#allocation2 + $0x28] sm:$0xff] %vm199_vm4, %v583_v35  ;;  %v852_v39 = vld [vmem:[#allocation2 + $0x18] sm:$0xff] }
 0x112   : > { %v850_v42 = vld [vmem:[#allocation2 + $0x8] sm:$0xff] }
 0x113   : > { %v2506_v38 = vpop.f32.mrb[12].mxu1 }
 0x114   : > { %v2500_v40 = vpop.f32.mrb[8].mxu0  ;;  %v961_v13 = vadd.f32 %v2506_v38, %v851_v36  ;;  %v928_v41 = vpop.f32.mrb[13].mxu1 }
 0x115   : > { %v616_v43 = vld [vmem:[#allocation2 + $0x30] sm:$0xff]  ;;  %v809_v59 = vpop.f32.mrb[9].mxu0  ;;  %v959_v44 = vadd.f32 %v928_v41, %v849_v37  ;;  %v2507_v45 = vpop.f32.mrb[14].mxu1 }
 0x116   : > { %v830_v46 = vadd.f32 %v2500_v40, %v616_v43  ;;  %v614_v47 = vld [vmem:[#allocation2 + $0x20] sm:$0xff]  ;;  %v2501_v49 = vpop.f32.mrb[10].mxu0  ;;  %969 = vst.msk [vmem:[#allocation2 + $0x10] sm:$0xff] %vm199_vm4, %v961_v13  ;;  %v962_v50 = vadd.f32 %v2507_v45, %v852_v39  ;;  %v931_v51 = vpop.f32.mrb[15].mxu1 }
 0x117   : > { %v828_v52 = vadd.f32 %v809_v59, %v614_v47  ;;  %v617_v15 = vld [vmem:[#allocation2 + $0x38] sm:$0xff]  ;;  %v812_v48 = vpop.f32.mrb[11].mxu0  ;;  %967 = vst.msk [vmem:[#allocation2] sm:$0xff] %vm199_vm4, %v959_v44  ;;  %v960_v53 = vadd.f32 %v931_v51, %v850_v42 }
 0x118   : > { %838 = vst.msk [vmem:[#allocation2 + $0x30] sm:$0xff] %vm199_vm4, %v830_v46  ;;  %v831_v54 = vadd.f32 %v2501_v49, %v617_v15  ;;  %v615_v55 = vld [vmem:[#allocation2 + $0x28] sm:$0xff]  ;;  %970 = vst.msk [vmem:[#allocation2 + $0x18] sm:$0xff] %vm199_vm4, %v962_v50 }
 0x119   : > { %836 = vst.msk [vmem:[#allocation2 + $0x20] sm:$0xff] %vm199_vm4, %v828_v52  ;;  %v829_v56 = vadd.f32 %v812_v48, %v615_v55  ;;  %968 = vst.msk [vmem:[#allocation2 + $0x8] sm:$0xff] %vm199_vm4, %v960_v53 }
 0x11a   : > { %839 = vst.msk [vmem:[#allocation2 + $0x38] sm:$0xff] %vm199_vm4, %v831_v54 }
 0x11b   : > { %837 = vst.msk [vmem:[#allocation2 + $0x28] sm:$0xff] %vm199_vm4, %v829_v56  ;;  %v2510_v57 = vpop.f32.mrb[16].mxu1 }
 0x11c   : > { %v944_v58 = vpop.f32.mrb[17].mxu1 }
 0x11d   : > { %v2511_v8 = vpop.f32.mrb[18].mxu1  ;;  %v994_v60 = vld [vmem:[#allocation2 + $0x10] sm:$0xff] }
 0x11e   : > { %v2516_v61 = vpop.f32.mrb[12].mxu0  ;;  %v947_v62 = vpop.f32.mrb[19].mxu1  ;;  %v992_v63 = vld [vmem:[#allocation2] sm:$0xff] }
 0x11f   : > { %v855_v0 = vld [vmem:[#allocation2 + $0x30] sm:$0xff]  ;;  %v1208_v1 = vadd.f32 %v2516_v61, %v994_v60  ;;  %v1175_v2 = vpop.f32.mrb[13].mxu0  ;;  %v995_v3 = vld [vmem:[#allocation2 + $0x18] sm:$0xff] }
 0x120   : > { %v965_v9 = vadd.f32 %v2510_v57, %v855_v0  ;;  %v853_v4 = vld [vmem:[#allocation2 + $0x20] sm:$0xff]  ;;  %v1206_v5 = vadd.f32 %v1175_v2, %v992_v63  ;;  %v2517_v6 = vpop.f32.mrb[14].mxu0  ;;  %v993_v7 = vld [vmem:[#allocation2 + $0x8] sm:$0xff] }
 0x121   : > { %v963_v16 = vadd.f32 %v944_v58, %v853_v4  ;;  %v856_v17 = vld [vmem:[#allocation2 + $0x38] sm:$0xff]  ;;  %1216 = vst.msk [vmem:[#allocation2 + $0x10] sm:$0xff] %vm199_vm4, %v1208_v1  ;;  %v1209_v10 = vadd.f32 %v2517_v6, %v995_v3  ;;  %v1178_v18 = vpop.f32.mrb[15].mxu0 }
 0x122   : > { %973 = vst.msk [vmem:[#allocation2 + $0x30] sm:$0xff] %vm199_vm4, %v965_v9  ;;  %v966_v19 = vadd.f32 %v2511_v8, %v856_v17  ;;  %v854_v20 = vld [vmem:[#allocation2 + $0x28] sm:$0xff]  ;;  %1214 = vst.msk [vmem:[#allocation2] sm:$0xff] %vm199_vm4, %v1206_v5  ;;  %v1207_v21 = vadd.f32 %v1178_v18, %v993_v7 }
 0x123   : > { %971 = vst.msk [vmem:[#allocation2 + $0x20] sm:$0xff] %vm199_vm4, %v963_v16  ;;  %v964_v14 = vadd.f32 %v947_v62, %v854_v20  ;;  %1217 = vst.msk [vmem:[#allocation2 + $0x18] sm:$0xff] %vm199_vm4, %v1209_v10 }
 0x124   : > { %974 = vst.msk [vmem:[#allocation2 + $0x38] sm:$0xff] %vm199_vm4, %v966_v19  ;;  %1215 = vst.msk [vmem:[#allocation2 + $0x8] sm:$0xff] %vm199_vm4, %v1207_v21 }
 0x125   : > { %972 = vst.msk [vmem:[#allocation2 + $0x28] sm:$0xff] %vm199_vm4, %v964_v14 }
 0x128   : > { %v2520_v22 = vpop.f32.mrb[16].mxu0  ;;  %v1240_v32 = vld [vmem:[#allocation2 + $0x10] sm:$0xff] }
 0x129   : > { %v998_v23 = vld [vmem:[#allocation2 + $0x30] sm:$0xff]  ;;  %v1191_v24 = vpop.f32.mrb[17].mxu0  ;;  %v1238_v33 = vld [vmem:[#allocation2] sm:$0xff] }
 0x12a   : > { %v1212_v25 = vadd.f32 %v2520_v22, %v998_v23  ;;  %v996_v12 = vld [vmem:[#allocation2 + $0x20] sm:$0xff]  ;;  %v2521_v26 = vpop.f32.mrb[18].mxu0  ;;  %v1241_v36 = vld [vmem:[#allocation2 + $0x18] sm:$0xff] }
 0x12b   : > { %v1210_v27 = vadd.f32 %v1191_v24, %v996_v12  ;;  %v999_v28 = vld [vmem:[#allocation2 + $0x38] sm:$0xff]  ;;  %v1194_v29 = vpop.f32.mrb[19].mxu0  ;;  %v1239_v40 = vld [vmem:[#allocation2 + $0x8] sm:$0xff] }
 0x12c   : > { %1220 = vst.msk [vmem:[#allocation2 + $0x30] sm:$0xff] %vm199_vm4, %v1212_v25  ;;  %v1213_v30 = vadd.f32 %v2521_v26, %v999_v28  ;;  %v997_v11 = vld [vmem:[#allocation2 + $0x28] sm:$0xff] }
 0x12d   : > { %1218 = vst.msk [vmem:[#allocation2 + $0x20] sm:$0xff] %vm199_vm4, %v1210_v27  ;;  %v1211_v31 = vadd.f32 %v1194_v29, %v997_v11 }
 0x12e   : > { %1221 = vst.msk [vmem:[#allocation2 + $0x38] sm:$0xff] %vm199_vm4, %v1213_v30 }
 0x12f   : > { %1219 = vst.msk [vmem:[#allocation2 + $0x28] sm:$0xff] %vm199_vm4, %v1211_v31 }
 0x130   : > { %v2536_v34 = vpop.f32.mrb[20].mxu0  ;;  %v2526_v35 = vpop.f32.mrb[20].mxu1 }
 0x131   : > { %v1556_v37 = vpop.f32.mrb[21].mxu0  ;;  %v1454_v38 = vadd.f32 %v2526_v35, %v1240_v32  ;;  %v1421_v39 = vpop.f32.mrb[21].mxu1 }
 0x132   : > { %v2537_v13 = vpop.f32.mrb[22].mxu0  ;;  %v1452_v41 = vadd.f32 %v1421_v39, %v1238_v33  ;;  %v2527_v42 = vpop.f32.mrb[22].mxu1 }
 0x133   : > { %v1559_v43 = vpop.f32.mrb[23].mxu0  ;;  %1462 = vst.msk [vmem:[#allocation2 + $0x10] sm:$0xff] %vm199_vm4, %v1454_v38  ;;  %v1455_v59 = vadd.f32 %v2527_v42, %v1241_v36  ;;  %v1424_v44 = vpop.f32.mrb[23].mxu1  ;;  %v1244_v47 = vld [vmem:[#allocation2 + $0x30] sm:$0xff] }
 0x134   : > { %1460 = vst.msk [vmem:[#allocation2] sm:$0xff] %vm199_vm4, %v1452_v41  ;;  %v1453_v45 = vadd.f32 %v1424_v44, %v1239_v40  ;;  %v1242_v50 = vld [vmem:[#allocation2 + $0x20] sm:$0xff] }
 0x135   : > { %1463 = vst.msk [vmem:[#allocation2 + $0x18] sm:$0xff] %vm199_vm4, %v1455_v59  ;;  %v1245_v15 = vld [vmem:[#allocation2 + $0x38] sm:$0xff] }
 0x136   : > { %1461 = vst.msk [vmem:[#allocation2 + $0x8] sm:$0xff] %vm199_vm4, %v1453_v45  ;;  %v1243_v57 = vld [vmem:[#allocation2 + $0x28] sm:$0xff] }
 0x138   : > { %v2540_v46 = vpop.f32.mrb[24].mxu0 }
 0x139   : > { %v1572_v49 = vpop.f32.mrb[25].mxu0 }
 0x13a   : > { %v2541_v51 = vpop.f32.mrb[26].mxu0  ;;  %v2530_v52 = vpop.f32.mrb[24].mxu1  ;;  %v1479_v48 = vld [vmem:[#allocation2 + $0x10] sm:$0xff] }
 0x13b   : > { %v1575_v53 = vpop.f32.mrb[27].mxu0  ;;  %v1458_v54 = vadd.f32 %v2530_v52, %v1244_v47  ;;  %v1437_v55 = vpop.f32.mrb[25].mxu1  ;;  %v1589_v56 = vadd.f32 %v2536_v34, %v1479_v48  ;;  %v1477_v58 = vld [vmem:[#allocation2] sm:$0xff] }
 0x13c   : > { %v1456_v8 = vadd.f32 %v1437_v55, %v1242_v50  ;;  %v2531_v60 = vpop.f32.mrb[26].mxu1  ;;  %v1587_v61 = vadd.f32 %v1556_v37, %v1477_v58  ;;  %v1480_v62 = vld [vmem:[#allocation2 + $0x18] sm:$0xff] }
 0x13d   : > { %1466 = vst.msk [vmem:[#allocation2 + $0x30] sm:$0xff] %vm199_vm4, %v1458_v54  ;;  %v1459_v63 = vadd.f32 %v2531_v60, %v1245_v15  ;;  %1597 = vst.msk [vmem:[#allocation2 + $0x10] sm:$0xff] %vm199_vm4, %v1589_v56  ;;  %v1440_v0 = vpop.f32.mrb[27].mxu1  ;;  %v1590_v1 = vadd.f32 %v2537_v13, %v1480_v62  ;;  %v1478_v2 = vld [vmem:[#allocation2 + $0x8] sm:$0xff] }
 0x13e   : > { %1464 = vst.msk [vmem:[#allocation2 + $0x20] sm:$0xff] %vm199_vm4, %v1456_v8  ;;  %v1457_v3 = vadd.f32 %v1440_v0, %v1243_v57  ;;  %1595 = vst.msk [vmem:[#allocation2] sm:$0xff] %vm199_vm4, %v1587_v61  ;;  %v1588_v9 = vadd.f32 %v1559_v43, %v1478_v2 }
 0x13f   : > { %1467 = vst.msk [vmem:[#allocation2 + $0x38] sm:$0xff] %vm199_vm4, %v1459_v63  ;;  %1598 = vst.msk [vmem:[#allocation2 + $0x18] sm:$0xff] %vm199_vm4, %v1590_v1 }
 0x140   : > { %1465 = vst.msk [vmem:[#allocation2 + $0x28] sm:$0xff] %vm199_vm4, %v1457_v3  ;;  %1596 = vst.msk [vmem:[#allocation2 + $0x8] sm:$0xff] %vm199_vm4, %v1588_v9 }
 0x144   : > { %v2546_v4 = vpop.f32.mrb[28].mxu1  ;;  %v1483_v5 = vld [vmem:[#allocation2 + $0x30] sm:$0xff] }
 0x145   : > { %v1622_v6 = vld [vmem:[#allocation2 + $0x10] sm:$0xff]  ;;  %v1803_v7 = vpop.f32.mrb[29].mxu1  ;;  %v1593_v16 = vadd.f32 %v2540_v46, %v1483_v5  ;;  %v1481_v17 = vld [vmem:[#allocation2 + $0x20] sm:$0xff] }
 0x146   : > { %v1836_v10 = vadd.f32 %v2546_v4, %v1622_v6  ;;  %v1620_v18 = vld [vmem:[#allocation2] sm:$0xff]  ;;  %v2547_v19 = vpop.f32.mrb[30].mxu1  ;;  %v1591_v20 = vadd.f32 %v1572_v49, %v1481_v17  ;;  %v1484_v21 = vld [vmem:[#allocation2 + $0x38] sm:$0xff] }
 0x147   : > { %v1834_v14 = vadd.f32 %v1803_v7, %v1620_v18  ;;  %v1623_v22 = vld [vmem:[#allocation2 + $0x18] sm:$0xff]  ;;  %v1806_v23 = vpop.f32.mrb[31].mxu1  ;;  %1601 = vst.msk [vmem:[#allocation2 + $0x30] sm:$0xff] %vm199_vm4, %v1593_v16  ;;  %v1594_v24 = vadd.f32 %v2541_v51, %v1484_v21  ;;  %v1482_v25 = vld [vmem:[#allocation2 + $0x28] sm:$0xff]  ;;  %v2422_v51 = vld [vmem:[%s3082_s2] ss:$0 sm:$0xff] }
 0x148   : > { %1844 = vst.msk [vmem:[#allocation2 + $0x10] sm:$0xff] %vm199_vm4, %v1836_v10  ;;  %v1837_v12 = vadd.f32 %v2547_v19, %v1623_v22  ;;  %v1621_v26 = vld [vmem:[#allocation2 + $0x8] sm:$0xff]  ;;  %1599 = vst.msk [vmem:[#allocation2 + $0x20] sm:$0xff] %vm199_vm4, %v1591_v20  ;;  %v1592_v27 = vadd.f32 %v1575_v53, %v1482_v25  ;;  %v2423_v53 = vld [vmem:[%s3083_s3] ss:$0 sm:$0xff] }
 0x149   : > { %1842 = vst.msk [vmem:[#allocation2] sm:$0xff] %vm199_vm4, %v1834_v14  ;;  %v1835_v28 = vadd.f32 %v1806_v23, %v1621_v26  ;;  %1602 = vst.msk [vmem:[#allocation2 + $0x38] sm:$0xff] %vm199_vm4, %v1594_v24 }
 0x14a   : > { %1845 = vst.msk [vmem:[#allocation2 + $0x18] sm:$0xff] %vm199_vm4, %v1837_v12  ;;  %1600 = vst.msk [vmem:[#allocation2 + $0x28] sm:$0xff] %vm199_vm4, %v1592_v27 }
 0x14b   : > { %1843 = vst.msk [vmem:[#allocation2 + $0x8] sm:$0xff] %vm199_vm4, %v1835_v28 }
 0x14d   : > { %v2550_v29 = vpop.f32.mrb[32].mxu1 }
 0x14e   : > { %v1626_v30 = vld [vmem:[#allocation2 + $0x30] sm:$0xff]  ;;  %v1819_v11 = vpop.f32.mrb[33].mxu1 }
 0x14f   : > { %v1840_v31 = vadd.f32 %v2550_v29, %v1626_v30  ;;  %v1624_v32 = vld [vmem:[#allocation2 + $0x20] sm:$0xff]  ;;  %v2551_v33 = vpop.f32.mrb[34].mxu1  ;;  %v1868_v40 = vld [vmem:[#allocation2 + $0x10] sm:$0xff] }
 0x150   : > { %v1838_v34 = vadd.f32 %v1819_v11, %v1624_v32  ;;  %v1627_v35 = vld [vmem:[#allocation2 + $0x38] sm:$0xff]  ;;  %v1822_v36 = vpop.f32.mrb[35].mxu1  ;;  %v1866_v13 = vld [vmem:[#allocation2] sm:$0xff] }
 0x151   : > { %1848 = vst.msk [vmem:[#allocation2 + $0x30] sm:$0xff] %vm199_vm4, %v1840_v31  ;;  %v1841_v37 = vadd.f32 %v2551_v33, %v1627_v35  ;;  %v1625_v38 = vld [vmem:[#allocation2 + $0x28] sm:$0xff]  ;;  %v1869_v42 = vld [vmem:[#allocation2 + $0x18] sm:$0xff] }
 0x152   : > { %1846 = vst.msk [vmem:[#allocation2 + $0x20] sm:$0xff] %vm199_vm4, %v1838_v34  ;;  %v1839_v39 = vadd.f32 %v1822_v36, %v1625_v38  ;;  %v1867_v44 = vld [vmem:[#allocation2 + $0x8] sm:$0xff] }
 0x153   : > { %1849 = vst.msk [vmem:[#allocation2 + $0x38] sm:$0xff] %vm199_vm4, %v1841_v37 }
 0x154   : > { %1847 = vst.msk [vmem:[#allocation2 + $0x28] sm:$0xff] %vm199_vm4, %v1839_v39 }
 0x157   : > { %v2556_v41 = vpop.f32.mrb[28].mxu0 }
 0x158   : > { %v2082_v43 = vadd.f32 %v2556_v41, %v1868_v40  ;;  %v2049_v59 = vpop.f32.mrb[29].mxu0  ;;  %v1872_v52 = vld [vmem:[#allocation2 + $0x30] sm:$0xff] }
 0x159   : > { %v2080_v45 = vadd.f32 %v2049_v59, %v1866_v13  ;;  %v2557_v46 = vpop.f32.mrb[30].mxu0  ;;  %v1870_v15 = vld [vmem:[#allocation2 + $0x20] sm:$0xff] }
 0x15a   : > { %2090 = vst.msk [vmem:[#allocation2 + $0x10] sm:$0xff] %vm199_vm4, %v2082_v43  ;;  %v2083_v47 = vadd.f32 %v2557_v46, %v1869_v42  ;;  %v2052_v49 = vpop.f32.mrb[31].mxu0  ;;  %v1873_v55 = vld [vmem:[#allocation2 + $0x38] sm:$0xff] }
 0x15b   : > { %2088 = vst.msk [vmem:[#allocation2] sm:$0xff] %vm199_vm4, %v2080_v45  ;;  %v2081_v50 = vadd.f32 %v2052_v49, %v1867_v44  ;;  %v1871_v60 = vld [vmem:[#allocation2 + $0x28] sm:$0xff] }
 0x15c   : > { %2091 = vst.msk [vmem:[#allocation2 + $0x18] sm:$0xff] %vm199_vm4, %v2083_v47 }
 0x15d   : > { %2089 = vst.msk [vmem:[#allocation2 + $0x8] sm:$0xff] %vm199_vm4, %v2081_v50 }
 0x160   : > { %v2560_v54 = vpop.f32.mrb[32].mxu0 }
 0x161   : > { %v2098_v48 = vld [vmem:[#allocation2 + $0x10] sm:$0xff]  ;;  %v2086_v58 = vadd.f32 %v2560_v54, %v1872_v52  ;;  %v2065_v8 = vpop.f32.mrb[33].mxu0 }
 0x162   : > { %v2113_v56 = vmul.f32 %v2422_v51, %v2098_v48  ;;  %v2096_v57 = vld [vmem:[#allocation2] sm:$0xff]  ;;  %v2084_v63 = vadd.f32 %v2065_v8, %v1870_v15  ;;  %v2561_v0 = vpop.f32.mrb[34].mxu0 }
 0x163   : > { %v2111_v61 = vmul.f32 %v2422_v51, %v2096_v57  ;;  %v2099_v62 = vld [vmem:[#allocation2 + $0x18] sm:$0xff]  ;;  %2094 = vst.msk [vmem:[#allocation2 + $0x30] sm:$0xff] %vm199_vm4, %v2086_v58  ;;  %v2087_v9 = vadd.f32 %v2561_v0, %v1873_v55  ;;  %v2068_v4 = vpop.f32.mrb[35].mxu0 }
 0x164   : > { %v2128_v1 = vadd.f32 %v2423_v53, %v2113_v56  ;;  %v2114_v2 = vmul.f32 %v2422_v51, %v2099_v62  ;;  %v2097_v3 = vld [vmem:[#allocation2 + $0x8] sm:$0xff]  ;;  %2092 = vst.msk [vmem:[#allocation2 + $0x20] sm:$0xff] %vm199_vm4, %v2084_v63  ;;  %v2085_v7 = vadd.f32 %v2068_v4, %v1871_v60 }
 0x165   : > { %v2126_v5 = vadd.f32 %v2423_v53, %v2111_v61  ;;  %v2112_v6 = vmul.f32 %v2422_v51, %v2097_v3  ;;  %2095 = vst.msk [vmem:[#allocation2 + $0x38] sm:$0xff] %vm199_vm4, %v2087_v9 }
 0x166   : > { %v2136_v16 = vmax.f32 %v2128_v1, 0.0  ;;  %v2129_v17 = vadd.f32 %v2423_v53, %v2114_v2  ;;  %2093 = vst.msk [vmem:[#allocation2 + $0x28] sm:$0xff] %vm199_vm4, %v2085_v7 }
 0x167   : > { %v2134_v10 = vmax.f32 %v2126_v5, 0.0  ;;  %v2127_v18 = vadd.f32 %v2423_v53, %v2112_v6 }
 0x168   : > { %v2144_v19 = vpack.c.bf16 %v2136_v16, %v2136_v16  ;;  %v2137_v20 = vmax.f32 %v2129_v17, 0.0 }
 0x169   : > { %v2142_v21 = vpack.c.bf16 %v2134_v10, %v2134_v10  ;;  %v2135_v14 = vmax.f32 %v2127_v18, 0.0 }
 0x16a   : > { %2153 = vst.msk [vmem:[%s3058_s16 + $0x8] sm:$0xf] %vm2150_vm6, %v2144_v19  ;;  %v2145_v22 = vpack.c.bf16 %v2137_v20, %v2137_v20  ;;  %v2102_v24 = vld [vmem:[#allocation2 + $0x30] sm:$0xff] }
 0x16b   : > { %2151 = vst.msk [vmem:[%s3058_s16] sm:$0xf] %vm2150_vm6, %v2142_v21  ;;  %v2143_v23 = vpack.c.bf16 %v2135_v14, %v2135_v14  ;;  %v2117_v25 = vmul.f32 %v2422_v51, %v2102_v24  ;;  %v2100_v12 = vld [vmem:[#allocation2 + $0x20] sm:$0xff] }
 0x16c   : > { %2154 = vst.msk [vmem:[%s3058_s16 + $0xc] sm:$0xf] %vm2150_vm6, %v2145_v22  ;;  %v2115_v26 = vmul.f32 %v2422_v51, %v2100_v12  ;;  %v2103_v27 = vld [vmem:[#allocation2 + $0x38] sm:$0xff] }
 0x16d   : > { %2152 = vst.msk [vmem:[%s3058_s16 + $0x4] sm:$0xf] %vm2150_vm6, %v2143_v23  ;;  %v2132_v28 = vadd.f32 %v2423_v53, %v2117_v25  ;;  %v2118_v29 = vmul.f32 %v2422_v51, %v2103_v27  ;;  %v2101_v30 = vld [vmem:[#allocation2 + $0x28] sm:$0xff] }
 0x16e   : > { %v2130_v11 = vadd.f32 %v2423_v53, %v2115_v26  ;;  %v2116_v31 = vmul.f32 %v2422_v51, %v2101_v30 }
 0x16f   : > { %v2140_v32 = vmax.f32 %v2132_v28, 0.0  ;;  %v2133_v33 = vadd.f32 %v2423_v53, %v2118_v29 }
 0x170   : > { %v2138_v34 = vmax.f32 %v2130_v11, 0.0  ;;  %v2131_v35 = vadd.f32 %v2423_v53, %v2116_v31 }
 0x171   : > { %v2148_v36 = vpack.c.bf16 %v2140_v32, %v2140_v32  ;;  %v2141_v37 = vmax.f32 %v2133_v33, 0.0 }
 0x172   : > { %v2146_v38 = vpack.c.bf16 %v2138_v34, %v2138_v34  ;;  %v2139_v39 = vmax.f32 %v2131_v35, 0.0 }
 0x173   : > { %2157 = vst.msk [vmem:[%s3058_s16 + $0x18] sm:$0xf] %vm2150_vm6, %v2148_v36  ;;  %v2149_v40 = vpack.c.bf16 %v2141_v37, %v2141_v37 }
 0x174   : > { %2155 = vst.msk [vmem:[%s3058_s16 + $0x10] sm:$0xf] %vm2150_vm6, %v2146_v38  ;;  %v2147_v13 = vpack.c.bf16 %v2139_v39, %v2139_v39 }
 0x175   : > { %2158 = vst.msk [vmem:[%s3058_s16 + $0x1c] sm:$0xf] %vm2150_vm6, %v2149_v40 }
 0x176   : > { %2156 = vst.msk [vmem:[%s3058_s16 + $0x14] sm:$0xf] %vm2150_vm6, %v2147_v13 }
 0x177 PF: > { %s14_s15 = sadd.s32 1, %s2602_s15  }
 0x178   : > { %p11_p4 = scmp.ge.s32.totalorder %s14_s15, 4  }
 0x17a   :  { %13 = sbr.rel (!%p11_p4) target bundleno = 1 (0x1), region = 80 }

// kernel: _lambda_.5
= control target key start
LH: loop header
LB: loop body
LE: loop exit
PB: predicated region body
PF: predicated region fallthrough
CT: control target
= control target key end

     0   :  { %s2683_s15 = smov 0   ;;  %s3176_s0 = inlined_call_operand.vmem [shape: bf16[2,1,1,10,10,8], index: 0, kind: input, shape index: {}]   ;;  %s3177_s1 = inlined_call_operand.vmem [shape: bf16[3,3,8,8], index: 1, kind: input, shape index: {}]   ;;  %s3178_s2 = inlined_call_operand.vmem [shape: bf16[2,2,2,9,9,4], index: 2, kind: input, shape index: {}]   ;;  %s3179_s3 = inlined_call_operand.vmem [shape: bf16[4,8], index: 3, kind: input, shape index: {}]   ;;  %s3180_s4 = inlined_call_operand.vmem [shape: bf16[2,8,8,8], index: 4, kind: output, shape index: {}]  }
   0x1 LB: > { %s2246_s16 = sadd.s32 4294967295, %s2655_s15   ;;  %p2250_p0 = scmp.ge.s32.totalorder %s2655_s15, 1  ;;  %s2655_s15 = sphi %s2683_s15, %s14_s15  }
   0x2   : > { %p172_p1 = scmp.lt.s32.totalorder %s2655_s15, 3 }
   0x4   : > { %p173_p2 = pnand %p2250_p0, %p172_p1 }
   0x5   : > { %v244_v0 = vld [vmem:[%s3177_s1] sm:$0xf] (!%p173_p2)  ;;  %vm277_vm0 = vcmask (!%p173_p2), 1043456   ;;  %p203_p3 = scmp.lt.s32.totalorder (!%p173_p2), %s2246_s16, 1  ;;  %v2280_v2 = vld [vmem:[%s3177_s1 + $0x8] sm:$0xf] (!%p173_p2) }
   0x6   : > { %176 = sbr.rel (%p173_p2) target bundleno = 347 (0x15b), region = 36  ;;  %2616 = vmatprep.subr.msk.bf16.mxu0 (!%p173_p2), %vm277_vm0, %v244_v0  ;;  %v279_v1 = vsel (!%p173_p2), %vm277_vm0, %v244_v0, 0  ;;  %v2263_v3 = vld [vmem:[%s3177_s1 + $0x4] sm:$0xf] (!%p173_p2)  ;;  %v2297_v5 = vld [vmem:[%s3177_s1 + $0xc] sm:$0xf] (!%p173_p2) }
   0x7   : > { %2517 = vmatpush3.bf16.msra.mxu0 (!%p173_p2), %v279_v1  ;;  %2617 = vmatprep.subr.msk.bf16.mxu1 (!%p173_p2), %vm277_vm0, %v2263_v3  ;;  %v528_v4 = vsel (!%p173_p2), %vm277_vm0, %v2263_v3, 0  ;;  %vm219_vm1 = vcmask (!%p173_p2), 64512   ;;  %v713_v6 = vsel (!%p173_p2), %vm277_vm0, %v2280_v2, 0  ;;  %vm386_vm2 = vsmask.f32 (!%p173_p2), 3328 }
   0x8   : > { %2618 = vmatprep.subr.msk.bf16.mxu0 (!%p173_p2), %vm277_vm0, %v2280_v2  ;;  %2527 = vmatpush3.bf16.msra.mxu1 (!%p173_p2), %v528_v4  ;;  %vm387_vm3 = vsmask.f32 (!%p173_p2), 7440  ;;  %v2322_v7 = vld [vmem:[%s3177_s1 + $0x10] sm:$0xf] (!%p173_p2)  ;;  %v2727_v11 = vsel (!%p173_p2), %vm277_vm0, %v2297_v5, 0  ;;  %vm651_vm4 = vcmask (!%p173_p2), 1042432  }
   0x9   : > { %2619 = vmatprep.subr.msk.bf16.mxu1 (!%p173_p2), %vm277_vm0, %v2297_v5  ;;  %v2730_v12 = vsel (!%p173_p2), %vm277_vm0, %v2322_v7, 0  ;;  %vm652_vm5 = vcmask (!%p173_p2), 1046532   ;;  %vm2746_vm6 = vmor (!%p173_p2), %vm386_vm2, %vm387_vm3  ;;  %vm2085_vm8 = vcmask (!%p173_p2), 1041408   ;;  %vm2072_vm9 = vcmask (!%p173_p2), 31744  }
   0xa   : > { %vm2766_vm7 = vmor (!%p173_p2), %vm651_vm4, %vm652_vm5  ;;  %vm2170_vm10 = vcmask (!%p173_p2), 60416  }
   0xd   : > { %s3186_s16 = smov (!%p203_p3, %s2246_s16), 1 }
   0xe   : > { %s2626_s25 = smul.u32 80, %s3186_s16  ;;  %s2465_s21 = sshll.u32 %s3186_s16, 5 }
   0xf   : > { %s2627_s17 = smul.u32 288, %s3186_s16  ;;  %s3153_s24 = scalar_lea.vmem %s3180_s4, %s2465_s21 }
  0x10   : > { %s2716_s28 = scalar_lea.vmem %s3176_s0, %s2626_s25 }
  0x11   : > { %v2637_v8 = vld [vmem:[%s2716_s28] ss:$8 sps:$4 sm:$0xff]   ;;  %v2638_v9 = vld [vmem:[%s2716_s28 + $0x10] ss:$8 sps:$4 sm:$0xff]   ;;  %v363_v14 = vld [vmem:[%s2716_s28 + $0x4] sm:$0x1]  ;;  %s3005_s20 = scalar_lea.vmem %s3178_s2, %s2627_s17 }
  0x12   : > { %2518 = vmatprep.mubr.msk.bf16.mxu0 %vm219_vm1, %v2637_v8  ;;  %v2639_v10 = vld [vmem:[%s2716_s28 + $0x20] ss:$8 sps:$4 sm:$0xff]   ;;  %v2640_v16 = vld [vmem:[%s2716_s28 + $0x30] ss:$8 sps:$4 sm:$0xff]   ;;  %v365_v17 = vld [vmem:[%s2716_s28 + $0xc] sm:$0x1] }
  0x13   : > { %2519 = vmatmul.mubr.msk.bf16.vlgmr.msra.gmra.mrb[0].mxu0 %vm219_vm1, %v2638_v9  ;;  %v362_v13 = vld [vmem:[%s2716_s28] sm:$0xf]  ;;  %v364_v15 = vld [vmem:[%s2716_s28 + $0x8] sm:$0xf]  ;;  %v399_v20 = vshll.u32 %v363_v14, 16  ;;  %v413_v23 = vshll.u32 %v365_v17, 16 }
  0x14   : > { %2537 = vmatpush3.bf16.msra.mxu0 %v713_v6  ;;  %2522 = vmatprep.mubr.msk.bf16.mxu0 %vm219_vm1, %v2639_v10  ;;  %v390_v18 = vshrl.u32 %v362_v13, 16  ;;  %v393_v19 = vshll.u32 %v362_v13, 16  ;;  %v404_v21 = vshrl.u32 %v364_v15, 16  ;;  %v407_v22 = vshll.u32 %v364_v15, 16  ;;  %v366_v24 = vld [vmem:[%s2716_s28 + $0x10] sm:$0xf] }
  0x15   : > { %2620 = vmatprep.subr.msk.bf16.mxu0 %vm277_vm0, %v2322_v7  ;;  %v367_v25 = vld [vmem:[%s2716_s28 + $0x14] sm:$0x1]  ;;  %v401_v28 = vrot.slane %v399_v20, 5  ;;  %v368_v30 = vld [vmem:[%s2716_s28 + $0x18] sm:$0xf]  ;;  %v415_v32 = vrot.slane %v413_v23, 5 }
  0x16   : > { %v392_v26 = vrot.slane %v390_v18, 4  ;;  %v395_v27 = vrot.slane %v393_v19, 5  ;;  %v406_v29 = vrot.slane %v404_v21, 4  ;;  %v409_v31 = vrot.slane %v407_v22, 5  ;;  %v369_v33 = vld [vmem:[%s2716_s28 + $0x1c] sm:$0x1] }
  0x17   : > { %v418_v34 = vshrl.u32 %v366_v24, 16  ;;  %v421_v35 = vshll.u32 %v366_v24, 16  ;;  %v427_v37 = vshll.u32 %v367_v25, 16  ;;  %v432_v38 = vshrl.u32 %v368_v30, 16  ;;  %v370_v40 = vld [vmem:[%s2716_s28 + $0x20] sm:$0xf] }
  0x18   : > { %v396_v36 = vor.u32 %v395_v27, %v392_v26  ;;  %v435_v39 = vshll.u32 %v368_v30, 16  ;;  %v410_v42 = vor.u32 %v409_v31, %v406_v29  ;;  %v441_v45 = vshll.u32 %v369_v33, 16  ;;  %v371_v46 = vld [vmem:[%s2716_s28 + $0x24] sm:$0x1]  ;;  %v372_v51 = vld [vmem:[%s2716_s28 + $0x28] sm:$0xf] }
  0x19   : > { %v420_v43 = vrot.slane %v418_v34, 4  ;;  %v423_v44 = vrot.slane %v421_v35, 5  ;;  %v429_v48 = vrot.slane %v427_v37, 5  ;;  %v434_v49 = vrot.slane %v432_v38, 4  ;;  %v373_v55 = vld [vmem:[%s2716_s28 + $0x2c] sm:$0x1] }
  0x1a   : > { %v397_v47 = vrot.slane %v396_v36, 4  ;;  %v437_v50 = vrot.slane %v435_v39, 5  ;;  %v411_v52 = vrot.slane %v410_v42, 4  ;;  %v443_v54 = vrot.slane %v441_v45, 5  ;;  %v611_v61 = vld [vmem:[%s2716_s28] sm:$0xe] }
  0x1b   : > { %2523 = vmatmul.mubr.msk.bf16.gmra.mrb[4].mxu0 %vm219_vm1, %v2640_v16  ;;  %v424_v53 = vor.u32 %v423_v44, %v420_v43  ;;  %v446_v56 = vshrl.u32 %v370_v40, 16  ;;  %v449_v59 = vshll.u32 %v370_v40, 16  ;;  %v455_v60 = vshll.u32 %v371_v46, 16  ;;  %v612_v62 = vld [vmem:[%s2716_s28 + $0x4] sm:$0x1] }
  0x1c   : > { %v402_v57 = vsel %vm2746_vm6, %v397_v47, %v401_v28  ;;  %v438_v58 = vor.u32 %v437_v50, %v434_v49  ;;  %v416_v63 = vsel %vm2746_vm6, %v411_v52, %v415_v32  ;;  %v460_v2 = vshrl.u32 %v372_v51, 16  ;;  %v613_v3 = vld [vmem:[%s2716_s28 + $0x8] sm:$0xe]  ;;  %v614_v8 = vld [vmem:[%s2716_s28 + $0xc] sm:$0x1] }
  0x1d   : > { %v425_v0 = vrot.slane %v424_v53, 4  ;;  %v448_v1 = vrot.slane %v446_v56, 4  ;;  %v2264_v4 = vcombine.low %v402_v57, %v416_v63  ;;  %v451_v6 = vrot.slane %v449_v59, 5  ;;  %v374_v16 = vld [vmem:[%s2716_s28 + $0x30] sm:$0xf] }
  0x1e   : > { %v439_v5 = vrot.slane %v438_v58, 4  ;;  %v457_v7 = vrot.slane %v455_v60, 5  ;;  %v462_v10 = vrot.slane %v460_v2, 4  ;;  %v463_v13 = vshll.u32 %v372_v51, 16  ;;  %v375_v21 = vld [vmem:[%s2716_s28 + $0x34] sm:$0x1] }
  0x1f   : > { %v430_v9 = vsel %vm2746_vm6, %v425_v0, %v429_v48  ;;  %v469_v14 = vshll.u32 %v373_v55, 16  ;;  %2528 = vmatprep.mubr.msk.bf16.mxu1 %vm219_vm1, %v2264_v4  ;;  %v452_v18 = vor.u32 %v451_v6, %v448_v1  ;;  %v2272_v19 = vrot.slane %v611_v61, 9  ;;  %v376_v22 = vld [vmem:[%s2716_s28 + $0x38] sm:$0xf]  ;;  %v2779_v23 = vld [vmem:[%s3177_s1 + $0x14] sm:$0xf] }
  0x20   : > { %v444_v17 = vsel %vm2746_vm6, %v439_v5, %v443_v54  ;;  %v656_v20 = vrot.slane %v612_v62, 5  ;;  %v465_v25 = vrot.slane %v463_v13, 5  ;;  %v2273_v27 = vrot.slane %v613_v3, 9  ;;  %v377_v28 = vld [vmem:[%s2716_s28 + $0x3c] sm:$0x1] }
  0x21   : > { %v2265_v24 = vcombine.low %v430_v9, %v444_v17  ;;  %v471_v26 = vrot.slane %v469_v14, 5  ;;  %v453_v29 = vrot.slane %v452_v18, 4  ;;  %v660_v31 = vrot.slane %v614_v8, 5  ;;  %v615_v33 = vld [vmem:[%s2716_s28 + $0x10] sm:$0xe] }
  0x22   : > { %v657_v30 = vsel %vm2766_vm7, %v2272_v19, %v656_v20  ;;  %v474_v32 = vshrl.u32 %v374_v16, 16  ;;  %v466_v34 = vor.u32 %v465_v25, %v462_v10  ;;  %v477_v35 = vshll.u32 %v374_v16, 16  ;;  %v616_v38 = vld [vmem:[%s2716_s28 + $0x14] sm:$0x1]  ;;  %v617_v44 = vld [vmem:[%s2716_s28 + $0x18] sm:$0xe] }
  0x23   : > { %2529 = vmatmul.mubr.msk.bf16.vlgmr.msra.gmra.mrb[0].mxu1 %vm219_vm1, %v2265_v24  ;;  %v483_v36 = vshll.u32 %v375_v21, 16  ;;  %v488_v37 = vshrl.u32 %v376_v22, 16  ;;  %v458_v39 = vsel %vm2746_vm6, %v453_v29, %v457_v7  ;;  %v661_v40 = vsel %vm2766_vm7, %v2273_v27, %v660_v31  ;;  %v618_v45 = vld [vmem:[%s2716_s28 + $0x1c] sm:$0x1]  ;;  %v619_v50 = vld [vmem:[%s2716_s28 + $0x20] sm:$0xe] }
  0x24   : > { %2547 = vmatpush3.bf16.msra.mxu1 %v2727_v11  ;;  %v476_v42 = vrot.slane %v474_v32, 4  ;;  %v491_v43 = vshll.u32 %v376_v22, 16  ;;  %v467_v46 = vrot.slane %v466_v34, 4  ;;  %v2281_v47 = vcombine.low %v657_v30, %v661_v40  ;;  %v620_v54 = vld [vmem:[%s2716_s28 + $0x24] sm:$0x1] }
  0x25   : > { %v479_v48 = vrot.slane %v477_v35, 5  ;;  %v485_v49 = vrot.slane %v483_v36, 5  ;;  %2621 = vmatprep.subr.msk.bf16.mxu1 %vm277_vm0, %v2779_v23  ;;  %v490_v11 = vrot.slane %v488_v37, 4  ;;  %v497_v52 = vshll.u32 %v377_v28, 16  ;;  %v621_v59 = vld [vmem:[%s2716_s28 + $0x28] sm:$0xe] }
  0x26   : > { %v493_v51 = vrot.slane %v491_v43, 5  ;;  %v2274_v53 = vrot.slane %v615_v33, 9  ;;  %v472_v55 = vsel %vm2746_vm6, %v467_v46, %v471_v26  ;;  %2538 = vmatprep.mubr.msk.bf16.mxu0 %vm219_vm1, %v2281_v47  ;;  %v664_v57 = vrot.slane %v616_v38, 5  ;;  %v622_v60 = vld [vmem:[%s2716_s28 + $0x2c] sm:$0x1] }
  0x27   : > { %v480_v56 = vor.u32 %v479_v48, %v476_v42  ;;  %v2275_v58 = vrot.slane %v617_v44, 9  ;;  %v2266_v61 = vcombine.low %v458_v39, %v472_v55  ;;  %v499_v63 = vrot.slane %v497_v52, 5  ;;  %v623_v1 = vld [vmem:[%s2716_s28 + $0x30] sm:$0xe]  ;;  %v624_v2 = vld [vmem:[%s2716_s28 + $0x34] sm:$0x1] }
  0x28   : > { %v494_v62 = vor.u32 %v493_v51, %v490_v11  ;;  %v668_v0 = vrot.slane %v618_v45, 5  ;;  %v665_v4 = vsel %vm2766_vm7, %v2274_v53, %v664_v57  ;;  %v2276_v5 = vrot.slane %v619_v50, 9  ;;  %v625_v7 = vld [vmem:[%s2716_s28 + $0x38] sm:$0xe]  ;;  %v626_v14 = vld [vmem:[%s2716_s28 + $0x3c] sm:$0x1] }
  0x29   : > { %v481_v3 = vrot.slane %v480_v56, 4  ;;  %v672_v6 = vrot.slane %v620_v54, 5  ;;  %2532 = vmatprep.mubr.msk.bf16.mxu1 %vm219_vm1, %v2266_v61  ;;  %v2277_v10 = vrot.slane %v621_v59, 9  ;;  %v676_v13 = vrot.slane %v622_v60, 5  ;;  %v2372_v16 = vld [vmem:[%s3177_s1 + $0x18] sm:$0xf] }
  0x2a   : > { %v495_v8 = vrot.slane %v494_v62, 4  ;;  %v669_v9 = vsel %vm2766_vm7, %v2275_v58, %v668_v0  ;;  %v2818_v17 = vld [vmem:[%s3177_s1 + $0x1c] sm:$0xf]  ;;  %v2278_v21 = vrot.slane %v623_v1, 9  ;;  %v680_v25 = vrot.slane %v624_v2, 5 }
  0x2b   : > { %v486_v18 = vsel %vm2746_vm6, %v481_v3, %v485_v49  ;;  %v2282_v19 = vcombine.low %v665_v4, %v669_v9  ;;  %v673_v20 = vsel %vm2766_vm7, %v2276_v5, %v672_v6  ;;  %v677_v24 = vsel %vm2766_vm7, %v2277_v10, %v676_v13  ;;  %v2641_v27 = vld [vmem:[%s2716_s28 + $0x8] ss:$8 sps:$4 sm:$0xff]   ;;  %v2307_v36 = vld [vmem:[%s2716_s28 + $0xc] sm:$0x1]  ;;  %v2642_v38 = vld [vmem:[%s2716_s28 + $0x18] ss:$8 sps:$4 sm:$0xff]  }
  0x2c   : > { %v500_v22 = vsel %vm2746_vm6, %v495_v8, %v499_v63  ;;  %v2279_v26 = vrot.slane %v625_v7, 9  ;;  %v2283_v29 = vcombine.low %v673_v20, %v677_v24  ;;  %v684_v30 = vrot.slane %v626_v14, 5  ;;  %v2308_v37 = vld [vmem:[%s2716_s28 + $0x10] sm:$0xf]  ;;  %v2309_v39 = vld [vmem:[%s2716_s28 + $0x14] sm:$0x1] }
  0x2d   : > { %v2267_v28 = vcombine.low %v486_v18, %v500_v22  ;;  %2539 = vmatmul.mubr.msk.bf16.vlgmr.msra.gmra.mrb[8].mxu0 %vm219_vm1, %v2282_v19  ;;  %v681_v31 = vsel %vm2766_vm7, %v2278_v21, %v680_v25  ;;  %v1276_v32 = vsel %vm277_vm0, %v2779_v23, 0  ;;  %v2840_v34 = vsel %vm277_vm0, %v2372_v16, 0  ;;  %v2306_v23 = vld [vmem:[%s2716_s28 + $0x8] sm:$0xf]  ;;  %v2310_v48 = vld [vmem:[%s2716_s28 + $0x18] sm:$0xf] }
  0x2e   : > { %2557 = vmatpush3.bf16.msra.mxu0 %v2730_v12  ;;  %2542 = vmatprep.mubr.msk.bf16.mxu0 %vm219_vm1, %v2283_v29  ;;  %v685_v33 = vsel %vm2766_vm7, %v2279_v26, %v684_v30  ;;  %v2844_v12 = vsel %vm277_vm0, %v2818_v17, 0  ;;  %v956_v40 = vshrl.u32 %v2306_v23, 16  ;;  %v959_v42 = vshll.u32 %v2306_v23, 16  ;;  %v2643_v45 = vld [vmem:[%s2716_s28 + $0x28] ss:$8 sps:$4 sm:$0xff]  }
  0x2f   : > { %2533 = vmatmul.mubr.msk.bf16.gmra.mrb[4].mxu1 %vm219_vm1, %v2267_v28  ;;  %v2284_v35 = vcombine.low %v681_v31, %v685_v33  ;;  %2622 = vmatprep.subr.msk.bf16.mxu0 %vm277_vm0, %v2372_v16  ;;  %v965_v43 = vshll.u32 %v2307_v36, 16  ;;  %v970_v44 = vshrl.u32 %v2308_v37, 16  ;;  %v973_v46 = vshll.u32 %v2308_v37, 16  ;;  %v2311_v49 = vld [vmem:[%s2716_s28 + $0x1c] sm:$0x1] }
  0x30   : > { %2548 = vmatprep.mubr.msk.bf16.mxu1 %vm219_vm1, %v2641_v27  ;;  %v979_v47 = vshll.u32 %v2309_v39, 16  ;;  %v958_v50 = vrot.slane %v956_v40, 4  ;;  %v961_v11 = vrot.slane %v959_v42, 5  ;;  %v2312_v53 = vld [vmem:[%s2716_s28 + $0x20] sm:$0xf]  ;;  %v984_v57 = vshrl.u32 %v2310_v48, 16 }
  0x31   : > { %v967_v51 = vrot.slane %v965_v43, 5  ;;  %v972_v52 = vrot.slane %v970_v44, 4  ;;  %v975_v54 = vrot.slane %v973_v46, 5  ;;  %v2313_v56 = vld [vmem:[%s2716_s28 + $0x24] sm:$0x1]  ;;  %v987_v58 = vshll.u32 %v2310_v48, 16 }
  0x32   : > { %v981_v55 = vrot.slane %v979_v47, 5  ;;  %v962_v59 = vor.u32 %v961_v11, %v958_v50  ;;  %v993_v60 = vshll.u32 %v2311_v49, 16  ;;  %v998_v61 = vshrl.u32 %v2312_v53, 16  ;;  %v2314_v63 = vld [vmem:[%s2716_s28 + $0x28] sm:$0xf] }
  0x33   : > { %v1001_v62 = vshll.u32 %v2312_v53, 16  ;;  %v976_v0 = vor.u32 %v975_v54, %v972_v52  ;;  %v986_v1 = vrot.slane %v984_v57, 4  ;;  %v989_v2 = vrot.slane %v987_v58, 5  ;;  %v2315_v4 = vld [vmem:[%s2716_s28 + $0x2c] sm:$0x1] }
  0x34   : > { %v1007_v3 = vshll.u32 %v2313_v56, 16  ;;  %v963_v5 = vrot.slane %v962_v59, 4  ;;  %v995_v6 = vrot.slane %v993_v60, 5  ;;  %v1000_v7 = vrot.slane %v998_v61, 4  ;;  %v2316_v9 = vld [vmem:[%s2716_s28 + $0x30] sm:$0xf] }
  0x35   : > { %2543 = vmatmul.mubr.msk.bf16.gmra.mrb[12].mxu0 %vm219_vm1, %v2284_v35  ;;  %v1003_v8 = vrot.slane %v1001_v62, 5  ;;  %v977_v10 = vrot.slane %v976_v0, 4  ;;  %v990_v13 = vor.u32 %v989_v2, %v986_v1  ;;  %v1012_v16 = vshrl.u32 %v2314_v63, 16  ;;  %v2644_v18 = vld [vmem:[%s2716_s28 + $0x38] ss:$8 sps:$4 sm:$0xff]  }
  0x36   : > { %v1009_v14 = vrot.slane %v1007_v3, 5  ;;  %v968_v19 = vsel %vm2746_vm6, %v963_v5, %v967_v51  ;;  %v2317_v21 = vld [vmem:[%s2716_s28 + $0x34] sm:$0x1]  ;;  %v1015_v22 = vshll.u32 %v2314_v63, 16  ;;  %v1021_v24 = vshll.u32 %v2315_v4, 16 }
  0x37   : > { %2549 = vmatmul.mubr.msk.bf16.vlgmr.msra.gmra.mrb[8].mxu1 %vm219_vm1, %v2642_v38  ;;  %v1004_v20 = vor.u32 %v1003_v8, %v1000_v7  ;;  %v2318_v25 = vld [vmem:[%s2716_s28 + $0x38] sm:$0xf]  ;;  %v982_v26 = vsel %vm2746_vm6, %v977_v10, %v981_v55  ;;  %v991_v27 = vrot.slane %v990_v13, 4  ;;  %v1014_v28 = vrot.slane %v1012_v16, 4  ;;  %v2319_v30 = vld [vmem:[%s2716_s28 + $0x3c] sm:$0x1] }
  0x38   : > { %2552 = vmatprep.mubr.msk.bf16.mxu1 %vm219_vm1, %v2643_v45  ;;  %2567 = vmatpush3.bf16.msra.mxu1 %v1276_v32  ;;  %v1026_v29 = vshrl.u32 %v2316_v9, 16  ;;  %v2323_v31 = vcombine.low %v968_v19, %v982_v26  ;;  %v1017_v33 = vrot.slane %v1015_v22, 5  ;;  %v1023_v35 = vrot.slane %v1021_v24, 5  ;;  %v2320_v23 = vld [vmem:[%s2716_s28 + $0x40] sm:$0xf] }
  0x39   : > { %2623 = vmatprep.subr.msk.bf16.mxu1 %vm277_vm0, %v2818_v17  ;;  %v1005_v32 = vrot.slane %v1004_v20, 4  ;;  %v996_v36 = vsel %vm2746_vm6, %v991_v27, %v995_v6  ;;  %v1029_v17 = vshll.u32 %v2316_v9, 16  ;;  %v1035_v38 = vshll.u32 %v2317_v21, 16  ;;  %v2321_v39 = vld [vmem:[%s2716_s28 + $0x44] sm:$0x1] }
  0x3a   : > { %v1028_v37 = vrot.slane %v1026_v29, 4  ;;  %2558 = vmatprep.mubr.msk.bf16.mxu0 %vm219_vm1, %v2323_v31  ;;  %v1018_v42 = vor.u32 %v1017_v33, %v1014_v28  ;;  %v1040_v43 = vshrl.u32 %v2318_v25, 16  ;;  %v1043_v44 = vshll.u32 %v2318_v25, 16  ;;  %v2331_v45 = vld [vmem:[%s2716_s28 + $0x8] sm:$0xe] }
  0x3b   : > { %v1010_v40 = vsel %vm2746_vm6, %v1005_v32, %v1009_v14  ;;  %v2332_v46 = vld [vmem:[%s2716_s28 + $0xc] sm:$0x1]  ;;  %v2886_v47 = vld [vmem:[%s3177_s1 + $0x20] sm:$0xf]  ;;  %v1031_v49 = vrot.slane %v1029_v17, 5  ;;  %v1037_v50 = vrot.slane %v1035_v38, 5 }
  0x3c   : > { %v2324_v48 = vcombine.low %v996_v36, %v1010_v40  ;;  %v1049_v11 = vshll.u32 %v2319_v30, 16  ;;  %v2333_v51 = vld [vmem:[%s2716_s28 + $0x10] sm:$0xe]  ;;  %v2334_v52 = vld [vmem:[%s2716_s28 + $0x14] sm:$0x1]  ;;  %v1019_v53 = vrot.slane %v1018_v42, 4 }
  0x3d   : > { %v1042_v54 = vrot.slane %v1040_v43, 4  ;;  %v1045_v55 = vrot.slane %v1043_v44, 5  ;;  %v1054_v56 = vshrl.u32 %v2320_v23, 16  ;;  %v2335_v57 = vld [vmem:[%s2716_s28 + $0x18] sm:$0xe]  ;;  %v1032_v58 = vor.u32 %v1031_v49, %v1028_v37 }
  0x3e   : > { %2559 = vmatmul.mubr.msk.bf16.vlgmr.msra.gmra.mrb[16].mxu0 %vm219_vm1, %v2324_v48  ;;  %v1051_v59 = vrot.slane %v1049_v11, 5  ;;  %v1057_v60 = vshll.u32 %v2320_v23, 16  ;;  %v1063_v61 = vshll.u32 %v2321_v39, 16  ;;  %v2336_v62 = vld [vmem:[%s2716_s28 + $0x1c] sm:$0x1]  ;;  %v1024_v63 = vsel %vm2746_vm6, %v1019_v53, %v1023_v35 }
  0x3f   : > { %2553 = vmatmul.mubr.msk.bf16.gmra.mrb[12].mxu1 %vm219_vm1, %v2644_v18  ;;  %2577 = vmatpush3.bf16.msra.mxu0 %v2840_v34  ;;  %v1046_v0 = vor.u32 %v1045_v55, %v1042_v54  ;;  %v1056_v1 = vrot.slane %v1054_v56, 4  ;;  %v2347_v2 = vrot.slane %v2331_v45, 9  ;;  %v2337_v3 = vld [vmem:[%s2716_s28 + $0x20] sm:$0xe]  ;;  %v2338_v4 = vld [vmem:[%s2716_s28 + $0x24] sm:$0x1] }
  0x40   : > { %v1033_v5 = vrot.slane %v1032_v58, 4  ;;  %v1059_v6 = vrot.slane %v1057_v60, 5  ;;  %v1065_v7 = vrot.slane %v1063_v61, 5  ;;  %v1219_v8 = vrot.slane %v2332_v46, 5  ;;  %v2339_v9 = vld [vmem:[%s2716_s28 + $0x28] sm:$0xe]  ;;  %2624 = vmatprep.subr.msk.bf16.mxu0 %vm277_vm0, %v2886_v47 }
  0x41   : > { %v1047_v10 = vrot.slane %v1046_v0, 4  ;;  %v2348_v34 = vrot.slane %v2333_v51, 9  ;;  %v1223_v13 = vrot.slane %v2334_v52, 5  ;;  %v2349_v14 = vrot.slane %v2335_v57, 9  ;;  %v2340_v16 = vld [vmem:[%s2716_s28 + $0x2c] sm:$0x1] }
  0x42   : > { %v1038_v18 = vsel %vm2746_vm6, %v1033_v5, %v1037_v50  ;;  %v1060_v19 = vor.u32 %v1059_v6, %v1056_v1  ;;  %v1220_v20 = vsel %vm2766_vm7, %v2347_v2, %v1219_v8  ;;  %v1227_v21 = vrot.slane %v2336_v62, 5  ;;  %v2341_v22 = vld [vmem:[%s2716_s28 + $0x30] sm:$0xe]  ;;  %v2342_v24 = vld [vmem:[%s2716_s28 + $0x34] sm:$0x1] }
  0x43   : > { %v2325_v25 = vcombine.low %v1024_v63, %v1038_v18  ;;  %v1052_v26 = vsel %vm2746_vm6, %v1047_v10, %v1051_v59  ;;  %v1224_v27 = vsel %vm2766_vm7, %v2348_v34, %v1223_v13  ;;  %v2350_v28 = vrot.slane %v2337_v3, 9  ;;  %v2343_v29 = vld [vmem:[%s2716_s28 + $0x38] sm:$0xe]  ;;  %v2344_v30 = vld [vmem:[%s2716_s28 + $0x3c] sm:$0x1] }
  0x44   : > { %v1061_v31 = vrot.slane %v1060_v19, 4  ;;  %v2356_v32 = vcombine.low %v1220_v20, %v1224_v27  ;;  %v1228_v33 = vsel %vm2766_vm7, %v2349_v14, %v1227_v21  ;;  %v1231_v35 = vrot.slane %v2338_v4, 5  ;;  %v2345_v23 = vld [vmem:[%s2716_s28 + $0x40] sm:$0xe]  ;;  %v2346_v36 = vld [vmem:[%s2716_s28 + $0x44] sm:$0x1] }
  0x45   : > { %2562 = vmatprep.mubr.msk.bf16.mxu0 %vm219_vm1, %v2325_v25  ;;  %v2351_v37 = vrot.slane %v2339_v9, 9  ;;  %v1235_v17 = vrot.slane %v2340_v16, 5  ;;  %v2352_v38 = vrot.slane %v2341_v22, 9  ;;  %v1239_v39 = vrot.slane %v2342_v24, 5  ;;  %v2928_v45 = vld [vmem:[%s3179_s3] sm:$0x3] }
  0x46   : > { %v1066_v40 = vsel %vm2746_vm6, %v1061_v31, %v1065_v7  ;;  %2568 = vmatprep.mubr.msk.bf16.mxu1 %vm219_vm1, %v2356_v32  ;;  %v1232_v42 = vsel %vm2766_vm7, %v2350_v28, %v1231_v35  ;;  %v2353_v43 = vrot.slane %v2343_v29, 9  ;;  %v1243_v44 = vrot.slane %v2344_v30, 5  ;;  %v2645_v11 = vld [vmem:[%s2716_s28 + $0x10] ss:$8 sps:$4 sm:$0xff]   ;;  %v2382_v58 = vld [vmem:[%s2716_s28 + $0x14] sm:$0x1] }
  0x47   : > { %v2326_v46 = vcombine.low %v1052_v26, %v1066_v40  ;;  %v2357_v48 = vcombine.low %v1228_v33, %v1232_v42  ;;  %v1236_v49 = vsel %vm2766_vm7, %v2351_v37, %v1235_v17  ;;  %v1240_v50 = vsel %vm2766_vm7, %v2352_v38, %v1239_v39  ;;  %v2381_v57 = vld [vmem:[%s2716_s28 + $0x10] sm:$0xf]  ;;  %v2646_v59 = vld [vmem:[%s2716_s28 + $0x20] ss:$8 sps:$4 sm:$0xff]   ;;  %v2383_v60 = vld [vmem:[%s2716_s28 + $0x18] sm:$0xf] }
  0x48   : > { %v2358_v51 = vcombine.low %v1236_v49, %v1240_v50  ;;  %v2354_v52 = vrot.slane %v2345_v23, 9  ;;  %v1247_v53 = vrot.slane %v2346_v36, 5  ;;  %v1244_v54 = vsel %vm2766_vm7, %v2353_v43, %v1243_v44  ;;  %v2384_v61 = vld [vmem:[%s2716_s28 + $0x1c] sm:$0x1]  ;;  %v2647_v63 = vld [vmem:[%s2716_s28 + $0x30] ss:$8 sps:$4 sm:$0xff]  }
  0x49   : > { %2563 = vmatmul.mubr.msk.bf16.gmra.mrb[20].mxu0 %vm219_vm1, %v2326_v46  ;;  %2569 = vmatmul.mubr.msk.bf16.vlgmr.msra.gmra.mrb[16].mxu1 %vm219_vm1, %v2357_v48  ;;  %v1839_v56 = vsel %vm277_vm0, %v2886_v47, 0  ;;  %v1522_v62 = vshll.u32 %v2381_v57, 16  ;;  %v1528_v0 = vshll.u32 %v2382_v58, 16  ;;  %v1533_v1 = vshrl.u32 %v2383_v60, 16  ;;  %v2385_v3 = vld [vmem:[%s2716_s28 + $0x20] sm:$0xf] }
  0x4a   : > { %2572 = vmatprep.mubr.msk.bf16.mxu1 %vm219_vm1, %v2358_v51  ;;  %2587 = vmatpush3.bf16.msra.mxu1 %v2844_v12  ;;  %v1248_v55 = vsel %vm2766_vm7, %v2354_v52, %v1247_v53  ;;  %v1519_v12 = vshrl.u32 %v2381_v57, 16  ;;  %v1536_v2 = vshll.u32 %v2383_v60, 16  ;;  %v1542_v47 = vshll.u32 %v2384_v61, 16  ;;  %v2386_v7 = vld [vmem:[%s2716_s28 + $0x24] sm:$0x1] }
  0x4b   : > { %2578 = vmatprep.mubr.msk.bf16.mxu0 %vm219_vm1, %v2645_v11  ;;  %2625 = vmatprep.subr.msk.bf16.mxu1 %vm2085_vm8, %v2928_v45  ;;  %v2359_v4 = vcombine.low %v1244_v54, %v1248_v55  ;;  %v1524_v6 = vrot.slane %v1522_v62, 5  ;;  %v2387_v8 = vld [vmem:[%s2716_s28 + $0x28] sm:$0xf]  ;;  %v1530_v9 = vrot.slane %v1528_v0, 5  ;;  %v1535_v10 = vrot.slane %v1533_v1, 4 }
  0x4c   : > { %v1521_v5 = vrot.slane %v1519_v12, 4  ;;  %v1538_v34 = vrot.slane %v1536_v2, 5  ;;  %v1544_v13 = vrot.slane %v1542_v47, 5  ;;  %v2388_v14 = vld [vmem:[%s2716_s28 + $0x2c] sm:$0x1]  ;;  %v1547_v18 = vshrl.u32 %v2385_v3, 16 }
  0x4d   : > { %v1550_v19 = vshll.u32 %v2385_v3, 16  ;;  %v1556_v20 = vshll.u32 %v2386_v7, 16  ;;  %v2389_v21 = vld [vmem:[%s2716_s28 + $0x30] sm:$0xf]  ;;  %v1561_v24 = vshrl.u32 %v2387_v8, 16  ;;  %v1564_v25 = vshll.u32 %v2387_v8, 16 }
  0x4e   : > { %v1525_v16 = vor.u32 %v1524_v6, %v1521_v5  ;;  %v1539_v22 = vor.u32 %v1538_v34, %v1535_v10  ;;  %v1570_v26 = vshll.u32 %v2388_v14, 16  ;;  %v2390_v27 = vld [vmem:[%s2716_s28 + $0x34] sm:$0x1]  ;;  %v1549_v29 = vrot.slane %v1547_v18, 4  ;;  %v2391_v32 = vld [vmem:[%s2716_s28 + $0x38] sm:$0xf] }
  0x4f   : > { %v1552_v30 = vrot.slane %v1550_v19, 5  ;;  %v1558_v31 = vrot.slane %v1556_v20, 5  ;;  %v1563_v35 = vrot.slane %v1561_v24, 4  ;;  %v1566_v23 = vrot.slane %v1564_v25, 5  ;;  %v2648_v37 = vld [vmem:[%s2716_s28 + $0x40] ss:$8 sps:$4 sm:$0xff]  }
  0x50   : > { %v1526_v28 = vrot.slane %v1525_v16, 4  ;;  %v1540_v33 = vrot.slane %v1539_v22, 4  ;;  %v1572_v36 = vrot.slane %v1570_v26, 5  ;;  %v1575_v39 = vshrl.u32 %v2389_v21, 16  ;;  %v2392_v44 = vld [vmem:[%s2716_s28 + $0x3c] sm:$0x1] }
  0x51   : > { %2573 = vmatmul.mubr.msk.bf16.gmra.mrb[20].mxu1 %vm219_vm1, %v2359_v4  ;;  %2579 = vmatmul.mubr.msk.bf16.vlgmr.msra.gmra.mrb[24].mxu0 %vm219_vm1, %v2646_v59  ;;  %v1553_v38 = vor.u32 %v1552_v30, %v1549_v29  ;;  %v1578_v40 = vshll.u32 %v2389_v21, 16  ;;  %v1567_v43 = vor.u32 %v1566_v23, %v1563_v35  ;;  %v1584_v46 = vshll.u32 %v2390_v27, 16  ;;  %v2393_v49 = vld [vmem:[%s2716_s28 + $0x40] sm:$0xf]  ;;  %v2394_v53 = vld [vmem:[%s2716_s28 + $0x44] sm:$0x1] }
  0x52   : > { %2582 = vmatprep.mubr.msk.bf16.mxu0 %vm219_vm1, %v2647_v63  ;;  %2597 = vmatpush3.bf16.msra.mxu0 %v1839_v56  ;;  %v1531_v17 = vsel %vm2746_vm6, %v1526_v28, %v1530_v9  ;;  %v1545_v42 = vsel %vm2746_vm6, %v1540_v33, %v1544_v13  ;;  %v1589_v48 = vshrl.u32 %v2391_v32, 16  ;;  %v1577_v51 = vrot.slane %v1575_v39, 4  ;;  %v2395_v58 = vld [vmem:[%s2716_s28 + $0x48] sm:$0xf]  ;;  %v2396_v62 = vld [vmem:[%s2716_s28 + $0x4c] sm:$0x1] }
  0x53   : > { %v2398_v50 = vcombine.low %v1531_v17, %v1545_v42  ;;  %v1554_v11 = vrot.slane %v1553_v38, 4  ;;  %v1580_v52 = vrot.slane %v1578_v40, 5  ;;  %v1568_v54 = vrot.slane %v1567_v43, 4  ;;  %v2406_v63 = vld [vmem:[%s2716_s28 + $0x10] sm:$0xe] }
  0x54   : > { %v1586_v55 = vrot.slane %v1584_v46, 5  ;;  %v1591_v56 = vrot.slane %v1589_v48, 4  ;;  %v1592_v57 = vshll.u32 %v2391_v32, 16  ;;  %v1598_v61 = vshll.u32 %v2392_v44, 16  ;;  %v2407_v3 = vld [vmem:[%s2716_s28 + $0x14] sm:$0x1] }
  0x55   : > { %2588 = vmatprep.mubr.msk.bf16.mxu1 %vm219_vm1, %v2398_v50  ;;  %v1559_v59 = vsel %vm2746_vm6, %v1554_v11, %v1558_v31  ;;  %v1581_v60 = vor.u32 %v1580_v52, %v1577_v51  ;;  %v2087_v12 = vsel %vm2085_vm8, %v2928_v45, 0  ;;  %v1573_v0 = vsel %vm2746_vm6, %v1568_v54, %v1572_v36  ;;  %v2408_v4 = vld [vmem:[%s2716_s28 + $0x18] sm:$0xe]  ;;  %v2409_v45 = vld [vmem:[%s2716_s28 + $0x1c] sm:$0x1] }
  0x56   : > { %v1594_v1 = vrot.slane %v1592_v57, 5  ;;  %v1603_v2 = vshrl.u32 %v2393_v49, 16  ;;  %v1606_v47 = vshll.u32 %v2393_v49, 16  ;;  %v2399_v5 = vcombine.low %v1559_v59, %v1573_v0  ;;  %v2410_v9 = vld [vmem:[%s2716_s28 + $0x20] sm:$0xe] }
  0x57   : > { %v1582_v6 = vrot.slane %v1581_v60, 4  ;;  %v1600_v7 = vrot.slane %v1598_v61, 5  ;;  %v1612_v8 = vshll.u32 %v2394_v53, 16  ;;  %v1617_v14 = vshrl.u32 %v2395_v58, 16  ;;  %v2411_v16 = vld [vmem:[%s2716_s28 + $0x24] sm:$0x1] }
  0x58   : > { %v1595_v10 = vor.u32 %v1594_v1, %v1591_v56  ;;  %v1605_v34 = vrot.slane %v1603_v2, 4  ;;  %v1608_v13 = vrot.slane %v1606_v47, 5  ;;  %v1620_v20 = vshll.u32 %v2395_v58, 16  ;;  %v2412_v22 = vld [vmem:[%s2716_s28 + $0x28] sm:$0xe] }
  0x59   : > { %2583 = vmatmul.mubr.msk.bf16.gmra.mrb[28].mxu0 %vm219_vm1, %v2648_v37  ;;  %2589 = vmatmul.mubr.msk.bf16.vlgmr.msra.gmra.mrb[24].mxu1 %vm219_vm1, %v2399_v5  ;;  %v1587_v18 = vsel %vm2746_vm6, %v1582_v6, %v1586_v55  ;;  %v1614_v19 = vrot.slane %v1612_v8, 5  ;;  %v1626_v21 = vshll.u32 %v2396_v62, 16  ;;  %v1619_v26 = vrot.slane %v1617_v14, 4  ;;  %v2413_v28 = vld [vmem:[%s2716_s28 + $0x2c] sm:$0x1] }
  0x5a   : > { %v1596_v24 = vrot.slane %v1595_v10, 4  ;;  %2607 = vmatpush3.bf16.msra.mxu1 %v2087_v12  ;;  %v1609_v25 = vor.u32 %v1608_v13, %v1605_v34  ;;  %v2422_v27 = vrot.slane %v2406_v63, 9  ;;  %v1622_v29 = vrot.slane %v1620_v20, 5  ;;  %v2414_v33 = vld [vmem:[%s2716_s28 + $0x30] sm:$0xe] }
  0x5b   : > { %v1628_v30 = vrot.slane %v1626_v21, 5  ;;  %v1782_v31 = vrot.slane %v2407_v3, 5  ;;  %v2423_v32 = vrot.slane %v2408_v4, 9  ;;  %v1786_v36 = vrot.slane %v2409_v45, 5  ;;  %v2415_v17 = vld [vmem:[%s2716_s28 + $0x34] sm:$0x1] }
  0x5c   : > { %v1601_v35 = vsel %vm2746_vm6, %v1596_v24, %v1600_v7  ;;  %v1610_v23 = vrot.slane %v1609_v25, 4  ;;  %v2424_v37 = vrot.slane %v2410_v9, 9  ;;  %v1623_v39 = vor.u32 %v1622_v29, %v1619_v26  ;;  %v2416_v43 = vld [vmem:[%s2716_s28 + $0x38] sm:$0xe]  ;;  %v2417_v44 = vld [vmem:[%s2716_s28 + $0x3c] sm:$0x1] }
  0x5d   : > { %v2400_v38 = vcombine.low %v1587_v18, %v1601_v35  ;;  %v1783_v40 = vsel %vm2766_vm7, %v2422_v27, %v1782_v31  ;;  %v1790_v42 = vrot.slane %v2411_v16, 5  ;;  %v1787_v48 = vsel %vm2766_vm7, %v2423_v32, %v1786_v36  ;;  %v2418_v11 = vld [vmem:[%s2716_s28 + $0x40] sm:$0xe]  ;;  %v2419_v51 = vld [vmem:[%s2716_s28 + $0x44] sm:$0x1] }
  0x5e   : > { %v1615_v46 = vsel %vm2746_vm6, %v1610_v23, %v1614_v19  ;;  %v2425_v49 = vrot.slane %v2412_v22, 9  ;;  %v1794_v50 = vrot.slane %v2413_v28, 5  ;;  %v1624_v52 = vrot.slane %v1623_v39, 4  ;;  %v2420_v56 = vld [vmem:[%s2716_s28 + $0x48] sm:$0xe] }
  0x5f   : > { %2592 = vmatprep.mubr.msk.bf16.mxu1 %vm219_vm1, %v2400_v38  ;;  %v2431_v53 = vcombine.low %v1783_v40, %v1787_v48  ;;  %v1791_v54 = vsel %vm2766_vm7, %v2424_v37, %v1790_v42  ;;  %v2426_v55 = vrot.slane %v2414_v33, 9  ;;  %v2421_v57 = vld [vmem:[%s2716_s28 + $0x4c] sm:$0x1]  ;;  %v1798_v59 = vrot.slane %v2415_v17, 5  ;;  %v2439_v12 = vld [vmem:[%s3005_s20 + $0x8] sm:$0xf] }
  0x60   : > { %v1795_v58 = vsel %vm2766_vm7, %v2425_v49, %v1794_v50  ;;  %v2427_v60 = vrot.slane %v2416_v43, 9  ;;  %v1802_v61 = vrot.slane %v2417_v44, 5  ;;  %v1629_v62 = vsel %vm2746_vm6, %v1624_v52, %v1628_v30  ;;  %v2440_v2 = vld [vmem:[%s3005_s20 + $0xc] sm:$0x1]  ;;  %v2441_v47 = vld [vmem:[%s3005_s20 + $0x10] sm:$0xf] }
  0x61   : > { %2598 = vmatprep.mubr.msk.bf16.mxu0 %vm219_vm1, %v2431_v53  ;;  %v2432_v63 = vcombine.low %v1791_v54, %v1795_v58  ;;  %v2428_v0 = vrot.slane %v2418_v11, 9  ;;  %v1806_v1 = vrot.slane %v2419_v51, 5  ;;  %v2401_v3 = vcombine.low %v1615_v46, %v1629_v62  ;;  %v2442_v7 = vld [vmem:[%s3005_s20 + $0x14] sm:$0x1]  ;;  %v2443_v8 = vld [vmem:[%s3005_s20 + $0x18] sm:$0xf] }
  0x62   : > { %v1799_v4 = vsel %vm2766_vm7, %v2426_v55, %v1798_v59  ;;  %v1803_v5 = vsel %vm2766_vm7, %v2427_v60, %v1802_v61  ;;  %v2429_v6 = vrot.slane %v2420_v56, 9  ;;  %v1810_v10 = vrot.slane %v2421_v57, 5  ;;  %v2444_v13 = vld [vmem:[%s3005_s20 + $0x1c] sm:$0x1]  ;;  %v2445_v20 = vld [vmem:[%s3005_s20 + $0x20] sm:$0xf] }
  0x63   : > { %2599 = vmatmul.mubr.msk.bf16.vlgmr.msra.gmra.mrb[32].mxu0 %vm219_vm1, %v2432_v63  ;;  %v2433_v45 = vcombine.low %v1799_v4, %v1803_v5  ;;  %v1807_v9 = vsel %vm2766_vm7, %v2428_v0, %v1806_v1  ;;  %v1948_v34 = vshrl.u32 %v2439_v12, 16  ;;  %2593 = vmatmul.mubr.msk.bf16.gmra.mrb[28].mxu1 %vm219_vm1, %v2401_v3  ;;  %v1951_v14 = vshll.u32 %v2439_v12, 16  ;;  %v2446_v25 = vld [vmem:[%s3005_s20 + $0x24] sm:$0x1]  ;;  %v2447_v31 = vld [vmem:[%s3005_s20 + $0x28] sm:$0xf] }
  0x64   : > { %v1957_v16 = vshll.u32 %v2440_v2, 16  ;;  %v1962_v18 = vshrl.u32 %v2441_v47, 16  ;;  %v1965_v19 = vshll.u32 %v2441_v47, 16  ;;  %v1811_v21 = vsel %vm2766_vm7, %v2429_v6, %v1810_v10  ;;  %v2448_v42 = vld [vmem:[%s3005_s20 + $0x2c] sm:$0x1] }
  0x65   : > { %2602 = vmatprep.mubr.msk.bf16.mxu0 %vm219_vm1, %v2433_v45  ;;  %v1950_v22 = vrot.slane %v1948_v34, 4  ;;  %v1971_v24 = vshll.u32 %v2442_v7, 16  ;;  %v1976_v26 = vshrl.u32 %v2443_v8, 16  ;;  %v2434_v27 = vcombine.low %v1807_v9, %v1811_v21  ;;  %v2449_v50 = vld [vmem:[%s3005_s20 + $0x30] sm:$0xf] }
  0x66   : > { %v1953_v28 = vrot.slane %v1951_v14, 5  ;;  %v1959_v29 = vrot.slane %v1957_v16, 5  ;;  %v1964_v30 = vrot.slane %v1962_v18, 4  ;;  %v1967_v32 = vrot.slane %v1965_v19, 5  ;;  %v2450_v56 = vld [vmem:[%s3005_s20 + $0x34] sm:$0x1] }
  0x67   : > { %v1973_v33 = vrot.slane %v1971_v24, 5  ;;  %v1978_v35 = vrot.slane %v1976_v26, 4  ;;  %v1979_v23 = vshll.u32 %v2443_v8, 16  ;;  %v1985_v37 = vshll.u32 %v2444_v13, 16  ;;  %v2451_v62 = vld [vmem:[%s3005_s20 + $0x38] sm:$0xf] }
  0x68   : > { %v1954_v36 = vor.u32 %v1953_v28, %v1950_v22  ;;  %v1990_v15 = vshrl.u32 %v2445_v20, 16  ;;  %v1993_v17 = vshll.u32 %v2445_v20, 16  ;;  %v1968_v38 = vor.u32 %v1967_v32, %v1964_v30  ;;  %v2452_v47 = vld [vmem:[%s3005_s20 + $0x3c] sm:$0x1]  ;;  %v2453_v7 = vld [vmem:[%s3005_s20 + $0x40] sm:$0xf] }
  0x69   : > { %v1981_v39 = vrot.slane %v1979_v23, 5  ;;  %v1999_v40 = vshll.u32 %v2446_v25, 16  ;;  %v2004_v43 = vshrl.u32 %v2447_v31, 16  ;;  %v1987_v46 = vrot.slane %v1985_v37, 5  ;;  %v2454_v9 = vld [vmem:[%s3005_s20 + $0x44] sm:$0x1] }
  0x6a   : > { %v1955_v44 = vrot.slane %v1954_v36, 4  ;;  %v1992_v48 = vrot.slane %v1990_v15, 4  ;;  %v1995_v49 = vrot.slane %v1993_v17, 5  ;;  %v1969_v11 = vrot.slane %v1968_v38, 4 }
  0x6b   : > { %2603 = vmatmul.mubr.msk.bf16.gmra.mrb[36].mxu0 %vm219_vm1, %v2434_v27  ;;  %v1982_v51 = vor.u32 %v1981_v39, %v1978_v35  ;;  %v2001_v52 = vrot.slane %v1999_v40, 5  ;;  %v2006_v53 = vrot.slane %v2004_v43, 4  ;;  %v2007_v57 = vshll.u32 %v2447_v31, 16 }
  0x6c   : > { %v1960_v54 = vsel %vm2746_vm6, %v1955_v44, %v1959_v29  ;;  %v1996_v55 = vor.u32 %v1995_v49, %v1992_v48  ;;  %v2013_v58 = vshll.u32 %v2448_v42, 16  ;;  %v1974_v59 = vsel %vm2746_vm6, %v1969_v11, %v1973_v33 }
  0x6d   : > { %v1983_v60 = vrot.slane %v1982_v51, 4  ;;  %v2018_v61 = vshrl.u32 %v2449_v50, 16  ;;  %v2021_v12 = vshll.u32 %v2449_v50, 16  ;;  %v2455_v63 = vcombine.low %v1960_v54, %v1974_v59 }
  0x6e   : > { %v1997_v0 = vrot.slane %v1996_v55, 4  ;;  %v2009_v1 = vrot.slane %v2007_v57, 5  ;;  %v2015_v2 = vrot.slane %v2013_v58, 5  ;;  %v2027_v6 = vshll.u32 %v2450_v56, 16 }
  0x6f   : > { %v1988_v3 = vsel %vm2746_vm6, %v1983_v60, %v1987_v46  ;;  %v2020_v4 = vrot.slane %v2018_v61, 4  ;;  %v2023_v5 = vrot.slane %v2021_v12, 5  ;;  %2608 = vmatprep.mubr.msk.bf16.mxu1 %vm2072_vm9, %v2455_v63  ;;  %v2032_v10 = vshrl.u32 %v2451_v62, 16 }
  0x70   : > { %v2002_v8 = vsel %vm2746_vm6, %v1997_v0, %v2001_v52  ;;  %v2010_v45 = vor.u32 %v2009_v1, %v2006_v53  ;;  %v2035_v34 = vshll.u32 %v2451_v62, 16  ;;  %v2029_v16 = vrot.slane %v2027_v6, 5 }
  0x71   : > { %v2456_v13 = vcombine.low %v1988_v3, %v2002_v8  ;;  %v2024_v14 = vor.u32 %v2023_v5, %v2020_v4  ;;  %v2041_v18 = vshll.u32 %v2452_v47, 16  ;;  %v2034_v20 = vrot.slane %v2032_v10, 4 }
  0x72   : > { %v2011_v19 = vrot.slane %v2010_v45, 4  ;;  %v2037_v21 = vrot.slane %v2035_v34, 5  ;;  %v2046_v22 = vshrl.u32 %v2453_v7, 16  ;;  %v2049_v25 = vshll.u32 %v2453_v7, 16 }
  0x73   : > { %2609 = vmatmul.mubr.msk.bf16.vlgmr.msra.gmra.mrb[32].mxu1 %vm2072_vm9, %v2456_v13  ;;  %v2025_v24 = vrot.slane %v2024_v14, 4  ;;  %v2055_v26 = vshll.u32 %v2454_v9, 16  ;;  %v2043_v31 = vrot.slane %v2041_v18, 5  ;;  %v2657_v33 = vmov 0.0  }
  0x74   : > { %v2016_v27 = vsel %vm2746_vm6, %v2011_v19, %v2015_v2  ;;  %v2038_v28 = vor.u32 %v2037_v21, %v2034_v20  ;;  %v2048_v29 = vrot.slane %v2046_v22, 4  ;;  %v2051_v32 = vrot.slane %v2049_v25, 5  ;;  %222 = vst.msk [vmem:[#allocation2 + $0x10] sm:$0xff] %vm219_vm1, %v2657_v33  ;;  %220 = vst.msk [vmem:[#allocation2] sm:$0xff] %vm219_vm1, %v2657_v33 }
  0x75   : > { %v2030_v30 = vsel %vm2746_vm6, %v2025_v24, %v2029_v16  ;;  %221 = vst.msk [vmem:[#allocation2 + $0x8] sm:$0xff] %vm219_vm1, %v2657_v33  ;;  %223 = vst.msk [vmem:[#allocation2 + $0x18] sm:$0xff] %vm219_vm1, %v2657_v33  ;;  %v2057_v37 = vrot.slane %v2055_v26, 5 }
  0x76   : > { %224 = vst.msk [vmem:[#allocation2 + $0x20] sm:$0xff] %vm219_vm1, %v2657_v33  ;;  %225 = vst.msk [vmem:[#allocation2 + $0x28] sm:$0xff] %vm219_vm1, %v2657_v33  ;;  %v2457_v35 = vcombine.low %v2016_v27, %v2030_v30  ;;  %v2039_v23 = vrot.slane %v2038_v28, 4  ;;  %v2052_v36 = vor.u32 %v2051_v32, %v2048_v29 }
  0x77   : > { %226 = vst.msk [vmem:[#allocation2 + $0x30] sm:$0xff] %vm219_vm1, %v2657_v33  ;;  %227 = vst.msk [vmem:[#allocation2 + $0x38] sm:$0xff] %vm219_vm1, %v2657_v33 }
  0x78   : > { %2612 = vmatprep.mubr.msk.bf16.mxu1 %vm2072_vm9, %v2457_v35  ;;  %v2044_v15 = vsel %vm2746_vm6, %v2039_v23, %v2043_v31  ;;  %v2053_v17 = vrot.slane %v2052_v36, 4 }
  0x7a   : > { %v2058_v38 = vsel %vm2746_vm6, %v2053_v17, %v2057_v37 }
  0x7b   : > { %v2458_v39 = vcombine.low %v2044_v15, %v2058_v38  ;;  %v238_v40 = vld [vmem:[#allocation2 + $0x10] sm:$0xff]  ;;  %v236_v42 = vld [vmem:[#allocation2] sm:$0xff] }
  0x7c   : > { %v239_v44 = vld [vmem:[#allocation2 + $0x18] sm:$0xff]  ;;  %v237_v49 = vld [vmem:[#allocation2 + $0x8] sm:$0xff] }
  0x7d   : > { %2613 = vmatmul.mubr.msk.bf16.gmra.mrb[36].mxu1 %vm2072_vm9, %v2458_v39  ;;  %v240_v54 = vld [vmem:[#allocation2 + $0x20] sm:$0xff]  ;;  %v241_v59 = vld [vmem:[#allocation2 + $0x28] sm:$0xff] }
  0x7e   : > { %v242_v53 = vld [vmem:[#allocation2 + $0x30] sm:$0xff]  ;;  %v243_v56 = vld [vmem:[#allocation2 + $0x38] sm:$0xff] }
  0xe6   : > { %v2520_v43 = vpop.f32.mrb[0].mxu0 }
  0xe7   : > { %v348_v46 = vadd.f32 %v2520_v43, %v238_v40  ;;  %v315_v48 = vpop.f32.mrb[1].mxu0 }
  0xe8   : > { %v346_v50 = vadd.f32 %v315_v48, %v236_v42  ;;  %v2521_v11 = vpop.f32.mrb[2].mxu0 }
  0xe9   : > { %356 = vst.msk [vmem:[#allocation2 + $0x10] sm:$0xff] %vm219_vm1, %v348_v46  ;;  %v349_v51 = vadd.f32 %v2521_v11, %v239_v44  ;;  %v318_v52 = vpop.f32.mrb[3].mxu0 }
  0xea   : > { %354 = vst.msk [vmem:[#allocation2] sm:$0xff] %vm219_vm1, %v346_v50  ;;  %v347_v41 = vadd.f32 %v318_v52, %v237_v49 }
  0xeb   : > { %357 = vst.msk [vmem:[#allocation2 + $0x18] sm:$0xff] %vm219_vm1, %v349_v51 }
  0xec   : > { %355 = vst.msk [vmem:[#allocation2 + $0x8] sm:$0xff] %vm219_vm1, %v347_v41 }
  0xee   : > { %v2524_v55 = vpop.f32.mrb[4].mxu0 }
  0xef   : > { %v352_v57 = vadd.f32 %v2524_v55, %v242_v53  ;;  %v331_v58 = vpop.f32.mrb[5].mxu0 }
  0xf0   : > { %v350_v60 = vadd.f32 %v331_v58, %v240_v54  ;;  %v2525_v61 = vpop.f32.mrb[6].mxu0  ;;  %v380_v0 = vld [vmem:[#allocation2 + $0x10] sm:$0xff] }
  0xf1   : > { %360 = vst.msk [vmem:[#allocation2 + $0x30] sm:$0xff] %vm219_vm1, %v352_v57  ;;  %v353_v12 = vadd.f32 %v2525_v61, %v243_v56  ;;  %v334_v62 = vpop.f32.mrb[7].mxu0  ;;  %v378_v1 = vld [vmem:[#allocation2] sm:$0xff] }
  0xf2   : > { %358 = vst.msk [vmem:[#allocation2 + $0x20] sm:$0xff] %vm219_vm1, %v350_v60  ;;  %v351_v63 = vadd.f32 %v334_v62, %v241_v59  ;;  %v381_v47 = vld [vmem:[#allocation2 + $0x18] sm:$0xff] }
  0xf3   : > { %361 = vst.msk [vmem:[#allocation2 + $0x38] sm:$0xff] %vm219_vm1, %v353_v12  ;;  %v379_v5 = vld [vmem:[#allocation2 + $0x8] sm:$0xff] }
  0xf4   : > { %359 = vst.msk [vmem:[#allocation2 + $0x28] sm:$0xff] %vm219_vm1, %v351_v63 }
  0xf6   : > { %v2530_v2 = vpop.f32.mrb[0].mxu1 }
  0xf7   : > { %v597_v3 = vadd.f32 %v2530_v2, %v380_v0  ;;  %v564_v4 = vpop.f32.mrb[1].mxu1 }
  0xf8   : > { %v595_v6 = vadd.f32 %v564_v4, %v378_v1  ;;  %v2531_v7 = vpop.f32.mrb[2].mxu1  ;;  %v384_v10 = vld [vmem:[#allocation2 + $0x30] sm:$0xff] }
  0xf9   : > { %605 = vst.msk [vmem:[#allocation2 + $0x10] sm:$0xff] %vm219_vm1, %v597_v3  ;;  %v598_v8 = vadd.f32 %v2531_v7, %v381_v47  ;;  %v567_v45 = vpop.f32.mrb[3].mxu1  ;;  %v382_v16 = vld [vmem:[#allocation2 + $0x20] sm:$0xff] }
  0xfa   : > { %603 = vst.msk [vmem:[#allocation2] sm:$0xff] %vm219_vm1, %v595_v6  ;;  %v596_v9 = vadd.f32 %v567_v45, %v379_v5  ;;  %v385_v22 = vld [vmem:[#allocation2 + $0x38] sm:$0xff] }
  0xfb   : > { %606 = vst.msk [vmem:[#allocation2 + $0x18] sm:$0xff] %vm219_vm1, %v598_v8  ;;  %v383_v29 = vld [vmem:[#allocation2 + $0x28] sm:$0xff] }
  0xfc   : > { %604 = vst.msk [vmem:[#allocation2 + $0x8] sm:$0xff] %vm219_vm1, %v596_v9 }
 0x100   : > { %v629_v34 = vld [vmem:[#allocation2 + $0x10] sm:$0xff]  ;;  %v2540_v13 = vpop.f32.mrb[8].mxu0 }
 0x101   : > { %v782_v14 = vadd.f32 %v2540_v13, %v629_v34  ;;  %v627_v18 = vld [vmem:[#allocation2] sm:$0xff]  ;;  %v749_v19 = vpop.f32.mrb[9].mxu0 }
 0x102   : > { %v2534_v20 = vpop.f32.mrb[4].mxu1  ;;  %v780_v21 = vadd.f32 %v749_v19, %v627_v18  ;;  %v630_v24 = vld [vmem:[#allocation2 + $0x18] sm:$0xff]  ;;  %v2541_v25 = vpop.f32.mrb[10].mxu0 }
 0x103   : > { %v601_v26 = vadd.f32 %v2534_v20, %v384_v10  ;;  %790 = vst.msk [vmem:[#allocation2 + $0x10] sm:$0xff] %vm219_vm1, %v782_v14  ;;  %v580_v27 = vpop.f32.mrb[5].mxu1  ;;  %v783_v28 = vadd.f32 %v2541_v25, %v630_v24  ;;  %v628_v30 = vld [vmem:[#allocation2 + $0x8] sm:$0xff]  ;;  %v752_v31 = vpop.f32.mrb[11].mxu0 }
 0x104   : > { %v599_v32 = vadd.f32 %v580_v27, %v382_v16  ;;  %788 = vst.msk [vmem:[#allocation2] sm:$0xff] %vm219_vm1, %v780_v21  ;;  %v2535_v33 = vpop.f32.mrb[6].mxu1  ;;  %v781_v35 = vadd.f32 %v752_v31, %v628_v30 }
 0x105   : > { %609 = vst.msk [vmem:[#allocation2 + $0x30] sm:$0xff] %vm219_vm1, %v601_v26  ;;  %v602_v23 = vadd.f32 %v2535_v33, %v385_v22  ;;  %791 = vst.msk [vmem:[#allocation2 + $0x18] sm:$0xff] %vm219_vm1, %v783_v28  ;;  %v583_v36 = vpop.f32.mrb[7].mxu1 }
 0x106   : > { %607 = vst.msk [vmem:[#allocation2 + $0x20] sm:$0xff] %vm219_vm1, %v599_v32  ;;  %v600_v37 = vadd.f32 %v583_v36, %v383_v29  ;;  %789 = vst.msk [vmem:[#allocation2 + $0x8] sm:$0xff] %vm219_vm1, %v781_v35 }
 0x107   : > { %610 = vst.msk [vmem:[#allocation2 + $0x38] sm:$0xff] %vm219_vm1, %v602_v23 }
 0x108   : > { %608 = vst.msk [vmem:[#allocation2 + $0x28] sm:$0xff] %vm219_vm1, %v600_v37  ;;  %v2544_v15 = vpop.f32.mrb[12].mxu0 }
 0x109   : > { %v765_v17 = vpop.f32.mrb[13].mxu0 }
 0x10a   : > { %v2545_v38 = vpop.f32.mrb[14].mxu0  ;;  %v807_v39 = vld [vmem:[#allocation2 + $0x10] sm:$0xff]  ;;  %v2550_v40 = vpop.f32.mrb[8].mxu1 }
 0x10b   : > { %v917_v42 = vadd.f32 %v2550_v40, %v807_v39  ;;  %v768_v43 = vpop.f32.mrb[15].mxu0  ;;  %v805_v44 = vld [vmem:[#allocation2] sm:$0xff]  ;;  %v884_v46 = vpop.f32.mrb[9].mxu1 }
 0x10c   : > { %v633_v48 = vld [vmem:[#allocation2 + $0x30] sm:$0xff]  ;;  %v915_v49 = vadd.f32 %v884_v46, %v805_v44  ;;  %v808_v50 = vld [vmem:[#allocation2 + $0x18] sm:$0xff]  ;;  %v2551_v11 = vpop.f32.mrb[10].mxu1 }
 0x10d   : > { %v786_v51 = vadd.f32 %v2544_v15, %v633_v48  ;;  %v631_v52 = vld [vmem:[#allocation2 + $0x20] sm:$0xff]  ;;  %925 = vst.msk [vmem:[#allocation2 + $0x10] sm:$0xff] %vm219_vm1, %v917_v42  ;;  %v918_v41 = vadd.f32 %v2551_v11, %v808_v50  ;;  %v806_v53 = vld [vmem:[#allocation2 + $0x8] sm:$0xff]  ;;  %v887_v54 = vpop.f32.mrb[11].mxu1 }
 0x10e   : > { %v784_v55 = vadd.f32 %v765_v17, %v631_v52  ;;  %v634_v56 = vld [vmem:[#allocation2 + $0x38] sm:$0xff]  ;;  %923 = vst.msk [vmem:[#allocation2] sm:$0xff] %vm219_vm1, %v915_v49  ;;  %v916_v57 = vadd.f32 %v887_v54, %v806_v53 }
 0x10f   : > { %794 = vst.msk [vmem:[#allocation2 + $0x30] sm:$0xff] %vm219_vm1, %v786_v51  ;;  %v787_v58 = vadd.f32 %v2545_v38, %v634_v56  ;;  %v632_v59 = vld [vmem:[#allocation2 + $0x28] sm:$0xff]  ;;  %926 = vst.msk [vmem:[#allocation2 + $0x18] sm:$0xff] %vm219_vm1, %v918_v41 }
 0x110   : > { %792 = vst.msk [vmem:[#allocation2 + $0x20] sm:$0xff] %vm219_vm1, %v784_v55  ;;  %v785_v60 = vadd.f32 %v768_v43, %v632_v59  ;;  %924 = vst.msk [vmem:[#allocation2 + $0x8] sm:$0xff] %vm219_vm1, %v916_v57 }
 0x111   : > { %795 = vst.msk [vmem:[#allocation2 + $0x38] sm:$0xff] %vm219_vm1, %v787_v58  ;;  %v2560_v62 = vpop.f32.mrb[16].mxu0 }
 0x112   : > { %793 = vst.msk [vmem:[#allocation2 + $0x28] sm:$0xff] %vm219_vm1, %v785_v60  ;;  %v2554_v61 = vpop.f32.mrb[12].mxu1  ;;  %v1130_v1 = vpop.f32.mrb[17].mxu0 }
 0x113   : > { %v900_v12 = vpop.f32.mrb[13].mxu1  ;;  %v2561_v4 = vpop.f32.mrb[18].mxu0 }
 0x114   : > { %v2555_v63 = vpop.f32.mrb[14].mxu1  ;;  %v949_v0 = vld [vmem:[#allocation2 + $0x10] sm:$0xff]  ;;  %v1133_v8 = vpop.f32.mrb[19].mxu0 }
 0x115   : > { %v1163_v2 = vadd.f32 %v2560_v62, %v949_v0  ;;  %v903_v47 = vpop.f32.mrb[15].mxu1  ;;  %v947_v3 = vld [vmem:[#allocation2] sm:$0xff] }
 0x116   : > { %v811_v5 = vld [vmem:[#allocation2 + $0x30] sm:$0xff]  ;;  %v1161_v6 = vadd.f32 %v1130_v1, %v947_v3  ;;  %v950_v7 = vld [vmem:[#allocation2 + $0x18] sm:$0xff] }
 0x117   : > { %v921_v45 = vadd.f32 %v2554_v61, %v811_v5  ;;  %v809_v9 = vld [vmem:[#allocation2 + $0x20] sm:$0xff]  ;;  %1171 = vst.msk [vmem:[#allocation2 + $0x10] sm:$0xff] %vm219_vm1, %v1163_v2  ;;  %v1164_v10 = vadd.f32 %v2561_v4, %v950_v7  ;;  %v948_v34 = vld [vmem:[#allocation2 + $0x8] sm:$0xff] }
 0x118   : > { %v919_v13 = vadd.f32 %v900_v12, %v809_v9  ;;  %v812_v14 = vld [vmem:[#allocation2 + $0x38] sm:$0xff]  ;;  %1169 = vst.msk [vmem:[#allocation2] sm:$0xff] %vm219_vm1, %v1161_v6  ;;  %v1162_v16 = vadd.f32 %v1133_v8, %v948_v34 }
 0x119   : > { %929 = vst.msk [vmem:[#allocation2 + $0x30] sm:$0xff] %vm219_vm1, %v921_v45  ;;  %v922_v18 = vadd.f32 %v2555_v63, %v812_v14  ;;  %v810_v19 = vld [vmem:[#allocation2 + $0x28] sm:$0xff]  ;;  %1172 = vst.msk [vmem:[#allocation2 + $0x18] sm:$0xff] %vm219_vm1, %v1164_v10 }
 0x11a   : > { %927 = vst.msk [vmem:[#allocation2 + $0x20] sm:$0xff] %vm219_vm1, %v919_v13  ;;  %v920_v20 = vadd.f32 %v903_v47, %v810_v19  ;;  %1170 = vst.msk [vmem:[#allocation2 + $0x8] sm:$0xff] %vm219_vm1, %v1162_v16 }
 0x11b   : > { %930 = vst.msk [vmem:[#allocation2 + $0x38] sm:$0xff] %vm219_vm1, %v922_v18 }
 0x11c   : > { %928 = vst.msk [vmem:[#allocation2 + $0x28] sm:$0xff] %vm219_vm1, %v920_v20  ;;  %v2564_v21 = vpop.f32.mrb[20].mxu0  ;;  %v2570_v24 = vpop.f32.mrb[16].mxu1 }
 0x11d   : > { %v1146_v25 = vpop.f32.mrb[21].mxu0  ;;  %v1312_v28 = vpop.f32.mrb[17].mxu1 }
 0x11e   : > { %v1195_v22 = vld [vmem:[#allocation2 + $0x10] sm:$0xff]  ;;  %v2565_v30 = vpop.f32.mrb[22].mxu0  ;;  %v2571_v33 = vpop.f32.mrb[18].mxu1 }
 0x11f   : > { %v1345_v26 = vadd.f32 %v2570_v24, %v1195_v22  ;;  %v1193_v27 = vld [vmem:[#allocation2] sm:$0xff]  ;;  %v1149_v36 = vpop.f32.mrb[23].mxu0  ;;  %v1315_v17 = vpop.f32.mrb[19].mxu1 }
 0x120   : > { %v953_v29 = vld [vmem:[#allocation2 + $0x30] sm:$0xff]  ;;  %v1343_v31 = vadd.f32 %v1312_v28, %v1193_v27  ;;  %v1196_v32 = vld [vmem:[#allocation2 + $0x18] sm:$0xff] }
 0x121   : > { %v1167_v35 = vadd.f32 %v2564_v21, %v953_v29  ;;  %v951_v23 = vld [vmem:[#allocation2 + $0x20] sm:$0xff]  ;;  %1353 = vst.msk [vmem:[#allocation2 + $0x10] sm:$0xff] %vm219_vm1, %v1345_v26  ;;  %v1346_v37 = vadd.f32 %v2571_v33, %v1196_v32  ;;  %v1194_v15 = vld [vmem:[#allocation2 + $0x8] sm:$0xff] }
 0x122   : > { %v1165_v38 = vadd.f32 %v1146_v25, %v951_v23  ;;  %v954_v39 = vld [vmem:[#allocation2 + $0x38] sm:$0xff]  ;;  %1351 = vst.msk [vmem:[#allocation2] sm:$0xff] %vm219_vm1, %v1343_v31  ;;  %v1344_v40 = vadd.f32 %v1315_v17, %v1194_v15 }
 0x123   : > { %1175 = vst.msk [vmem:[#allocation2 + $0x30] sm:$0xff] %vm219_vm1, %v1167_v35  ;;  %v1168_v42 = vadd.f32 %v2565_v30, %v954_v39  ;;  %v952_v43 = vld [vmem:[#allocation2 + $0x28] sm:$0xff]  ;;  %1354 = vst.msk [vmem:[#allocation2 + $0x18] sm:$0xff] %vm219_vm1, %v1346_v37 }
 0x124   : > { %1173 = vst.msk [vmem:[#allocation2 + $0x20] sm:$0xff] %vm219_vm1, %v1165_v38  ;;  %v1166_v44 = vadd.f32 %v1149_v36, %v952_v43  ;;  %1352 = vst.msk [vmem:[#allocation2 + $0x8] sm:$0xff] %vm219_vm1, %v1344_v40  ;;  %v2574_v46 = vpop.f32.mrb[20].mxu1  ;;  %v2580_v48 = vpop.f32.mrb[24].mxu0 }
 0x125   : > { %1176 = vst.msk [vmem:[#allocation2 + $0x38] sm:$0xff] %vm219_vm1, %v1168_v42  ;;  %v1328_v49 = vpop.f32.mrb[21].mxu1  ;;  %v1447_v50 = vpop.f32.mrb[25].mxu0 }
 0x126   : > { %1174 = vst.msk [vmem:[#allocation2 + $0x28] sm:$0xff] %vm219_vm1, %v1166_v44  ;;  %v2575_v11 = vpop.f32.mrb[22].mxu1  ;;  %v2581_v52 = vpop.f32.mrb[26].mxu0 }
 0x127   : > { %v1331_v53 = vpop.f32.mrb[23].mxu1  ;;  %v1450_v55 = vpop.f32.mrb[27].mxu0 }
 0x128   : > { %v1370_v51 = vld [vmem:[#allocation2 + $0x10] sm:$0xff] }
 0x129   : > { %v1480_v41 = vadd.f32 %v2580_v48, %v1370_v51  ;;  %v1368_v54 = vld [vmem:[#allocation2] sm:$0xff] }
 0x12a   : > { %v1199_v56 = vld [vmem:[#allocation2 + $0x30] sm:$0xff]  ;;  %v1478_v57 = vadd.f32 %v1447_v50, %v1368_v54  ;;  %v1371_v58 = vld [vmem:[#allocation2 + $0x18] sm:$0xff] }
 0x12b   : > { %v1349_v59 = vadd.f32 %v2574_v46, %v1199_v56  ;;  %v1197_v60 = vld [vmem:[#allocation2 + $0x20] sm:$0xff]  ;;  %1488 = vst.msk [vmem:[#allocation2 + $0x10] sm:$0xff] %vm219_vm1, %v1480_v41  ;;  %v1481_v61 = vadd.f32 %v2581_v52, %v1371_v58  ;;  %v1369_v12 = vld [vmem:[#allocation2 + $0x8] sm:$0xff] }
 0x12c   : > { %v1347_v62 = vadd.f32 %v1328_v49, %v1197_v60  ;;  %v1200_v63 = vld [vmem:[#allocation2 + $0x38] sm:$0xff]  ;;  %1486 = vst.msk [vmem:[#allocation2] sm:$0xff] %vm219_vm1, %v1478_v57  ;;  %v1479_v0 = vadd.f32 %v1450_v55, %v1369_v12  ;;  %v2584_v3 = vpop.f32.mrb[28].mxu0  ;;  %v2590_v6 = vpop.f32.mrb[24].mxu1 }
 0x12d   : > { %1357 = vst.msk [vmem:[#allocation2 + $0x30] sm:$0xff] %vm219_vm1, %v1349_v59  ;;  %v1350_v1 = vadd.f32 %v2575_v11, %v1200_v63  ;;  %v1198_v2 = vld [vmem:[#allocation2 + $0x28] sm:$0xff]  ;;  %1489 = vst.msk [vmem:[#allocation2 + $0x18] sm:$0xff] %vm219_vm1, %v1481_v61  ;;  %v1463_v4 = vpop.f32.mrb[29].mxu0  ;;  %v1693_v8 = vpop.f32.mrb[25].mxu1 }
 0x12e   : > { %1355 = vst.msk [vmem:[#allocation2 + $0x20] sm:$0xff] %vm219_vm1, %v1347_v62  ;;  %v1348_v47 = vadd.f32 %v1331_v53, %v1198_v2  ;;  %1487 = vst.msk [vmem:[#allocation2 + $0x8] sm:$0xff] %vm219_vm1, %v1479_v0  ;;  %v2585_v5 = vpop.f32.mrb[30].mxu0  ;;  %v2591_v9 = vpop.f32.mrb[26].mxu1 }
 0x12f   : > { %1358 = vst.msk [vmem:[#allocation2 + $0x38] sm:$0xff] %vm219_vm1, %v1350_v1  ;;  %v1466_v7 = vpop.f32.mrb[31].mxu0  ;;  %v1696_v13 = vpop.f32.mrb[27].mxu1 }
 0x130   : > { %1356 = vst.msk [vmem:[#allocation2 + $0x28] sm:$0xff] %vm219_vm1, %v1348_v47 }
 0x132   : > { %v1512_v45 = vld [vmem:[#allocation2 + $0x10] sm:$0xff] }
 0x133   : > { %v1726_v10 = vadd.f32 %v2590_v6, %v1512_v45  ;;  %v1510_v34 = vld [vmem:[#allocation2] sm:$0xff] }
 0x134   : > { %v1374_v14 = vld [vmem:[#allocation2 + $0x30] sm:$0xff]  ;;  %v1724_v16 = vadd.f32 %v1693_v8, %v1510_v34  ;;  %v1513_v18 = vld [vmem:[#allocation2 + $0x18] sm:$0xff] }
 0x135   : > { %v1484_v19 = vadd.f32 %v2584_v3, %v1374_v14  ;;  %v1372_v20 = vld [vmem:[#allocation2 + $0x20] sm:$0xff]  ;;  %1734 = vst.msk [vmem:[#allocation2 + $0x10] sm:$0xff] %vm219_vm1, %v1726_v10  ;;  %v1727_v21 = vadd.f32 %v2591_v9, %v1513_v18  ;;  %v1511_v22 = vld [vmem:[#allocation2 + $0x8] sm:$0xff] }
 0x136   : > { %v1482_v24 = vadd.f32 %v1463_v4, %v1372_v20  ;;  %v1375_v25 = vld [vmem:[#allocation2 + $0x38] sm:$0xff]  ;;  %1732 = vst.msk [vmem:[#allocation2] sm:$0xff] %vm219_vm1, %v1724_v16  ;;  %v1725_v26 = vadd.f32 %v1696_v13, %v1511_v22  ;;  %v2600_v30 = vpop.f32.mrb[32].mxu0  ;;  %v2594_v31 = vpop.f32.mrb[28].mxu1 }
 0x137   : > { %1492 = vst.msk [vmem:[#allocation2 + $0x30] sm:$0xff] %vm219_vm1, %v1484_v19  ;;  %v1485_v27 = vadd.f32 %v2585_v5, %v1375_v25  ;;  %v1373_v28 = vld [vmem:[#allocation2 + $0x28] sm:$0xff]  ;;  %1735 = vst.msk [vmem:[#allocation2 + $0x18] sm:$0xff] %vm219_vm1, %v1727_v21  ;;  %v1875_v32 = vpop.f32.mrb[33].mxu0  ;;  %v1709_v33 = vpop.f32.mrb[29].mxu1 }
 0x138   : > { %1490 = vst.msk [vmem:[#allocation2 + $0x20] sm:$0xff] %vm219_vm1, %v1482_v24  ;;  %v1483_v29 = vadd.f32 %v1466_v7, %v1373_v28  ;;  %1733 = vst.msk [vmem:[#allocation2 + $0x8] sm:$0xff] %vm219_vm1, %v1725_v26  ;;  %v2601_v23 = vpop.f32.mrb[34].mxu0  ;;  %v2595_v36 = vpop.f32.mrb[30].mxu1 }
 0x139   : > { %1493 = vst.msk [vmem:[#allocation2 + $0x38] sm:$0xff] %vm219_vm1, %v1485_v27  ;;  %v1878_v17 = vpop.f32.mrb[35].mxu0  ;;  %v1712_v39 = vpop.f32.mrb[31].mxu1 }
 0x13a   : > { %1491 = vst.msk [vmem:[#allocation2 + $0x28] sm:$0xff] %vm219_vm1, %v1483_v29 }
 0x13c   : > { %v1758_v35 = vld [vmem:[#allocation2 + $0x10] sm:$0xff] }
 0x13d   : > { %v1908_v37 = vadd.f32 %v2600_v30, %v1758_v35  ;;  %v1756_v15 = vld [vmem:[#allocation2] sm:$0xff] }
 0x13e   : > { %v1516_v38 = vld [vmem:[#allocation2 + $0x30] sm:$0xff]  ;;  %v1906_v40 = vadd.f32 %v1875_v32, %v1756_v15  ;;  %v1759_v42 = vld [vmem:[#allocation2 + $0x18] sm:$0xff]  ;;  %v2604_v53 = vpop.f32.mrb[36].mxu0 }
 0x13f   : > { %v1730_v43 = vadd.f32 %v2594_v31, %v1516_v38  ;;  %v1514_v44 = vld [vmem:[#allocation2 + $0x20] sm:$0xff]  ;;  %1916 = vst.msk [vmem:[#allocation2 + $0x10] sm:$0xff] %vm219_vm1, %v1908_v37  ;;  %v1909_v46 = vadd.f32 %v2601_v23, %v1759_v42  ;;  %v1757_v48 = vld [vmem:[#allocation2 + $0x8] sm:$0xff]  ;;  %v1891_v54 = vpop.f32.mrb[37].mxu0 }
 0x140   : > { %v1728_v49 = vadd.f32 %v1709_v33, %v1514_v44  ;;  %v1517_v50 = vld [vmem:[#allocation2 + $0x38] sm:$0xff]  ;;  %1914 = vst.msk [vmem:[#allocation2] sm:$0xff] %vm219_vm1, %v1906_v40  ;;  %v1907_v11 = vadd.f32 %v1878_v17, %v1757_v48  ;;  %v2605_v55 = vpop.f32.mrb[38].mxu0 }
 0x141   : > { %1738 = vst.msk [vmem:[#allocation2 + $0x30] sm:$0xff] %vm219_vm1, %v1730_v43  ;;  %v1731_v51 = vadd.f32 %v2595_v36, %v1517_v50  ;;  %v1515_v52 = vld [vmem:[#allocation2 + $0x28] sm:$0xff]  ;;  %1917 = vst.msk [vmem:[#allocation2 + $0x18] sm:$0xff] %vm219_vm1, %v1909_v46  ;;  %v1894_v56 = vpop.f32.mrb[39].mxu0 }
 0x142   : > { %1736 = vst.msk [vmem:[#allocation2 + $0x20] sm:$0xff] %vm219_vm1, %v1728_v49  ;;  %v1729_v41 = vadd.f32 %v1712_v39, %v1515_v52  ;;  %1915 = vst.msk [vmem:[#allocation2 + $0x8] sm:$0xff] %vm219_vm1, %v1907_v11 }
 0x143   : > { %1739 = vst.msk [vmem:[#allocation2 + $0x38] sm:$0xff] %vm219_vm1, %v1731_v51 }
 0x144   : > { %1737 = vst.msk [vmem:[#allocation2 + $0x28] sm:$0xff] %vm219_vm1, %v1729_v41 }
 0x146   : > { %v1924_v58 = vld [vmem:[#allocation2 + $0x10] sm:$0xff]  ;;  %v2610_v63 = vpop.f32.mrb[32].mxu1 }
 0x147   : > { %v1922_v61 = vld [vmem:[#allocation2] sm:$0xff]  ;;  %v2156_v2 = vadd.f32 %v2610_v63, %v1924_v58  ;;  %v2123_v3 = vpop.f32.mrb[33].mxu1 }
 0x148   : > { %v1762_v57 = vld [vmem:[#allocation2 + $0x30] sm:$0xff]  ;;  %v1925_v0 = vld [vmem:[#allocation2 + $0x18] sm:$0xff]  ;;  %v2154_v6 = vadd.f32 %v2123_v3, %v1922_v61  ;;  %v2611_v7 = vpop.f32.mrb[34].mxu1 }
 0x149   : > { %v1912_v59 = vadd.f32 %v2604_v53, %v1762_v57  ;;  %v1760_v60 = vld [vmem:[#allocation2 + $0x20] sm:$0xff]  ;;  %v1923_v4 = vld [vmem:[#allocation2 + $0x8] sm:$0xff]  ;;  %v2164_v8 = vpack.c.bf16 %v2156_v2, %v2156_v2  ;;  %v2157_v45 = vadd.f32 %v2611_v7, %v1925_v0  ;;  %v2126_v9 = vpop.f32.mrb[35].mxu1 }
 0x14a   : > { %v1910_v12 = vadd.f32 %v1891_v54, %v1760_v60  ;;  %v1763_v62 = vld [vmem:[#allocation2 + $0x38] sm:$0xff]  ;;  %v2162_v10 = vpack.c.bf16 %v2154_v6, %v2154_v6  ;;  %v2155_v34 = vadd.f32 %v2126_v9, %v1923_v4 }
 0x14b   : > { %1920 = vst.msk [vmem:[#allocation2 + $0x30] sm:$0xff] %vm219_vm1, %v1912_v59  ;;  %v1913_v1 = vadd.f32 %v2605_v55, %v1763_v62  ;;  %v1761_v47 = vld [vmem:[#allocation2 + $0x28] sm:$0xff]  ;;  %v2165_v13 = vpack.c.bf16 %v2157_v45, %v2157_v45 }
 0x14c   : > { %1918 = vst.msk [vmem:[#allocation2 + $0x20] sm:$0xff] %vm219_vm1, %v1910_v12  ;;  %v1911_v5 = vadd.f32 %v1894_v56, %v1761_v47  ;;  %v2163_v14 = vpack.c.bf16 %v2155_v34, %v2155_v34 }
 0x14d   : > { %1921 = vst.msk [vmem:[#allocation2 + $0x38] sm:$0xff] %vm219_vm1, %v1913_v1 }
 0x14e   : > { %1919 = vst.msk [vmem:[#allocation2 + $0x28] sm:$0xff] %vm219_vm1, %v1911_v5 }
 0x14f   : > { %2173 = vst.msk [vmem:[%s3153_s24 + $0x8] sm:$0xf] %vm2170_vm10, %v2164_v8  ;;  %2171 = vst.msk [vmem:[%s3153_s24] sm:$0xf] %vm2170_vm10, %v2162_v10 }
 0x150   : > { %2174 = vst.msk [vmem:[%s3153_s24 + $0xc] sm:$0xf] %vm2170_vm10, %v2165_v13  ;;  %2172 = vst.msk [vmem:[%s3153_s24 + $0x4] sm:$0xf] %vm2170_vm10, %v2163_v14  ;;  %v2614_v19 = vpop.f32.mrb[36].mxu1 }
 0x151   : > { %v2139_v22 = vpop.f32.mrb[37].mxu1 }
 0x152   : > { %v1928_v16 = vld [vmem:[#allocation2 + $0x30] sm:$0xff]  ;;  %v2615_v26 = vpop.f32.mrb[38].mxu1 }
 0x153   : > { %v1926_v18 = vld [vmem:[#allocation2 + $0x20] sm:$0xff]  ;;  %v2160_v21 = vadd.f32 %v2614_v19, %v1928_v16  ;;  %v2142_v29 = vpop.f32.mrb[39].mxu1 }
 0x154   : > { %v1929_v20 = vld [vmem:[#allocation2 + $0x38] sm:$0xff]  ;;  %v2158_v25 = vadd.f32 %v2139_v22, %v1926_v18 }
 0x155   : > { %v1927_v24 = vld [vmem:[#allocation2 + $0x28] sm:$0xff]  ;;  %v2168_v27 = vpack.c.bf16 %v2160_v21, %v2160_v21  ;;  %v2161_v28 = vadd.f32 %v2615_v26, %v1929_v20 }
 0x156   : > { %v2166_v30 = vpack.c.bf16 %v2158_v25, %v2158_v25  ;;  %v2159_v31 = vadd.f32 %v2142_v29, %v1927_v24 }
 0x157   : > { %2177 = vst.msk [vmem:[%s3153_s24 + $0x18] sm:$0xf] %vm2170_vm10, %v2168_v27  ;;  %v2169_v32 = vpack.c.bf16 %v2161_v28, %v2161_v28 }
 0x158   : > { %2175 = vst.msk [vmem:[%s3153_s24 + $0x10] sm:$0xf] %vm2170_vm10, %v2166_v30  ;;  %v2167_v33 = vpack.c.bf16 %v2159_v31, %v2159_v31 }
 0x159   : > { %2178 = vst.msk [vmem:[%s3153_s24 + $0x1c] sm:$0xf] %vm2170_vm10, %v2169_v32 }
 0x15a   : > { %2176 = vst.msk [vmem:[%s3153_s24 + $0x14] sm:$0xf] %vm2170_vm10, %v2167_v33 }
 0x15b PF: > { %s14_s15 = sadd.s32 1, %s2655_s15  }
 0x15c   : > { %p11_p4 = scmp.ge.s32.totalorder %s14_s15, 4  }
 0x15e   :  { %13 = sbr.rel (!%p11_p4) target bundleno = 1 (0x1), region = 80 }

// kernel: _lambda_.7
= control target key start
LH: loop header
LB: loop body
LE: loop exit
PB: predicated region body
PF: predicated region fallthrough
CT: control target
= control target key end

     0   :  { %s2426_s12 = smov 0   ;;  %s2885_s0 = inlined_call_operand.vmem [shape: bf16[2,1,1,10,10,8], index: 0, kind: input, shape index: {}]   ;;  %s2886_s1 = inlined_call_operand.vmem [shape: bf16[3,3,8,8], index: 1, kind: input, shape index: {}]   ;;  %s2887_s2 = inlined_call_operand.vmem [shape: bf16[2,8,8,8], index: 2, kind: input, shape index: {}]   ;;  %s2888_s3 = inlined_call_operand.vmem [shape: bf16[2,8,8,8], index: 3, kind: output, shape index: {}]  }
   0x1 LB: > { %s2011_s13 = sadd.s32 4294967295, %s2403_s12   ;;  %p2015_p0 = scmp.ge.s32.totalorder %s2403_s12, 1  ;;  %s2403_s12 = sphi %s2426_s12, %s13_s12  }
   0x2   : > { %p147_p1 = scmp.lt.s32.totalorder %s2403_s12, 3 }
   0x4   : > { %p148_p2 = pnand %p2015_p0, %p147_p1 }
   0x5   : > { %v217_v0 = vld [vmem:[%s2886_s1] sm:$0xf] (!%p148_p2)  ;;  %vm250_vm0 = vcmask (!%p148_p2), 1043456   ;;  %p176_p3 = scmp.lt.s32.totalorder (!%p148_p2), %s2011_s13, 1  ;;  %v2029_v2 = vld [vmem:[%s2886_s1 + $0x4] sm:$0xf] (!%p148_p2) }
   0x6   : > { %151 = sbr.rel (%p148_p2) target bundleno = 350 (0x15e), region = 32  ;;  %2365 = vmatprep.subr.msk.bf16.mxu0 (!%p148_p2), %vm250_vm0, %v217_v0  ;;  %2366 = vmatprep.subr.msk.bf16.mxu1 (!%p148_p2), %vm250_vm0, %v217_v0  ;;  %v252_v1 = vsel (!%p148_p2), %vm250_vm0, %v217_v0, 0  ;;  %v2046_v3 = vld [vmem:[%s2886_s1 + $0x8] sm:$0xf] (!%p148_p2)  ;;  %vm192_vm1 = vcmask (!%p148_p2), 64512   ;;  %v2405_v6 = vmov (!%p148_p2), 0.0  }
   0x7   : > { %2274 = vmatpush3.bf16.msra.mxu0 (!%p148_p2), %v252_v1  ;;  %2364 = vmatpush3.bf16.msra.mxu1 (!%p148_p2), %v252_v1  ;;  %v2063_v4 = vld [vmem:[%s2886_s1 + $0xc] sm:$0xf] (!%p148_p2)  ;;  %v2088_v5 = vld [vmem:[%s2886_s1 + $0x10] sm:$0xf] (!%p148_p2)  ;;  %195 = vst.msk [vmem:[#allocation2 + $0x10] sm:$0xff] (!%p148_p2), %vm192_vm1, %v2405_v6  ;;  %193 = vst.msk [vmem:[#allocation2] sm:$0xff] (!%p148_p2), %vm192_vm1, %v2405_v6 }
   0x8   : > { %2367 = vmatprep.subr.msk.bf16.mxu1 (!%p148_p2), %vm250_vm0, %v2029_v2  ;;  %2368 = vmatprep.subr.msk.bf16.mxu0 (!%p148_p2), %vm250_vm0, %v2046_v3  ;;  %194 = vst.msk [vmem:[#allocation2 + $0x8] sm:$0xff] (!%p148_p2), %vm192_vm1, %v2405_v6  ;;  %196 = vst.msk [vmem:[#allocation2 + $0x18] sm:$0xff] (!%p148_p2), %vm192_vm1, %v2405_v6  ;;  %v501_v7 = vsel (!%p148_p2), %vm250_vm0, %v2029_v2, 0  ;;  %vm359_vm2 = vsmask.f32 (!%p148_p2), 3328  ;;  %v686_v8 = vsel (!%p148_p2), %vm250_vm0, %v2046_v3, 0 }
   0x9   : > { %197 = vst.msk [vmem:[#allocation2 + $0x20] sm:$0xff] (!%p148_p2), %vm192_vm1, %v2405_v6  ;;  %198 = vst.msk [vmem:[#allocation2 + $0x28] sm:$0xff] (!%p148_p2), %vm192_vm1, %v2405_v6  ;;  %vm360_vm3 = vsmask.f32 (!%p148_p2), 7440  ;;  %v2473_v9 = vsel (!%p148_p2), %vm250_vm0, %v2063_v4, 0  ;;  %v2476_v10 = vsel (!%p148_p2), %vm250_vm0, %v2088_v5, 0 }
   0xa   : > { %199 = vst.msk [vmem:[#allocation2 + $0x30] sm:$0xff] (!%p148_p2), %vm192_vm1, %v2405_v6  ;;  %200 = vst.msk [vmem:[#allocation2 + $0x38] sm:$0xff] (!%p148_p2), %vm192_vm1, %v2405_v6  ;;  %vm624_vm4 = vcmask (!%p148_p2), 1042432   ;;  %vm625_vm5 = vcmask (!%p148_p2), 1046532   ;;  %v2500_v42 = vld [vmem:[%s2886_s1 + $0x14] sm:$0xf] (!%p148_p2) }
   0xb   : > { %vm2504_vm6 = vmor (!%p148_p2), %vm359_vm2, %vm360_vm3  ;;  %v2526_v6 = vsel (!%p148_p2), %vm250_vm0, %v2500_v42, 0  ;;  %vm1935_vm8 = vcmask (!%p148_p2), 60416  }
   0xc   : > { %vm2513_vm7 = vmor (!%p148_p2), %vm624_vm4, %vm625_vm5 }
   0xd   : > { %s2894_s13 = smov (!%p176_p3, %s2011_s13), 1 }
   0xe   : > { %s2375_s24 = smul.u32 80, %s2894_s13  ;;  %s2207_s9 = sshll.u32 %s2894_s13, 5 }
   0xf   : > { %s2841_s14 = scalar_lea.vmem %s2887_s2, %s2207_s9  ;;  %s2858_s17 = scalar_lea.vmem %s2888_s3, %s2207_s9 }
  0x10   : > { %s2469_s27 = scalar_lea.vmem %s2885_s0, %s2375_s24 }
  0x11   : > { %v2385_v11 = vld [vmem:[%s2469_s27] ss:$8 sps:$4 sm:$0xff]   ;;  %v2387_v13 = vld [vmem:[%s2469_s27 + $0x10] ss:$8 sps:$4 sm:$0xff]   ;;  %v336_v16 = vld [vmem:[%s2469_s27 + $0x4] sm:$0x1] }
  0x12   : > { %v2386_v12 = vld [vmem:[%s2469_s27 + $0x20] ss:$8 sps:$4 sm:$0xff]   ;;  %2275 = vmatprep.mubr.msk.bf16.mxu0 %vm192_vm1, %v2385_v11  ;;  %v2388_v14 = vld [vmem:[%s2469_s27 + $0x30] ss:$8 sps:$4 sm:$0xff]   ;;  %v338_v18 = vld [vmem:[%s2469_s27 + $0xc] sm:$0x1] }
  0x13   : > { %2279 = vmatprep.mubr.msk.bf16.mxu1 %vm192_vm1, %v2386_v12  ;;  %2276 = vmatmul.mubr.msk.bf16.vlgmr.msra.gmra.mrb[0].mxu0 %vm192_vm1, %v2387_v13  ;;  %v335_v15 = vld [vmem:[%s2469_s27] sm:$0xf]  ;;  %v337_v17 = vld [vmem:[%s2469_s27 + $0x8] sm:$0xf]  ;;  %v372_v21 = vshll.u32 %v336_v16, 16  ;;  %v386_v24 = vshll.u32 %v338_v18, 16 }
  0x14   : > { %2280 = vmatmul.mubr.msk.bf16.vlgmr.msra.gmra.mrb[0].mxu1 %vm192_vm1, %v2388_v14  ;;  %v363_v19 = vshrl.u32 %v335_v15, 16  ;;  %v366_v20 = vshll.u32 %v335_v15, 16  ;;  %v377_v22 = vshrl.u32 %v337_v17, 16  ;;  %2294 = vmatpush3.bf16.msra.mxu0 %v686_v8  ;;  %v380_v23 = vshll.u32 %v337_v17, 16  ;;  %v339_v25 = vld [vmem:[%s2469_s27 + $0x10] sm:$0xf] }
  0x15   : > { %2284 = vmatpush3.bf16.msra.mxu1 %v501_v7  ;;  %v340_v26 = vld [vmem:[%s2469_s27 + $0x14] sm:$0x1]  ;;  %2370 = vmatprep.subr.msk.bf16.mxu0 %vm250_vm0, %v2088_v5  ;;  %v374_v29 = vrot.slane %v372_v21, 5  ;;  %v341_v31 = vld [vmem:[%s2469_s27 + $0x18] sm:$0xf]  ;;  %v388_v33 = vrot.slane %v386_v24, 5 }
  0x16   : > { %v365_v27 = vrot.slane %v363_v19, 4  ;;  %v368_v28 = vrot.slane %v366_v20, 5  ;;  %v379_v30 = vrot.slane %v377_v22, 4  ;;  %2369 = vmatprep.subr.msk.bf16.mxu1 %vm250_vm0, %v2063_v4  ;;  %v382_v32 = vrot.slane %v380_v23, 5  ;;  %v342_v34 = vld [vmem:[%s2469_s27 + $0x1c] sm:$0x1] }
  0x17   : > { %v391_v35 = vshrl.u32 %v339_v25, 16  ;;  %v394_v36 = vshll.u32 %v339_v25, 16  ;;  %v400_v38 = vshll.u32 %v340_v26, 16  ;;  %v405_v39 = vshrl.u32 %v341_v31, 16  ;;  %v584_v41 = vld [vmem:[%s2469_s27] sm:$0xe] }
  0x18   : > { %v369_v37 = vor.u32 %v368_v28, %v365_v27  ;;  %v408_v40 = vshll.u32 %v341_v31, 16  ;;  %v383_v44 = vor.u32 %v382_v32, %v379_v30  ;;  %v414_v47 = vshll.u32 %v342_v34, 16  ;;  %v585_v48 = vld [vmem:[%s2469_s27 + $0x4] sm:$0x1]  ;;  %v586_v53 = vld [vmem:[%s2469_s27 + $0x8] sm:$0xe] }
  0x19   : > { %v393_v45 = vrot.slane %v391_v35, 4  ;;  %v396_v46 = vrot.slane %v394_v36, 5  ;;  %v402_v50 = vrot.slane %v400_v38, 5  ;;  %v407_v51 = vrot.slane %v405_v39, 4  ;;  %v587_v57 = vld [vmem:[%s2469_s27 + $0xc] sm:$0x1] }
  0x1a   : > { %v370_v49 = vrot.slane %v369_v37, 4  ;;  %v410_v52 = vrot.slane %v408_v40, 5  ;;  %v384_v54 = vrot.slane %v383_v44, 4  ;;  %v416_v56 = vrot.slane %v414_v47, 5  ;;  %v343_v0 = vld [vmem:[%s2469_s27 + $0x20] sm:$0xf] }
  0x1b   : > { %v397_v55 = vor.u32 %v396_v46, %v393_v45  ;;  %v2038_v59 = vrot.slane %v584_v41, 9  ;;  %v629_v62 = vrot.slane %v585_v48, 5  ;;  %v2039_v63 = vrot.slane %v586_v53, 9  ;;  %v344_v1 = vld [vmem:[%s2469_s27 + $0x24] sm:$0x1] }
  0x1c   : > { %v375_v60 = vsel %vm2504_vm6, %v370_v49, %v374_v29  ;;  %v411_v61 = vor.u32 %v410_v52, %v407_v51  ;;  %v389_v2 = vsel %vm2504_vm6, %v384_v54, %v388_v33  ;;  %v633_v4 = vrot.slane %v587_v57, 5  ;;  %v345_v5 = vld [vmem:[%s2469_s27 + $0x28] sm:$0xf]  ;;  %v346_v12 = vld [vmem:[%s2469_s27 + $0x2c] sm:$0x1] }
  0x1d   : > { %v398_v3 = vrot.slane %v397_v55, 4  ;;  %v2030_v7 = vcombine.low %v375_v60, %v389_v2  ;;  %v630_v11 = vsel %vm2513_vm7, %v2038_v59, %v629_v62  ;;  %v419_v13 = vshrl.u32 %v343_v0, 16  ;;  %v588_v14 = vld [vmem:[%s2469_s27 + $0x10] sm:$0xe]  ;;  %v589_v19 = vld [vmem:[%s2469_s27 + $0x14] sm:$0x1] }
  0x1e   : > { %v412_v8 = vrot.slane %v411_v61, 4  ;;  %v634_v16 = vsel %vm2513_vm7, %v2039_v63, %v633_v4  ;;  %v422_v17 = vshll.u32 %v343_v0, 16  ;;  %v428_v18 = vshll.u32 %v344_v1, 16  ;;  %v590_v20 = vld [vmem:[%s2469_s27 + $0x18] sm:$0xe] }
  0x1f   : > { %v403_v15 = vsel %vm2504_vm6, %v398_v3, %v402_v50  ;;  %2285 = vmatprep.mubr.msk.bf16.mxu1 %vm192_vm1, %v2030_v7  ;;  %v2047_v22 = vcombine.low %v630_v11, %v634_v16  ;;  %v421_v23 = vrot.slane %v419_v13, 4  ;;  %v433_v24 = vshrl.u32 %v345_v5, 16  ;;  %v591_v25 = vld [vmem:[%s2469_s27 + $0x1c] sm:$0x1]  ;;  %v347_v26 = vld [vmem:[%s2469_s27 + $0x30] sm:$0xf] }
  0x20   : > { %v417_v21 = vsel %vm2504_vm6, %v412_v8, %v416_v56  ;;  %v424_v28 = vrot.slane %v422_v17, 5  ;;  %v430_v29 = vrot.slane %v428_v18, 5  ;;  %v436_v30 = vshll.u32 %v345_v5, 16  ;;  %v348_v31 = vld [vmem:[%s2469_s27 + $0x34] sm:$0x1] }
  0x21   : > { %v2031_v27 = vcombine.low %v403_v15, %v417_v21  ;;  %2295 = vmatprep.mubr.msk.bf16.mxu0 %vm192_vm1, %v2047_v22  ;;  %v435_v32 = vrot.slane %v433_v24, 4  ;;  %v442_v33 = vshll.u32 %v346_v12, 16  ;;  %v2040_v34 = vrot.slane %v588_v14, 9  ;;  %v349_v36 = vld [vmem:[%s2469_s27 + $0x38] sm:$0xf] }
  0x22   : > { %v637_v35 = vrot.slane %v589_v19, 5  ;;  %v425_v37 = vor.u32 %v424_v28, %v421_v23  ;;  %v438_v38 = vrot.slane %v436_v30, 5  ;;  %v2041_v39 = vrot.slane %v590_v20, 9  ;;  %v350_v41 = vld [vmem:[%s2469_s27 + $0x3c] sm:$0x1] }
  0x23   : > { %2286 = vmatmul.mubr.msk.bf16.vlgmr.msra.gmra.mrb[4].mxu1 %vm192_vm1, %v2031_v27  ;;  %v641_v40 = vrot.slane %v591_v25, 5  ;;  %v592_v44 = vld [vmem:[%s2469_s27 + $0x20] sm:$0xe]  ;;  %v444_v45 = vrot.slane %v442_v33, 5  ;;  %v447_v47 = vshrl.u32 %v347_v26, 16  ;;  %v450_v48 = vshll.u32 %v347_v26, 16 }
  0x24   : > { %2304 = vmatpush3.bf16.msra.mxu1 %v2473_v9  ;;  %v638_v46 = vsel %vm2513_vm7, %v2040_v34, %v637_v35  ;;  %v593_v49 = vld [vmem:[%s2469_s27 + $0x24] sm:$0x1]  ;;  %v426_v50 = vrot.slane %v425_v37, 4  ;;  %v439_v51 = vor.u32 %v438_v38, %v435_v32  ;;  %v456_v53 = vshll.u32 %v348_v31, 16  ;;  %v594_v54 = vld [vmem:[%s2469_s27 + $0x28] sm:$0xe] }
  0x25   : > { %v642_v52 = vsel %vm2513_vm7, %v2041_v39, %v641_v40  ;;  %v595_v55 = vld [vmem:[%s2469_s27 + $0x2c] sm:$0x1]  ;;  %2371 = vmatprep.subr.msk.bf16.mxu1 %vm250_vm0, %v2500_v42  ;;  %v2138_v9 = vld [vmem:[%s2886_s1 + $0x18] sm:$0xf]  ;;  %v449_v57 = vrot.slane %v447_v47, 4  ;;  %v452_v59 = vrot.slane %v450_v48, 5 }
  0x26   : > { %v2048_v56 = vcombine.low %v638_v46, %v642_v52  ;;  %v461_v60 = vshrl.u32 %v349_v36, 16  ;;  %v596_v61 = vld [vmem:[%s2469_s27 + $0x30] sm:$0xe]  ;;  %v431_v62 = vsel %vm2504_vm6, %v426_v50, %v430_v29  ;;  %v440_v63 = vrot.slane %v439_v51, 4  ;;  %v597_v2 = vld [vmem:[%s2469_s27 + $0x34] sm:$0x1] }
  0x27   : > { %v458_v0 = vrot.slane %v456_v53, 5  ;;  %v464_v1 = vshll.u32 %v349_v36, 16  ;;  %v453_v42 = vor.u32 %v452_v59, %v449_v57  ;;  %v470_v4 = vshll.u32 %v350_v41, 16  ;;  %v598_v7 = vld [vmem:[%s2469_s27 + $0x38] sm:$0xe] }
  0x28   : > { %2296 = vmatmul.mubr.msk.bf16.vlgmr.msra.gmra.mrb[4].mxu0 %vm192_vm1, %v2048_v56  ;;  %v463_v3 = vrot.slane %v461_v60, 4  ;;  %v2042_v5 = vrot.slane %v592_v44, 9  ;;  %v445_v8 = vsel %vm2504_vm6, %v440_v63, %v444_v45  ;;  %v645_v12 = vrot.slane %v593_v49, 5  ;;  %v599_v14 = vld [vmem:[%s2469_s27 + $0x3c] sm:$0x1] }
  0x29   : > { %v466_v11 = vrot.slane %v464_v1, 5  ;;  %v2043_v13 = vrot.slane %v594_v54, 9  ;;  %2314 = vmatpush3.bf16.msra.mxu0 %v2476_v10  ;;  %v2032_v15 = vcombine.low %v431_v62, %v445_v8  ;;  %v454_v16 = vrot.slane %v453_v42, 4  ;;  %v2578_v23 = vld [vmem:[%s2886_s1 + $0x1c] sm:$0xf] }
  0x2a   : > { %v472_v17 = vrot.slane %v470_v4, 5  ;;  %v649_v18 = vrot.slane %v595_v55, 5  ;;  %2372 = vmatprep.subr.msk.bf16.mxu0 %vm250_vm0, %v2138_v9  ;;  %v646_v20 = vsel %vm2513_vm7, %v2042_v5, %v645_v12  ;;  %v2044_v21 = vrot.slane %v596_v61, 9  ;;  %v2389_v35 = vld [vmem:[%s2469_s27 + $0x8] ss:$8 sps:$4 sm:$0xff]  }
  0x2b   : > { %v467_v19 = vor.u32 %v466_v11, %v463_v3  ;;  %v653_v22 = vrot.slane %v597_v2, 5  ;;  %2289 = vmatprep.mubr.msk.bf16.mxu1 %vm192_vm1, %v2032_v15  ;;  %v2045_v24 = vrot.slane %v598_v7, 9  ;;  %v657_v25 = vrot.slane %v599_v14, 5  ;;  %v2072_v36 = vld [vmem:[%s2469_s27 + $0x8] sm:$0xf] }
  0x2c   : > { %v650_v10 = vsel %vm2513_vm7, %v2043_v13, %v649_v18  ;;  %v459_v26 = vsel %vm2504_vm6, %v454_v16, %v458_v0  ;;  %v2590_v31 = vsel %vm250_vm0, %v2138_v9, 0  ;;  %v2594_v32 = vsel %vm250_vm0, %v2578_v23, 0  ;;  %v2073_v38 = vld [vmem:[%s2469_s27 + $0xc] sm:$0x1]  ;;  %v2074_v39 = vld [vmem:[%s2469_s27 + $0x10] sm:$0xf] }
  0x2d   : > { %v468_v27 = vrot.slane %v467_v19, 4  ;;  %v2049_v28 = vcombine.low %v646_v20, %v650_v10  ;;  %v654_v29 = vsel %vm2513_vm7, %v2044_v21, %v653_v22  ;;  %v658_v30 = vsel %vm2513_vm7, %v2045_v24, %v657_v25  ;;  %v2075_v40 = vld [vmem:[%s2469_s27 + $0x14] sm:$0x1]  ;;  %v2076_v47 = vld [vmem:[%s2469_s27 + $0x18] sm:$0xf] }
  0x2e   : > { %v2050_v34 = vcombine.low %v654_v29, %v658_v30  ;;  %v929_v41 = vshrl.u32 %v2072_v36, 16  ;;  %v932_v44 = vshll.u32 %v2072_v36, 16  ;;  %v938_v45 = vshll.u32 %v2073_v38, 16  ;;  %v2077_v50 = vld [vmem:[%s2469_s27 + $0x1c] sm:$0x1] }
  0x2f   : > { %v473_v33 = vsel %vm2504_vm6, %v468_v27, %v472_v17  ;;  %2299 = vmatprep.mubr.msk.bf16.mxu0 %vm192_vm1, %v2049_v28  ;;  %v943_v46 = vshrl.u32 %v2074_v39, 16  ;;  %v946_v48 = vshll.u32 %v2074_v39, 16  ;;  %v952_v49 = vshll.u32 %v2075_v40, 16  ;;  %v2078_v51 = vld [vmem:[%s2469_s27 + $0x20] sm:$0xf] }
  0x30   : > { %v2033_v37 = vcombine.low %v459_v26, %v473_v33  ;;  %2300 = vmatmul.mubr.msk.bf16.gmra.mrb[8].mxu0 %vm192_vm1, %v2050_v34  ;;  %v931_v52 = vrot.slane %v929_v41, 4  ;;  %v934_v53 = vrot.slane %v932_v44, 5  ;;  %v940_v54 = vrot.slane %v938_v45, 5  ;;  %v2079_v9 = vld [vmem:[%s2469_s27 + $0x24] sm:$0x1] }
  0x31   : > { %v945_v55 = vrot.slane %v943_v46, 4  ;;  %v2390_v56 = vld [vmem:[%s2469_s27 + $0x18] ss:$8 sps:$4 sm:$0xff]   ;;  %v948_v57 = vrot.slane %v946_v48, 5  ;;  %v954_v59 = vrot.slane %v952_v49, 5  ;;  %v957_v60 = vshrl.u32 %v2076_v47, 16 }
  0x32   : > { %2290 = vmatmul.mubr.msk.bf16.gmra.mrb[8].mxu1 %vm192_vm1, %v2033_v37  ;;  %v960_v61 = vshll.u32 %v2076_v47, 16  ;;  %v2391_v62 = vld [vmem:[%s2469_s27 + $0x28] ss:$8 sps:$4 sm:$0xff]   ;;  %v935_v63 = vor.u32 %v934_v53, %v931_v52  ;;  %v966_v0 = vshll.u32 %v2077_v50, 16  ;;  %v971_v1 = vshrl.u32 %v2078_v51, 16 }
  0x33   : > { %2305 = vmatprep.mubr.msk.bf16.mxu1 %vm192_vm1, %v2389_v35  ;;  %v974_v2 = vshll.u32 %v2078_v51, 16  ;;  %v2080_v42 = vld [vmem:[%s2469_s27 + $0x28] sm:$0xf]  ;;  %v949_v3 = vor.u32 %v948_v57, %v945_v55  ;;  %v959_v4 = vrot.slane %v957_v60, 4  ;;  %v980_v7 = vshll.u32 %v2079_v9, 16 }
  0x34   : > { %v962_v5 = vrot.slane %v960_v61, 5  ;;  %v2081_v8 = vld [vmem:[%s2469_s27 + $0x2c] sm:$0x1]  ;;  %v936_v11 = vrot.slane %v935_v63, 4  ;;  %v968_v12 = vrot.slane %v966_v0, 5  ;;  %v973_v13 = vrot.slane %v971_v1, 4 }
  0x35   : > { %v976_v14 = vrot.slane %v974_v2, 5  ;;  %v2082_v15 = vld [vmem:[%s2469_s27 + $0x30] sm:$0xf]  ;;  %v950_v16 = vrot.slane %v949_v3, 4  ;;  %v982_v18 = vrot.slane %v980_v7, 5  ;;  %v985_v19 = vshrl.u32 %v2080_v42, 16 }
  0x36   : > { %v963_v17 = vor.u32 %v962_v5, %v959_v4  ;;  %v941_v20 = vsel %vm2504_vm6, %v936_v11, %v940_v54  ;;  %v2083_v22 = vld [vmem:[%s2469_s27 + $0x34] sm:$0x1]  ;;  %v988_v10 = vshll.u32 %v2080_v42, 16  ;;  %v994_v24 = vshll.u32 %v2081_v8, 16  ;;  %v2084_v25 = vld [vmem:[%s2469_s27 + $0x38] sm:$0xf] }
  0x37   : > { %v977_v21 = vor.u32 %v976_v14, %v973_v13  ;;  %v955_v26 = vsel %vm2504_vm6, %v950_v16, %v954_v59  ;;  %v987_v28 = vrot.slane %v985_v19, 4  ;;  %v999_v29 = vshrl.u32 %v2082_v15, 16  ;;  %v2085_v30 = vld [vmem:[%s2469_s27 + $0x3c] sm:$0x1]  ;;  %v2086_v37 = vld [vmem:[%s2469_s27 + $0x40] sm:$0xf] }
  0x38   : > { %v964_v27 = vrot.slane %v963_v17, 4  ;;  %v2089_v33 = vcombine.low %v941_v20, %v955_v26  ;;  %v990_v35 = vrot.slane %v988_v10, 5  ;;  %v996_v36 = vrot.slane %v994_v24, 5  ;;  %v2392_v38 = vld [vmem:[%s2469_s27 + $0x38] ss:$8 sps:$4 sm:$0xff]  }
  0x39   : > { %v978_v34 = vrot.slane %v977_v21, 4  ;;  %v1001_v40 = vrot.slane %v999_v29, 4  ;;  %v1002_v41 = vshll.u32 %v2082_v15, 16  ;;  %v1008_v44 = vshll.u32 %v2083_v22, 16  ;;  %v2087_v45 = vld [vmem:[%s2469_s27 + $0x44] sm:$0x1] }
  0x3a   : > { %2306 = vmatmul.mubr.msk.bf16.vlgmr.msra.gmra.mrb[12].mxu1 %vm192_vm1, %v2390_v56  ;;  %v969_v39 = vsel %vm2504_vm6, %v964_v27, %v968_v12  ;;  %2315 = vmatprep.mubr.msk.bf16.mxu0 %vm192_vm1, %v2089_v33  ;;  %v991_v46 = vor.u32 %v990_v35, %v987_v28  ;;  %v1013_v47 = vshrl.u32 %v2084_v25, 16  ;;  %v1016_v48 = vshll.u32 %v2084_v25, 16  ;;  %v2097_v49 = vld [vmem:[%s2469_s27 + $0x8] sm:$0xe]  ;;  %v2098_v50 = vld [vmem:[%s2469_s27 + $0xc] sm:$0x1] }
  0x3b   : > { %2309 = vmatprep.mubr.msk.bf16.mxu1 %vm192_vm1, %v2391_v62  ;;  %2324 = vmatpush3.bf16.msra.mxu1 %v2526_v6  ;;  %v983_v6 = vsel %vm2504_vm6, %v978_v34, %v982_v18  ;;  %v2641_v51 = vld [vmem:[%s2886_s1 + $0x20] sm:$0xf]  ;;  %v1004_v53 = vrot.slane %v1002_v41, 5  ;;  %v1022_v54 = vshll.u32 %v2085_v30, 16  ;;  %v2099_v55 = vld [vmem:[%s2469_s27 + $0x10] sm:$0xe] }
  0x3c   : > { %2373 = vmatprep.subr.msk.bf16.mxu1 %vm250_vm0, %v2578_v23  ;;  %v2090_v52 = vcombine.low %v969_v39, %v983_v6  ;;  %v1010_v23 = vrot.slane %v1008_v44, 5  ;;  %v2100_v9 = vld [vmem:[%s2469_s27 + $0x14] sm:$0x1]  ;;  %v992_v56 = vrot.slane %v991_v46, 4  ;;  %v1015_v57 = vrot.slane %v1013_v47, 4 }
  0x3d   : > { %v1018_v59 = vrot.slane %v1016_v48, 5  ;;  %v1027_v60 = vshrl.u32 %v2086_v37, 16  ;;  %v2101_v61 = vld [vmem:[%s2469_s27 + $0x18] sm:$0xe]  ;;  %v1005_v62 = vor.u32 %v1004_v53, %v1001_v40  ;;  %v1024_v63 = vrot.slane %v1022_v54, 5 }
  0x3e   : > { %2316 = vmatmul.mubr.msk.bf16.vlgmr.msra.gmra.mrb[12].mxu0 %vm192_vm1, %v2090_v52  ;;  %v1030_v0 = vshll.u32 %v2086_v37, 16  ;;  %v1036_v1 = vshll.u32 %v2087_v45, 16  ;;  %v2102_v2 = vld [vmem:[%s2469_s27 + $0x1c] sm:$0x1]  ;;  %v997_v42 = vsel %vm2504_vm6, %v992_v56, %v996_v36  ;;  %v2113_v5 = vrot.slane %v2097_v49, 9 }
  0x3f   : > { %2334 = vmatpush3.bf16.msra.mxu0 %v2590_v31  ;;  %v1019_v3 = vor.u32 %v1018_v59, %v1015_v57  ;;  %v1029_v4 = vrot.slane %v1027_v60, 4  ;;  %v2103_v7 = vld [vmem:[%s2469_s27 + $0x20] sm:$0xe]  ;;  %v2104_v8 = vld [vmem:[%s2469_s27 + $0x24] sm:$0x1]  ;;  %v1006_v11 = vrot.slane %v1005_v62, 4 }
  0x40   : > { %v1032_v12 = vrot.slane %v1030_v0, 5  ;;  %v1038_v13 = vrot.slane %v1036_v1, 5  ;;  %v1192_v14 = vrot.slane %v2098_v50, 5  ;;  %v2105_v15 = vld [vmem:[%s2469_s27 + $0x28] sm:$0xe]  ;;  %2374 = vmatprep.subr.msk.bf16.mxu0 %vm250_vm0, %v2641_v51  ;;  %v2114_v17 = vrot.slane %v2099_v55, 9 }
  0x41   : > { %v2106_v16 = vld [vmem:[%s2469_s27 + $0x2c] sm:$0x1]  ;;  %v1020_v31 = vrot.slane %v1019_v3, 4  ;;  %v1196_v18 = vrot.slane %v2100_v9, 5  ;;  %v2115_v19 = vrot.slane %v2101_v61, 9  ;;  %v1011_v21 = vsel %vm2504_vm6, %v1006_v11, %v1010_v23 }
  0x42   : > { %2310 = vmatmul.mubr.msk.bf16.gmra.mrb[16].mxu1 %vm192_vm1, %v2392_v38  ;;  %v2107_v20 = vld [vmem:[%s2469_s27 + $0x30] sm:$0xe]  ;;  %v1033_v22 = vor.u32 %v1032_v12, %v1029_v4  ;;  %v1193_v10 = vsel %vm2513_vm7, %v2113_v5, %v1192_v14  ;;  %v1200_v24 = vrot.slane %v2102_v2, 5  ;;  %v2108_v25 = vld [vmem:[%s2469_s27 + $0x34] sm:$0x1]  ;;  %v2091_v27 = vcombine.low %v997_v42, %v1011_v21 }
  0x43   : > { %v2109_v26 = vld [vmem:[%s2469_s27 + $0x38] sm:$0xe]  ;;  %v1025_v28 = vsel %vm2504_vm6, %v1020_v31, %v1024_v63  ;;  %v1197_v29 = vsel %vm2513_vm7, %v2114_v17, %v1196_v18  ;;  %v2116_v30 = vrot.slane %v2103_v7, 9  ;;  %v2110_v33 = vld [vmem:[%s2469_s27 + $0x3c] sm:$0x1]  ;;  %v1204_v38 = vrot.slane %v2104_v8, 5 }
  0x44   : > { %v2111_v34 = vld [vmem:[%s2469_s27 + $0x40] sm:$0xe]  ;;  %v1034_v35 = vrot.slane %v1033_v22, 4  ;;  %v2122_v36 = vcombine.low %v1193_v10, %v1197_v29  ;;  %v1201_v37 = vsel %vm2513_vm7, %v2115_v19, %v1200_v24  ;;  %v2112_v39 = vld [vmem:[%s2469_s27 + $0x44] sm:$0x1]  ;;  %2319 = vmatprep.mubr.msk.bf16.mxu0 %vm192_vm1, %v2091_v27  ;;  %v2117_v40 = vrot.slane %v2105_v15, 9 }
  0x45   : > { %v1208_v41 = vrot.slane %v2106_v16, 5  ;;  %v2118_v44 = vrot.slane %v2107_v20, 9  ;;  %v1212_v45 = vrot.slane %v2108_v25, 5  ;;  %v1205_v46 = vsel %vm2513_vm7, %v2116_v30, %v1204_v38  ;;  %v2393_v23 = vld [vmem:[%s2469_s27 + $0x10] ss:$8 sps:$4 sm:$0xff]  }
  0x46   : > { %v1039_v6 = vsel %vm2504_vm6, %v1034_v35, %v1038_v13  ;;  %2325 = vmatprep.mubr.msk.bf16.mxu1 %vm192_vm1, %v2122_v36  ;;  %v2119_v47 = vrot.slane %v2109_v26, 9  ;;  %v1216_v48 = vrot.slane %v2110_v33, 5  ;;  %v2123_v50 = vcombine.low %v1201_v37, %v1205_v46  ;;  %v2147_v59 = vld [vmem:[%s2469_s27 + $0x10] sm:$0xf]  ;;  %v2148_v60 = vld [vmem:[%s2469_s27 + $0x14] sm:$0x1] }
  0x47   : > { %v2092_v49 = vcombine.low %v1025_v28, %v1039_v6  ;;  %v1209_v52 = vsel %vm2513_vm7, %v2117_v40, %v1208_v41  ;;  %v1213_v53 = vsel %vm2513_vm7, %v2118_v44, %v1212_v45  ;;  %v2120_v55 = vrot.slane %v2111_v34, 9  ;;  %v2149_v61 = vld [vmem:[%s2469_s27 + $0x18] sm:$0xf]  ;;  %v2394_v62 = vld [vmem:[%s2469_s27 + $0x20] ss:$8 sps:$4 sm:$0xff]  }
  0x48   : > { %v2124_v54 = vcombine.low %v1209_v52, %v1213_v53  ;;  %v1220_v9 = vrot.slane %v2112_v39, 5  ;;  %v1217_v56 = vsel %vm2513_vm7, %v2119_v47, %v1216_v48  ;;  %v1812_v63 = vsel %vm250_vm0, %v2641_v51, 0  ;;  %v2150_v0 = vld [vmem:[%s2469_s27 + $0x1c] sm:$0x1]  ;;  %v2395_v3 = vld [vmem:[%s2469_s27 + $0x30] ss:$8 sps:$4 sm:$0xff]  }
  0x49   : > { %2320 = vmatmul.mubr.msk.bf16.gmra.mrb[16].mxu0 %vm192_vm1, %v2092_v49  ;;  %v1492_v1 = vshrl.u32 %v2147_v59, 16  ;;  %v1495_v2 = vshll.u32 %v2147_v59, 16  ;;  %v1501_v42 = vshll.u32 %v2148_v60, 16  ;;  %v1506_v4 = vshrl.u32 %v2149_v61, 16  ;;  %v2151_v8 = vld [vmem:[%s2469_s27 + $0x20] sm:$0xf] }
  0x4a   : > { %2326 = vmatmul.mubr.msk.bf16.vlgmr.msra.gmra.mrb[20].mxu1 %vm192_vm1, %v2123_v50  ;;  %v1221_v57 = vsel %vm2513_vm7, %v2120_v55, %v1220_v9  ;;  %2335 = vmatprep.mubr.msk.bf16.mxu0 %vm192_vm1, %v2393_v23  ;;  %v1509_v5 = vshll.u32 %v2149_v61, 16  ;;  %v1515_v7 = vshll.u32 %v2150_v0, 16  ;;  %v2152_v14 = vld [vmem:[%s2469_s27 + $0x24] sm:$0x1]  ;;  %v1520_v15 = vshrl.u32 %v2151_v8, 16 }
  0x4b   : > { %2329 = vmatprep.mubr.msk.bf16.mxu1 %vm192_vm1, %v2124_v54  ;;  %2344 = vmatpush3.bf16.msra.mxu1 %v2594_v32  ;;  %v2125_v32 = vcombine.low %v1217_v56, %v1221_v57  ;;  %v1494_v11 = vrot.slane %v1492_v1, 4  ;;  %v1497_v12 = vrot.slane %v1495_v2, 5  ;;  %v1503_v13 = vrot.slane %v1501_v42, 5  ;;  %v2153_v17 = vld [vmem:[%s2469_s27 + $0x28] sm:$0xf] }
  0x4c   : > { %v1508_v16 = vrot.slane %v1506_v4, 4  ;;  %v1511_v51 = vrot.slane %v1509_v5, 5  ;;  %v1517_v31 = vrot.slane %v1515_v7, 5  ;;  %v1523_v18 = vshll.u32 %v2151_v8, 16  ;;  %v2154_v20 = vld [vmem:[%s2469_s27 + $0x2c] sm:$0x1] }
  0x4d   : > { %v1498_v19 = vor.u32 %v1497_v12, %v1494_v11  ;;  %v1522_v21 = vrot.slane %v1520_v15, 4  ;;  %v1529_v22 = vshll.u32 %v2152_v14, 16  ;;  %v1534_v10 = vshrl.u32 %v2153_v17, 16  ;;  %v2155_v28 = vld [vmem:[%s2469_s27 + $0x30] sm:$0xf] }
  0x4e   : > { %v1512_v24 = vor.u32 %v1511_v51, %v1508_v16  ;;  %v1525_v25 = vrot.slane %v1523_v18, 5  ;;  %v1537_v26 = vshll.u32 %v2153_v17, 16  ;;  %v1543_v27 = vshll.u32 %v2154_v20, 16  ;;  %v2156_v34 = vld [vmem:[%s2469_s27 + $0x34] sm:$0x1] }
  0x4f   : > { %v1499_v29 = vrot.slane %v1498_v19, 4  ;;  %v1531_v30 = vrot.slane %v1529_v22, 5  ;;  %v1536_v33 = vrot.slane %v1534_v10, 4  ;;  %v1548_v35 = vshrl.u32 %v2155_v28, 16  ;;  %v2157_v40 = vld [vmem:[%s2469_s27 + $0x38] sm:$0xf] }
  0x50   : > { %v1513_v36 = vrot.slane %v1512_v24, 4  ;;  %v1526_v37 = vor.u32 %v1525_v25, %v1522_v21  ;;  %v1539_v38 = vrot.slane %v1537_v26, 5  ;;  %v1545_v39 = vrot.slane %v1543_v27, 5  ;;  %v2396_v41 = vld [vmem:[%s2469_s27 + $0x40] ss:$8 sps:$4 sm:$0xff]  }
  0x51   : > { %2336 = vmatmul.mubr.msk.bf16.vlgmr.msra.gmra.mrb[20].mxu0 %vm192_vm1, %v2394_v62  ;;  %v1504_v44 = vsel %vm2504_vm6, %v1499_v29, %v1503_v13  ;;  %v2158_v45 = vld [vmem:[%s2469_s27 + $0x3c] sm:$0x1]  ;;  %v1550_v6 = vrot.slane %v1548_v35, 4  ;;  %v1551_v46 = vshll.u32 %v2155_v28, 16  ;;  %v1557_v47 = vshll.u32 %v2156_v34, 16 }
  0x52   : > { %2330 = vmatmul.mubr.msk.bf16.gmra.mrb[24].mxu1 %vm192_vm1, %v2125_v32  ;;  %2339 = vmatprep.mubr.msk.bf16.mxu0 %vm192_vm1, %v2395_v3  ;;  %v1518_v48 = vsel %vm2504_vm6, %v1513_v36, %v1517_v31  ;;  %v1527_v49 = vrot.slane %v1526_v37, 4  ;;  %v1540_v50 = vor.u32 %v1539_v38, %v1536_v33  ;;  %v1562_v52 = vshrl.u32 %v2157_v40, 16  ;;  %v2159_v53 = vld [vmem:[%s2469_s27 + $0x40] sm:$0xf]  ;;  %v2160_v23 = vld [vmem:[%s2469_s27 + $0x44] sm:$0x1] }
  0x53   : > { %2354 = vmatpush3.bf16.msra.mxu0 %v1812_v63  ;;  %v2164_v54 = vcombine.low %v1504_v44, %v1518_v48  ;;  %v1553_v55 = vrot.slane %v1551_v46, 5  ;;  %v1559_v9 = vrot.slane %v1557_v47, 5  ;;  %v1565_v56 = vshll.u32 %v2157_v40, 16  ;;  %v2161_v57 = vld [vmem:[%s2469_s27 + $0x48] sm:$0xf] }
  0x54   : > { %v1532_v59 = vsel %vm2504_vm6, %v1527_v49, %v1531_v30  ;;  %v1541_v60 = vrot.slane %v1540_v50, 4  ;;  %v1564_v61 = vrot.slane %v1562_v52, 4  ;;  %v1571_v62 = vshll.u32 %v2158_v45, 16  ;;  %v2162_v63 = vld [vmem:[%s2469_s27 + $0x4c] sm:$0x1] }
  0x55   : > { %2345 = vmatprep.mubr.msk.bf16.mxu1 %vm192_vm1, %v2164_v54  ;;  %v1554_v0 = vor.u32 %v1553_v55, %v1550_v6  ;;  %v1567_v1 = vrot.slane %v1565_v56, 5  ;;  %v1576_v2 = vshrl.u32 %v2159_v53, 16  ;;  %v1579_v42 = vshll.u32 %v2159_v53, 16  ;;  %v2172_v32 = vld [vmem:[%s2469_s27 + $0x10] sm:$0xe] }
  0x56   : > { %v1546_v3 = vsel %vm2504_vm6, %v1541_v60, %v1545_v39  ;;  %v1573_v4 = vrot.slane %v1571_v62, 5  ;;  %v1585_v5 = vshll.u32 %v2160_v23, 16  ;;  %v1590_v7 = vshrl.u32 %v2161_v57, 16  ;;  %v2173_v8 = vld [vmem:[%s2469_s27 + $0x14] sm:$0x1] }
  0x57   : > { %v2165_v11 = vcombine.low %v1532_v59, %v1546_v3  ;;  %v1555_v12 = vrot.slane %v1554_v0, 4  ;;  %v1568_v13 = vor.u32 %v1567_v1, %v1564_v61  ;;  %v1578_v14 = vrot.slane %v1576_v2, 4  ;;  %v2174_v15 = vld [vmem:[%s2469_s27 + $0x18] sm:$0xe]  ;;  %v2175_v16 = vld [vmem:[%s2469_s27 + $0x1c] sm:$0x1] }
  0x58   : > { %v1581_v51 = vrot.slane %v1579_v42, 5  ;;  %v1587_v31 = vrot.slane %v1585_v5, 5  ;;  %v1592_v17 = vrot.slane %v1590_v7, 4  ;;  %v1593_v18 = vshll.u32 %v2161_v57, 16  ;;  %v2176_v19 = vld [vmem:[%s2469_s27 + $0x20] sm:$0xe] }
  0x59   : > { %2340 = vmatmul.mubr.msk.bf16.gmra.mrb[24].mxu0 %vm192_vm1, %v2396_v41  ;;  %v1560_v20 = vsel %vm2504_vm6, %v1555_v12, %v1559_v9  ;;  %v1569_v21 = vrot.slane %v1568_v13, 4  ;;  %v1599_v22 = vshll.u32 %v2162_v63, 16  ;;  %v2188_v10 = vrot.slane %v2172_v32, 9  ;;  %v2177_v24 = vld [vmem:[%s2469_s27 + $0x24] sm:$0x1]  ;;  %v211_v12 = vld [vmem:[#allocation2 + $0x10] sm:$0xff] }
  0x5a   : > { %2346 = vmatmul.mubr.msk.bf16.vlgmr.msra.gmra.mrb[28].mxu1 %vm192_vm1, %v2165_v11  ;;  %v1582_v25 = vor.u32 %v1581_v51, %v1578_v14  ;;  %v1595_v26 = vrot.slane %v1593_v18, 5  ;;  %v1755_v27 = vrot.slane %v2173_v8, 5  ;;  %v2189_v28 = vrot.slane %v2174_v15, 9  ;;  %v2178_v29 = vld [vmem:[%s2469_s27 + $0x28] sm:$0xe]  ;;  %v215_v13 = vld [vmem:[#allocation2 + $0x30] sm:$0xff] }
  0x5b   : > { %v1574_v30 = vsel %vm2504_vm6, %v1569_v21, %v1573_v4  ;;  %v1601_v33 = vrot.slane %v1599_v22, 5  ;;  %v1759_v34 = vrot.slane %v2175_v16, 5  ;;  %v2179_v35 = vld [vmem:[%s2469_s27 + $0x2c] sm:$0x1]  ;;  %v2190_v36 = vrot.slane %v2176_v19, 9  ;;  %v209_v14 = vld [vmem:[#allocation2] sm:$0xff] }
  0x5c   : > { %v2166_v37 = vcombine.low %v1560_v20, %v1574_v30  ;;  %v1583_v38 = vrot.slane %v1582_v25, 4  ;;  %v1596_v39 = vor.u32 %v1595_v26, %v1592_v17  ;;  %v1756_v40 = vsel %vm2513_vm7, %v2188_v10, %v1755_v27  ;;  %v2180_v41 = vld [vmem:[%s2469_s27 + $0x30] sm:$0xe]  ;;  %v2181_v44 = vld [vmem:[%s2469_s27 + $0x34] sm:$0x1]  ;;  %v213_v16 = vld [vmem:[#allocation2 + $0x20] sm:$0xff] }
  0x5d   : > { %v1760_v45 = vsel %vm2513_vm7, %v2189_v28, %v1759_v34  ;;  %v1763_v6 = vrot.slane %v2177_v24, 5  ;;  %v2191_v46 = vrot.slane %v2178_v29, 9  ;;  %v1767_v47 = vrot.slane %v2179_v35, 5  ;;  %v2182_v48 = vld [vmem:[%s2469_s27 + $0x38] sm:$0xe]  ;;  %v210_v20 = vld [vmem:[#allocation2 + $0x8] sm:$0xff] }
  0x5e   : > { %2349 = vmatprep.mubr.msk.bf16.mxu1 %vm192_vm1, %v2166_v37  ;;  %v1588_v49 = vsel %vm2504_vm6, %v1583_v38, %v1587_v31  ;;  %v1597_v50 = vrot.slane %v1596_v39, 4  ;;  %v2197_v52 = vcombine.low %v1756_v40, %v1760_v45  ;;  %v2183_v53 = vld [vmem:[%s2469_s27 + $0x3c] sm:$0x1]  ;;  %v2192_v23 = vrot.slane %v2180_v41, 9  ;;  %v2184_v54 = vld [vmem:[%s2469_s27 + $0x40] sm:$0xe] }
  0x5f   : > { %v1764_v55 = vsel %vm2513_vm7, %v2190_v36, %v1763_v6  ;;  %v1768_v9 = vsel %vm2513_vm7, %v2191_v46, %v1767_v47  ;;  %v1771_v56 = vrot.slane %v2181_v44, 5  ;;  %v2193_v57 = vrot.slane %v2182_v48, 9  ;;  %v2185_v59 = vld [vmem:[%s2469_s27 + $0x44] sm:$0x1]  ;;  %v2186_v60 = vld [vmem:[%s2469_s27 + $0x48] sm:$0xe] }
  0x60   : > { %v1602_v61 = vsel %vm2504_vm6, %v1597_v50, %v1601_v33  ;;  %2355 = vmatprep.mubr.msk.bf16.mxu0 %vm192_vm1, %v2197_v52  ;;  %v2198_v62 = vcombine.low %v1764_v55, %v1768_v9  ;;  %v1775_v63 = vrot.slane %v2183_v53, 5  ;;  %v2187_v0 = vld [vmem:[%s2469_s27 + $0x4c] sm:$0x1]  ;;  %v2194_v1 = vrot.slane %v2184_v54, 9  ;;  %v212_v51 = vld [vmem:[#allocation2 + $0x18] sm:$0xff] }
  0x61   : > { %v2167_v2 = vcombine.low %v1588_v49, %v1602_v61  ;;  %v1772_v42 = vsel %vm2513_vm7, %v2192_v23, %v1771_v56  ;;  %v1779_v32 = vrot.slane %v2185_v59, 5  ;;  %v2195_v3 = vrot.slane %v2186_v60, 9  ;;  %v216_v19 = vld [vmem:[#allocation2 + $0x38] sm:$0xff]  ;;  %v214_v24 = vld [vmem:[#allocation2 + $0x28] sm:$0xff] }
  0x62   : > { %2356 = vmatmul.mubr.msk.bf16.vlgmr.msra.gmra.mrb[28].mxu0 %vm192_vm1, %v2198_v62  ;;  %v1776_v4 = vsel %vm2513_vm7, %v2193_v57, %v1775_v63  ;;  %v1783_v5 = vrot.slane %v2187_v0, 5 }
  0x63   : > { %2350 = vmatmul.mubr.msk.bf16.gmra.mrb[32].mxu1 %vm192_vm1, %v2167_v2  ;;  %v2199_v43 = vcombine.low %v1772_v42, %v1776_v4  ;;  %v1780_v7 = vsel %vm2513_vm7, %v2194_v1, %v1779_v32 }
  0x64   : > { %v1784_v8 = vsel %vm2513_vm7, %v2195_v3, %v1783_v5 }
  0x65   : > { %2359 = vmatprep.mubr.msk.bf16.mxu0 %vm192_vm1, %v2199_v43  ;;  %v2200_v11 = vcombine.low %v1780_v7, %v1784_v8 }
  0x6a   : > { %2360 = vmatmul.mubr.msk.bf16.gmra.mrb[32].mxu0 %vm192_vm1, %v2200_v11 }
  0xe6   : > { %v2277_v15 = vpop.f32.mrb[0].mxu0 }
  0xe7   : > { %v321_v31 = vadd.f32 %v2277_v15, %v211_v12  ;;  %v2281_v17 = vpop.f32.mrb[0].mxu1  ;;  %v288_v18 = vpop.f32.mrb[1].mxu0 }
  0xe8   : > { %v325_v21 = vadd.f32 %v2281_v17, %v215_v13  ;;  %v319_v22 = vadd.f32 %v288_v18, %v209_v14  ;;  %v304_v58 = vpop.f32.mrb[1].mxu1  ;;  %v2278_v10 = vpop.f32.mrb[2].mxu0 }
  0xe9   : > { %329 = vst.msk [vmem:[#allocation2 + $0x10] sm:$0xff] %vm192_vm1, %v321_v31  ;;  %v323_v25 = vadd.f32 %v304_v58, %v213_v16  ;;  %v322_v26 = vadd.f32 %v2278_v10, %v212_v51  ;;  %v2282_v27 = vpop.f32.mrb[2].mxu1  ;;  %v291_v28 = vpop.f32.mrb[3].mxu0 }
  0xea   : > { %333 = vst.msk [vmem:[#allocation2 + $0x30] sm:$0xff] %vm192_vm1, %v325_v21  ;;  %327 = vst.msk [vmem:[#allocation2] sm:$0xff] %vm192_vm1, %v319_v22  ;;  %v326_v29 = vadd.f32 %v2282_v27, %v216_v19  ;;  %v320_v30 = vadd.f32 %v291_v28, %v210_v20  ;;  %v307_v33 = vpop.f32.mrb[3].mxu1 }
  0xeb   : > { %331 = vst.msk [vmem:[#allocation2 + $0x20] sm:$0xff] %vm192_vm1, %v323_v25  ;;  %330 = vst.msk [vmem:[#allocation2 + $0x18] sm:$0xff] %vm192_vm1, %v322_v26  ;;  %v324_v34 = vadd.f32 %v307_v33, %v214_v24 }
  0xec   : > { %334 = vst.msk [vmem:[#allocation2 + $0x38] sm:$0xff] %vm192_vm1, %v326_v29  ;;  %328 = vst.msk [vmem:[#allocation2 + $0x8] sm:$0xff] %vm192_vm1, %v320_v30 }
  0xed   : > { %332 = vst.msk [vmem:[#allocation2 + $0x28] sm:$0xff] %vm192_vm1, %v324_v34 }
  0xf0   : > { %v353_v35 = vld [vmem:[#allocation2 + $0x10] sm:$0xff] }
  0xf1   : > { %v351_v36 = vld [vmem:[#allocation2] sm:$0xff]  ;;  %v357_v61 = vld [vmem:[#allocation2 + $0x30] sm:$0xff] }
  0xf2   : > { %v354_v38 = vld [vmem:[#allocation2 + $0x18] sm:$0xff]  ;;  %v355_v1 = vld [vmem:[#allocation2 + $0x20] sm:$0xff] }
  0xf3   : > { %v352_v41 = vld [vmem:[#allocation2 + $0x8] sm:$0xff]  ;;  %v358_v3 = vld [vmem:[#allocation2 + $0x38] sm:$0xff] }
  0xf4   : > { %v356_v7 = vld [vmem:[#allocation2 + $0x28] sm:$0xff] }
  0xf6   : > { %v2287_v37 = vpop.f32.mrb[4].mxu1 }
  0xf7   : > { %v570_v39 = vadd.f32 %v2287_v37, %v353_v35  ;;  %v537_v40 = vpop.f32.mrb[5].mxu1 }
  0xf8   : > { %v568_v44 = vadd.f32 %v537_v40, %v351_v36  ;;  %v2288_v45 = vpop.f32.mrb[6].mxu1 }
  0xf9   : > { %578 = vst.msk [vmem:[#allocation2 + $0x10] sm:$0xff] %vm192_vm1, %v570_v39  ;;  %v571_v6 = vadd.f32 %v2288_v45, %v354_v38  ;;  %v540_v46 = vpop.f32.mrb[7].mxu1 }
  0xfa   : > { %576 = vst.msk [vmem:[#allocation2] sm:$0xff] %vm192_vm1, %v568_v44  ;;  %v569_v47 = vadd.f32 %v540_v46, %v352_v41 }
  0xfb   : > { %579 = vst.msk [vmem:[#allocation2 + $0x18] sm:$0xff] %vm192_vm1, %v571_v6  ;;  %v2297_v48 = vpop.f32.mrb[4].mxu0 }
  0xfc   : > { %577 = vst.msk [vmem:[#allocation2 + $0x8] sm:$0xff] %vm192_vm1, %v569_v47  ;;  %v722_v49 = vpop.f32.mrb[5].mxu0 }
  0xfd   : > { %v2298_v50 = vpop.f32.mrb[6].mxu0 }
  0xfe   : > { %v725_v52 = vpop.f32.mrb[7].mxu0 }
 0x100   : > { %v602_v53 = vld [vmem:[#allocation2 + $0x10] sm:$0xff] }
 0x101   : > { %v755_v23 = vadd.f32 %v2297_v48, %v602_v53  ;;  %v600_v54 = vld [vmem:[#allocation2] sm:$0xff] }
 0x102   : > { %v753_v55 = vadd.f32 %v722_v49, %v600_v54  ;;  %v603_v9 = vld [vmem:[#allocation2 + $0x18] sm:$0xff] }
 0x103   : > { %763 = vst.msk [vmem:[#allocation2 + $0x10] sm:$0xff] %vm192_vm1, %v755_v23  ;;  %v756_v56 = vadd.f32 %v2298_v50, %v603_v9  ;;  %v601_v57 = vld [vmem:[#allocation2 + $0x8] sm:$0xff]  ;;  %v2301_v60 = vpop.f32.mrb[8].mxu0 }
 0x104   : > { %761 = vst.msk [vmem:[#allocation2] sm:$0xff] %vm192_vm1, %v753_v55  ;;  %v754_v59 = vadd.f32 %v725_v52, %v601_v57  ;;  %v738_v63 = vpop.f32.mrb[9].mxu0 }
 0x105   : > { %v2291_v62 = vpop.f32.mrb[8].mxu1  ;;  %764 = vst.msk [vmem:[#allocation2 + $0x18] sm:$0xff] %vm192_vm1, %v756_v56  ;;  %v2302_v42 = vpop.f32.mrb[10].mxu0 }
 0x106   : > { %v574_v0 = vadd.f32 %v2291_v62, %v357_v61  ;;  %v553_v2 = vpop.f32.mrb[9].mxu1  ;;  %762 = vst.msk [vmem:[#allocation2 + $0x8] sm:$0xff] %vm192_vm1, %v754_v59  ;;  %v741_v5 = vpop.f32.mrb[11].mxu0 }
 0x107   : > { %v572_v32 = vadd.f32 %v553_v2, %v355_v1  ;;  %v2292_v4 = vpop.f32.mrb[10].mxu1 }
 0x108   : > { %582 = vst.msk [vmem:[#allocation2 + $0x30] sm:$0xff] %vm192_vm1, %v574_v0  ;;  %v575_v43 = vadd.f32 %v2292_v4, %v358_v3  ;;  %v556_v8 = vpop.f32.mrb[11].mxu1 }
 0x109   : > { %580 = vst.msk [vmem:[#allocation2 + $0x20] sm:$0xff] %vm192_vm1, %v572_v32  ;;  %v573_v11 = vadd.f32 %v556_v8, %v356_v7 }
 0x10a   : > { %583 = vst.msk [vmem:[#allocation2 + $0x38] sm:$0xff] %vm192_vm1, %v575_v43  ;;  %v780_v12 = vld [vmem:[#allocation2 + $0x10] sm:$0xff] }
 0x10b   : > { %581 = vst.msk [vmem:[#allocation2 + $0x28] sm:$0xff] %vm192_vm1, %v573_v11  ;;  %v778_v13 = vld [vmem:[#allocation2] sm:$0xff] }
 0x10c   : > { %v781_v15 = vld [vmem:[#allocation2 + $0x18] sm:$0xff] }
 0x10d   : > { %v2307_v14 = vpop.f32.mrb[12].mxu1  ;;  %v779_v31 = vld [vmem:[#allocation2 + $0x8] sm:$0xff] }
 0x10e   : > { %v890_v16 = vadd.f32 %v2307_v14, %v780_v12  ;;  %v857_v51 = vpop.f32.mrb[13].mxu1 }
 0x10f   : > { %v606_v17 = vld [vmem:[#allocation2 + $0x30] sm:$0xff]  ;;  %v888_v18 = vadd.f32 %v857_v51, %v778_v13  ;;  %v2308_v19 = vpop.f32.mrb[14].mxu1 }
 0x110   : > { %v759_v20 = vadd.f32 %v2301_v60, %v606_v17  ;;  %v604_v21 = vld [vmem:[#allocation2 + $0x20] sm:$0xff]  ;;  %898 = vst.msk [vmem:[#allocation2 + $0x10] sm:$0xff] %vm192_vm1, %v890_v16  ;;  %v891_v22 = vadd.f32 %v2308_v19, %v781_v15  ;;  %v860_v58 = vpop.f32.mrb[15].mxu1 }
 0x111   : > { %v757_v10 = vadd.f32 %v738_v63, %v604_v21  ;;  %v607_v24 = vld [vmem:[#allocation2 + $0x38] sm:$0xff]  ;;  %896 = vst.msk [vmem:[#allocation2] sm:$0xff] %vm192_vm1, %v888_v18  ;;  %v889_v25 = vadd.f32 %v860_v58, %v779_v31  ;;  %v2317_v29 = vpop.f32.mrb[12].mxu0 }
 0x112   : > { %767 = vst.msk [vmem:[#allocation2 + $0x30] sm:$0xff] %vm192_vm1, %v759_v20  ;;  %v760_v26 = vadd.f32 %v2302_v42, %v607_v24  ;;  %v605_v27 = vld [vmem:[#allocation2 + $0x28] sm:$0xff]  ;;  %899 = vst.msk [vmem:[#allocation2 + $0x18] sm:$0xff] %vm192_vm1, %v891_v22  ;;  %v1103_v30 = vpop.f32.mrb[13].mxu0 }
 0x113   : > { %765 = vst.msk [vmem:[#allocation2 + $0x20] sm:$0xff] %vm192_vm1, %v757_v10  ;;  %v758_v28 = vadd.f32 %v741_v5, %v605_v27  ;;  %897 = vst.msk [vmem:[#allocation2 + $0x8] sm:$0xff] %vm192_vm1, %v889_v25  ;;  %v2318_v34 = vpop.f32.mrb[14].mxu0 }
 0x114   : > { %768 = vst.msk [vmem:[#allocation2 + $0x38] sm:$0xff] %vm192_vm1, %v760_v26  ;;  %v1106_v36 = vpop.f32.mrb[15].mxu0 }
 0x115   : > { %766 = vst.msk [vmem:[#allocation2 + $0x28] sm:$0xff] %vm192_vm1, %v758_v28  ;;  %v2311_v33 = vpop.f32.mrb[16].mxu1 }
 0x116   : > { %v873_v35 = vpop.f32.mrb[17].mxu1 }
 0x117   : > { %v2312_v37 = vpop.f32.mrb[18].mxu1  ;;  %v922_v38 = vld [vmem:[#allocation2 + $0x10] sm:$0xff] }
 0x118   : > { %v1136_v39 = vadd.f32 %v2317_v29, %v922_v38  ;;  %v876_v40 = vpop.f32.mrb[19].mxu1  ;;  %v920_v41 = vld [vmem:[#allocation2] sm:$0xff] }
 0x119   : > { %v784_v44 = vld [vmem:[#allocation2 + $0x30] sm:$0xff]  ;;  %v1134_v45 = vadd.f32 %v1103_v30, %v920_v41  ;;  %v923_v6 = vld [vmem:[#allocation2 + $0x18] sm:$0xff] }
 0x11a   : > { %v894_v46 = vadd.f32 %v2311_v33, %v784_v44  ;;  %v782_v47 = vld [vmem:[#allocation2 + $0x20] sm:$0xff]  ;;  %1144 = vst.msk [vmem:[#allocation2 + $0x10] sm:$0xff] %vm192_vm1, %v1136_v39  ;;  %v1137_v48 = vadd.f32 %v2318_v34, %v923_v6  ;;  %v921_v49 = vld [vmem:[#allocation2 + $0x8] sm:$0xff] }
 0x11b   : > { %v892_v50 = vadd.f32 %v873_v35, %v782_v47  ;;  %v785_v52 = vld [vmem:[#allocation2 + $0x38] sm:$0xff]  ;;  %1142 = vst.msk [vmem:[#allocation2] sm:$0xff] %vm192_vm1, %v1134_v45  ;;  %v1135_v53 = vadd.f32 %v1106_v36, %v921_v49 }
 0x11c   : > { %902 = vst.msk [vmem:[#allocation2 + $0x30] sm:$0xff] %vm192_vm1, %v894_v46  ;;  %v895_v23 = vadd.f32 %v2312_v37, %v785_v52  ;;  %v783_v54 = vld [vmem:[#allocation2 + $0x28] sm:$0xff]  ;;  %1145 = vst.msk [vmem:[#allocation2 + $0x18] sm:$0xff] %vm192_vm1, %v1137_v48  ;;  %v2321_v9 = vpop.f32.mrb[16].mxu0 }
 0x11d   : > { %900 = vst.msk [vmem:[#allocation2 + $0x20] sm:$0xff] %vm192_vm1, %v892_v50  ;;  %v893_v55 = vadd.f32 %v876_v40, %v783_v54  ;;  %1143 = vst.msk [vmem:[#allocation2 + $0x8] sm:$0xff] %vm192_vm1, %v1135_v53  ;;  %v2327_v56 = vpop.f32.mrb[20].mxu1  ;;  %v1119_v57 = vpop.f32.mrb[17].mxu0 }
 0x11e   : > { %903 = vst.msk [vmem:[#allocation2 + $0x38] sm:$0xff] %vm192_vm1, %v895_v23  ;;  %v1285_v59 = vpop.f32.mrb[21].mxu1  ;;  %v2322_v60 = vpop.f32.mrb[18].mxu0 }
 0x11f   : > { %901 = vst.msk [vmem:[#allocation2 + $0x28] sm:$0xff] %vm192_vm1, %v893_v55  ;;  %v2328_v61 = vpop.f32.mrb[22].mxu1  ;;  %v1122_v63 = vpop.f32.mrb[19].mxu0 }
 0x120   : > { %v1288_v0 = vpop.f32.mrb[23].mxu1 }
 0x121   : > { %v1168_v62 = vld [vmem:[#allocation2 + $0x10] sm:$0xff] }
 0x122   : > { %v1318_v1 = vadd.f32 %v2327_v56, %v1168_v62  ;;  %v1166_v2 = vld [vmem:[#allocation2] sm:$0xff] }
 0x123   : > { %v926_v42 = vld [vmem:[#allocation2 + $0x30] sm:$0xff]  ;;  %v1316_v32 = vadd.f32 %v1285_v59, %v1166_v2  ;;  %v1169_v3 = vld [vmem:[#allocation2 + $0x18] sm:$0xff] }
 0x124   : > { %v1140_v4 = vadd.f32 %v2321_v9, %v926_v42  ;;  %v924_v5 = vld [vmem:[#allocation2 + $0x20] sm:$0xff]  ;;  %1326 = vst.msk [vmem:[#allocation2 + $0x10] sm:$0xff] %vm192_vm1, %v1318_v1  ;;  %v1319_v43 = vadd.f32 %v2328_v61, %v1169_v3  ;;  %v1167_v7 = vld [vmem:[#allocation2 + $0x8] sm:$0xff]  ;;  %v2337_v16 = vpop.f32.mrb[20].mxu0 }
 0x125   : > { %v1138_v8 = vadd.f32 %v1119_v57, %v924_v5  ;;  %v927_v11 = vld [vmem:[#allocation2 + $0x38] sm:$0xff]  ;;  %1324 = vst.msk [vmem:[#allocation2] sm:$0xff] %vm192_vm1, %v1316_v32  ;;  %v1317_v12 = vadd.f32 %v1288_v0, %v1167_v7  ;;  %v2331_v15 = vpop.f32.mrb[24].mxu1  ;;  %v1420_v17 = vpop.f32.mrb[21].mxu0 }
 0x126   : > { %1148 = vst.msk [vmem:[#allocation2 + $0x30] sm:$0xff] %vm192_vm1, %v1140_v4  ;;  %v1141_v13 = vadd.f32 %v2322_v60, %v927_v11  ;;  %v925_v14 = vld [vmem:[#allocation2 + $0x28] sm:$0xff]  ;;  %1327 = vst.msk [vmem:[#allocation2 + $0x18] sm:$0xff] %vm192_vm1, %v1319_v43  ;;  %v1301_v31 = vpop.f32.mrb[25].mxu1  ;;  %v2338_v19 = vpop.f32.mrb[22].mxu0 }
 0x127   : > { %1146 = vst.msk [vmem:[#allocation2 + $0x20] sm:$0xff] %vm192_vm1, %v1138_v8  ;;  %v1139_v51 = vadd.f32 %v1122_v63, %v925_v14  ;;  %1325 = vst.msk [vmem:[#allocation2 + $0x8] sm:$0xff] %vm192_vm1, %v1317_v12  ;;  %v2332_v18 = vpop.f32.mrb[26].mxu1  ;;  %v1423_v21 = vpop.f32.mrb[23].mxu0 }
 0x128   : > { %1149 = vst.msk [vmem:[#allocation2 + $0x38] sm:$0xff] %vm192_vm1, %v1141_v13  ;;  %v1304_v20 = vpop.f32.mrb[27].mxu1 }
 0x129   : > { %1147 = vst.msk [vmem:[#allocation2 + $0x28] sm:$0xff] %vm192_vm1, %v1139_v51 }
 0x12b   : > { %v1343_v22 = vld [vmem:[#allocation2 + $0x10] sm:$0xff] }
 0x12c   : > { %v1453_v58 = vadd.f32 %v2337_v16, %v1343_v22  ;;  %v1341_v10 = vld [vmem:[#allocation2] sm:$0xff]  ;;  %v2341_v33 = vpop.f32.mrb[24].mxu0 }
 0x12d   : > { %v1172_v24 = vld [vmem:[#allocation2 + $0x30] sm:$0xff]  ;;  %v1451_v25 = vadd.f32 %v1420_v17, %v1341_v10  ;;  %v1344_v26 = vld [vmem:[#allocation2 + $0x18] sm:$0xff]  ;;  %v1436_v37 = vpop.f32.mrb[25].mxu0  ;;  %v2347_v41 = vpop.f32.mrb[28].mxu1 }
 0x12e   : > { %v1322_v27 = vadd.f32 %v2331_v15, %v1172_v24  ;;  %v1170_v28 = vld [vmem:[#allocation2 + $0x20] sm:$0xff]  ;;  %1461 = vst.msk [vmem:[#allocation2 + $0x10] sm:$0xff] %vm192_vm1, %v1453_v58  ;;  %v1454_v29 = vadd.f32 %v2338_v19, %v1344_v26  ;;  %v1342_v30 = vld [vmem:[#allocation2 + $0x8] sm:$0xff]  ;;  %v2342_v40 = vpop.f32.mrb[26].mxu0  ;;  %v1666_v6 = vpop.f32.mrb[29].mxu1 }
 0x12f   : > { %v1320_v34 = vadd.f32 %v1301_v31, %v1170_v28  ;;  %v1173_v35 = vld [vmem:[#allocation2 + $0x38] sm:$0xff]  ;;  %1459 = vst.msk [vmem:[#allocation2] sm:$0xff] %vm192_vm1, %v1451_v25  ;;  %v1452_v36 = vadd.f32 %v1423_v21, %v1342_v30  ;;  %v1439_v45 = vpop.f32.mrb[27].mxu0  ;;  %v2348_v46 = vpop.f32.mrb[30].mxu1  ;;  %v2210_v24 = vld [vmem:[%s2841_s14] sm:$0xff]  }
 0x130   : > { %1330 = vst.msk [vmem:[#allocation2 + $0x30] sm:$0xff] %vm192_vm1, %v1322_v27  ;;  %v1323_v38 = vadd.f32 %v2332_v18, %v1173_v35  ;;  %v1171_v39 = vld [vmem:[#allocation2 + $0x28] sm:$0xff]  ;;  %1462 = vst.msk [vmem:[#allocation2 + $0x18] sm:$0xff] %vm192_vm1, %v1454_v29  ;;  %v1669_v47 = vpop.f32.mrb[31].mxu1  ;;  %v2211_v28 = vunpack.c.l.bf16 %v2210_v24 }
 0x131   : > { %1328 = vst.msk [vmem:[#allocation2 + $0x20] sm:$0xff] %vm192_vm1, %v1320_v34  ;;  %v1321_v44 = vadd.f32 %v1304_v20, %v1171_v39  ;;  %1460 = vst.msk [vmem:[#allocation2 + $0x8] sm:$0xff] %vm192_vm1, %v1452_v36  ;;  %v2225_v20 = vld [vmem:[%s2841_s14 + $0x8] sm:$0xff]  }
 0x132   : > { %1331 = vst.msk [vmem:[#allocation2 + $0x38] sm:$0xff] %vm192_vm1, %v1323_v38  ;;  %v2215_v27 = vunpack.c.l.bf16 %v2225_v20  ;;  %v2216_v29 = vunpack.c.h.bf16 %v2225_v20 }
 0x133   : > { %1329 = vst.msk [vmem:[#allocation2 + $0x28] sm:$0xff] %vm192_vm1, %v1321_v44 }
 0x135   : > { %v1485_v48 = vld [vmem:[#allocation2 + $0x10] sm:$0xff]  ;;  %v2357_v61 = vpop.f32.mrb[28].mxu0 }
 0x136   : > { %v1699_v49 = vadd.f32 %v2347_v41, %v1485_v48  ;;  %v1483_v50 = vld [vmem:[#allocation2] sm:$0xff]  ;;  %v2351_v0 = vpop.f32.mrb[32].mxu1  ;;  %v1848_v1 = vpop.f32.mrb[29].mxu0 }
 0x137   : > { %v1347_v52 = vld [vmem:[#allocation2 + $0x30] sm:$0xff]  ;;  %v1697_v53 = vadd.f32 %v1666_v6, %v1483_v50  ;;  %v1486_v23 = vld [vmem:[#allocation2 + $0x18] sm:$0xff]  ;;  %v1682_v42 = vpop.f32.mrb[33].mxu1  ;;  %v2358_v32 = vpop.f32.mrb[30].mxu0 }
 0x138   : > { %v1457_v54 = vadd.f32 %v2341_v33, %v1347_v52  ;;  %v1345_v55 = vld [vmem:[#allocation2 + $0x20] sm:$0xff]  ;;  %1707 = vst.msk [vmem:[#allocation2 + $0x10] sm:$0xff] %vm192_vm1, %v1699_v49  ;;  %v1700_v9 = vadd.f32 %v2348_v46, %v1486_v23  ;;  %v1484_v56 = vld [vmem:[#allocation2 + $0x8] sm:$0xff]  ;;  %v2352_v3 = vpop.f32.mrb[34].mxu1  ;;  %v1851_v4 = vpop.f32.mrb[31].mxu0  ;;  %v2212_v33 = vunpack.c.h.bf16 %v2210_v24  ;;  %v2227_v23 = vld [vmem:[%s2841_s14 + $0x18] sm:$0xff]  }
 0x139   : > { %v1455_v57 = vadd.f32 %v1436_v37, %v1345_v55  ;;  %v1348_v59 = vld [vmem:[#allocation2 + $0x38] sm:$0xff]  ;;  %1705 = vst.msk [vmem:[#allocation2] sm:$0xff] %vm192_vm1, %v1697_v53  ;;  %v1698_v60 = vadd.f32 %v1669_v47, %v1484_v56  ;;  %v1685_v5 = vpop.f32.mrb[35].mxu1  ;;  %v2226_v55 = vld [vmem:[%s2841_s14 + $0x10] sm:$0xff]  }
 0x13a   : > { %1465 = vst.msk [vmem:[#allocation2 + $0x30] sm:$0xff] %vm192_vm1, %v1457_v54  ;;  %v1458_v62 = vadd.f32 %v2342_v40, %v1348_v59  ;;  %v1346_v63 = vld [vmem:[#allocation2 + $0x28] sm:$0xff]  ;;  %1708 = vst.msk [vmem:[#allocation2 + $0x18] sm:$0xff] %vm192_vm1, %v1700_v9  ;;  %v2223_v9 = vunpack.c.l.bf16 %v2227_v23  ;;  %v2219_v56 = vunpack.c.l.bf16 %v2226_v55 }
 0x13b   : > { %1463 = vst.msk [vmem:[#allocation2 + $0x20] sm:$0xff] %vm192_vm1, %v1455_v57  ;;  %v1456_v2 = vadd.f32 %v1439_v45, %v1346_v63  ;;  %1706 = vst.msk [vmem:[#allocation2 + $0x8] sm:$0xff] %vm192_vm1, %v1698_v60  ;;  %v2224_v57 = vunpack.c.h.bf16 %v2227_v23  ;;  %v2220_v60 = vunpack.c.h.bf16 %v2226_v55 }
 0x13c   : > { %1466 = vst.msk [vmem:[#allocation2 + $0x38] sm:$0xff] %vm192_vm1, %v1458_v62 }
 0x13d   : > { %1464 = vst.msk [vmem:[#allocation2 + $0x28] sm:$0xff] %vm192_vm1, %v1456_v2  ;;  %v2361_v14 = vpop.f32.mrb[32].mxu0 }
 0x13e   : > { %v1864_v17 = vpop.f32.mrb[33].mxu0 }
 0x13f   : > { %v1731_v43 = vld [vmem:[#allocation2 + $0x10] sm:$0xff]  ;;  %v2362_v22 = vpop.f32.mrb[34].mxu0 }
 0x140   : > { %v1881_v7 = vadd.f32 %v2357_v61, %v1731_v43  ;;  %v1729_v8 = vld [vmem:[#allocation2] sm:$0xff]  ;;  %v1867_v25 = vpop.f32.mrb[35].mxu0 }
 0x141   : > { %v1489_v11 = vld [vmem:[#allocation2 + $0x30] sm:$0xff]  ;;  %v1879_v12 = vadd.f32 %v1848_v1, %v1729_v8  ;;  %v1732_v13 = vld [vmem:[#allocation2 + $0x18] sm:$0xff] }
 0x142   : > { %v1703_v15 = vadd.f32 %v2351_v0, %v1489_v11  ;;  %v1487_v16 = vld [vmem:[#allocation2 + $0x20] sm:$0xff]  ;;  %1889 = vst.msk [vmem:[#allocation2 + $0x10] sm:$0xff] %vm192_vm1, %v1881_v7  ;;  %v1882_v51 = vadd.f32 %v2358_v32, %v1732_v13  ;;  %v1730_v31 = vld [vmem:[#allocation2 + $0x8] sm:$0xff] }
 0x143   : > { %v1701_v18 = vadd.f32 %v1682_v42, %v1487_v16  ;;  %v1490_v19 = vld [vmem:[#allocation2 + $0x38] sm:$0xff]  ;;  %1887 = vst.msk [vmem:[#allocation2] sm:$0xff] %vm192_vm1, %v1879_v12  ;;  %v1880_v21 = vadd.f32 %v1851_v4, %v1730_v31 }
 0x144   : > { %1711 = vst.msk [vmem:[#allocation2 + $0x30] sm:$0xff] %vm192_vm1, %v1703_v15  ;;  %v1704_v58 = vadd.f32 %v2352_v3, %v1490_v19  ;;  %v1488_v10 = vld [vmem:[#allocation2 + $0x28] sm:$0xff]  ;;  %1890 = vst.msk [vmem:[#allocation2 + $0x18] sm:$0xff] %vm192_vm1, %v1882_v51 }
 0x145   : > { %1709 = vst.msk [vmem:[#allocation2 + $0x20] sm:$0xff] %vm192_vm1, %v1701_v18  ;;  %v1702_v26 = vadd.f32 %v1685_v5, %v1488_v10  ;;  %1888 = vst.msk [vmem:[#allocation2 + $0x8] sm:$0xff] %vm192_vm1, %v1880_v21 }
 0x146   : > { %1712 = vst.msk [vmem:[#allocation2 + $0x38] sm:$0xff] %vm192_vm1, %v1704_v58 }
 0x147   : > { %1710 = vst.msk [vmem:[#allocation2 + $0x28] sm:$0xff] %vm192_vm1, %v1702_v26 }
 0x149   : > { %v1897_v30 = vld [vmem:[#allocation2 + $0x10] sm:$0xff] }
 0x14a   : > { %v1921_v34 = vadd.f32 %v2215_v27, %v1897_v30  ;;  %v1895_v35 = vld [vmem:[#allocation2] sm:$0xff] }
 0x14b   : > { %v1919_v36 = vadd.f32 %v2211_v28, %v1895_v35  ;;  %v1898_v37 = vld [vmem:[#allocation2 + $0x18] sm:$0xff]  ;;  %v1735_v38 = vld [vmem:[#allocation2 + $0x30] sm:$0xff] }
 0x14c   : > { %v1929_v39 = vpack.c.bf16 %v1921_v34, %v1921_v34  ;;  %v1922_v40 = vadd.f32 %v2216_v29, %v1898_v37  ;;  %v1896_v41 = vld [vmem:[#allocation2 + $0x8] sm:$0xff]  ;;  %v1885_v44 = vadd.f32 %v2361_v14, %v1735_v38  ;;  %v1733_v45 = vld [vmem:[#allocation2 + $0x20] sm:$0xff] }
 0x14d   : > { %v1927_v6 = vpack.c.bf16 %v1919_v36, %v1919_v36  ;;  %v1920_v46 = vadd.f32 %v2212_v33, %v1896_v41  ;;  %v1883_v47 = vadd.f32 %v1864_v17, %v1733_v45  ;;  %v1736_v48 = vld [vmem:[#allocation2 + $0x38] sm:$0xff] }
 0x14e   : > { %1938 = vst.msk [vmem:[%s2858_s17 + $0x8] sm:$0xf] %vm1935_vm8, %v1929_v39  ;;  %v1930_v49 = vpack.c.bf16 %v1922_v40, %v1922_v40  ;;  %v1886_v50 = vadd.f32 %v2362_v22, %v1736_v48  ;;  %v1734_v52 = vld [vmem:[#allocation2 + $0x28] sm:$0xff] }
 0x14f   : > { %1893 = vst.msk [vmem:[#allocation2 + $0x30] sm:$0xff] %vm192_vm1, %v1885_v44  ;;  %v1928_v53 = vpack.c.bf16 %v1920_v46, %v1920_v46  ;;  %1891 = vst.msk [vmem:[#allocation2 + $0x20] sm:$0xff] %vm192_vm1, %v1883_v47  ;;  %v1884_v54 = vadd.f32 %v1867_v25, %v1734_v52 }
 0x150   : > { %1936 = vst.msk [vmem:[%s2858_s17] sm:$0xf] %vm1935_vm8, %v1927_v6  ;;  %1939 = vst.msk [vmem:[%s2858_s17 + $0xc] sm:$0xf] %vm1935_vm8, %v1930_v49 }
 0x151   : > { %1894 = vst.msk [vmem:[#allocation2 + $0x38] sm:$0xff] %vm192_vm1, %v1886_v50  ;;  %1892 = vst.msk [vmem:[#allocation2 + $0x28] sm:$0xff] %vm192_vm1, %v1884_v54 }
 0x152   : > { %1937 = vst.msk [vmem:[%s2858_s17 + $0x4] sm:$0xf] %vm1935_vm8, %v1928_v53 }
 0x156   : > { %v1901_v59 = vld [vmem:[#allocation2 + $0x30] sm:$0xff]  ;;  %v1899_v62 = vld [vmem:[#allocation2 + $0x20] sm:$0xff] }
 0x157   : > { %v1925_v61 = vadd.f32 %v2223_v9, %v1901_v59  ;;  %v1923_v63 = vadd.f32 %v2219_v56, %v1899_v62 }
 0x158   : > { %v1902_v0 = vld [vmem:[#allocation2 + $0x38] sm:$0xff]  ;;  %v1900_v42 = vld [vmem:[#allocation2 + $0x28] sm:$0xff] }
 0x159   : > { %v1933_v1 = vpack.c.bf16 %v1925_v61, %v1925_v61  ;;  %v1926_v2 = vadd.f32 %v2224_v57, %v1902_v0  ;;  %v1931_v32 = vpack.c.bf16 %v1923_v63, %v1923_v63  ;;  %v1924_v3 = vadd.f32 %v2220_v60, %v1900_v42 }
 0x15b   : > { %1942 = vst.msk [vmem:[%s2858_s17 + $0x18] sm:$0xf] %vm1935_vm8, %v1933_v1  ;;  %v1934_v4 = vpack.c.bf16 %v1926_v2, %v1926_v2  ;;  %1940 = vst.msk [vmem:[%s2858_s17 + $0x10] sm:$0xf] %vm1935_vm8, %v1931_v32  ;;  %v1932_v5 = vpack.c.bf16 %v1924_v3, %v1924_v3 }
 0x15d   : > { %1943 = vst.msk [vmem:[%s2858_s17 + $0x1c] sm:$0xf] %vm1935_vm8, %v1934_v4  ;;  %1941 = vst.msk [vmem:[%s2858_s17 + $0x14] sm:$0xf] %vm1935_vm8, %v1932_v5 }
 0x15e PF: > { %s13_s12 = sadd.s32 1, %s2403_s12  }
 0x15f   : > { %p10_p4 = scmp.ge.s32.totalorder %s13_s12, 4  }
 0x161   :  { %12 = sbr.rel (!%p10_p4) target bundleno = 1 (0x1), region = 75 }

</bundles_post_ra>
